<compile_context>
chip_gen: v7x
topology: tpu7x:2x2x1
jax: 0.10.0
libtpu: 0.0.40
codegen_flags: <defaults>
</compile_context>

<pallas_src>
import math
from functools import partial

import jax
import jax.numpy as jnp
from jax.experimental import pallas as pl
from jax.experimental.pallas import tpu as pltpu


# ---------------------------------------------------------------------------
# small helpers
# ---------------------------------------------------------------------------

def _round_up(x, m):
    return (x + m - 1) // m * m


def _tile_rows(m, prefer):
    """Pick (padded_M, row_tile): tile divides padded_M and is sublane aligned."""
    if m <= prefer:
        mp = _round_up(m, 16)
        return mp, mp
    for t in (prefer, 256, 128):
        if m % t == 0:
            return m, t
    mp = _round_up(m, prefer)
    return mp, prefer


# ---------------------------------------------------------------------------
# Pallas kernels
# ---------------------------------------------------------------------------

def _make_gemm_kernel(act, has_shift, stats):
    def kernel(*refs):
        a_ref, b_ref = refs[0], refs[1]
        idx = 2
        shift_ref = None
        if has_shift:
            shift_ref = refs[idx]
            idx += 1
        o_ref = refs[idx]
        idx += 1
        # MXU matmul: bf16 x bf16 -> f32 accumulate; epilogue stays f32 on VPU.
        y = jnp.dot(a_ref[...], b_ref[...], preferred_element_type=jnp.float32)
        if has_shift:
            y = y + shift_ref[...]
        if act == "relu":
            y = jnp.maximum(y, 0.0)
        elif act == "sigmoid":
            y = jax.nn.sigmoid(y)
        o_ref[...] = y
        if stats:
            sum_ref, ssq_ref = refs[idx], refs[idx + 1]

            @pl.when(pl.program_id(0) == 0)
            def _():
                sum_ref[...] = jnp.zeros_like(sum_ref)
                ssq_ref[...] = jnp.zeros_like(ssq_ref)

            sum_ref[...] += jnp.sum(y, axis=0, keepdims=True)
            ssq_ref[...] += jnp.sum(y * y, axis=0, keepdims=True)

    return kernel


def matmul_fused(a, b, shift=None, act="none", stats=False):
    """C = act(A @ B + shift) on the MXU, with an optional fused per-column
    sum / sum-of-squares reduction (training-mode BatchNorm statistics)."""
    assert not (stats and (shift is not None or act != "none"))
    M, K = a.shape
    K2, Nc = b.shape
    assert K == K2
    Np = _round_up(Nc, 128)                 # lane-dense output stores
    Mp, TM = _tile_rows(M, prefer=256)

    a = a.astype(jnp.bfloat16)
    b = b.astype(jnp.bfloat16)
    if Mp != M:
        a = jnp.pad(a, ((0, Mp - M), (0, 0)))
    if Np != Nc:
        b = jnp.pad(b, ((0, 0), (0, Np - Nc)))

    inputs = [a, b]
    in_specs = [pl.BlockSpec((TM, K), lambda i: (i, 0)),
                pl.BlockSpec((K, Np), lambda i: (0, 0))]
    if shift is not None:
        sh = shift.reshape(1, -1).astype(jnp.float32)
        if Np != Nc:
            sh = jnp.pad(sh, ((0, 0), (0, Np - Nc)))
        inputs.append(sh)
        in_specs.append(pl.BlockSpec((1, Np), lambda i: (0, 0)))

    out_shape = [jax.ShapeDtypeStruct((Mp, Np), jnp.float32)]
    out_specs = [pl.BlockSpec((TM, Np), lambda i: (i, 0))]
    if stats:
        out_shape += [jax.ShapeDtypeStruct((1, Np), jnp.float32),
                      jax.ShapeDtypeStruct((1, Np), jnp.float32)]
        out_specs += [pl.BlockSpec((1, Np), lambda i: (0, 0)),
                      pl.BlockSpec((1, Np), lambda i: (0, 0))]

    outs = pl.pallas_call(
        _make_gemm_kernel(act, shift is not None, stats),
        out_shape=tuple(out_shape),
        grid=(Mp // TM,),
        in_specs=in_specs,
        out_specs=tuple(out_specs),
        compiler_params=pltpu.CompilerParams(
            dimension_semantics=("arbitrary",) if stats else ("parallel",),
            vmem_limit_bytes=32 * 1024 * 1024),
    )(*inputs)

    c = outs[0][:M, :Nc]
    if stats:
        return c, outs[1][0, :Nc], outs[2][0, :Nc]
    return c


def _make_bn_kernel(has_res, act):
    def kernel(*refs):
        if has_res:
            x_ref, sc_ref, sh_ref, r_ref, o_ref = refs
        else:
            x_ref, sc_ref, sh_ref, o_ref = refs
        y = x_ref[...] * sc_ref[...] + sh_ref[...]
        if has_res:
            y = y + r_ref[...]
        if act == "relu":
            y = jnp.maximum(y, 0.0)
        o_ref[...] = y

    return kernel


def bn_apply(x_nhwc, csum, csumsq, gamma, beta, residual=None, act="relu", eps=1e-5):
    """Training-mode BatchNorm (batch stats over N,H,W) + optional residual + ReLU.

    Per-channel sum / sum-of-squares come fused from the producing GEMM; the
    tiny (C,)-sized scale/shift math runs in plain JAX, the M x C normalize +
    residual + activation runs as a tiled Pallas kernel."""
    N, H, W, C = x_nhwc.shape
    M = N * H * W
    mean = csum / M
    var = jnp.maximum(csumsq / M - mean * mean, 0.0)   # biased var (PyTorch train mode)
    inv = gamma * jax.lax.rsqrt(var + eps)
    scale = inv.reshape(1, C).astype(jnp.float32)
    shift = (beta - mean * inv).reshape(1, C).astype(jnp.float32)

    Mp, TM = _tile_rows(M, prefer=512)
    xf = x_nhwc.reshape(M, C)
    rf = residual.reshape(M, C) if residual is not None else None
    if Mp != M:
        xf = jnp.pad(xf, ((0, Mp - M), (0, 0)))
        if rf is not None:
            rf = jnp.pad(rf, ((0, Mp - M), (0, 0)))

    inputs = [xf, scale, shift]
    in_specs = [pl.BlockSpec((TM, C), lambda i: (i, 0)),
                pl.BlockSpec((1, C), lambda i: (0, 0)),
                pl.BlockSpec((1, C), lambda i: (0, 0))]
    if rf is not None:
        inputs.append(rf)
        in_specs.append(pl.BlockSpec((TM, C), lambda i: (i, 0)))

    out = pl.pallas_call(
        _make_bn_kernel(rf is not None, act),
        out_shape=jax.ShapeDtypeStruct((Mp, C), jnp.float32),
        grid=(Mp // TM,),
        in_specs=in_specs,
        out_specs=pl.BlockSpec((TM, C), lambda i: (i, 0)),
        compiler_params=pltpu.CompilerParams(
            dimension_semantics=("parallel",),
            vmem_limit_bytes=32 * 1024 * 1024),
    )(*inputs)
    return out[:M].reshape(N, H, W, C)


# ---------------------------------------------------------------------------
# Conv helpers (im2col glue in JAX, fused GEMM in Pallas)
# ---------------------------------------------------------------------------

def rep_pad(x, p):
    """ReplicationPad2d(p) on NHWC."""
    return jnp.pad(x, ((0, 0), (p, p), (p, p), (0, 0)), mode="edge")


def conv2d(x, w, stride=1, shift=None, act="none", stats=False):
    """x: NHWC (f32), w: PyTorch layout (Cout, Cin, kh, kw), VALID padding.

    bf16 im2col + fused Pallas GEMM (bias / activation / BN-stats epilogue)."""
    Cout, Cin, kh, kw = w.shape
    N, H, W, C = x.shape
    assert C == Cin
    OH = (H - kh) // stride + 1
    OW = (W - kw) // stride + 1
    xb = x.astype(jnp.bfloat16)              # halves im2col + GEMM-A HBM traffic
    cols = []
    for i in range(kh):
        for j in range(kw):
            cols.append(xb[:, i:i + stride * (OH - 1) + 1:stride,
                            j:j + stride * (OW - 1) + 1:stride, :])
    patches = jnp.concatenate(cols, axis=-1).reshape(N * OH * OW, kh * kw * Cin)
    wmat = jnp.transpose(w, (2, 3, 1, 0)).reshape(kh * kw * Cin, Cout)
    res = matmul_fused(patches, wmat, shift=shift, act=act, stats=stats)
    if stats:
        out, s, q = res
        return out.reshape(N, OH, OW, Cout), s, q
    return res.reshape(N, OH, OW, Cout)


def conv_transpose2d(x, w_t, stride, padding, output_padding,
                     shift=None, act="none", stats=False):
    """x: NHWC, w_t: PyTorch ConvTranspose2d layout (Cin, Cout, kh, kw).

    Zero-dilation + (possibly negative) padding + ordinary conv with the
    spatially-flipped, transposed weight -- GEMM runs fused in Pallas."""
    Cin, Cout, kh, kw = w_t.shape
    N, H, W, C = x.shape
    assert C == Cin
    DH, DW = (H - 1) * stride + 1, (W - 1) * stride + 1
    xd = jnp.zeros((N, DH, DW, C), x.dtype).at[:, ::stride, ::stride, :].set(x)

    pad_t = kh - 1 - padding
    pad_l = kw - 1 - padding
    pad_b = pad_t + output_padding
    pad_r = pad_l + output_padding
    xd = jnp.pad(xd, ((0, 0),
                      (max(pad_t, 0), max(pad_b, 0)),
                      (max(pad_l, 0), max(pad_r, 0)),
                      (0, 0)))
    ct, cb = max(-pad_t, 0), max(-pad_b, 0)
    cl, cr = max(-pad_l, 0), max(-pad_r, 0)
    xd = xd[:, ct:xd.shape[1] - cb, cl:xd.shape[2] - cr, :]

    # equivalent forward-conv weight, PyTorch conv layout (Cout, Cin, kh, kw)
    w_conv = jnp.transpose(jnp.flip(w_t, axis=(2, 3)), (1, 0, 2, 3))
    return conv2d(xd, w_conv, stride=1, shift=shift, act=act, stats=stats)


def upsample2x_nearest(x):
    return jnp.repeat(jnp.repeat(x, 2, axis=1), 2, axis=2)


# ---------------------------------------------------------------------------
# Model: parameters + forward
# ---------------------------------------------------------------------------

def init_params(key):
    keys = iter(jax.random.split(key, 128))

    def conv_w(co, ci, kh, kw):
        fan_in = ci * kh * kw
        return jax.random.normal(next(keys), (co, ci, kh, kw),
                                 jnp.float32) * (1.0 / math.sqrt(fan_in))

    def convt_w(ci, co, kh, kw):                 # PyTorch ConvT layout (in, out, kh, kw)
        fan_in = ci * kh * kw
        return jax.random.normal(next(keys), (ci, co, kh, kw),
                                 jnp.float32) * (1.0 / math.sqrt(fan_in))

    def small(shape):
        return jax.random.normal(next(keys), shape, jnp.float32) * 0.01

    p = {
        "conv1_w": conv_w(32, 4, 7, 7),
        "conv2_w": conv_w(64, 32, 5, 5),
        "conv3_w": convt_w(64, 32, 5, 5),
        "conv4_w": conv_w(3, 32, 7, 7),
        "conv4_b": small((3,)),
    }
    # block1: downsample 64 -> 128
    p["b1"] = dict(conv1_w=conv_w(128, 64, 3, 3),
                   conc1_w=conv_w(128, 64, 1, 1),
                   conv2_w=conv_w(128, 128, 3, 3),
                   bn1_g=jnp.ones((128,), jnp.float32), bn1_b=jnp.zeros((128,), jnp.float32),
                   bn2_g=jnp.ones((128,), jnp.float32), bn2_b=jnp.zeros((128,), jnp.float32))
    # blocks 2..7: plain 128 -> 128 (conv1 has a bias in the PyTorch module;
    # it cancels exactly under training-mode BN so it is never applied).
    for i in range(2, 8):
        p[f"b{i}"] = dict(conv1_w=conv_w(128, 128, 3, 3),
                          conv1_b=small((128,)),
                          conv2_w=conv_w(128, 128, 3, 3),
                          bn1_g=jnp.ones((128,), jnp.float32), bn1_b=jnp.zeros((128,), jnp.float32),
                          bn2_g=jnp.ones((128,), jnp.float32), bn2_b=jnp.zeros((128,), jnp.float32))
    # block8: upsample 128 -> 64
    p["b8"] = dict(conv1_w=convt_w(128, 64, 3, 3),
                   conc1_w=conv_w(64, 128, 1, 1),
                   conv2_w=conv_w(64, 64, 3, 3),
                   bn1_g=jnp.ones((64,), jnp.float32), bn1_b=jnp.zeros((64,), jnp.float32),
                   bn2_g=jnp.ones((64,), jnp.float32), bn2_b=jnp.zeros((64,), jnp.float32))
    return p


def res_block(x, p, mode):
    """mode in {'plain', 'down', 'up'} -- mirrors resBlock.forward."""
    inp = x
    h = rep_pad(x, 1)
    if mode == "down":
        h, s1, q1 = conv2d(h, p["conv1_w"], stride=2, stats=True)
    elif mode == "up":
        h, s1, q1 = conv_transpose2d(h, p["conv1_w"], stride=2, padding=3,
                                     output_padding=1, stats=True)
    else:
        # conv1's bias (plain path) cancels under training-mode BN -> not applied.
        h, s1, q1 = conv2d(h, p["conv1_w"], stride=1, stats=True)
    h = bn_apply(h, s1, q1, p["bn1_g"], p["bn1_b"], act="relu")

    h = rep_pad(h, 1)
    h, s2, q2 = conv2d(h, p["conv2_w"], stride=1, stats=True)

    if mode == "down":
        conc = conv2d(inp, p["conc1_w"], stride=2)
    elif mode == "up":
        conc = upsample2x_nearest(conv2d(inp, p["conc1_w"], stride=1))
    else:
        conc = inp

    # fused: BN(conv2) + residual + ReLU
    return bn_apply(h, s2, q2, p["bn2_g"], p["bn2_b"], residual=conc, act="relu")


@partial(jax.jit)
def resnet_forward(params, x_nchw):
    x = jnp.transpose(x_nchw, (0, 2, 3, 1)).astype(jnp.float32)      # NCHW -> NHWC

    x = conv2d(rep_pad(x, 3), params["conv1_w"], stride=1, act="relu")
    x = conv2d(rep_pad(x, 2), params["conv2_w"], stride=2, act="relu")

    x = res_block(x, params["b1"], "down")
    for i in range(2, 8):
        x = res_block(x, params[f"b{i}"], "plain")
    x = res_block(x, params["b8"], "up")

    x = conv_transpose2d(rep_pad(x, 1), params["conv3_w"], stride=2,
                         padding=4, output_padding=1, act="relu")
    x = conv2d(rep_pad(x, 3), params["conv4_w"], stride=1,
               shift=params["conv4_b"], act="sigmoid")

    return jnp.transpose(x, (0, 3, 1, 2))                            # NHWC -> NCHW


# ---------------------------------------------------------------------------

if __name__ == "__main__":
    key = jax.random.PRNGKey(0)
    pkey, xkey = jax.random.split(key)
    params = init_params(pkey)
    x = jax.random.normal(xkey, (2, 4, 16, 16), jnp.float32)          # NCHW, like PyTorch

    out = resnet_forward(params, x)
    out = jax.block_until_ready(out)

    assert out.shape == (2, 3, 16, 16), out.shape
    assert out.dtype == jnp.float32
    assert bool(jnp.all(jnp.isfinite(out)))
    assert bool(jnp.all((out >= 0.0) & (out <= 1.0)))                 # sigmoid output range
    print("KERNEL_OK")
</pallas_src>

<mosaic_0001>
module attributes {stable_mosaic.version = 11 : i64} {
  func.func @kernel(%arg0: i32, %arg1: memref<256x196xbf16, #tpu.memory_space<vmem>>, %arg2: memref<196x128xbf16, #tpu.memory_space<vmem>>, %arg3: memref<256x128xf32, #tpu.memory_space<vmem>>) attributes {dimension_semantics = [#tpu.dimension_semantics<parallel>], iteration_bounds = array<i64: 2>, scalar_prefetch = 0 : i64, scratch_operands = 0 : i64, tpu.core_type = #tpu.core_type<tc>, window_params = [{transform_indices = @transform_0, window_bounds = array<i64: 256, 196>}, {pipeline_mode = #tpu.pipeline_mode<synchronous>, transform_indices = @transform_1, window_bounds = array<i64: 196, 128>}, {transform_indices = @transform_2, window_bounds = array<i64: 256, 128>}]} {
    %c0 = arith.constant 0 : index
    %c0_0 = arith.constant 0 : index
    %0 = vector.load %arg1[%c0, %c0_0] : memref<256x196xbf16, #tpu.memory_space<vmem>>, vector<256x196xbf16>
    %c0_1 = arith.constant 0 : index
    %c0_2 = arith.constant 0 : index
    %1 = vector.load %arg2[%c0_1, %c0_2] : memref<196x128xbf16, #tpu.memory_space<vmem>>, vector<196x128xbf16>
    %cst = arith.constant dense<0.000000e+00> : vector<256x128xf32>
    %2 = tpu.matmul %0, %1, %cst {dimension_numbers = #tpu.dot_dimension_numbers<[1], [0], [0], [1], [0, 0, 1, 1], [], []>} : vector<256x196xbf16>, vector<196x128xbf16>, vector<256x128xf32> -> vector<256x128xf32>
    %cst_3 = arith.constant 0.000000e+00 : f32
    %3 = vector.broadcast %cst_3 : f32 to vector<256x128xf32>
    %4 = arith.maximumf %2, %3 : vector<256x128xf32>
    %c0_4 = arith.constant 0 : index
    %c0_5 = arith.constant 0 : index
    %5 = vector.load %arg3[%c0_4, %c0_5] : memref<256x128xf32, #tpu.memory_space<vmem>>, vector<256x128xf32>
    tpu.vector_store %arg3[%c0_4, %c0_5], %4 {strides = array<i32>} : memref<256x128xf32, #tpu.memory_space<vmem>>, vector<256x128xf32>,
    return
  }
  func.func @transform_0(%arg0: i32) -> (i32, i32) {
    %c0_i32 = arith.constant 0 : i32
    %c0_i32_0 = arith.constant 0 : i32
    return %arg0, %c0_i32 : i32, i32
  }
  func.func @transform_1(%arg0: i32) -> (i32, i32) {
    %c0_i32 = arith.constant 0 : i32
    %c0_i32_0 = arith.constant 0 : i32
    %c0_i32_1 = arith.constant 0 : i32
    return %c0_i32, %c0_i32_0 : i32, i32
  }
  func.func @transform_2(%arg0: i32) -> (i32, i32) {
    %c0_i32 = arith.constant 0 : i32
    %c0_i32_0 = arith.constant 0 : i32
    return %arg0, %c0_i32 : i32, i32
  }
}

module attributes {stable_mosaic.version = 11 : i64} {
  func.func @kernel(%arg0: i32, %arg1: memref<128x800xbf16, #tpu.memory_space<vmem>>, %arg2: memref<800x128xbf16, #tpu.memory_space<vmem>>, %arg3: memref<128x128xf32, #tpu.memory_space<vmem>>) attributes {dimension_semantics = [#tpu.dimension_semantics<parallel>], iteration_bounds = array<i64: 1>, scalar_prefetch = 0 : i64, scratch_operands = 0 : i64, tpu.core_type = #tpu.core_type<tc>, window_params = [{transform_indices = @transform_0, window_bounds = array<i64: 128, 800>}, {pipeline_mode = #tpu.pipeline_mode<synchronous>, transform_indices = @transform_1, window_bounds = array<i64: 800, 128>}, {transform_indices = @transform_2, window_bounds = array<i64: 128, 128>}]} {
    %c0 = arith.constant 0 : index
    %c0_0 = arith.constant 0 : index
    %0 = vector.load %arg1[%c0, %c0_0] : memref<128x800xbf16, #tpu.memory_space<vmem>>, vector<128x800xbf16>
    %c0_1 = arith.constant 0 : index
    %c0_2 = arith.constant 0 : index
    %1 = vector.load %arg2[%c0_1, %c0_2] : memref<800x128xbf16, #tpu.memory_space<vmem>>, vector<800x128xbf16>
    %cst = arith.constant dense<0.000000e+00> : vector<128x128xf32>
    %2 = tpu.matmul %0, %1, %cst {dimension_numbers = #tpu.dot_dimension_numbers<[1], [0], [0], [1], [0, 0, 1, 1], [], []>} : vector<128x800xbf16>, vector<800x128xbf16>, vector<128x128xf32> -> vector<128x128xf32>
    %cst_3 = arith.constant 0.000000e+00 : f32
    %3 = vector.broadcast %cst_3 : f32 to vector<128x128xf32>
    %4 = arith.maximumf %2, %3 : vector<128x128xf32>
    %c0_4 = arith.constant 0 : index
    %c0_5 = arith.constant 0 : index
    %5 = vector.load %arg3[%c0_4, %c0_5] : memref<128x128xf32, #tpu.memory_space<vmem>>, vector<128x128xf32>
    tpu.vector_store %arg3[%c0_4, %c0_5], %4 {strides = array<i32>} : memref<128x128xf32, #tpu.memory_space<vmem>>, vector<128x128xf32>,
    return
  }
  func.func @transform_0(%arg0: i32) -> (i32, i32) {
    %c0_i32 = arith.constant 0 : i32
    %c0_i32_0 = arith.constant 0 : i32
    return %arg0, %c0_i32 : i32, i32
  }
  func.func @transform_1(%arg0: i32) -> (i32, i32) {
    %c0_i32 = arith.constant 0 : i32
    %c0_i32_0 = arith.constant 0 : i32
    %c0_i32_1 = arith.constant 0 : i32
    return %c0_i32, %c0_i32_0 : i32, i32
  }
  func.func @transform_2(%arg0: i32) -> (i32, i32) {
    %c0_i32 = arith.constant 0 : i32
    %c0_i32_0 = arith.constant 0 : i32
    return %arg0, %c0_i32 : i32, i32
  }
}

module attributes {stable_mosaic.version = 11 : i64} {
  func.func @kernel(%arg0: i32, %arg1: memref<32x576xbf16, #tpu.memory_space<vmem>>, %arg2: memref<576x128xbf16, #tpu.memory_space<vmem>>, %arg3: memref<32x128xf32, #tpu.memory_space<vmem>>, %arg4: memref<1x128xf32, #tpu.memory_space<vmem>>, %arg5: memref<1x128xf32, #tpu.memory_space<vmem>>) attributes {dimension_semantics = [#tpu.dimension_semantics<arbitrary>], iteration_bounds = array<i64: 1>, scalar_prefetch = 0 : i64, scratch_operands = 0 : i64, tpu.core_type = #tpu.core_type<tc>, window_params = [{transform_indices = @transform_0, window_bounds = array<i64: 32, 576>}, {pipeline_mode = #tpu.pipeline_mode<synchronous>, transform_indices = @transform_1, window_bounds = array<i64: 576, 128>}, {transform_indices = @transform_2, window_bounds = array<i64: 32, 128>}, {pipeline_mode = #tpu.pipeline_mode<synchronous>, transform_indices = @transform_3, window_bounds = array<i64: 1, 128>}, {pipeline_mode = #tpu.pipeline_mode<synchronous>, transform_indices = @transform_4, window_bounds = array<i64: 1, 128>}]} {
    %c0 = arith.constant 0 : index
    %c0_0 = arith.constant 0 : index
    %0 = vector.load %arg1[%c0, %c0_0] : memref<32x576xbf16, #tpu.memory_space<vmem>>, vector<32x576xbf16>
    %c0_1 = arith.constant 0 : index
    %c0_2 = arith.constant 0 : index
    %1 = vector.load %arg2[%c0_1, %c0_2] : memref<576x128xbf16, #tpu.memory_space<vmem>>, vector<576x128xbf16>
    %cst = arith.constant dense<0.000000e+00> : vector<32x128xf32>
    %2 = tpu.matmul %0, %1, %cst {dimension_numbers = #tpu.dot_dimension_numbers<[1], [0], [0], [1], [0, 0, 1, 1], [], []>} : vector<32x576xbf16>, vector<576x128xbf16>, vector<32x128xf32> -> vector<32x128xf32>
    %c0_3 = arith.constant 0 : index
    %c0_4 = arith.constant 0 : index
    %3 = vector.load %arg3[%c0_3, %c0_4] : memref<32x128xf32, #tpu.memory_space<vmem>>, vector<32x128xf32>
    tpu.vector_store %arg3[%c0_3, %c0_4], %2 {strides = array<i32>} : memref<32x128xf32, #tpu.memory_space<vmem>>, vector<32x128xf32>,
    %c0_i32 = arith.constant 0 : i32
    %4 = arith.cmpi eq, %arg0, %c0_i32 : i32
    %5 = arith.extui %4 : i1 to i32
    %c0_i32_5 = arith.constant 0 : i32
    %6 = arith.cmpi ne, %5, %c0_i32_5 : i32
    scf.if %6 {
      %cst_16 = arith.constant 0.000000e+00 : f32
      %18 = vector.broadcast %cst_16 : f32 to vector<1x128xf32>
      %c0_17 = arith.constant 0 : index
      %c0_18 = arith.constant 0 : index
      %19 = vector.load %arg4[%c0_17, %c0_18] : memref<1x128xf32, #tpu.memory_space<vmem>>, vector<1x128xf32>
      tpu.vector_store %arg4[%c0_17, %c0_18], %18 {strides = array<i32>} : memref<1x128xf32, #tpu.memory_space<vmem>>, vector<1x128xf32>,
      %cst_19 = arith.constant 0.000000e+00 : f32
      %20 = vector.broadcast %cst_19 : f32 to vector<1x128xf32>
      %c0_20 = arith.constant 0 : index
      %c0_21 = arith.constant 0 : index
      %21 = vector.load %arg5[%c0_20, %c0_21] : memref<1x128xf32, #tpu.memory_space<vmem>>, vector<1x128xf32>
      tpu.vector_store %arg5[%c0_20, %c0_21], %20 {strides = array<i32>} : memref<1x128xf32, #tpu.memory_space<vmem>>, vector<1x128xf32>,
    } else {
    }
    %c0_6 = arith.constant 0 : index
    %c0_7 = arith.constant 0 : index
    %7 = vector.load %arg4[%c0_6, %c0_7] : memref<1x128xf32, #tpu.memory_space<vmem>>, vector<1x128xf32>
    %cst_8 = arith.constant dense<0.000000e+00> : vector<128xf32>
    %8 = vector.multi_reduction <add>, %2, %cst_8 [0] : vector<32x128xf32> to vector<128xf32>
    %9 = vector.shape_cast %8 : vector<128xf32> to vector<1x128xf32>
    %10 = arith.addf %7, %9 : vector<1x128xf32>
    %c0_9 = arith.constant 0 : index
    %c0_10 = arith.constant 0 : index
    %11 = vector.load %arg4[%c0_9, %c0_10] : memref<1x128xf32, #tpu.memory_space<vmem>>, vector<1x128xf32>
    tpu.vector_store %arg4[%c0_9, %c0_10], %10 {strides = array<i32>} : memref<1x128xf32, #tpu.memory_space<vmem>>, vector<1x128xf32>,
    %c0_11 = arith.constant 0 : index
    %c0_12 = arith.constant 0 : index
    %12 = vector.load %arg5[%c0_11, %c0_12] : memref<1x128xf32, #tpu.memory_space<vmem>>, vector<1x128xf32>
    %13 = arith.mulf %2, %2 : vector<32x128xf32>
    %cst_13 = arith.constant dense<0.000000e+00> : vector<128xf32>
    %14 = vector.multi_reduction <add>, %13, %cst_13 [0] : vector<32x128xf32> to vector<128xf32>
    %15 = vector.shape_cast %14 : vector<128xf32> to vector<1x128xf32>
    %16 = arith.addf %12, %15 : vector<1x128xf32>
    %c0_14 = arith.constant 0 : index
    %c0_15 = arith.constant 0 : index
    %17 = vector.load %arg5[%c0_14, %c0_15] : memref<1x128xf32, #tpu.memory_space<vmem>>, vector<1x128xf32>
    tpu.vector_store %arg5[%c0_14, %c0_15], %16 {strides = array<i32>} : memref<1x128xf32, #tpu.memory_space<vmem>>, vector<1x128xf32>,
    return
  }
  func.func @transform_0(%arg0: i32) -> (i32, i32) {
    %c0_i32 = arith.constant 0 : i32
    %c0_i32_0 = arith.constant 0 : i32
    return %arg0, %c0_i32 : i32, i32
  }
  func.func @transform_1(%arg0: i32) -> (i32, i32) {
    %c0_i32 = arith.constant 0 : i32
    %c0_i32_0 = arith.constant 0 : i32
    %c0_i32_1 = arith.constant 0 : i32
    return %c0_i32, %c0_i32_0 : i32, i32
  }
  func.func @transform_2(%arg0: i32) -> (i32, i32) {
    %c0_i32 = arith.constant 0 : i32
    %c0_i32_0 = arith.constant 0 : i32
    return %arg0, %c0_i32 : i32, i32
  }
  func.func @transform_3(%arg0: i32) -> (i32, i32) {
    %c0_i32 = arith.constant 0 : i32
    %c0_i32_0 = arith.constant 0 : i32
    %c0_i32_1 = arith.constant 0 : i32
    return %c0_i32, %c0_i32_0 : i32, i32
  }
  func.func @transform_4(%arg0: i32) -> (i32, i32) {
    %c0_i32 = arith.constant 0 : i32
    %c0_i32_0 = arith.constant 0 : i32
    %c0_i32_1 = arith.constant 0 : i32
    return %c0_i32, %c0_i32_0 : i32, i32
  }
}

module attributes {stable_mosaic.version = 11 : i64} {
  func.func @kernel(%arg0: i32, %arg1: memref<32x128xf32, #tpu.memory_space<vmem>>, %arg2: memref<1x128xf32, #tpu.memory_space<vmem>>, %arg3: memref<1x128xf32, #tpu.memory_space<vmem>>, %arg4: memref<32x128xf32, #tpu.memory_space<vmem>>) attributes {dimension_semantics = [#tpu.dimension_semantics<parallel>], iteration_bounds = array<i64: 1>, scalar_prefetch = 0 : i64, scratch_operands = 0 : i64, tpu.core_type = #tpu.core_type<tc>, window_params = [{transform_indices = @transform_0, window_bounds = array<i64: 32, 128>}, {pipeline_mode = #tpu.pipeline_mode<synchronous>, transform_indices = @transform_1, window_bounds = array<i64: 1, 128>}, {pipeline_mode = #tpu.pipeline_mode<synchronous>, transform_indices = @transform_2, window_bounds = array<i64: 1, 128>}, {transform_indices = @transform_3, window_bounds = array<i64: 32, 128>}]} {
    %c0 = arith.constant 0 : index
    %c0_0 = arith.constant 0 : index
    %0 = vector.load %arg1[%c0, %c0_0] : memref<32x128xf32, #tpu.memory_space<vmem>>, vector<32x128xf32>
    %c0_1 = arith.constant 0 : index
    %c0_2 = arith.constant 0 : index
    %1 = vector.load %arg2[%c0_1, %c0_2] : memref<1x128xf32, #tpu.memory_space<vmem>>, vector<1x128xf32>
    %2 = vector.broadcast %1 : vector<1x128xf32> to vector<32x128xf32>
    %3 = arith.mulf %0, %2 : vector<32x128xf32>
    %c0_3 = arith.constant 0 : index
    %c0_4 = arith.constant 0 : index
    %4 = vector.load %arg3[%c0_3, %c0_4] : memref<1x128xf32, #tpu.memory_space<vmem>>, vector<1x128xf32>
    %5 = vector.broadcast %4 : vector<1x128xf32> to vector<32x128xf32>
    %6 = arith.addf %3, %5 : vector<32x128xf32>
    %cst = arith.constant 0.000000e+00 : f32
    %7 = vector.broadcast %cst : f32 to vector<32x128xf32>
    %8 = arith.maximumf %6, %7 : vector<32x128xf32>
    %c0_5 = arith.constant 0 : index
    %c0_6 = arith.constant 0 : index
    %9 = vector.load %arg4[%c0_5, %c0_6] : memref<32x128xf32, #tpu.memory_space<vmem>>, vector<32x128xf32>
    tpu.vector_store %arg4[%c0_5, %c0_6], %8 {strides = array<i32>} : memref<32x128xf32, #tpu.memory_space<vmem>>, vector<32x128xf32>,
    return
  }
  func.func @transform_0(%arg0: i32) -> (i32, i32) {
    %c0_i32 = arith.constant 0 : i32
    %c0_i32_0 = arith.constant 0 : i32
    return %arg0, %c0_i32 : i32, i32
  }
  func.func @transform_1(%arg0: i32) -> (i32, i32) {
    %c0_i32 = arith.constant 0 : i32
    %c0_i32_0 = arith.constant 0 : i32
    %c0_i32_1 = arith.constant 0 : i32
    return %c0_i32, %c0_i32_0 : i32, i32
  }
  func.func @transform_2(%arg0: i32) -> (i32, i32) {
    %c0_i32 = arith.constant 0 : i32
    %c0_i32_0 = arith.constant 0 : i32
    %c0_i32_1 = arith.constant 0 : i32
    return %c0_i32, %c0_i32_0 : i32, i32
  }
  func.func @transform_3(%arg0: i32) -> (i32, i32) {
    %c0_i32 = arith.constant 0 : i32
    %c0_i32_0 = arith.constant 0 : i32
    return %arg0, %c0_i32 : i32, i32
  }
}

module attributes {stable_mosaic.version = 11 : i64} {
  func.func @kernel(%arg0: i32, %arg1: memref<32x128xf32, #tpu.memory_space<vmem>>, %arg2: memref<1x128xf32, #tpu.memory_space<vmem>>, %arg3: memref<1x128xf32, #tpu.memory_space<vmem>>, %arg4: memref<32x128xf32, #tpu.memory_space<vmem>>, %arg5: memref<32x128xf32, #tpu.memory_space<vmem>>) attributes {dimension_semantics = [#tpu.dimension_semantics<parallel>], iteration_bounds = array<i64: 1>, scalar_prefetch = 0 : i64, scratch_operands = 0 : i64, tpu.core_type = #tpu.core_type<tc>, window_params = [{transform_indices = @transform_0, window_bounds = array<i64: 32, 128>}, {pipeline_mode = #tpu.pipeline_mode<synchronous>, transform_indices = @transform_1, window_bounds = array<i64: 1, 128>}, {pipeline_mode = #tpu.pipeline_mode<synchronous>, transform_indices = @transform_2, window_bounds = array<i64: 1, 128>}, {transform_indices = @transform_3, window_bounds = array<i64: 32, 128>}, {transform_indices = @transform_4, window_bounds = array<i64: 32, 128>}]} {
    %c0 = arith.constant 0 : index
    %c0_0 = arith.constant 0 : index
    %0 = vector.load %arg1[%c0, %c0_0] : memref<32x128xf32, #tpu.memory_space<vmem>>, vector<32x128xf32>
    %c0_1 = arith.constant 0 : index
    %c0_2 = arith.constant 0 : index
    %1 = vector.load %arg2[%c0_1, %c0_2] : memref<1x128xf32, #tpu.memory_space<vmem>>, vector<1x128xf32>
    %2 = vector.broadcast %1 : vector<1x128xf32> to vector<32x128xf32>
    %3 = arith.mulf %0, %2 : vector<32x128xf32>
    %c0_3 = arith.constant 0 : index
    %c0_4 = arith.constant 0 : index
    %4 = vector.load %arg3[%c0_3, %c0_4] : memref<1x128xf32, #tpu.memory_space<vmem>>, vector<1x128xf32>
    %5 = vector.broadcast %4 : vector<1x128xf32> to vector<32x128xf32>
    %6 = arith.addf %3, %5 : vector<32x128xf32>
    %c0_5 = arith.constant 0 : index
    %c0_6 = arith.constant 0 : index
    %7 = vector.load %arg4[%c0_5, %c0_6] : memref<32x128xf32, #tpu.memory_space<vmem>>, vector<32x128xf32>
    %8 = arith.addf %6, %7 : vector<32x128xf32>
    %cst = arith.constant 0.000000e+00 : f32
    %9 = vector.broadcast %cst : f32 to vector<32x128xf32>
    %10 = arith.maximumf %8, %9 : vector<32x128xf32>
    %c0_7 = arith.constant 0 : index
    %c0_8 = arith.constant 0 : index
    %11 = vector.load %arg5[%c0_7, %c0_8] : memref<32x128xf32, #tpu.memory_space<vmem>>, vector<32x128xf32>
    tpu.vector_store %arg5[%c0_7, %c0_8], %10 {strides = array<i32>} : memref<32x128xf32, #tpu.memory_space<vmem>>, vector<32x128xf32>,
    return
  }
  func.func @transform_0(%arg0: i32) -> (i32, i32) {
    %c0_i32 = arith.constant 0 : i32
    %c0_i32_0 = arith.constant 0 : i32
    return %arg0, %c0_i32 : i32, i32
  }
  func.func @transform_1(%arg0: i32) -> (i32, i32) {
    %c0_i32 = arith.constant 0 : i32
    %c0_i32_0 = arith.constant 0 : i32
    %c0_i32_1 = arith.constant 0 : i32
    return %c0_i32, %c0_i32_0 : i32, i32
  }
  func.func @transform_2(%arg0: i32) -> (i32, i32) {
    %c0_i32 = arith.constant 0 : i32
    %c0_i32_0 = arith.constant 0 : i32
    %c0_i32_1 = arith.constant 0 : i32
    return %c0_i32, %c0_i32_0 : i32, i32
  }
  func.func @transform_3(%arg0: i32) -> (i32, i32) {
    %c0_i32 = arith.constant 0 : i32
    %c0_i32_0 = arith.constant 0 : i32
    return %arg0, %c0_i32 : i32, i32
  }
  func.func @transform_4(%arg0: i32) -> (i32, i32) {
    %c0_i32 = arith.constant 0 : i32
    %c0_i32_0 = arith.constant 0 : i32
    return %arg0, %c0_i32 : i32, i32
  }
}

module attributes {stable_mosaic.version = 11 : i64} {
  func.func @kernel(%arg0: i32, %arg1: memref<32x1152xbf16, #tpu.memory_space<vmem>>, %arg2: memref<1152x128xbf16, #tpu.memory_space<vmem>>, %arg3: memref<32x128xf32, #tpu.memory_space<vmem>>, %arg4: memref<1x128xf32, #tpu.memory_space<vmem>>, %arg5: memref<1x128xf32, #tpu.memory_space<vmem>>) attributes {dimension_semantics = [#tpu.dimension_semantics<arbitrary>], iteration_bounds = array<i64: 1>, scalar_prefetch = 0 : i64, scratch_operands = 0 : i64, tpu.core_type = #tpu.core_type<tc>, window_params = [{transform_indices = @transform_0, window_bounds = array<i64: 32, 1152>}, {pipeline_mode = #tpu.pipeline_mode<synchronous>, transform_indices = @transform_1, window_bounds = array<i64: 1152, 128>}, {transform_indices = @transform_2, window_bounds = array<i64: 32, 128>}, {pipeline_mode = #tpu.pipeline_mode<synchronous>, transform_indices = @transform_3, window_bounds = array<i64: 1, 128>}, {pipeline_mode = #tpu.pipeline_mode<synchronous>, transform_indices = @transform_4, window_bounds = array<i64: 1, 128>}]} {
    %c0 = arith.constant 0 : index
    %c0_0 = arith.constant 0 : index
    %0 = vector.load %arg1[%c0, %c0_0] : memref<32x1152xbf16, #tpu.memory_space<vmem>>, vector<32x1152xbf16>
    %c0_1 = arith.constant 0 : index
    %c0_2 = arith.constant 0 : index
    %1 = vector.load %arg2[%c0_1, %c0_2] : memref<1152x128xbf16, #tpu.memory_space<vmem>>, vector<1152x128xbf16>
    %cst = arith.constant dense<0.000000e+00> : vector<32x128xf32>
    %2 = tpu.matmul %0, %1, %cst {dimension_numbers = #tpu.dot_dimension_numbers<[1], [0], [0], [1], [0, 0, 1, 1], [], []>} : vector<32x1152xbf16>, vector<1152x128xbf16>, vector<32x128xf32> -> vector<32x128xf32>
    %c0_3 = arith.constant 0 : index
    %c0_4 = arith.constant 0 : index
    %3 = vector.load %arg3[%c0_3, %c0_4] : memref<32x128xf32, #tpu.memory_space<vmem>>, vector<32x128xf32>
    tpu.vector_store %arg3[%c0_3, %c0_4], %2 {strides = array<i32>} : memref<32x128xf32, #tpu.memory_space<vmem>>, vector<32x128xf32>,
    %c0_i32 = arith.constant 0 : i32
    %4 = arith.cmpi eq, %arg0, %c0_i32 : i32
    %5 = arith.extui %4 : i1 to i32
    %c0_i32_5 = arith.constant 0 : i32
    %6 = arith.cmpi ne, %5, %c0_i32_5 : i32
    scf.if %6 {
      %cst_16 = arith.constant 0.000000e+00 : f32
      %18 = vector.broadcast %cst_16 : f32 to vector<1x128xf32>
      %c0_17 = arith.constant 0 : index
      %c0_18 = arith.constant 0 : index
      %19 = vector.load %arg4[%c0_17, %c0_18] : memref<1x128xf32, #tpu.memory_space<vmem>>, vector<1x128xf32>
      tpu.vector_store %arg4[%c0_17, %c0_18], %18 {strides = array<i32>} : memref<1x128xf32, #tpu.memory_space<vmem>>, vector<1x128xf32>,
      %cst_19 = arith.constant 0.000000e+00 : f32
      %20 = vector.broadcast %cst_19 : f32 to vector<1x128xf32>
      %c0_20 = arith.constant 0 : index
      %c0_21 = arith.constant 0 : index
      %21 = vector.load %arg5[%c0_20, %c0_21] : memref<1x128xf32, #tpu.memory_space<vmem>>, vector<1x128xf32>
      tpu.vector_store %arg5[%c0_20, %c0_21], %20 {strides = array<i32>} : memref<1x128xf32, #tpu.memory_space<vmem>>, vector<1x128xf32>,
    } else {
    }
    %c0_6 = arith.constant 0 : index
    %c0_7 = arith.constant 0 : index
    %7 = vector.load %arg4[%c0_6, %c0_7] : memref<1x128xf32, #tpu.memory_space<vmem>>, vector<1x128xf32>
    %cst_8 = arith.constant dense<0.000000e+00> : vector<128xf32>
    %8 = vector.multi_reduction <add>, %2, %cst_8 [0] : vector<32x128xf32> to vector<128xf32>
    %9 = vector.shape_cast %8 : vector<128xf32> to vector<1x128xf32>
    %10 = arith.addf %7, %9 : vector<1x128xf32>
    %c0_9 = arith.constant 0 : index
    %c0_10 = arith.constant 0 : index
    %11 = vector.load %arg4[%c0_9, %c0_10] : memref<1x128xf32, #tpu.memory_space<vmem>>, vector<1x128xf32>
    tpu.vector_store %arg4[%c0_9, %c0_10], %10 {strides = array<i32>} : memref<1x128xf32, #tpu.memory_space<vmem>>, vector<1x128xf32>,
    %c0_11 = arith.constant 0 : index
    %c0_12 = arith.constant 0 : index
    %12 = vector.load %arg5[%c0_11, %c0_12] : memref<1x128xf32, #tpu.memory_space<vmem>>, vector<1x128xf32>
    %13 = arith.mulf %2, %2 : vector<32x128xf32>
    %cst_13 = arith.constant dense<0.000000e+00> : vector<128xf32>
    %14 = vector.multi_reduction <add>, %13, %cst_13 [0] : vector<32x128xf32> to vector<128xf32>
    %15 = vector.shape_cast %14 : vector<128xf32> to vector<1x128xf32>
    %16 = arith.addf %12, %15 : vector<1x128xf32>
    %c0_14 = arith.constant 0 : index
    %c0_15 = arith.constant 0 : index
    %17 = vector.load %arg5[%c0_14, %c0_15] : memref<1x128xf32, #tpu.memory_space<vmem>>, vector<1x128xf32>
    tpu.vector_store %arg5[%c0_14, %c0_15], %16 {strides = array<i32>} : memref<1x128xf32, #tpu.memory_space<vmem>>, vector<1x128xf32>,
    return
  }
  func.func @transform_0(%arg0: i32) -> (i32, i32) {
    %c0_i32 = arith.constant 0 : i32
    %c0_i32_0 = arith.constant 0 : i32
    return %arg0, %c0_i32 : i32, i32
  }
  func.func @transform_1(%arg0: i32) -> (i32, i32) {
    %c0_i32 = arith.constant 0 : i32
    %c0_i32_0 = arith.constant 0 : i32
    %c0_i32_1 = arith.constant 0 : i32
    return %c0_i32, %c0_i32_0 : i32, i32
  }
  func.func @transform_2(%arg0: i32) -> (i32, i32) {
    %c0_i32 = arith.constant 0 : i32
    %c0_i32_0 = arith.constant 0 : i32
    return %arg0, %c0_i32 : i32, i32
  }
  func.func @transform_3(%arg0: i32) -> (i32, i32) {
    %c0_i32 = arith.constant 0 : i32
    %c0_i32_0 = arith.constant 0 : i32
    %c0_i32_1 = arith.constant 0 : i32
    return %c0_i32, %c0_i32_0 : i32, i32
  }
  func.func @transform_4(%arg0: i32) -> (i32, i32) {
    %c0_i32 = arith.constant 0 : i32
    %c0_i32_0 = arith.constant 0 : i32
    %c0_i32_1 = arith.constant 0 : i32
    return %c0_i32, %c0_i32_0 : i32, i32
  }
}

module attributes {stable_mosaic.version = 11 : i64} {
  func.func @kernel(%arg0: i32, %arg1: memref<32x64xbf16, #tpu.memory_space<vmem>>, %arg2: memref<64x128xbf16, #tpu.memory_space<vmem>>, %arg3: memref<32x128xf32, #tpu.memory_space<vmem>>) attributes {dimension_semantics = [#tpu.dimension_semantics<parallel>], iteration_bounds = array<i64: 1>, scalar_prefetch = 0 : i64, scratch_operands = 0 : i64, tpu.core_type = #tpu.core_type<tc>, window_params = [{transform_indices = @transform_0, window_bounds = array<i64: 32, 64>}, {pipeline_mode = #tpu.pipeline_mode<synchronous>, transform_indices = @transform_1, window_bounds = array<i64: 64, 128>}, {transform_indices = @transform_2, window_bounds = array<i64: 32, 128>}]} {
    %c0 = arith.constant 0 : index
    %c0_0 = arith.constant 0 : index
    %0 = vector.load %arg1[%c0, %c0_0] : memref<32x64xbf16, #tpu.memory_space<vmem>>, vector<32x64xbf16>
    %c0_1 = arith.constant 0 : index
    %c0_2 = arith.constant 0 : index
    %1 = vector.load %arg2[%c0_1, %c0_2] : memref<64x128xbf16, #tpu.memory_space<vmem>>, vector<64x128xbf16>
    %cst = arith.constant dense<0.000000e+00> : vector<32x128xf32>
    %2 = tpu.matmul %0, %1, %cst {dimension_numbers = #tpu.dot_dimension_numbers<[1], [0], [0], [1], [0, 0, 1, 1], [], []>} : vector<32x64xbf16>, vector<64x128xbf16>, vector<32x128xf32> -> vector<32x128xf32>
    %c0_3 = arith.constant 0 : index
    %c0_4 = arith.constant 0 : index
    %3 = vector.load %arg3[%c0_3, %c0_4] : memref<32x128xf32, #tpu.memory_space<vmem>>, vector<32x128xf32>
    tpu.vector_store %arg3[%c0_3, %c0_4], %2 {strides = array<i32>} : memref<32x128xf32, #tpu.memory_space<vmem>>, vector<32x128xf32>,
    return
  }
  func.func @transform_0(%arg0: i32) -> (i32, i32) {
    %c0_i32 = arith.constant 0 : i32
    %c0_i32_0 = arith.constant 0 : i32
    return %arg0, %c0_i32 : i32, i32
  }
  func.func @transform_1(%arg0: i32) -> (i32, i32) {
    %c0_i32 = arith.constant 0 : i32
    %c0_i32_0 = arith.constant 0 : i32
    %c0_i32_1 = arith.constant 0 : i32
    return %c0_i32, %c0_i32_0 : i32, i32
  }
  func.func @transform_2(%arg0: i32) -> (i32, i32) {
    %c0_i32 = arith.constant 0 : i32
    %c0_i32_0 = arith.constant 0 : i32
    return %arg0, %c0_i32 : i32, i32
  }
}

module attributes {stable_mosaic.version = 11 : i64} {
  func.func @kernel(%arg0: i32, %arg1: memref<128x64xf32, #tpu.memory_space<vmem>>, %arg2: memref<1x64xf32, #tpu.memory_space<vmem>>, %arg3: memref<1x64xf32, #tpu.memory_space<vmem>>, %arg4: memref<128x64xf32, #tpu.memory_space<vmem>>) attributes {dimension_semantics = [#tpu.dimension_semantics<parallel>], iteration_bounds = array<i64: 1>, scalar_prefetch = 0 : i64, scratch_operands = 0 : i64, tpu.core_type = #tpu.core_type<tc>, window_params = [{transform_indices = @transform_0, window_bounds = array<i64: 128, 64>}, {pipeline_mode = #tpu.pipeline_mode<synchronous>, transform_indices = @transform_1, window_bounds = array<i64: 1, 64>}, {pipeline_mode = #tpu.pipeline_mode<synchronous>, transform_indices = @transform_2, window_bounds = array<i64: 1, 64>}, {transform_indices = @transform_3, window_bounds = array<i64: 128, 64>}]} {
    %c0 = arith.constant 0 : index
    %c0_0 = arith.constant 0 : index
    %0 = vector.load %arg1[%c0, %c0_0] : memref<128x64xf32, #tpu.memory_space<vmem>>, vector<128x64xf32>
    %c0_1 = arith.constant 0 : index
    %c0_2 = arith.constant 0 : index
    %1 = vector.load %arg2[%c0_1, %c0_2] : memref<1x64xf32, #tpu.memory_space<vmem>>, vector<1x64xf32>
    %2 = vector.broadcast %1 : vector<1x64xf32> to vector<128x64xf32>
    %3 = arith.mulf %0, %2 : vector<128x64xf32>
    %c0_3 = arith.constant 0 : index
    %c0_4 = arith.constant 0 : index
    %4 = vector.load %arg3[%c0_3, %c0_4] : memref<1x64xf32, #tpu.memory_space<vmem>>, vector<1x64xf32>
    %5 = vector.broadcast %4 : vector<1x64xf32> to vector<128x64xf32>
    %6 = arith.addf %3, %5 : vector<128x64xf32>
    %cst = arith.constant 0.000000e+00 : f32
    %7 = vector.broadcast %cst : f32 to vector<128x64xf32>
    %8 = arith.maximumf %6, %7 : vector<128x64xf32>
    %c0_5 = arith.constant 0 : index
    %c0_6 = arith.constant 0 : index
    %9 = vector.load %arg4[%c0_5, %c0_6] : memref<128x64xf32, #tpu.memory_space<vmem>>, vector<128x64xf32>
    tpu.vector_store %arg4[%c0_5, %c0_6], %8 {strides = array<i32>} : memref<128x64xf32, #tpu.memory_space<vmem>>, vector<128x64xf32>,
    return
  }
  func.func @transform_0(%arg0: i32) -> (i32, i32) {
    %c0_i32 = arith.constant 0 : i32
    %c0_i32_0 = arith.constant 0 : i32
    return %arg0, %c0_i32 : i32, i32
  }
  func.func @transform_1(%arg0: i32) -> (i32, i32) {
    %c0_i32 = arith.constant 0 : i32
    %c0_i32_0 = arith.constant 0 : i32
    %c0_i32_1 = arith.constant 0 : i32
    return %c0_i32, %c0_i32_0 : i32, i32
  }
  func.func @transform_2(%arg0: i32) -> (i32, i32) {
    %c0_i32 = arith.constant 0 : i32
    %c0_i32_0 = arith.constant 0 : i32
    %c0_i32_1 = arith.constant 0 : i32
    return %c0_i32, %c0_i32_0 : i32, i32
  }
  func.func @transform_3(%arg0: i32) -> (i32, i32) {
    %c0_i32 = arith.constant 0 : i32
    %c0_i32_0 = arith.constant 0 : i32
    return %arg0, %c0_i32 : i32, i32
  }
}

module attributes {stable_mosaic.version = 11 : i64} {
  func.func @kernel(%arg0: i32, %arg1: memref<128x1152xbf16, #tpu.memory_space<vmem>>, %arg2: memref<1152x128xbf16, #tpu.memory_space<vmem>>, %arg3: memref<128x128xf32, #tpu.memory_space<vmem>>, %arg4: memref<1x128xf32, #tpu.memory_space<vmem>>, %arg5: memref<1x128xf32, #tpu.memory_space<vmem>>) attributes {dimension_semantics = [#tpu.dimension_semantics<arbitrary>], iteration_bounds = array<i64: 1>, scalar_prefetch = 0 : i64, scratch_operands = 0 : i64, tpu.core_type = #tpu.core_type<tc>, window_params = [{transform_indices = @transform_0, window_bounds = array<i64: 128, 1152>}, {pipeline_mode = #tpu.pipeline_mode<synchronous>, transform_indices = @transform_1, window_bounds = array<i64: 1152, 128>}, {transform_indices = @transform_2, window_bounds = array<i64: 128, 128>}, {pipeline_mode = #tpu.pipeline_mode<synchronous>, transform_indices = @transform_3, window_bounds = array<i64: 1, 128>}, {pipeline_mode = #tpu.pipeline_mode<synchronous>, transform_indices = @transform_4, window_bounds = array<i64: 1, 128>}]} {
    %c0 = arith.constant 0 : index
    %c0_0 = arith.constant 0 : index
    %0 = vector.load %arg1[%c0, %c0_0] : memref<128x1152xbf16, #tpu.memory_space<vmem>>, vector<128x1152xbf16>
    %c0_1 = arith.constant 0 : index
    %c0_2 = arith.constant 0 : index
    %1 = vector.load %arg2[%c0_1, %c0_2] : memref<1152x128xbf16, #tpu.memory_space<vmem>>, vector<1152x128xbf16>
    %cst = arith.constant dense<0.000000e+00> : vector<128x128xf32>
    %2 = tpu.matmul %0, %1, %cst {dimension_numbers = #tpu.dot_dimension_numbers<[1], [0], [0], [1], [0, 0, 1, 1], [], []>} : vector<128x1152xbf16>, vector<1152x128xbf16>, vector<128x128xf32> -> vector<128x128xf32>
    %c0_3 = arith.constant 0 : index
    %c0_4 = arith.constant 0 : index
    %3 = vector.load %arg3[%c0_3, %c0_4] : memref<128x128xf32, #tpu.memory_space<vmem>>, vector<128x128xf32>
    tpu.vector_store %arg3[%c0_3, %c0_4], %2 {strides = array<i32>} : memref<128x128xf32, #tpu.memory_space<vmem>>, vector<128x128xf32>,
    %c0_i32 = arith.constant 0 : i32
    %4 = arith.cmpi eq, %arg0, %c0_i32 : i32
    %5 = arith.extui %4 : i1 to i32
    %c0_i32_5 = arith.constant 0 : i32
    %6 = arith.cmpi ne, %5, %c0_i32_5 : i32
    scf.if %6 {
      %cst_16 = arith.constant 0.000000e+00 : f32
      %18 = vector.broadcast %cst_16 : f32 to vector<1x128xf32>
      %c0_17 = arith.constant 0 : index
      %c0_18 = arith.constant 0 : index
      %19 = vector.load %arg4[%c0_17, %c0_18] : memref<1x128xf32, #tpu.memory_space<vmem>>, vector<1x128xf32>
      tpu.vector_store %arg4[%c0_17, %c0_18], %18 {strides = array<i32>} : memref<1x128xf32, #tpu.memory_space<vmem>>, vector<1x128xf32>,
      %cst_19 = arith.constant 0.000000e+00 : f32
      %20 = vector.broadcast %cst_19 : f32 to vector<1x128xf32>
      %c0_20 = arith.constant 0 : index
      %c0_21 = arith.constant 0 : index
      %21 = vector.load %arg5[%c0_20, %c0_21] : memref<1x128xf32, #tpu.memory_space<vmem>>, vector<1x128xf32>
      tpu.vector_store %arg5[%c0_20, %c0_21], %20 {strides = array<i32>} : memref<1x128xf32, #tpu.memory_space<vmem>>, vector<1x128xf32>,
    } else {
    }
    %c0_6 = arith.constant 0 : index
    %c0_7 = arith.constant 0 : index
    %7 = vector.load %arg4[%c0_6, %c0_7] : memref<1x128xf32, #tpu.memory_space<vmem>>, vector<1x128xf32>
    %cst_8 = arith.constant dense<0.000000e+00> : vector<128xf32>
    %8 = vector.multi_reduction <add>, %2, %cst_8 [0] : vector<128x128xf32> to vector<128xf32>
    %9 = vector.shape_cast %8 : vector<128xf32> to vector<1x128xf32>
    %10 = arith.addf %7, %9 : vector<1x128xf32>
    %c0_9 = arith.constant 0 : index
    %c0_10 = arith.constant 0 : index
    %11 = vector.load %arg4[%c0_9, %c0_10] : memref<1x128xf32, #tpu.memory_space<vmem>>, vector<1x128xf32>
    tpu.vector_store %arg4[%c0_9, %c0_10], %10 {strides = array<i32>} : memref<1x128xf32, #tpu.memory_space<vmem>>, vector<1x128xf32>,
    %c0_11 = arith.constant 0 : index
    %c0_12 = arith.constant 0 : index
    %12 = vector.load %arg5[%c0_11, %c0_12] : memref<1x128xf32, #tpu.memory_space<vmem>>, vector<1x128xf32>
    %13 = arith.mulf %2, %2 : vector<128x128xf32>
    %cst_13 = arith.constant dense<0.000000e+00> : vector<128xf32>
    %14 = vector.multi_reduction <add>, %13, %cst_13 [0] : vector<128x128xf32> to vector<128xf32>
    %15 = vector.shape_cast %14 : vector<128xf32> to vector<1x128xf32>
    %16 = arith.addf %12, %15 : vector<1x128xf32>
    %c0_14 = arith.constant 0 : index
    %c0_15 = arith.constant 0 : index
    %17 = vector.load %arg5[%c0_14, %c0_15] : memref<1x128xf32, #tpu.memory_space<vmem>>, vector<1x128xf32>
    tpu.vector_store %arg5[%c0_14, %c0_15], %16 {strides = array<i32>} : memref<1x128xf32, #tpu.memory_space<vmem>>, vector<1x128xf32>,
    return
  }
  func.func @transform_0(%arg0: i32) -> (i32, i32) {
    %c0_i32 = arith.constant 0 : i32
    %c0_i32_0 = arith.constant 0 : i32
    return %arg0, %c0_i32 : i32, i32
  }
  func.func @transform_1(%arg0: i32) -> (i32, i32) {
    %c0_i32 = arith.constant 0 : i32
    %c0_i32_0 = arith.constant 0 : i32
    %c0_i32_1 = arith.constant 0 : i32
    return %c0_i32, %c0_i32_0 : i32, i32
  }
  func.func @transform_2(%arg0: i32) -> (i32, i32) {
    %c0_i32 = arith.constant 0 : i32
    %c0_i32_0 = arith.constant 0 : i32
    return %arg0, %c0_i32 : i32, i32
  }
  func.func @transform_3(%arg0: i32) -> (i32, i32) {
    %c0_i32 = arith.constant 0 : i32
    %c0_i32_0 = arith.constant 0 : i32
    %c0_i32_1 = arith.constant 0 : i32
    return %c0_i32, %c0_i32_0 : i32, i32
  }
  func.func @transform_4(%arg0: i32) -> (i32, i32) {
    %c0_i32 = arith.constant 0 : i32
    %c0_i32_0 = arith.constant 0 : i32
    %c0_i32_1 = arith.constant 0 : i32
    return %c0_i32, %c0_i32_0 : i32, i32
  }
}

module attributes {stable_mosaic.version = 11 : i64} {
  func.func @kernel(%arg0: i32, %arg1: memref<128x576xbf16, #tpu.memory_space<vmem>>, %arg2: memref<576x128xbf16, #tpu.memory_space<vmem>>, %arg3: memref<128x128xf32, #tpu.memory_space<vmem>>, %arg4: memref<1x128xf32, #tpu.memory_space<vmem>>, %arg5: memref<1x128xf32, #tpu.memory_space<vmem>>) attributes {dimension_semantics = [#tpu.dimension_semantics<arbitrary>], iteration_bounds = array<i64: 1>, scalar_prefetch = 0 : i64, scratch_operands = 0 : i64, tpu.core_type = #tpu.core_type<tc>, window_params = [{transform_indices = @transform_0, window_bounds = array<i64: 128, 576>}, {pipeline_mode = #tpu.pipeline_mode<synchronous>, transform_indices = @transform_1, window_bounds = array<i64: 576, 128>}, {transform_indices = @transform_2, window_bounds = array<i64: 128, 128>}, {pipeline_mode = #tpu.pipeline_mode<synchronous>, transform_indices = @transform_3, window_bounds = array<i64: 1, 128>}, {pipeline_mode = #tpu.pipeline_mode<synchronous>, transform_indices = @transform_4, window_bounds = array<i64: 1, 128>}]} {
    %c0 = arith.constant 0 : index
    %c0_0 = arith.constant 0 : index
    %0 = vector.load %arg1[%c0, %c0_0] : memref<128x576xbf16, #tpu.memory_space<vmem>>, vector<128x576xbf16>
    %c0_1 = arith.constant 0 : index
    %c0_2 = arith.constant 0 : index
    %1 = vector.load %arg2[%c0_1, %c0_2] : memref<576x128xbf16, #tpu.memory_space<vmem>>, vector<576x128xbf16>
    %cst = arith.constant dense<0.000000e+00> : vector<128x128xf32>
    %2 = tpu.matmul %0, %1, %cst {dimension_numbers = #tpu.dot_dimension_numbers<[1], [0], [0], [1], [0, 0, 1, 1], [], []>} : vector<128x576xbf16>, vector<576x128xbf16>, vector<128x128xf32> -> vector<128x128xf32>
    %c0_3 = arith.constant 0 : index
    %c0_4 = arith.constant 0 : index
    %3 = vector.load %arg3[%c0_3, %c0_4] : memref<128x128xf32, #tpu.memory_space<vmem>>, vector<128x128xf32>
    tpu.vector_store %arg3[%c0_3, %c0_4], %2 {strides = array<i32>} : memref<128x128xf32, #tpu.memory_space<vmem>>, vector<128x128xf32>,
    %c0_i32 = arith.constant 0 : i32
    %4 = arith.cmpi eq, %arg0, %c0_i32 : i32
    %5 = arith.extui %4 : i1 to i32
    %c0_i32_5 = arith.constant 0 : i32
    %6 = arith.cmpi ne, %5, %c0_i32_5 : i32
    scf.if %6 {
      %cst_16 = arith.constant 0.000000e+00 : f32
      %18 = vector.broadcast %cst_16 : f32 to vector<1x128xf32>
      %c0_17 = arith.constant 0 : index
      %c0_18 = arith.constant 0 : index
      %19 = vector.load %arg4[%c0_17, %c0_18] : memref<1x128xf32, #tpu.memory_space<vmem>>, vector<1x128xf32>
      tpu.vector_store %arg4[%c0_17, %c0_18], %18 {strides = array<i32>} : memref<1x128xf32, #tpu.memory_space<vmem>>, vector<1x128xf32>,
      %cst_19 = arith.constant 0.000000e+00 : f32
      %20 = vector.broadcast %cst_19 : f32 to vector<1x128xf32>
      %c0_20 = arith.constant 0 : index
      %c0_21 = arith.constant 0 : index
      %21 = vector.load %arg5[%c0_20, %c0_21] : memref<1x128xf32, #tpu.memory_space<vmem>>, vector<1x128xf32>
      tpu.vector_store %arg5[%c0_20, %c0_21], %20 {strides = array<i32>} : memref<1x128xf32, #tpu.memory_space<vmem>>, vector<1x128xf32>,
    } else {
    }
    %c0_6 = arith.constant 0 : index
    %c0_7 = arith.constant 0 : index
    %7 = vector.load %arg4[%c0_6, %c0_7] : memref<1x128xf32, #tpu.memory_space<vmem>>, vector<1x128xf32>
    %cst_8 = arith.constant dense<0.000000e+00> : vector<128xf32>
    %8 = vector.multi_reduction <add>, %2, %cst_8 [0] : vector<128x128xf32> to vector<128xf32>
    %9 = vector.shape_cast %8 : vector<128xf32> to vector<1x128xf32>
    %10 = arith.addf %7, %9 : vector<1x128xf32>
    %c0_9 = arith.constant 0 : index
    %c0_10 = arith.constant 0 : index
    %11 = vector.load %arg4[%c0_9, %c0_10] : memref<1x128xf32, #tpu.memory_space<vmem>>, vector<1x128xf32>
    tpu.vector_store %arg4[%c0_9, %c0_10], %10 {strides = array<i32>} : memref<1x128xf32, #tpu.memory_space<vmem>>, vector<1x128xf32>,
    %c0_11 = arith.constant 0 : index
    %c0_12 = arith.constant 0 : index
    %12 = vector.load %arg5[%c0_11, %c0_12] : memref<1x128xf32, #tpu.memory_space<vmem>>, vector<1x128xf32>
    %13 = arith.mulf %2, %2 : vector<128x128xf32>
    %cst_13 = arith.constant dense<0.000000e+00> : vector<128xf32>
    %14 = vector.multi_reduction <add>, %13, %cst_13 [0] : vector<128x128xf32> to vector<128xf32>
    %15 = vector.shape_cast %14 : vector<128xf32> to vector<1x128xf32>
    %16 = arith.addf %12, %15 : vector<1x128xf32>
    %c0_14 = arith.constant 0 : index
    %c0_15 = arith.constant 0 : index
    %17 = vector.load %arg5[%c0_14, %c0_15] : memref<1x128xf32, #tpu.memory_space<vmem>>, vector<1x128xf32>
    tpu.vector_store %arg5[%c0_14, %c0_15], %16 {strides = array<i32>} : memref<1x128xf32, #tpu.memory_space<vmem>>, vector<1x128xf32>,
    return
  }
  func.func @transform_0(%arg0: i32) -> (i32, i32) {
    %c0_i32 = arith.constant 0 : i32
    %c0_i32_0 = arith.constant 0 : i32
    return %arg0, %c0_i32 : i32, i32
  }
  func.func @transform_1(%arg0: i32) -> (i32, i32) {
    %c0_i32 = arith.constant 0 : i32
    %c0_i32_0 = arith.constant 0 : i32
    %c0_i32_1 = arith.constant 0 : i32
    return %c0_i32, %c0_i32_0 : i32, i32
  }
  func.func @transform_2(%arg0: i32) -> (i32, i32) {
    %c0_i32 = arith.constant 0 : i32
    %c0_i32_0 = arith.constant 0 : i32
    return %arg0, %c0_i32 : i32, i32
  }
  func.func @transform_3(%arg0: i32) -> (i32, i32) {
    %c0_i32 = arith.constant 0 : i32
    %c0_i32_0 = arith.constant 0 : i32
    %c0_i32_1 = arith.constant 0 : i32
    return %c0_i32, %c0_i32_0 : i32, i32
  }
  func.func @transform_4(%arg0: i32) -> (i32, i32) {
    %c0_i32 = arith.constant 0 : i32
    %c0_i32_0 = arith.constant 0 : i32
    %c0_i32_1 = arith.constant 0 : i32
    return %c0_i32, %c0_i32_0 : i32, i32
  }
}

module attributes {stable_mosaic.version = 11 : i64} {
  func.func @kernel(%arg0: i32, %arg1: memref<32x128xbf16, #tpu.memory_space<vmem>>, %arg2: memref<128x128xbf16, #tpu.memory_space<vmem>>, %arg3: memref<32x128xf32, #tpu.memory_space<vmem>>) attributes {dimension_semantics = [#tpu.dimension_semantics<parallel>], iteration_bounds = array<i64: 1>, scalar_prefetch = 0 : i64, scratch_operands = 0 : i64, tpu.core_type = #tpu.core_type<tc>, window_params = [{transform_indices = @transform_0, window_bounds = array<i64: 32, 128>}, {pipeline_mode = #tpu.pipeline_mode<synchronous>, transform_indices = @transform_1, window_bounds = array<i64: 128, 128>}, {transform_indices = @transform_2, window_bounds = array<i64: 32, 128>}]} {
    %c0 = arith.constant 0 : index
    %c0_0 = arith.constant 0 : index
    %0 = vector.load %arg1[%c0, %c0_0] : memref<32x128xbf16, #tpu.memory_space<vmem>>, vector<32x128xbf16>
    %c0_1 = arith.constant 0 : index
    %c0_2 = arith.constant 0 : index
    %1 = vector.load %arg2[%c0_1, %c0_2] : memref<128x128xbf16, #tpu.memory_space<vmem>>, vector<128x128xbf16>
    %cst = arith.constant dense<0.000000e+00> : vector<32x128xf32>
    %2 = tpu.matmul %0, %1, %cst {dimension_numbers = #tpu.dot_dimension_numbers<[1], [0], [0], [1], [0, 0, 1, 1], [], []>} : vector<32x128xbf16>, vector<128x128xbf16>, vector<32x128xf32> -> vector<32x128xf32>
    %c0_3 = arith.constant 0 : index
    %c0_4 = arith.constant 0 : index
    %3 = vector.load %arg3[%c0_3, %c0_4] : memref<32x128xf32, #tpu.memory_space<vmem>>, vector<32x128xf32>
    tpu.vector_store %arg3[%c0_3, %c0_4], %2 {strides = array<i32>} : memref<32x128xf32, #tpu.memory_space<vmem>>, vector<32x128xf32>,
    return
  }
  func.func @transform_0(%arg0: i32) -> (i32, i32) {
    %c0_i32 = arith.constant 0 : i32
    %c0_i32_0 = arith.constant 0 : i32
    return %arg0, %c0_i32 : i32, i32
  }
  func.func @transform_1(%arg0: i32) -> (i32, i32) {
    %c0_i32 = arith.constant 0 : i32
    %c0_i32_0 = arith.constant 0 : i32
    %c0_i32_1 = arith.constant 0 : i32
    return %c0_i32, %c0_i32_0 : i32, i32
  }
  func.func @transform_2(%arg0: i32) -> (i32, i32) {
    %c0_i32 = arith.constant 0 : i32
    %c0_i32_0 = arith.constant 0 : i32
    return %arg0, %c0_i32 : i32, i32
  }
}

module attributes {stable_mosaic.version = 11 : i64} {
  func.func @kernel(%arg0: i32, %arg1: memref<128x64xf32, #tpu.memory_space<vmem>>, %arg2: memref<1x64xf32, #tpu.memory_space<vmem>>, %arg3: memref<1x64xf32, #tpu.memory_space<vmem>>, %arg4: memref<128x64xf32, #tpu.memory_space<vmem>>, %arg5: memref<128x64xf32, #tpu.memory_space<vmem>>) attributes {dimension_semantics = [#tpu.dimension_semantics<parallel>], iteration_bounds = array<i64: 1>, scalar_prefetch = 0 : i64, scratch_operands = 0 : i64, tpu.core_type = #tpu.core_type<tc>, window_params = [{transform_indices = @transform_0, window_bounds = array<i64: 128, 64>}, {pipeline_mode = #tpu.pipeline_mode<synchronous>, transform_indices = @transform_1, window_bounds = array<i64: 1, 64>}, {pipeline_mode = #tpu.pipeline_mode<synchronous>, transform_indices = @transform_2, window_bounds = array<i64: 1, 64>}, {transform_indices = @transform_3, window_bounds = array<i64: 128, 64>}, {transform_indices = @transform_4, window_bounds = array<i64: 128, 64>}]} {
    %c0 = arith.constant 0 : index
    %c0_0 = arith.constant 0 : index
    %0 = vector.load %arg1[%c0, %c0_0] : memref<128x64xf32, #tpu.memory_space<vmem>>, vector<128x64xf32>
    %c0_1 = arith.constant 0 : index
    %c0_2 = arith.constant 0 : index
    %1 = vector.load %arg2[%c0_1, %c0_2] : memref<1x64xf32, #tpu.memory_space<vmem>>, vector<1x64xf32>
    %2 = vector.broadcast %1 : vector<1x64xf32> to vector<128x64xf32>
    %3 = arith.mulf %0, %2 : vector<128x64xf32>
    %c0_3 = arith.constant 0 : index
    %c0_4 = arith.constant 0 : index
    %4 = vector.load %arg3[%c0_3, %c0_4] : memref<1x64xf32, #tpu.memory_space<vmem>>, vector<1x64xf32>
    %5 = vector.broadcast %4 : vector<1x64xf32> to vector<128x64xf32>
    %6 = arith.addf %3, %5 : vector<128x64xf32>
    %c0_5 = arith.constant 0 : index
    %c0_6 = arith.constant 0 : index
    %7 = vector.load %arg4[%c0_5, %c0_6] : memref<128x64xf32, #tpu.memory_space<vmem>>, vector<128x64xf32>
    %8 = arith.addf %6, %7 : vector<128x64xf32>
    %cst = arith.constant 0.000000e+00 : f32
    %9 = vector.broadcast %cst : f32 to vector<128x64xf32>
    %10 = arith.maximumf %8, %9 : vector<128x64xf32>
    %c0_7 = arith.constant 0 : index
    %c0_8 = arith.constant 0 : index
    %11 = vector.load %arg5[%c0_7, %c0_8] : memref<128x64xf32, #tpu.memory_space<vmem>>, vector<128x64xf32>
    tpu.vector_store %arg5[%c0_7, %c0_8], %10 {strides = array<i32>} : memref<128x64xf32, #tpu.memory_space<vmem>>, vector<128x64xf32>,
    return
  }
  func.func @transform_0(%arg0: i32) -> (i32, i32) {
    %c0_i32 = arith.constant 0 : i32
    %c0_i32_0 = arith.constant 0 : i32
    return %arg0, %c0_i32 : i32, i32
  }
  func.func @transform_1(%arg0: i32) -> (i32, i32) {
    %c0_i32 = arith.constant 0 : i32
    %c0_i32_0 = arith.constant 0 : i32
    %c0_i32_1 = arith.constant 0 : i32
    return %c0_i32, %c0_i32_0 : i32, i32
  }
  func.func @transform_2(%arg0: i32) -> (i32, i32) {
    %c0_i32 = arith.constant 0 : i32
    %c0_i32_0 = arith.constant 0 : i32
    %c0_i32_1 = arith.constant 0 : i32
    return %c0_i32, %c0_i32_0 : i32, i32
  }
  func.func @transform_3(%arg0: i32) -> (i32, i32) {
    %c0_i32 = arith.constant 0 : i32
    %c0_i32_0 = arith.constant 0 : i32
    return %arg0, %c0_i32 : i32, i32
  }
  func.func @transform_4(%arg0: i32) -> (i32, i32) {
    %c0_i32 = arith.constant 0 : i32
    %c0_i32_0 = arith.constant 0 : i32
    return %arg0, %c0_i32 : i32, i32
  }
}

module attributes {stable_mosaic.version = 11 : i64} {
  func.func @kernel(%arg0: i32, %arg1: memref<256x1600xbf16, #tpu.memory_space<vmem>>, %arg2: memref<1600x128xbf16, #tpu.memory_space<vmem>>, %arg3: memref<256x128xf32, #tpu.memory_space<vmem>>) attributes {dimension_semantics = [#tpu.dimension_semantics<parallel>], iteration_bounds = array<i64: 2>, scalar_prefetch = 0 : i64, scratch_operands = 0 : i64, tpu.core_type = #tpu.core_type<tc>, window_params = [{transform_indices = @transform_0, window_bounds = array<i64: 256, 1600>}, {pipeline_mode = #tpu.pipeline_mode<synchronous>, transform_indices = @transform_1, window_bounds = array<i64: 1600, 128>}, {transform_indices = @transform_2, window_bounds = array<i64: 256, 128>}]} {
    %c0 = arith.constant 0 : index
    %c0_0 = arith.constant 0 : index
    %0 = vector.load %arg1[%c0, %c0_0] : memref<256x1600xbf16, #tpu.memory_space<vmem>>, vector<256x1600xbf16>
    %c0_1 = arith.constant 0 : index
    %c0_2 = arith.constant 0 : index
    %1 = vector.load %arg2[%c0_1, %c0_2] : memref<1600x128xbf16, #tpu.memory_space<vmem>>, vector<1600x128xbf16>
    %cst = arith.constant dense<0.000000e+00> : vector<256x128xf32>
    %2 = tpu.matmul %0, %1, %cst {dimension_numbers = #tpu.dot_dimension_numbers<[1], [0], [0], [1], [0, 0, 1, 1], [], []>} : vector<256x1600xbf16>, vector<1600x128xbf16>, vector<256x128xf32> -> vector<256x128xf32>
    %cst_3 = arith.constant 0.000000e+00 : f32
    %3 = vector.broadcast %cst_3 : f32 to vector<256x128xf32>
    %4 = arith.maximumf %2, %3 : vector<256x128xf32>
    %c0_4 = arith.constant 0 : index
    %c0_5 = arith.constant 0 : index
    %5 = vector.load %arg3[%c0_4, %c0_5] : memref<256x128xf32, #tpu.memory_space<vmem>>, vector<256x128xf32>
    tpu.vector_store %arg3[%c0_4, %c0_5], %4 {strides = array<i32>} : memref<256x128xf32, #tpu.memory_space<vmem>>, vector<256x128xf32>,
    return
  }
  func.func @transform_0(%arg0: i32) -> (i32, i32) {
    %c0_i32 = arith.constant 0 : i32
    %c0_i32_0 = arith.constant 0 : i32
    return %arg0, %c0_i32 : i32, i32
  }
  func.func @transform_1(%arg0: i32) -> (i32, i32) {
    %c0_i32 = arith.constant 0 : i32
    %c0_i32_0 = arith.constant 0 : i32
    %c0_i32_1 = arith.constant 0 : i32
    return %c0_i32, %c0_i32_0 : i32, i32
  }
  func.func @transform_2(%arg0: i32) -> (i32, i32) {
    %c0_i32 = arith.constant 0 : i32
    %c0_i32_0 = arith.constant 0 : i32
    return %arg0, %c0_i32 : i32, i32
  }
}

module attributes {stable_mosaic.version = 11 : i64} {
  func.func @kernel(%arg0: i32, %arg1: memref<256x1568xbf16, #tpu.memory_space<vmem>>, %arg2: memref<1568x128xbf16, #tpu.memory_space<vmem>>, %arg3: memref<1x128xf32, #tpu.memory_space<vmem>>, %arg4: memref<256x128xf32, #tpu.memory_space<vmem>>) attributes {dimension_semantics = [#tpu.dimension_semantics<parallel>], iteration_bounds = array<i64: 2>, scalar_prefetch = 0 : i64, scratch_operands = 0 : i64, tpu.core_type = #tpu.core_type<tc>, window_params = [{transform_indices = @transform_0, window_bounds = array<i64: 256, 1568>}, {pipeline_mode = #tpu.pipeline_mode<synchronous>, transform_indices = @transform_1, window_bounds = array<i64: 1568, 128>}, {pipeline_mode = #tpu.pipeline_mode<synchronous>, transform_indices = @transform_2, window_bounds = array<i64: 1, 128>}, {transform_indices = @transform_3, window_bounds = array<i64: 256, 128>}]} {
    %c0 = arith.constant 0 : index
    %c0_0 = arith.constant 0 : index
    %0 = vector.load %arg1[%c0, %c0_0] : memref<256x1568xbf16, #tpu.memory_space<vmem>>, vector<256x1568xbf16>
    %c0_1 = arith.constant 0 : index
    %c0_2 = arith.constant 0 : index
    %1 = vector.load %arg2[%c0_1, %c0_2] : memref<1568x128xbf16, #tpu.memory_space<vmem>>, vector<1568x128xbf16>
    %cst = arith.constant dense<0.000000e+00> : vector<256x128xf32>
    %2 = tpu.matmul %0, %1, %cst {dimension_numbers = #tpu.dot_dimension_numbers<[1], [0], [0], [1], [0, 0, 1, 1], [], []>} : vector<256x1568xbf16>, vector<1568x128xbf16>, vector<256x128xf32> -> vector<256x128xf32>
    %c0_3 = arith.constant 0 : index
    %c0_4 = arith.constant 0 : index
    %3 = vector.load %arg3[%c0_3, %c0_4] : memref<1x128xf32, #tpu.memory_space<vmem>>, vector<1x128xf32>
    %4 = vector.broadcast %3 : vector<1x128xf32> to vector<256x128xf32>
    %5 = arith.addf %2, %4 : vector<256x128xf32>
    %6 = arith.negf %5 : vector<256x128xf32>
    %7 = math.exp %6 : vector<256x128xf32>
    %cst_5 = arith.constant 1.000000e+00 : f32
    %8 = vector.broadcast %cst_5 : f32 to vector<256x128xf32>
    %9 = arith.addf %8, %7 : vector<256x128xf32>
    %10 = arith.divf %8, %9 : vector<256x128xf32>
    %c0_6 = arith.constant 0 : index
    %c0_7 = arith.constant 0 : index
    %11 = vector.load %arg4[%c0_6, %c0_7] : memref<256x128xf32, #tpu.memory_space<vmem>>, vector<256x128xf32>
    tpu.vector_store %arg4[%c0_6, %c0_7], %10 {strides = array<i32>} : memref<256x128xf32, #tpu.memory_space<vmem>>, vector<256x128xf32>,
    return
  }
  func.func @transform_0(%arg0: i32) -> (i32, i32) {
    %c0_i32 = arith.constant 0 : i32
    %c0_i32_0 = arith.constant 0 : i32
    return %arg0, %c0_i32 : i32, i32
  }
  func.func @transform_1(%arg0: i32) -> (i32, i32) {
    %c0_i32 = arith.constant 0 : i32
    %c0_i32_0 = arith.constant 0 : i32
    %c0_i32_1 = arith.constant 0 : i32
    return %c0_i32, %c0_i32_0 : i32, i32
  }
  func.func @transform_2(%arg0: i32) -> (i32, i32) {
    %c0_i32 = arith.constant 0 : i32
    %c0_i32_0 = arith.constant 0 : i32
    %c0_i32_1 = arith.constant 0 : i32
    return %c0_i32, %c0_i32_0 : i32, i32
  }
  func.func @transform_3(%arg0: i32) -> (i32, i32) {
    %c0_i32 = arith.constant 0 : i32
    %c0_i32_0 = arith.constant 0 : i32
    return %arg0, %c0_i32 : i32, i32
  }
}

</mosaic_0001>

<bundles_post_ra>
// kernel: resnet_forward.38
= control target key start
LH: loop header
LB: loop body
LE: loop exit
PB: predicated region body
PF: predicated region fallthrough
CT: control target
= control target key end

     0   :  { %s955_s9 = smov 0   ;;  %s1128_s0 = inlined_call_operand.vmem [shape: bf16[512,196], index: 0, kind: input, shape index: {}]   ;;  %s1129_s1 = inlined_call_operand.vmem [shape: bf16[196,128], index: 1, kind: input, shape index: {}]   ;;  %s1130_s2 = inlined_call_operand.vmem [shape: f32[512,128], index: 2, kind: output, shape index: {}]  }
   0x1 LB: > { %s761_s10 = sadd.s32 4294967295, %s937_s9   ;;  %p765_p0 = scmp.ge.s32.totalorder %s937_s9, 1  ;;  %s937_s9 = sphi %s955_s9, %s12_s9  }
   0x2   : > { %p114_p1 = scmp.lt.s32.totalorder %s937_s9, 3 }
   0x4   : > { %p115_p2 = pnand %p765_p0, %p114_p1 }
   0x5   : > { %v870_v0 = vld [vmem:[%s1129_s1] sm:$0xff] (!%p115_p2)   ;;  %v939_v1 = vmov (!%p115_p2), 0   ;;  %v871_v2 = vld [vmem:[%s1129_s1 + $0x8] sm:$0xff] (!%p115_p2)   ;;  %s766_s15 = sshll.u32 (!%p115_p2), %s761_s10, 5  ;;  %v872_v3 = vld [vmem:[%s1129_s1 + $0x10] sm:$0xff] (!%p115_p2)   ;;  %vm427_vm0 = vcmask (!%p115_p2), 556032  }
   0x6   : > { %118 = sbr.rel (%p115_p2) target bundleno = 331 (0x14b), region = 28  ;;  %480 = vmatprep.subr.bf16.mxu0 (!%p115_p2), %v939_v1  ;;  %835 = vmatprep.subr.bf16.mxu1 (!%p115_p2), %v939_v1  ;;  %p138_p3 = scmp.lt.s32.totalorder (!%p115_p2), %s766_s15, 63  ;;  %v873_v4 = vld [vmem:[%s1129_s1 + $0x18] sm:$0xff] (!%p115_p2)   ;;  %v874_v6 = vld [vmem:[%s1129_s1 + $0x20] sm:$0xff] (!%p115_p2)   ;;  %v875_v8 = vld [vmem:[%s1129_s1 + $0x28] sm:$0xff] (!%p115_p2)   ;;  %vm476_vm1 = vcmask (!%p115_p2), 1041408  }
   0x7   : > { %481 = vmatpush1.bf16.msra.mxu0 (!%p115_p2), %v870_v0  ;;  %848 = vmatpush1.bf16.msra.mxu1 (!%p115_p2), %v870_v0  ;;  %v876_v9 = vld [vmem:[%s1129_s1 + $0x30] sm:$0xff] (!%p115_p2)   ;;  %v877_v10 = vld [vmem:[%s1129_s1 + $0x38] sm:$0xff] (!%p115_p2)   ;;  %v878_v11 = vld [vmem:[%s1129_s1 + $0x40] sm:$0xff] (!%p115_p2)  }
   0x8   : > { %482 = vmatprep.subr.bf16.mxu0 (!%p115_p2), %v939_v1  ;;  %836 = vmatprep.subr.bf16.mxu1 (!%p115_p2), %v939_v1  ;;  %v879_v12 = vld [vmem:[%s1129_s1 + $0x48] sm:$0xff] (!%p115_p2)   ;;  %v880_v13 = vld [vmem:[%s1129_s1 + $0x50] sm:$0xff] (!%p115_p2)   ;;  %v881_v14 = vld [vmem:[%s1129_s1 + $0x58] sm:$0xff] (!%p115_p2)  }
   0x9   : > { %v882_v15 = vld [vmem:[%s1129_s1 + $0x60] ss:$0 sps:$4 sm:$0x33] (!%p115_p2)  }
   0xa   : > { %v478_v16 = vsel (!%p115_p2), %vm476_vm1, %v882_v15, 0 }
   0xb   : > { %483 = vmatpush1.bf16.msra.mxu0 (!%p115_p2), %v871_v2  ;;  %849 = vmatpush1.bf16.msra.mxu1 (!%p115_p2), %v871_v2 }
   0xc   : > { %484 = vmatprep.subr.bf16.mxu0 (!%p115_p2), %v939_v1  ;;  %837 = vmatprep.subr.bf16.mxu1 (!%p115_p2), %v939_v1 }
   0xd   : > { %s1132_s15 = smov (!%p138_p3, %s766_s15), 63 }
   0xe   : > { %s834_s18 = sshll.u32 %s1132_s15, 3 }
   0xf   : > { %485 = vmatpush1.bf16.msra.mxu0 %v872_v3  ;;  %850 = vmatpush1.bf16.msra.mxu1 %v872_v3  ;;  %s989_s23 = scalar_lea.vmem %s1128_s0, %s834_s18  ;;  %s1091_s19 = scalar_lea.vmem %s1130_s2, %s834_s18 }
  0x10   : > { %486 = vmatprep.subr.bf16.mxu0 %v939_v1  ;;  %838 = vmatprep.subr.bf16.mxu1 %v939_v1  ;;  %v885_v5 = vld [vmem:[%s989_s23 + $0x4] ss:$8 sps:$4 sm:$0xff]   ;;  %v883_v17 = vld [vmem:[%s989_s23] ss:$8 sps:$4 sm:$0xff]   ;;  %v889_v19 = vld [vmem:[%s989_s23 + $0x14] ss:$8 sps:$4 sm:$0xff]  }
  0x11   : > { %v888_v7 = vld [vmem:[%s989_s23 + $0x84] ss:$8 sps:$4 sm:$0xff]   ;;  %816 = vmatprep.mubr.msk.bf16.mxu0 %vm427_vm0, %v885_v5  ;;  %v886_v18 = vld [vmem:[%s989_s23 + $0x80] ss:$8 sps:$4 sm:$0xff]   ;;  %v891_v20 = vld [vmem:[%s989_s23 + $0x94] ss:$8 sps:$4 sm:$0xff]  }
  0x12   : > { %824 = vmatprep.mubr.msk.bf16.mxu1 %vm427_vm0, %v888_v7  ;;  %v893_v21 = vld [vmem:[%s989_s23 + $0x10] ss:$8 sps:$4 sm:$0xff]   ;;  %v895_v23 = vld [vmem:[%s989_s23 + $0x24] ss:$8 sps:$4 sm:$0xff]   ;;  %v899_v25 = vld [vmem:[%s989_s23 + $0x20] ss:$8 sps:$4 sm:$0xff]  }
  0x13   : > { %487 = vmatpush1.bf16.msra.mxu0 %v873_v4  ;;  %851 = vmatpush1.bf16.msra.mxu1 %v873_v4  ;;  %v894_v22 = vld [vmem:[%s989_s23 + $0x90] ss:$8 sps:$4 sm:$0xff]   ;;  %v897_v24 = vld [vmem:[%s989_s23 + $0xa4] ss:$8 sps:$4 sm:$0xff]   ;;  %v900_v26 = vld [vmem:[%s989_s23 + $0xa0] ss:$8 sps:$4 sm:$0xff]  }
  0x14   : > { %488 = vmatprep.subr.bf16.mxu0 %v939_v1  ;;  %839 = vmatprep.subr.bf16.mxu1 %v939_v1  ;;  %v901_v27 = vld [vmem:[%s989_s23 + $0x34] ss:$8 sps:$4 sm:$0xff]   ;;  %v905_v29 = vld [vmem:[%s989_s23 + $0x30] ss:$8 sps:$4 sm:$0xff]   ;;  %v907_v31 = vld [vmem:[%s989_s23 + $0x44] ss:$8 sps:$4 sm:$0xff]  }
  0x15   : > { %v903_v28 = vld [vmem:[%s989_s23 + $0xb4] ss:$8 sps:$4 sm:$0xff]   ;;  %v906_v30 = vld [vmem:[%s989_s23 + $0xb0] ss:$8 sps:$4 sm:$0xff]   ;;  %v909_v32 = vld [vmem:[%s989_s23 + $0xc4] ss:$8 sps:$4 sm:$0xff]  }
  0x16   : > { %v911_v33 = vld [vmem:[%s989_s23 + $0x40] ss:$8 sps:$4 sm:$0xff]   ;;  %v913_v35 = vld [vmem:[%s989_s23 + $0x54] ss:$8 sps:$4 sm:$0xff]   ;;  %v917_v37 = vld [vmem:[%s989_s23 + $0x50] ss:$8 sps:$4 sm:$0xff]  }
  0x17   : > { %489 = vmatpush1.bf16.msra.mxu0 %v874_v6  ;;  %852 = vmatpush1.bf16.msra.mxu1 %v874_v6  ;;  %v912_v34 = vld [vmem:[%s989_s23 + $0xc0] ss:$8 sps:$4 sm:$0xff]   ;;  %v915_v36 = vld [vmem:[%s989_s23 + $0xd4] ss:$8 sps:$4 sm:$0xff]   ;;  %v918_v38 = vld [vmem:[%s989_s23 + $0xd0] ss:$8 sps:$4 sm:$0xff]  }
  0x18   : > { %490 = vmatprep.subr.bf16.mxu0 %v939_v1  ;;  %840 = vmatprep.subr.bf16.mxu1 %v939_v1  ;;  %v919_v39 = vld [vmem:[%s989_s23 + $0x64] ss:$8 sps:$4 sm:$0xff]   ;;  %v923_v41 = vld [vmem:[%s989_s23 + $0x60] ss:$8 sps:$4 sm:$0xff]   ;;  %v925_v43 = vld [vmem:[%s989_s23 + $0x74] ss:$8 sps:$4 sm:$0xff]  }
  0x19   : > { %v921_v40 = vld [vmem:[%s989_s23 + $0xe4] ss:$8 sps:$4 sm:$0xff]   ;;  %v924_v42 = vld [vmem:[%s989_s23 + $0xe0] ss:$8 sps:$4 sm:$0xff]   ;;  %v927_v44 = vld [vmem:[%s989_s23 + $0xf4] ss:$8 sps:$4 sm:$0xff]  }
  0x1a   : > { %v929_v45 = vld [vmem:[%s989_s23 + $0x70] ss:$8 sps:$4 sm:$0xff]  }
  0x1b   : > { %491 = vmatpush1.bf16.msra.mxu0 %v875_v8  ;;  %853 = vmatpush1.bf16.msra.mxu1 %v875_v8  ;;  %v930_v46 = vld [vmem:[%s989_s23 + $0xf0] ss:$8 sps:$4 sm:$0xff]  }
  0x1c   : > { %492 = vmatprep.subr.bf16.mxu0 %v939_v1  ;;  %841 = vmatprep.subr.bf16.mxu1 %v939_v1 }
  0x1f   : > { %493 = vmatpush1.bf16.msra.mxu0 %v876_v9  ;;  %854 = vmatpush1.bf16.msra.mxu1 %v876_v9 }
  0x20   : > { %494 = vmatprep.subr.bf16.mxu0 %v939_v1  ;;  %842 = vmatprep.subr.bf16.mxu1 %v939_v1 }
  0x23   : > { %495 = vmatpush1.bf16.msra.mxu0 %v877_v10  ;;  %855 = vmatpush1.bf16.msra.mxu1 %v877_v10 }
  0x24   : > { %496 = vmatprep.subr.bf16.mxu0 %v939_v1  ;;  %843 = vmatprep.subr.bf16.mxu1 %v939_v1 }
  0x27   : > { %497 = vmatpush1.bf16.msra.mxu0 %v878_v11  ;;  %856 = vmatpush1.bf16.msra.mxu1 %v878_v11 }
  0x28   : > { %498 = vmatprep.subr.bf16.mxu0 %v939_v1  ;;  %844 = vmatprep.subr.bf16.mxu1 %v939_v1 }
  0x2b   : > { %499 = vmatpush1.bf16.msra.mxu0 %v879_v12  ;;  %857 = vmatpush1.bf16.msra.mxu1 %v879_v12 }
  0x2c   : > { %500 = vmatprep.subr.bf16.mxu0 %v939_v1  ;;  %845 = vmatprep.subr.bf16.mxu1 %v939_v1 }
  0x2f   : > { %501 = vmatpush1.bf16.msra.mxu0 %v880_v13  ;;  %858 = vmatpush1.bf16.msra.mxu1 %v880_v13 }
  0x30   : > { %502 = vmatprep.subr.bf16.mxu0 %v939_v1  ;;  %846 = vmatprep.subr.bf16.mxu1 %v939_v1 }
  0x33   : > { %503 = vmatpush1.bf16.msra.mxu0 %v881_v14  ;;  %859 = vmatpush1.bf16.msra.mxu1 %v881_v14 }
  0x34   : > { %504 = vmatprep.subr.bf16.mxu0 %v939_v1  ;;  %847 = vmatprep.subr.bf16.mxu1 %v939_v1 }
  0x37   : > { %505 = vmatpush1.bf16.msra.mxu0 %v478_v16  ;;  %860 = vmatpush1.bf16.msra.mxu1 %v478_v16 }
  0x3a   : > { %513 = vmatmul.mubr.bf16.vlgmr.msra.gmra.mrb[0].mxu0 %v883_v17  ;;  %577 = vmatmul.mubr.bf16.vlgmr.msra.gmra.mrb[0].mxu1 %v886_v18 }
  0x3b   : > { %817 = vmatprep.mubr.msk.bf16.mxu0 %vm427_vm0, %v889_v19  ;;  %825 = vmatprep.mubr.msk.bf16.mxu1 %vm427_vm0, %v891_v20 }
  0x42   : > { %521 = vmatmul.mubr.bf16.gmra.mrb[4].mxu0 %v893_v21  ;;  %585 = vmatmul.mubr.bf16.gmra.mrb[4].mxu1 %v894_v22 }
  0x43   : > { %818 = vmatprep.mubr.msk.bf16.mxu0 %vm427_vm0, %v895_v23  ;;  %826 = vmatprep.mubr.msk.bf16.mxu1 %vm427_vm0, %v897_v24 }
  0x4a   : > { %529 = vmatmul.mubr.bf16.gmra.mrb[8].mxu0 %v899_v25  ;;  %593 = vmatmul.mubr.bf16.gmra.mrb[8].mxu1 %v900_v26 }
  0x4b   : > { %819 = vmatprep.mubr.msk.bf16.mxu0 %vm427_vm0, %v901_v27  ;;  %827 = vmatprep.mubr.msk.bf16.mxu1 %vm427_vm0, %v903_v28 }
  0x52   : > { %537 = vmatmul.mubr.bf16.gmra.mrb[12].mxu0 %v905_v29  ;;  %601 = vmatmul.mubr.bf16.gmra.mrb[12].mxu1 %v906_v30 }
  0x53   : > { %820 = vmatprep.mubr.msk.bf16.mxu0 %vm427_vm0, %v907_v31  ;;  %828 = vmatprep.mubr.msk.bf16.mxu1 %vm427_vm0, %v909_v32 }
  0x5a   : > { %545 = vmatmul.mubr.bf16.gmra.mrb[16].mxu0 %v911_v33  ;;  %609 = vmatmul.mubr.bf16.gmra.mrb[16].mxu1 %v912_v34 }
  0x5b   : > { %821 = vmatprep.mubr.msk.bf16.mxu0 %vm427_vm0, %v913_v35  ;;  %829 = vmatprep.mubr.msk.bf16.mxu1 %vm427_vm0, %v915_v36 }
  0x62   : > { %553 = vmatmul.mubr.bf16.gmra.mrb[20].mxu0 %v917_v37  ;;  %617 = vmatmul.mubr.bf16.gmra.mrb[20].mxu1 %v918_v38 }
  0x63   : > { %822 = vmatprep.mubr.msk.bf16.mxu0 %vm427_vm0, %v919_v39  ;;  %830 = vmatprep.mubr.msk.bf16.mxu1 %vm427_vm0, %v921_v40 }
  0x6a   : > { %561 = vmatmul.mubr.bf16.gmra.mrb[24].mxu0 %v923_v41  ;;  %625 = vmatmul.mubr.bf16.gmra.mrb[24].mxu1 %v924_v42 }
  0x6b   : > { %823 = vmatprep.mubr.msk.bf16.mxu0 %vm427_vm0, %v925_v43  ;;  %831 = vmatprep.mubr.msk.bf16.mxu1 %vm427_vm0, %v927_v44 }
  0x72   : > { %569 = vmatmul.mubr.bf16.gmra.mrb[28].mxu0 %v929_v45  ;;  %633 = vmatmul.mubr.bf16.gmra.mrb[28].mxu1 %v930_v46 }
 0x10d   : > { %v514_v47 = vpop.f32.mrb[0].mxu0  ;;  %v578_v48 = vpop.f32.mrb[0].mxu1 }
 0x10e   : > { %v641_v49 = vmax.f32 %v514_v47, 0.0  ;;  %v657_v50 = vmax.f32 %v578_v48, 0.0  ;;  %v516_v51 = vpop.f32.mrb[1].mxu0  ;;  %v580_v52 = vpop.f32.mrb[1].mxu1 }
 0x10f   : > { %v517_v53 = vpop.f32.mrb[2].mxu0  ;;  %v581_v54 = vpop.f32.mrb[2].mxu1 }
 0x110   : > { %673 = vst [vmem:[%s1091_s19] sm:$0xff] %v641_v49  ;;  %689 = vst [vmem:[%s1091_s19 + $0x80] sm:$0xff] %v657_v50  ;;  %v642_v55 = vmax.f32 %v517_v53, 0.0  ;;  %v658_v56 = vmax.f32 %v581_v54, 0.0  ;;  %v519_v57 = vpop.f32.mrb[3].mxu0  ;;  %v583_v58 = vpop.f32.mrb[3].mxu1 }
 0x112   : > { %674 = vst [vmem:[%s1091_s19 + $0x8] sm:$0xff] %v642_v55  ;;  %690 = vst [vmem:[%s1091_s19 + $0x88] sm:$0xff] %v658_v56 }
 0x115   : > { %v522_v59 = vpop.f32.mrb[4].mxu0  ;;  %v586_v60 = vpop.f32.mrb[4].mxu1 }
 0x116   : > { %v643_v61 = vmax.f32 %v522_v59, 0.0  ;;  %v659_v62 = vmax.f32 %v586_v60, 0.0  ;;  %v524_v63 = vpop.f32.mrb[5].mxu0  ;;  %v588_v0 = vpop.f32.mrb[5].mxu1 }
 0x117   : > { %v525_v1 = vpop.f32.mrb[6].mxu0  ;;  %v589_v2 = vpop.f32.mrb[6].mxu1 }
 0x118   : > { %675 = vst [vmem:[%s1091_s19 + $0x10] sm:$0xff] %v643_v61  ;;  %691 = vst [vmem:[%s1091_s19 + $0x90] sm:$0xff] %v659_v62  ;;  %v644_v3 = vmax.f32 %v525_v1, 0.0  ;;  %v660_v4 = vmax.f32 %v589_v2, 0.0  ;;  %v527_v5 = vpop.f32.mrb[7].mxu0  ;;  %v591_v6 = vpop.f32.mrb[7].mxu1 }
 0x11a   : > { %676 = vst [vmem:[%s1091_s19 + $0x18] sm:$0xff] %v644_v3  ;;  %692 = vst [vmem:[%s1091_s19 + $0x98] sm:$0xff] %v660_v4 }
 0x11d   : > { %v530_v7 = vpop.f32.mrb[8].mxu0  ;;  %v594_v8 = vpop.f32.mrb[8].mxu1 }
 0x11e   : > { %v645_v9 = vmax.f32 %v530_v7, 0.0  ;;  %v661_v10 = vmax.f32 %v594_v8, 0.0  ;;  %v532_v11 = vpop.f32.mrb[9].mxu0  ;;  %v596_v12 = vpop.f32.mrb[9].mxu1 }
 0x11f   : > { %v533_v13 = vpop.f32.mrb[10].mxu0  ;;  %v597_v14 = vpop.f32.mrb[10].mxu1 }
 0x120   : > { %677 = vst [vmem:[%s1091_s19 + $0x20] sm:$0xff] %v645_v9  ;;  %693 = vst [vmem:[%s1091_s19 + $0xa0] sm:$0xff] %v661_v10  ;;  %v646_v15 = vmax.f32 %v533_v13, 0.0  ;;  %v662_v16 = vmax.f32 %v597_v14, 0.0  ;;  %v535_v17 = vpop.f32.mrb[11].mxu0  ;;  %v599_v18 = vpop.f32.mrb[11].mxu1 }
 0x122   : > { %678 = vst [vmem:[%s1091_s19 + $0x28] sm:$0xff] %v646_v15  ;;  %694 = vst [vmem:[%s1091_s19 + $0xa8] sm:$0xff] %v662_v16 }
 0x125   : > { %v538_v19 = vpop.f32.mrb[12].mxu0  ;;  %v602_v20 = vpop.f32.mrb[12].mxu1 }
 0x126   : > { %v647_v21 = vmax.f32 %v538_v19, 0.0  ;;  %v663_v22 = vmax.f32 %v602_v20, 0.0  ;;  %v540_v23 = vpop.f32.mrb[13].mxu0  ;;  %v604_v24 = vpop.f32.mrb[13].mxu1 }
 0x127   : > { %v541_v25 = vpop.f32.mrb[14].mxu0  ;;  %v605_v26 = vpop.f32.mrb[14].mxu1 }
 0x128   : > { %679 = vst [vmem:[%s1091_s19 + $0x30] sm:$0xff] %v647_v21  ;;  %695 = vst [vmem:[%s1091_s19 + $0xb0] sm:$0xff] %v663_v22  ;;  %v648_v27 = vmax.f32 %v541_v25, 0.0  ;;  %v664_v28 = vmax.f32 %v605_v26, 0.0  ;;  %v543_v29 = vpop.f32.mrb[15].mxu0  ;;  %v607_v30 = vpop.f32.mrb[15].mxu1 }
 0x12a   : > { %680 = vst [vmem:[%s1091_s19 + $0x38] sm:$0xff] %v648_v27  ;;  %696 = vst [vmem:[%s1091_s19 + $0xb8] sm:$0xff] %v664_v28 }
 0x12d   : > { %v546_v31 = vpop.f32.mrb[16].mxu0  ;;  %v610_v32 = vpop.f32.mrb[16].mxu1 }
 0x12e   : > { %v649_v33 = vmax.f32 %v546_v31, 0.0  ;;  %v665_v34 = vmax.f32 %v610_v32, 0.0  ;;  %v548_v35 = vpop.f32.mrb[17].mxu0  ;;  %v612_v36 = vpop.f32.mrb[17].mxu1 }
 0x12f   : > { %v549_v37 = vpop.f32.mrb[18].mxu0  ;;  %v613_v38 = vpop.f32.mrb[18].mxu1 }
 0x130   : > { %681 = vst [vmem:[%s1091_s19 + $0x40] sm:$0xff] %v649_v33  ;;  %697 = vst [vmem:[%s1091_s19 + $0xc0] sm:$0xff] %v665_v34  ;;  %v650_v39 = vmax.f32 %v549_v37, 0.0  ;;  %v666_v40 = vmax.f32 %v613_v38, 0.0  ;;  %v551_v41 = vpop.f32.mrb[19].mxu0  ;;  %v615_v42 = vpop.f32.mrb[19].mxu1 }
 0x132   : > { %682 = vst [vmem:[%s1091_s19 + $0x48] sm:$0xff] %v650_v39  ;;  %698 = vst [vmem:[%s1091_s19 + $0xc8] sm:$0xff] %v666_v40 }
 0x135   : > { %v554_v43 = vpop.f32.mrb[20].mxu0  ;;  %v618_v44 = vpop.f32.mrb[20].mxu1 }
 0x136   : > { %v651_v45 = vmax.f32 %v554_v43, 0.0  ;;  %v667_v46 = vmax.f32 %v618_v44, 0.0  ;;  %v556_v47 = vpop.f32.mrb[21].mxu0  ;;  %v620_v48 = vpop.f32.mrb[21].mxu1 }
 0x137   : > { %v557_v49 = vpop.f32.mrb[22].mxu0  ;;  %v621_v50 = vpop.f32.mrb[22].mxu1 }
 0x138   : > { %683 = vst [vmem:[%s1091_s19 + $0x50] sm:$0xff] %v651_v45  ;;  %699 = vst [vmem:[%s1091_s19 + $0xd0] sm:$0xff] %v667_v46  ;;  %v652_v51 = vmax.f32 %v557_v49, 0.0  ;;  %v668_v52 = vmax.f32 %v621_v50, 0.0  ;;  %v559_v53 = vpop.f32.mrb[23].mxu0  ;;  %v623_v54 = vpop.f32.mrb[23].mxu1 }
 0x13a   : > { %684 = vst [vmem:[%s1091_s19 + $0x58] sm:$0xff] %v652_v51  ;;  %700 = vst [vmem:[%s1091_s19 + $0xd8] sm:$0xff] %v668_v52 }
 0x13d   : > { %v562_v55 = vpop.f32.mrb[24].mxu0  ;;  %v626_v56 = vpop.f32.mrb[24].mxu1 }
 0x13e   : > { %v653_v57 = vmax.f32 %v562_v55, 0.0  ;;  %v669_v58 = vmax.f32 %v626_v56, 0.0  ;;  %v564_v59 = vpop.f32.mrb[25].mxu0  ;;  %v628_v60 = vpop.f32.mrb[25].mxu1 }
 0x13f   : > { %v565_v61 = vpop.f32.mrb[26].mxu0  ;;  %v629_v62 = vpop.f32.mrb[26].mxu1 }
 0x140   : > { %685 = vst [vmem:[%s1091_s19 + $0x60] sm:$0xff] %v653_v57  ;;  %701 = vst [vmem:[%s1091_s19 + $0xe0] sm:$0xff] %v669_v58  ;;  %v654_v63 = vmax.f32 %v565_v61, 0.0  ;;  %v670_v0 = vmax.f32 %v629_v62, 0.0  ;;  %v567_v1 = vpop.f32.mrb[27].mxu0  ;;  %v631_v2 = vpop.f32.mrb[27].mxu1 }
 0x142   : > { %686 = vst [vmem:[%s1091_s19 + $0x68] sm:$0xff] %v654_v63  ;;  %702 = vst [vmem:[%s1091_s19 + $0xe8] sm:$0xff] %v670_v0 }
 0x145   : > { %v570_v3 = vpop.f32.mrb[28].mxu0  ;;  %v634_v4 = vpop.f32.mrb[28].mxu1 }
 0x146   : > { %v655_v5 = vmax.f32 %v570_v3, 0.0  ;;  %v671_v6 = vmax.f32 %v634_v4, 0.0  ;;  %v572_v7 = vpop.f32.mrb[29].mxu0  ;;  %v636_v8 = vpop.f32.mrb[29].mxu1 }
 0x147   : > { %v573_v9 = vpop.f32.mrb[30].mxu0  ;;  %v637_v10 = vpop.f32.mrb[30].mxu1 }
 0x148   : > { %687 = vst [vmem:[%s1091_s19 + $0x70] sm:$0xff] %v655_v5  ;;  %703 = vst [vmem:[%s1091_s19 + $0xf0] sm:$0xff] %v671_v6  ;;  %v656_v11 = vmax.f32 %v573_v9, 0.0  ;;  %v672_v12 = vmax.f32 %v637_v10, 0.0  ;;  %v575_v13 = vpop.f32.mrb[31].mxu0  ;;  %v639_v14 = vpop.f32.mrb[31].mxu1 }
 0x14a   : > { %688 = vst [vmem:[%s1091_s19 + $0x78] sm:$0xff] %v656_v11  ;;  %704 = vst [vmem:[%s1091_s19 + $0xf8] sm:$0xff] %v672_v12 }
 0x14b PF: > { %s12_s9 = sadd.s32 1, %s937_s9  }
 0x14c   : > { %p9_p4 = scmp.ge.s32.totalorder %s12_s9, 4  }
 0x14e   :  { %11 = sbr.rel (!%p9_p4) target bundleno = 1 (0x1), region = 58 }

// kernel: resnet_forward.39
= control target key start
LH: loop header
LB: loop body
LE: loop exit
PB: predicated region body
PF: predicated region fallthrough
CT: control target
= control target key end

     0   :  { %vm756_vm0 = vcmask 261120   ;;  %s2124_s1 = inlined_call_operand.vmem [shape: bf16[800,128], index: 1, kind: input, shape index: {}]   ;;  %s2125_s0 = inlined_call_operand.vmem [shape: bf16[128,800], index: 0, kind: input, shape index: {}]   ;;  %s2126_s2 = inlined_call_operand.vmem [shape: f32[128,128], index: 2, kind: output, shape index: {}]  }
   0x1   :  { %v1557_v0 = vld [vmem:[%s2124_s1 + $0x40] sm:$0xff]   ;;  %v1561_v4 = vld [vmem:[%s2124_s1 + $0x48] sm:$0xff]   ;;  %v1565_v8 = vld [vmem:[%s2124_s1 + $0x50] sm:$0xff]  }
   0x2   :  { %v1558_v1 = vld [vmem:[%s2124_s1 + $0xc0] sm:$0xff]   ;;  %1319 = vmatprep.subr.bf16.mxu0 %v1557_v0  ;;  %v1562_v5 = vld [vmem:[%s2124_s1 + $0xc8] sm:$0xff]   ;;  %v1566_v9 = vld [vmem:[%s2124_s1 + $0xd0] sm:$0xff]  }
   0x3   :  { %v1559_v2 = vld [vmem:[%s2124_s1] sm:$0xff]   ;;  %1383 = vmatprep.subr.bf16.mxu1 %v1558_v1  ;;  %v1563_v6 = vld [vmem:[%s2124_s1 + $0x8] sm:$0xff]   ;;  %v1567_v10 = vld [vmem:[%s2124_s1 + $0x10] sm:$0xff]  }
   0x4   :  { %v1560_v3 = vld [vmem:[%s2124_s1 + $0x80] sm:$0xff]   ;;  %1320 = vmatpush3.bf16.msra.mxu0 %v1559_v2  ;;  %v1564_v7 = vld [vmem:[%s2124_s1 + $0x88] sm:$0xff]   ;;  %v1568_v11 = vld [vmem:[%s2124_s1 + $0x90] sm:$0xff]  }
   0x5   :  { %1384 = vmatpush3.bf16.msra.mxu1 %v1560_v3  ;;  %1321 = vmatprep.subr.bf16.mxu0 %v1561_v4  ;;  %v1569_v12 = vld [vmem:[%s2124_s1 + $0x58] sm:$0xff]   ;;  %v1573_v16 = vld [vmem:[%s2124_s1 + $0x60] sm:$0xff]   ;;  %v1577_v20 = vld [vmem:[%s2124_s1 + $0x68] sm:$0xff]  }
   0x6   :  { %1385 = vmatprep.subr.bf16.mxu1 %v1562_v5  ;;  %v1570_v13 = vld [vmem:[%s2124_s1 + $0xd8] sm:$0xff]   ;;  %v1574_v17 = vld [vmem:[%s2124_s1 + $0xe0] sm:$0xff]   ;;  %v1578_v21 = vld [vmem:[%s2124_s1 + $0xe8] sm:$0xff]  }
   0x7   :  { %v1571_v14 = vld [vmem:[%s2124_s1 + $0x18] sm:$0xff]   ;;  %v1575_v18 = vld [vmem:[%s2124_s1 + $0x20] sm:$0xff]   ;;  %v1579_v22 = vld [vmem:[%s2124_s1 + $0x28] sm:$0xff]  }
   0x8   :  { %1322 = vmatpush3.bf16.msra.mxu0 %v1563_v6  ;;  %v1572_v15 = vld [vmem:[%s2124_s1 + $0x98] sm:$0xff]   ;;  %v1576_v19 = vld [vmem:[%s2124_s1 + $0xa0] sm:$0xff]   ;;  %v1580_v23 = vld [vmem:[%s2124_s1 + $0xa8] sm:$0xff]  }
   0x9   :  { %1386 = vmatpush3.bf16.msra.mxu1 %v1564_v7  ;;  %1323 = vmatprep.subr.bf16.mxu0 %v1565_v8  ;;  %v1581_v24 = vld [vmem:[%s2124_s1 + $0x70] sm:$0xff]   ;;  %v1585_v28 = vld [vmem:[%s2124_s1 + $0x78] sm:$0xff]   ;;  %v1591_v33 = vld [vmem:[%s2125_s0 + $0x4] ss:$28 sps:$4 sm:$0xff]  }
   0xa   :  { %1387 = vmatprep.subr.bf16.mxu1 %v1566_v9  ;;  %v1582_v25 = vld [vmem:[%s2124_s1 + $0xf0] sm:$0xff]   ;;  %v1586_v29 = vld [vmem:[%s2124_s1 + $0xf8] sm:$0xff]   ;;  %v1592_v34 = vld [vmem:[%s2125_s0 + $0x8] ss:$28 sps:$4 sm:$0xff]   ;;  %813 = vmatprep.mubr.bf16.mxu0 %v1591_v33 }
   0xb   :  { %v1583_v26 = vld [vmem:[%s2124_s1 + $0x30] sm:$0xff]   ;;  %v1587_v30 = vld [vmem:[%s2124_s1 + $0x38] sm:$0xff]   ;;  %v1594_v35 = vld [vmem:[%s2125_s0 + $0xc] ss:$28 sps:$4 sm:$0xff]  }
   0xc   :  { %1324 = vmatpush3.bf16.msra.mxu0 %v1567_v10  ;;  %v1584_v27 = vld [vmem:[%s2124_s1 + $0xb0] sm:$0xff]   ;;  %v1588_v31 = vld [vmem:[%s2124_s1 + $0xb8] sm:$0xff]   ;;  %v1595_v36 = vld [vmem:[%s2124_s1 + $0x140] sm:$0xff]   ;;  %910 = vmatprep.mubr.bf16.mxu1 %v1594_v35 }
   0xd   :  { %1388 = vmatpush3.bf16.msra.mxu1 %v1568_v11  ;;  %1325 = vmatprep.subr.bf16.mxu0 %v1569_v12  ;;  %v1589_v32 = vld [vmem:[%s2125_s0] ss:$28 sps:$4 sm:$0xff]   ;;  %v1601_v40 = vld [vmem:[%s2125_s0 + $0x38] ss:$28 sps:$4 sm:$0xff]   ;;  %v1603_v42 = vld [vmem:[%s2124_s1 + $0x148] sm:$0xff]  }
   0xe   :  { %1389 = vmatprep.subr.bf16.mxu1 %v1570_v13  ;;  %v1596_v37 = vld [vmem:[%s2124_s1 + $0x100] sm:$0xff]   ;;  %v1597_v38 = vld [vmem:[%s2125_s0 + $0x3c] ss:$28 sps:$4 sm:$0xff]   ;;  %v1604_v43 = vld [vmem:[%s2124_s1 + $0x108] sm:$0xff]  }
   0xf   :  { %v1599_v39 = vld [vmem:[%s2125_s0 + $0x44] ss:$28 sps:$4 sm:$0xff]   ;;  %v1605_v44 = vld [vmem:[%s2125_s0 + $0x74] ss:$28 sps:$4 sm:$0xff]   ;;  %v1607_v45 = vld [vmem:[%s2125_s0 + $0x7c] ss:$28 sps:$4 sm:$0xff]  }
  0x10   :  { %1326 = vmatpush3.bf16.msra.mxu0 %v1571_v14  ;;  %v1602_v41 = vld [vmem:[%s2125_s0 + $0x40] ss:$28 sps:$4 sm:$0xff]   ;;  %v1611_v46 = vld [vmem:[%s2124_s1 + $0x150] sm:$0xff]   ;;  %v1613_v50 = vld [vmem:[%s2125_s0 + $0xac] ss:$28 sps:$4 sm:$0xff]  }
  0x11   :  { %1390 = vmatpush3.bf16.msra.mxu1 %v1572_v15  ;;  %1327 = vmatprep.subr.bf16.mxu0 %v1573_v16  ;;  %v1612_v47 = vld [vmem:[%s2124_s1 + $0x110] sm:$0xff]   ;;  %v1619_v52 = vld [vmem:[%s2124_s1 + $0x158] sm:$0xff]   ;;  %v1627_v54 = vld [vmem:[%s2124_s1 + $0x160] sm:$0xff]  }
  0x12   :  { %1391 = vmatprep.subr.bf16.mxu1 %v1574_v17  ;;  %v1609_v48 = vld [vmem:[%s2125_s0 + $0x70] ss:$28 sps:$4 sm:$0xff]   ;;  %v1610_v49 = vld [vmem:[%s2125_s0 + $0x78] ss:$28 sps:$4 sm:$0xff]   ;;  %v1628_v55 = vld [vmem:[%s2124_s1 + $0x120] sm:$0xff]  }
  0x13   :  { %v1615_v51 = vld [vmem:[%s2125_s0 + $0xb4] ss:$28 sps:$4 sm:$0xff]   ;;  %v1620_v53 = vld [vmem:[%s2124_s1 + $0x118] sm:$0xff]   ;;  %v1617_v56 = vld [vmem:[%s2125_s0 + $0xa8] ss:$28 sps:$4 sm:$0xff]  }
  0x14   :  { %1328 = vmatpush3.bf16.msra.mxu0 %v1575_v18  ;;  %v1618_v57 = vld [vmem:[%s2125_s0 + $0xb0] ss:$28 sps:$4 sm:$0xff]   ;;  %v1621_v58 = vld [vmem:[%s2125_s0 + $0xe4] ss:$28 sps:$4 sm:$0xff]   ;;  %v1629_v2 = vld [vmem:[%s2125_s0 + $0x11c] ss:$28 sps:$4 sm:$0xff]  }
  0x15   :  { %1392 = vmatpush3.bf16.msra.mxu1 %v1576_v19  ;;  %1329 = vmatprep.subr.bf16.mxu0 %v1577_v20  ;;  %v1623_v59 = vld [vmem:[%s2125_s0 + $0xec] ss:$28 sps:$4 sm:$0xff]   ;;  %v1625_v62 = vld [vmem:[%s2125_s0 + $0xe0] ss:$28 sps:$4 sm:$0xff]   ;;  %v1643_v0 = vld [vmem:[%s2124_s1 + $0x170] sm:$0xff]  }
  0x16   :  { %1393 = vmatprep.subr.bf16.mxu1 %v1578_v21  ;;  %v1635_v60 = vld [vmem:[%s2124_s1 + $0x168] sm:$0xff]   ;;  %v1644_v1 = vld [vmem:[%s2124_s1 + $0x130] sm:$0xff]   ;;  %v1631_v3 = vld [vmem:[%s2125_s0 + $0x124] ss:$28 sps:$4 sm:$0xff]  }
  0x17   :  { %v1636_v61 = vld [vmem:[%s2124_s1 + $0x128] sm:$0xff]   ;;  %v1651_v4 = vld [vmem:[%s2124_s1 + $0x178] sm:$0xff]   ;;  %v1659_v8 = vld [vmem:[%s2124_s1 + $0x180] sm:$0xff]  }
  0x18   :  { %1330 = vmatpush3.bf16.msra.mxu0 %v1579_v22  ;;  %v1626_v63 = vld [vmem:[%s2125_s0 + $0xe8] ss:$28 sps:$4 sm:$0xff]   ;;  %v1652_v5 = vld [vmem:[%s2124_s1 + $0x138] sm:$0xff]   ;;  %v1637_v9 = vld [vmem:[%s2125_s0 + $0x154] ss:$28 sps:$4 sm:$0xff]  }
  0x19   :  { %1394 = vmatpush3.bf16.msra.mxu1 %v1580_v23  ;;  %1331 = vmatprep.subr.bf16.mxu0 %v1581_v24  ;;  %v1633_v6 = vld [vmem:[%s2125_s0 + $0x118] ss:$28 sps:$4 sm:$0xff]   ;;  %v1634_v7 = vld [vmem:[%s2125_s0 + $0x120] ss:$28 sps:$4 sm:$0xff]   ;;  %v1641_v11 = vld [vmem:[%s2125_s0 + $0x150] ss:$28 sps:$4 sm:$0xff]  }
  0x1a   :  { %1395 = vmatprep.subr.bf16.mxu1 %v1582_v25  ;;  %v1639_v10 = vld [vmem:[%s2125_s0 + $0x15c] ss:$28 sps:$4 sm:$0xff]   ;;  %v1645_v13 = vld [vmem:[%s2125_s0 + $0x18c] ss:$28 sps:$4 sm:$0xff]   ;;  %v1647_v14 = vld [vmem:[%s2125_s0 + $0x194] ss:$28 sps:$4 sm:$0xff]  }
  0x1b   :  { %v1642_v12 = vld [vmem:[%s2125_s0 + $0x158] ss:$28 sps:$4 sm:$0xff]   ;;  %v1649_v15 = vld [vmem:[%s2125_s0 + $0x188] ss:$28 sps:$4 sm:$0xff]   ;;  %v1650_v16 = vld [vmem:[%s2125_s0 + $0x190] ss:$28 sps:$4 sm:$0xff]  }
  0x1c   :  { %1332 = vmatpush3.bf16.msra.mxu0 %v1583_v26  ;;  %v1655_v17 = vld [vmem:[%s2125_s0 + $0x14] ss:$28 sps:$4 sm:$0xff]   ;;  %v1658_v18 = vld [vmem:[%s2125_s0 + $0x164] ss:$28 sps:$4 sm:$0xff]   ;;  %v1660_v21 = vld [vmem:[%s2125_s0 + $0x4c] ss:$28 sps:$4 sm:$0xff]  }
  0x1d   :  { %1396 = vmatpush3.bf16.msra.mxu1 %v1584_v27  ;;  %1333 = vmatprep.subr.bf16.mxu0 %v1585_v28  ;;  %v1653_v19 = vld [vmem:[%s2125_s0 + $0x10] ss:$28 sps:$4 sm:$0xff]   ;;  %v1656_v20 = vld [vmem:[%s2125_s0 + $0x160] ss:$28 sps:$4 sm:$0xff]   ;;  %v1664_v24 = vld [vmem:[%s2125_s0 + $0x48] ss:$28 sps:$4 sm:$0xff]  }
  0x1e   :  { %1397 = vmatprep.subr.bf16.mxu1 %v1586_v29  ;;  %v1662_v22 = vld [vmem:[%s2125_s0 + $0x19c] ss:$28 sps:$4 sm:$0xff]   ;;  %v1666_v23 = vld [vmem:[%s2124_s1 + $0x188] sm:$0xff]   ;;  %v1667_v26 = vld [vmem:[%s2125_s0 + $0x84] ss:$28 sps:$4 sm:$0xff]  }
  0x1f   :  { %v1665_v25 = vld [vmem:[%s2125_s0 + $0x198] ss:$28 sps:$4 sm:$0xff]   ;;  %v1670_v28 = vld [vmem:[%s2125_s0 + $0x80] ss:$28 sps:$4 sm:$0xff]   ;;  %v1671_v29 = vld [vmem:[%s2125_s0 + $0x50] ss:$28 sps:$4 sm:$0xff]  }
  0x20   :  { %1334 = vmatpush3.bf16.msra.mxu0 %v1587_v30  ;;  %v1669_v27 = vld [vmem:[%s2125_s0 + $0x18] ss:$28 sps:$4 sm:$0xff]   ;;  %v1676_v33 = vld [vmem:[%s2125_s0 + $0xc0] ss:$28 sps:$4 sm:$0xff]  }
  0x21   :  { %1398 = vmatpush3.bf16.msra.mxu1 %v1588_v31  ;;  %1447 = vmatprep.subr.bf16.mxu0 %v1595_v36  ;;  %v1672_v30 = vld [vmem:[%s2125_s0 + $0xbc] ss:$28 sps:$4 sm:$0xff]   ;;  %v1674_v31 = vld [vmem:[%s2125_s0 + $0x88] ss:$28 sps:$4 sm:$0xff]  }
  0x22   :  { %1541 = vmatprep.subr.bf16.mxu1 %v1595_v36  ;;  %v1679_v35 = vld [vmem:[%s2125_s0 + $0xf8] ss:$28 sps:$4 sm:$0xff]   ;;  %v1680_v36 = vld [vmem:[%s2125_s0 + $0xf0] ss:$28 sps:$4 sm:$0xff]  }
  0x23   :  { %814 = vmatmul.mubr.bf16.vlgmr.msra.gmra.mrb[0].mxu0 %v1589_v32  ;;  %v1675_v32 = vld [vmem:[%s2125_s0 + $0xb8] ss:$28 sps:$4 sm:$0xff]  }
  0x24   :  { %911 = vmatmul.mubr.bf16.vlgmr.msra.gmra.mrb[0].mxu1 %v1592_v34  ;;  %1448 = vmatpush3.bf16.msra.mxu0 %v1596_v37  ;;  %v1677_v34 = vld [vmem:[%s2125_s0 + $0xf4] ss:$28 sps:$4 sm:$0xff]  }
  0x25   :  { %1549 = vmatpush3.bf16.msra.mxu1 %v1596_v37  ;;  %821 = vmatprep.mubr.bf16.mxu0 %v1597_v38  ;;  %v1681_v37 = vld [vmem:[%s2125_s0 + $0x130] ss:$28 sps:$4 sm:$0xff]  }
  0x26   :  { %918 = vmatprep.mubr.bf16.mxu1 %v1599_v39  ;;  %1449 = vmatprep.subr.bf16.mxu0 %v1603_v42  ;;  %v1682_v38 = vld [vmem:[%s2125_s0 + $0x12c] ss:$28 sps:$4 sm:$0xff]  }
  0x27   :  { %1542 = vmatprep.subr.bf16.mxu1 %v1603_v42  ;;  %v1684_v39 = vld [vmem:[%s2125_s0 + $0x168] ss:$28 sps:$4 sm:$0xff]  }
  0x28   :  { %1450 = vmatpush3.bf16.msra.mxu0 %v1604_v43 }
  0x29   :  { %1550 = vmatpush3.bf16.msra.mxu1 %v1604_v43  ;;  %1451 = vmatprep.subr.bf16.mxu0 %v1611_v46 }
  0x2a   :  { %1543 = vmatprep.subr.bf16.mxu1 %v1611_v46 }
  0x2b   :  { %822 = vmatmul.mubr.bf16.gmra.mrb[4].mxu0 %v1601_v40  ;;  %v1685_v40 = vld [vmem:[%s2125_s0 + $0x128] ss:$28 sps:$4 sm:$0xff]  }
  0x2c   :  { %919 = vmatmul.mubr.bf16.gmra.mrb[4].mxu1 %v1602_v41  ;;  %829 = vmatprep.mubr.bf16.mxu0 %v1605_v44  ;;  %v1686_v41 = vld [vmem:[%s2125_s0 + $0x1a0] ss:$28 sps:$4 sm:$0xff]  }
  0x2d   :  { %926 = vmatprep.mubr.bf16.mxu1 %v1607_v45  ;;  %1452 = vmatpush3.bf16.msra.mxu0 %v1612_v47 }
  0x2e   :  { %1551 = vmatpush3.bf16.msra.mxu1 %v1612_v47  ;;  %1453 = vmatprep.subr.bf16.mxu0 %v1619_v52 }
  0x2f   :  { %1544 = vmatprep.subr.bf16.mxu1 %v1619_v52 }
  0x31   :  { %1454 = vmatpush3.bf16.msra.mxu0 %v1620_v53 }
  0x32   :  { %1552 = vmatpush3.bf16.msra.mxu1 %v1620_v53  ;;  %1455 = vmatprep.subr.bf16.mxu0 %v1627_v54 }
  0x33   :  { %830 = vmatmul.mubr.bf16.gmra.mrb[8].mxu0 %v1609_v48  ;;  %1545 = vmatprep.subr.bf16.mxu1 %v1627_v54 }
  0x34   :  { %927 = vmatmul.mubr.bf16.gmra.mrb[8].mxu1 %v1610_v49  ;;  %837 = vmatprep.mubr.bf16.mxu0 %v1613_v50 }
  0x35   :  { %934 = vmatprep.mubr.bf16.mxu1 %v1615_v51  ;;  %1456 = vmatpush3.bf16.msra.mxu0 %v1628_v55 }
  0x36   :  { %1553 = vmatpush3.bf16.msra.mxu1 %v1628_v55  ;;  %1457 = vmatprep.subr.bf16.mxu0 %v1635_v60 }
  0x37   :  { %1546 = vmatprep.subr.bf16.mxu1 %v1635_v60 }
  0x39   :  { %1458 = vmatpush3.bf16.msra.mxu0 %v1636_v61 }
  0x3a   :  { %1554 = vmatpush3.bf16.msra.mxu1 %v1636_v61  ;;  %1459 = vmatprep.subr.bf16.mxu0 %v1643_v0 }
  0x3b   :  { %838 = vmatmul.mubr.bf16.gmra.mrb[12].mxu0 %v1617_v56  ;;  %1547 = vmatprep.subr.bf16.mxu1 %v1643_v0 }
  0x3c   :  { %935 = vmatmul.mubr.bf16.gmra.mrb[12].mxu1 %v1618_v57  ;;  %845 = vmatprep.mubr.bf16.mxu0 %v1621_v58 }
  0x3d   :  { %942 = vmatprep.mubr.bf16.mxu1 %v1623_v59  ;;  %1460 = vmatpush3.bf16.msra.mxu0 %v1644_v1 }
  0x3e   :  { %1555 = vmatpush3.bf16.msra.mxu1 %v1644_v1  ;;  %1461 = vmatprep.subr.bf16.mxu0 %v1651_v4 }
  0x3f   :  { %1548 = vmatprep.subr.bf16.mxu1 %v1651_v4 }
  0x41   :  { %1462 = vmatpush3.bf16.msra.mxu0 %v1652_v5 }
  0x42   :  { %1556 = vmatpush3.bf16.msra.mxu1 %v1652_v5 }
  0x43   :  { %846 = vmatmul.mubr.bf16.gmra.mrb[16].mxu0 %v1625_v62  ;;  %1521 = vmatprep.subr.bf16.mxu1 %v1659_v8 }
  0x44   :  { %943 = vmatmul.mubr.bf16.gmra.mrb[16].mxu1 %v1626_v63  ;;  %853 = vmatprep.mubr.bf16.mxu0 %v1629_v2 }
  0x45   :  { %950 = vmatprep.mubr.bf16.mxu1 %v1631_v3 }
  0x4b   :  { %854 = vmatmul.mubr.bf16.gmra.mrb[20].mxu0 %v1633_v6 }
  0x4c   :  { %951 = vmatmul.mubr.bf16.gmra.mrb[20].mxu1 %v1634_v7  ;;  %861 = vmatprep.mubr.bf16.mxu0 %v1637_v9 }
  0x4d   :  { %958 = vmatprep.mubr.bf16.mxu1 %v1639_v10 }
  0x53   :  { %862 = vmatmul.mubr.bf16.gmra.mrb[24].mxu0 %v1641_v11 }
  0x54   :  { %959 = vmatmul.mubr.bf16.gmra.mrb[24].mxu1 %v1642_v12  ;;  %869 = vmatprep.mubr.bf16.mxu0 %v1645_v13 }
  0x55   :  { %966 = vmatprep.mubr.bf16.mxu1 %v1647_v14 }
  0x5b   :  { %870 = vmatmul.mubr.bf16.gmra.mrb[28].mxu0 %v1649_v15 }
  0x5c   :  { %967 = vmatmul.mubr.bf16.gmra.mrb[28].mxu1 %v1650_v16  ;;  %1007 = vmatprep.mubr.bf16.mxu0 %v1655_v17 }
  0x5d   :  { %1055 = vmatprep.mubr.bf16.mxu1 %v1658_v18 }
  0x63   :  { %1008 = vmatmul.mubr.bf16.vlgmr.msra.gmra.mrb[32].mxu0 %v1653_v19 }
  0x64   :  { %1056 = vmatmul.mubr.bf16.vlgmr.msra.gmra.mrb[32].mxu1 %v1656_v20  ;;  %1015 = vmatprep.mubr.bf16.mxu0 %v1660_v21 }
  0x65   :  { %1522 = vmatpush3.bf16.msra.mxu1 %v1659_v8  ;;  %1063 = vmatprep.mubr.bf16.mxu1 %v1662_v22 }
  0x66   :  { %1523 = vmatprep.subr.bf16.mxu1 %v1666_v23 }
  0x69   :  { %1524 = vmatpush3.bf16.msra.mxu1 %v1666_v23 }
  0x6b   :  { %1016 = vmatmul.mubr.bf16.gmra.mrb[36].mxu0 %v1664_v24 }
  0x6c   :  { %1064 = vmatmul.mubr.bf16.gmra.mrb[36].mxu1 %v1665_v25  ;;  %1023 = vmatprep.mubr.bf16.mxu0 %v1667_v26 }
  0x6d   :  { %1525 = vmatprep.mubr.msk.bf16.mxu1 %vm756_vm0, %v1669_v27 }
  0x73   :  { %1024 = vmatmul.mubr.bf16.gmra.mrb[40].mxu0 %v1670_v28 }
  0x74   :  { %1526 = vmatmul.mubr.msk.bf16.vlgmr.msra.gmra.mrb[40].mxu1 %vm756_vm0, %v1671_v29  ;;  %1031 = vmatprep.mubr.bf16.mxu0 %v1672_v30 }
  0x75   :  { %1529 = vmatprep.mubr.msk.bf16.mxu1 %vm756_vm0, %v1674_v31 }
  0x7b   :  { %1032 = vmatmul.mubr.bf16.gmra.mrb[44].mxu0 %v1675_v32 }
  0x7c   :  { %1530 = vmatmul.mubr.msk.bf16.gmra.mrb[44].mxu1 %vm756_vm0, %v1676_v33  ;;  %1039 = vmatprep.mubr.bf16.mxu0 %v1677_v34 }
  0x7d   :  { %1533 = vmatprep.mubr.msk.bf16.mxu1 %vm756_vm0, %v1679_v35 }
  0x83   :  { %1040 = vmatmul.mubr.bf16.gmra.mrb[48].mxu0 %v1680_v36 }
  0x84   :  { %1534 = vmatmul.mubr.msk.bf16.gmra.mrb[48].mxu1 %vm756_vm0, %v1681_v37  ;;  %1047 = vmatprep.mubr.bf16.mxu0 %v1682_v38 }
  0x85   :  { %1537 = vmatprep.mubr.msk.bf16.mxu1 %vm756_vm0, %v1684_v39 }
  0x8b   :  { %1048 = vmatmul.mubr.bf16.gmra.mrb[52].mxu0 %v1685_v40 }
  0x8c   :  { %1538 = vmatmul.mubr.msk.bf16.gmra.mrb[52].mxu1 %vm756_vm0, %v1686_v41 }
  0xf6   :  { %v1335_v42 = vpop.f32.mrb[0].mxu0 }
  0xf7   :  { %v1399_v43 = vpop.f32.mrb[0].mxu1  ;;  %v1336_v44 = vpop.f32.mrb[1].mxu0 }
  0xf8   :  { %v1337_v45 = vadd.f32 %v1336_v44, %v1335_v42  ;;  %v1400_v46 = vpop.f32.mrb[1].mxu1  ;;  %v1338_v47 = vpop.f32.mrb[2].mxu0 }
  0xf9   :  { %v1401_v48 = vadd.f32 %v1400_v46, %v1399_v43  ;;  %v1402_v49 = vpop.f32.mrb[2].mxu1  ;;  %v1339_v50 = vpop.f32.mrb[3].mxu0 }
  0xfa   :  { %v1340_v51 = vadd.f32 %v1339_v50, %v1338_v47  ;;  %v1403_v52 = vpop.f32.mrb[3].mxu1 }
  0xfb   :  { %v2028_v53 = vadd.f32 %v1401_v48, %v1337_v45  ;;  %v1404_v54 = vadd.f32 %v1403_v52, %v1402_v49 }
  0xfd   :  { %v2030_v55 = vadd.f32 %v1404_v54, %v1340_v51 }
  0xfe   :  { %v1341_v56 = vpop.f32.mrb[4].mxu0 }
  0xff   :  { %v1405_v57 = vpop.f32.mrb[4].mxu1  ;;  %v1342_v58 = vpop.f32.mrb[5].mxu0 }
 0x100   :  { %v1343_v59 = vadd.f32 %v1342_v58, %v1341_v56  ;;  %v1406_v60 = vpop.f32.mrb[5].mxu1  ;;  %v1344_v61 = vpop.f32.mrb[6].mxu0 }
 0x101   :  { %v1407_v62 = vadd.f32 %v1406_v60, %v1405_v57  ;;  %v1408_v63 = vpop.f32.mrb[6].mxu1  ;;  %v1345_v0 = vpop.f32.mrb[7].mxu0 }
 0x102   :  { %v1346_v1 = vadd.f32 %v1345_v0, %v1344_v61  ;;  %v1409_v2 = vpop.f32.mrb[7].mxu1 }
 0x103   :  { %v2032_v3 = vadd.f32 %v1407_v62, %v1343_v59  ;;  %v1410_v4 = vadd.f32 %v1409_v2, %v1408_v63 }
 0x105   :  { %v2034_v5 = vadd.f32 %v1410_v4, %v1346_v1 }
 0x106   :  { %v1347_v6 = vpop.f32.mrb[8].mxu0 }
 0x107   :  { %v1411_v7 = vpop.f32.mrb[8].mxu1  ;;  %v1348_v8 = vpop.f32.mrb[9].mxu0 }
 0x108   :  { %v1349_v9 = vadd.f32 %v1348_v8, %v1347_v6  ;;  %v1412_v10 = vpop.f32.mrb[9].mxu1  ;;  %v1350_v11 = vpop.f32.mrb[10].mxu0 }
 0x109   :  { %v1413_v12 = vadd.f32 %v1412_v10, %v1411_v7  ;;  %v1414_v13 = vpop.f32.mrb[10].mxu1  ;;  %v1351_v14 = vpop.f32.mrb[11].mxu0 }
 0x10a   :  { %v1352_v15 = vadd.f32 %v1351_v14, %v1350_v11  ;;  %v1415_v16 = vpop.f32.mrb[11].mxu1 }
 0x10b   :  { %v2036_v17 = vadd.f32 %v1413_v12, %v1349_v9  ;;  %v1416_v18 = vadd.f32 %v1415_v16, %v1414_v13 }
 0x10d   :  { %v2038_v19 = vadd.f32 %v1416_v18, %v1352_v15 }
 0x10e   :  { %v1353_v20 = vpop.f32.mrb[12].mxu0 }
 0x10f   :  { %v1417_v21 = vpop.f32.mrb[12].mxu1  ;;  %v1354_v22 = vpop.f32.mrb[13].mxu0 }
 0x110   :  { %v1355_v23 = vadd.f32 %v1354_v22, %v1353_v20  ;;  %v1418_v24 = vpop.f32.mrb[13].mxu1  ;;  %v1356_v25 = vpop.f32.mrb[14].mxu0 }
 0x111   :  { %v1419_v26 = vadd.f32 %v1418_v24, %v1417_v21  ;;  %v1420_v27 = vpop.f32.mrb[14].mxu1  ;;  %v1357_v28 = vpop.f32.mrb[15].mxu0 }
 0x112   :  { %v1358_v29 = vadd.f32 %v1357_v28, %v1356_v25  ;;  %v1421_v30 = vpop.f32.mrb[15].mxu1 }
 0x113   :  { %v2040_v31 = vadd.f32 %v1419_v26, %v1355_v23  ;;  %v1422_v32 = vadd.f32 %v1421_v30, %v1420_v27 }
 0x115   :  { %v2042_v33 = vadd.f32 %v1422_v32, %v1358_v29 }
 0x116   :  { %v1359_v34 = vpop.f32.mrb[16].mxu0 }
 0x117   :  { %v1423_v35 = vpop.f32.mrb[16].mxu1  ;;  %v1360_v36 = vpop.f32.mrb[17].mxu0 }
 0x118   :  { %v1361_v37 = vadd.f32 %v1360_v36, %v1359_v34  ;;  %v1424_v38 = vpop.f32.mrb[17].mxu1  ;;  %v1362_v39 = vpop.f32.mrb[18].mxu0 }
 0x119   :  { %v1425_v40 = vadd.f32 %v1424_v38, %v1423_v35  ;;  %v1426_v41 = vpop.f32.mrb[18].mxu1  ;;  %v1363_v42 = vpop.f32.mrb[19].mxu0 }
 0x11a   :  { %v1364_v43 = vadd.f32 %v1363_v42, %v1362_v39  ;;  %v1427_v44 = vpop.f32.mrb[19].mxu1 }
 0x11b   :  { %v2044_v45 = vadd.f32 %v1425_v40, %v1361_v37  ;;  %v1428_v46 = vadd.f32 %v1427_v44, %v1426_v41 }
 0x11d   :  { %v2046_v47 = vadd.f32 %v1428_v46, %v1364_v43 }
 0x11e   :  { %v1365_v48 = vpop.f32.mrb[20].mxu0 }
 0x11f   :  { %v1429_v49 = vpop.f32.mrb[20].mxu1  ;;  %v1366_v50 = vpop.f32.mrb[21].mxu0 }
 0x120   :  { %v1367_v51 = vadd.f32 %v1366_v50, %v1365_v48  ;;  %v1430_v52 = vpop.f32.mrb[21].mxu1  ;;  %v1368_v54 = vpop.f32.mrb[22].mxu0 }
 0x121   :  { %v1431_v56 = vadd.f32 %v1430_v52, %v1429_v49  ;;  %v1432_v57 = vpop.f32.mrb[22].mxu1  ;;  %v1369_v58 = vpop.f32.mrb[23].mxu0 }
 0x122   :  { %v1370_v59 = vadd.f32 %v1369_v58, %v1368_v54  ;;  %v1433_v60 = vpop.f32.mrb[23].mxu1 }
 0x123   :  { %v2048_v61 = vadd.f32 %v1431_v56, %v1367_v51  ;;  %v1434_v62 = vadd.f32 %v1433_v60, %v1432_v57 }
 0x125   :  { %v2050_v63 = vadd.f32 %v1434_v62, %v1370_v59 }
 0x126   :  { %v1371_v0 = vpop.f32.mrb[24].mxu0 }
 0x127   :  { %v1435_v1 = vpop.f32.mrb[24].mxu1  ;;  %v1372_v2 = vpop.f32.mrb[25].mxu0 }
 0x128   :  { %v1373_v4 = vadd.f32 %v1372_v2, %v1371_v0  ;;  %v1436_v6 = vpop.f32.mrb[25].mxu1  ;;  %v1374_v7 = vpop.f32.mrb[26].mxu0 }
 0x129   :  { %v1437_v8 = vadd.f32 %v1436_v6, %v1435_v1  ;;  %v1438_v9 = vpop.f32.mrb[26].mxu1  ;;  %v1375_v10 = vpop.f32.mrb[27].mxu0 }
 0x12a   :  { %v1376_v11 = vadd.f32 %v1375_v10, %v1374_v7  ;;  %v1439_v12 = vpop.f32.mrb[27].mxu1 }
 0x12b   :  { %v961_v13 = vadd.f32 %v1437_v8, %v1373_v4  ;;  %v1440_v14 = vadd.f32 %v1439_v12, %v1438_v9 }
 0x12d   :  { %v964_v15 = vadd.f32 %v1440_v14, %v1376_v11 }
 0x12e   :  { %v1377_v16 = vpop.f32.mrb[28].mxu0 }
 0x12f   :  { %v1441_v18 = vpop.f32.mrb[28].mxu1  ;;  %v1378_v20 = vpop.f32.mrb[29].mxu0 }
 0x130   :  { %v1379_v21 = vadd.f32 %v1378_v20, %v1377_v16  ;;  %v1442_v22 = vpop.f32.mrb[29].mxu1  ;;  %v1380_v23 = vpop.f32.mrb[30].mxu0 }
 0x131   :  { %v1443_v24 = vadd.f32 %v1442_v22, %v1441_v18  ;;  %v1444_v25 = vpop.f32.mrb[30].mxu1  ;;  %v1381_v26 = vpop.f32.mrb[31].mxu0 }
 0x132   :  { %v1382_v27 = vadd.f32 %v1381_v26, %v1380_v23  ;;  %v1445_v28 = vpop.f32.mrb[31].mxu1 }
 0x133   :  { %v969_v29 = vadd.f32 %v1443_v24, %v1379_v21  ;;  %v1446_v30 = vadd.f32 %v1445_v28, %v1444_v25 }
 0x135   :  { %v972_v32 = vadd.f32 %v1446_v30, %v1382_v27 }
 0x136   :  { %v1463_v34 = vpop.f32.mrb[32].mxu0 }
 0x137   :  { %v1499_v35 = vpop.f32.mrb[32].mxu1  ;;  %v1464_v36 = vpop.f32.mrb[33].mxu0 }
 0x138   :  { %v1465_v37 = vadd.f32 %v1464_v36, %v1463_v34  ;;  %v1500_v38 = vpop.f32.mrb[33].mxu1  ;;  %v1466_v39 = vpop.f32.mrb[34].mxu0 }
 0x139   :  { %v1501_v40 = vadd.f32 %v1500_v38, %v1499_v35  ;;  %v1502_v41 = vpop.f32.mrb[34].mxu1  ;;  %v1467_v42 = vpop.f32.mrb[35].mxu0 }
 0x13a   :  { %v1468_v43 = vadd.f32 %v1467_v42, %v1466_v39  ;;  %v1503_v44 = vpop.f32.mrb[35].mxu1  ;;  %v1010_v46 = vadd.f32 %v1465_v37, %v2028_v53 }
 0x13b   :  { %v1504_v48 = vadd.f32 %v1503_v44, %v1502_v41  ;;  %v2053_v49 = vadd.f32 %v1501_v40, %v961_v13 }
 0x13c   :  { %v1013_v50 = vadd.f32 %v1468_v43, %v2030_v55 }
 0x13d   :  { %v2056_v51 = vadd.f32 %v1504_v48, %v964_v15 }
 0x13e   :  { %v1469_v52 = vpop.f32.mrb[36].mxu0 }
 0x13f   :  { %v1505_v54 = vpop.f32.mrb[36].mxu1  ;;  %v1470_v56 = vpop.f32.mrb[37].mxu0 }
 0x140   :  { %v1471_v57 = vadd.f32 %v1470_v56, %v1469_v52  ;;  %v1506_v58 = vpop.f32.mrb[37].mxu1  ;;  %v1472_v59 = vpop.f32.mrb[38].mxu0 }
 0x141   :  { %v1507_v60 = vadd.f32 %v1506_v58, %v1505_v54  ;;  %v1508_v62 = vpop.f32.mrb[38].mxu1  ;;  %v1473_v0 = vpop.f32.mrb[39].mxu0 }
 0x142   :  { %v1474_v1 = vadd.f32 %v1473_v0, %v1472_v59  ;;  %v1509_v2 = vpop.f32.mrb[39].mxu1  ;;  %v1018_v53 = vadd.f32 %v1471_v57, %v2032_v3 }
 0x143   :  { %v1510_v4 = vadd.f32 %v1509_v2, %v1508_v62  ;;  %v2059_v6 = vadd.f32 %v1507_v60, %v969_v29 }
 0x144   :  { %v1021_v55 = vadd.f32 %v1474_v1, %v2034_v5 }
 0x145   :  { %v2062_v7 = vadd.f32 %v1510_v4, %v972_v32 }
 0x146   :  { %v1475_v8 = vpop.f32.mrb[40].mxu0 }
 0x147   :  { %v1527_v9 = vpop.f32.mrb[40].mxu1  ;;  %v1476_v10 = vpop.f32.mrb[41].mxu0 }
 0x148   :  { %v1115_v11 = vadd.f32 %v1527_v9, %v1018_v53  ;;  %v1477_v12 = vadd.f32 %v1476_v10, %v1475_v8  ;;  %v1106_v13 = vpop.f32.mrb[41].mxu1  ;;  %v1478_v14 = vpop.f32.mrb[42].mxu0 }
 0x149   :  { %v1107_v15 = vadd.f32 %v1106_v13, %v1010_v46  ;;  %v1528_v16 = vpop.f32.mrb[42].mxu1  ;;  %v1479_v18 = vpop.f32.mrb[43].mxu0 }
 0x14a   :  { %v1171_v20 = vmax.f32 %v1115_v11, 0.0  ;;  %v1118_v21 = vadd.f32 %v1528_v16, %v1021_v55  ;;  %v1480_v3 = vadd.f32 %v1479_v18, %v1478_v14  ;;  %v1109_v22 = vpop.f32.mrb[43].mxu1  ;;  %v1026_v23 = vadd.f32 %v1477_v12, %v2036_v17 }
 0x14b   :  { %v1169_v24 = vmax.f32 %v1107_v15, 0.0  ;;  %v1110_v5 = vadd.f32 %v1109_v22, %v1013_v50 }
 0x14c   :  { %1187 = vst [vmem:[%s2126_s2 + $0x10] sm:$0xff] %v1171_v20  ;;  %v1172_v25 = vmax.f32 %v1118_v21, 0.0  ;;  %v1029_v26 = vadd.f32 %v1480_v3, %v2038_v19 }
 0x14d   :  { %1185 = vst [vmem:[%s2126_s2] sm:$0xff] %v1169_v24  ;;  %v1170_v27 = vmax.f32 %v1110_v5, 0.0 }
 0x14e   :  { %1188 = vst [vmem:[%s2126_s2 + $0x18] sm:$0xff] %v1172_v25  ;;  %v1481_v28 = vpop.f32.mrb[44].mxu0 }
 0x14f   :  { %1186 = vst [vmem:[%s2126_s2 + $0x8] sm:$0xff] %v1170_v27  ;;  %v1531_v17 = vpop.f32.mrb[44].mxu1  ;;  %v1482_v29 = vpop.f32.mrb[45].mxu0 }
 0x150   :  { %v1483_v30 = vadd.f32 %v1482_v29, %v1481_v28  ;;  %v1122_v32 = vpop.f32.mrb[45].mxu1  ;;  %v1484_v34 = vpop.f32.mrb[46].mxu0 }
 0x151   :  { %v1123_v19 = vadd.f32 %v1122_v32, %v1026_v23  ;;  %v1532_v35 = vpop.f32.mrb[46].mxu1  ;;  %v1485_v36 = vpop.f32.mrb[47].mxu0 }
 0x152   :  { %v1034_v37 = vadd.f32 %v1483_v30, %v2040_v31  ;;  %v1486_v38 = vadd.f32 %v1485_v36, %v1484_v34  ;;  %v1125_v39 = vpop.f32.mrb[47].mxu1 }
 0x153   :  { %v1173_v40 = vmax.f32 %v1123_v19, 0.0  ;;  %v1126_v41 = vadd.f32 %v1125_v39, %v1029_v26 }
 0x154   :  { %v1131_v42 = vadd.f32 %v1531_v17, %v1034_v37  ;;  %v1037_v43 = vadd.f32 %v1486_v38, %v2042_v33 }
 0x155   :  { %1189 = vst [vmem:[%s2126_s2 + $0x20] sm:$0xff] %v1173_v40  ;;  %v1174_v44 = vmax.f32 %v1126_v41, 0.0 }
 0x156   :  { %v1175_v46 = vmax.f32 %v1131_v42, 0.0  ;;  %v1134_v48 = vadd.f32 %v1532_v35, %v1037_v43  ;;  %v1487_v50 = vpop.f32.mrb[48].mxu0 }
 0x157   :  { %1190 = vst [vmem:[%s2126_s2 + $0x28] sm:$0xff] %v1174_v44  ;;  %v1488_v31 = vpop.f32.mrb[49].mxu0  ;;  %v1535_v52 = vpop.f32.mrb[48].mxu1 }
 0x158   :  { %1191 = vst [vmem:[%s2126_s2 + $0x30] sm:$0xff] %v1175_v46  ;;  %v1176_v54 = vmax.f32 %v1134_v48, 0.0  ;;  %v1489_v33 = vadd.f32 %v1488_v31, %v1487_v50  ;;  %v1490_v56 = vpop.f32.mrb[50].mxu0  ;;  %v1138_v57 = vpop.f32.mrb[49].mxu1 }
 0x159   :  { %v1491_v58 = vpop.f32.mrb[51].mxu0  ;;  %v1536_v59 = vpop.f32.mrb[50].mxu1 }
 0x15a   :  { %1192 = vst [vmem:[%s2126_s2 + $0x38] sm:$0xff] %v1176_v54  ;;  %v1492_v60 = vadd.f32 %v1491_v58, %v1490_v56  ;;  %v1042_v62 = vadd.f32 %v1489_v33, %v2044_v45  ;;  %v1141_v0 = vpop.f32.mrb[51].mxu1 }
 0x15c   :  { %v1139_v1 = vadd.f32 %v1138_v57, %v1042_v62  ;;  %v1045_v2 = vadd.f32 %v1492_v60, %v2046_v47 }
 0x15e   :  { %v1177_v53 = vmax.f32 %v1139_v1, 0.0  ;;  %v1142_v4 = vadd.f32 %v1141_v0, %v1045_v2  ;;  %v1493_v55 = vpop.f32.mrb[52].mxu0 }
 0x15f   :  { %v1539_v8 = vpop.f32.mrb[52].mxu1  ;;  %v1494_v9 = vpop.f32.mrb[53].mxu0 }
 0x160   :  { %1193 = vst [vmem:[%s2126_s2 + $0x40] sm:$0xff] %v1177_v53  ;;  %v1178_v10 = vmax.f32 %v1142_v4, 0.0  ;;  %v1163_v11 = vadd.f32 %v1539_v8, %v2059_v6  ;;  %v1495_v12 = vadd.f32 %v1494_v9, %v1493_v55  ;;  %v1154_v13 = vpop.f32.mrb[53].mxu1  ;;  %v1496_v14 = vpop.f32.mrb[54].mxu0 }
 0x161   :  { %v1155_v45 = vadd.f32 %v1154_v13, %v2053_v49  ;;  %v1540_v15 = vpop.f32.mrb[54].mxu1  ;;  %v1497_v16 = vpop.f32.mrb[55].mxu0 }
 0x162   :  { %1194 = vst [vmem:[%s2126_s2 + $0x48] sm:$0xff] %v1178_v10  ;;  %v1183_v47 = vmax.f32 %v1163_v11, 0.0  ;;  %v1050_v18 = vadd.f32 %v1495_v12, %v2048_v61  ;;  %v1166_v20 = vadd.f32 %v1540_v15, %v2062_v7  ;;  %v1498_v21 = vadd.f32 %v1497_v16, %v1496_v14  ;;  %v1157_v3 = vpop.f32.mrb[55].mxu1 }
 0x163   :  { %v1181_v22 = vmax.f32 %v1155_v45, 0.0  ;;  %v1158_v6 = vadd.f32 %v1157_v3, %v2056_v51 }
 0x164   :  { %1199 = vst [vmem:[%s2126_s2 + $0x70] sm:$0xff] %v1183_v47  ;;  %v1147_v49 = vadd.f32 %v1535_v52, %v1050_v18  ;;  %v1184_v23 = vmax.f32 %v1166_v20, 0.0  ;;  %v1053_v24 = vadd.f32 %v1498_v21, %v2050_v63 }
 0x165   :  { %1197 = vst [vmem:[%s2126_s2 + $0x60] sm:$0xff] %v1181_v22  ;;  %v1182_v61 = vmax.f32 %v1158_v6, 0.0 }
 0x166   :  { %v1179_v5 = vmax.f32 %v1147_v49, 0.0  ;;  %1200 = vst [vmem:[%s2126_s2 + $0x78] sm:$0xff] %v1184_v23  ;;  %v1150_v7 = vadd.f32 %v1536_v59, %v1053_v24 }
 0x167   :  { %1198 = vst [vmem:[%s2126_s2 + $0x68] sm:$0xff] %v1182_v61 }
 0x168   :  { %1195 = vst [vmem:[%s2126_s2 + $0x50] sm:$0xff] %v1179_v5  ;;  %v1180_v63 = vmax.f32 %v1150_v7, 0.0 }
 0x16a   :  { %1196 = vst [vmem:[%s2126_s2 + $0x58] sm:$0xff] %v1180_v63 }

// kernel: resnet_forward.41
= control target key start
LH: loop header
LB: loop body
LE: loop exit
PB: predicated region body
PF: predicated region fallthrough
CT: control target
= control target key end

     0   :  { %s104_s0 = inlined_call_operand.vmem [shape: f32[32,128], index: 0, kind: input, shape index: {}]   ;;  %s105_s1 = inlined_call_operand.vmem [shape: f32[1,128], index: 1, kind: input, shape index: {}]   ;;  %s106_s2 = inlined_call_operand.vmem [shape: f32[1,128], index: 2, kind: input, shape index: {}]   ;;  %s107_s3 = inlined_call_operand.vmem [shape: f32[32,128], index: 3, kind: output, shape index: {}]  }
   0x1   :  { %v14_v0 = vld [vmem:[%s104_s0] sm:$0xff]  ;;  %v15_v4 = vld [vmem:[%s104_s0 + $0x8] sm:$0xff]  ;;  %v16_v5 = vld [vmem:[%s104_s0 + $0x10] sm:$0xff] }
   0x2   :  { %v52_v1 = vld [vmem:[%s105_s1] ss:$0 sm:$0xff]  ;;  %v17_v6 = vld [vmem:[%s104_s0 + $0x18] sm:$0xff] }
   0x3   :  { %v53_v2 = vld [vmem:[%s106_s2] ss:$0 sm:$0xff]  ;;  %v25_v3 = vmul.f32 %v52_v1, %v14_v0  ;;  %v26_v7 = vmul.f32 %v52_v1, %v15_v4  ;;  %v27_v8 = vmul.f32 %v52_v1, %v16_v5  ;;  %v28_v9 = vmul.f32 %v52_v1, %v17_v6 }
   0x5   :  { %v36_v10 = vadd.f32 %v53_v2, %v25_v3  ;;  %v37_v11 = vadd.f32 %v53_v2, %v26_v7  ;;  %v38_v12 = vadd.f32 %v53_v2, %v27_v8  ;;  %v39_v13 = vadd.f32 %v53_v2, %v28_v9 }
   0x7   :  { %v40_v14 = vmax.f32 %v36_v10, 0.0  ;;  %v41_v15 = vmax.f32 %v37_v11, 0.0  ;;  %v42_v16 = vmax.f32 %v38_v12, 0.0  ;;  %v43_v17 = vmax.f32 %v39_v13, 0.0 }
   0x9   :  { %44 = vst [vmem:[%s107_s3] sm:$0xff] %v40_v14  ;;  %45 = vst [vmem:[%s107_s3 + $0x8] sm:$0xff] %v41_v15 }
   0xa   :  { %46 = vst [vmem:[%s107_s3 + $0x10] sm:$0xff] %v42_v16  ;;  %47 = vst [vmem:[%s107_s3 + $0x18] sm:$0xff] %v43_v17 }

// kernel: resnet_forward.40
= control target key start
LH: loop header
LB: loop body
LE: loop exit
PB: predicated region body
PF: predicated region fallthrough
CT: control target
= control target key end

     0   :  { %vm365_vm0 = vcmask 523264   ;;  %v742_v46 = vmov 0.0   ;;  %s936_s1 = inlined_call_operand.vmem [shape: bf16[576,128], index: 1, kind: input, shape index: {}]   ;;  %s937_s0 = inlined_call_operand.vmem [shape: bf16[32,576], index: 0, kind: input, shape index: {}]   ;;  %s938_s3 = inlined_call_operand.vmem [shape: f32[1,128], index: 3, kind: output, shape index: {1}]   ;;  %s939_s4 = inlined_call_operand.vmem [shape: f32[1,128], index: 4, kind: output, shape index: {2}]   ;;  %s940_s2 = inlined_call_operand.vmem [shape: f32[32,128], index: 2, kind: output, shape index: {0}]  }
   0x1   :  { %v692_v0 = vld [vmem:[%s936_s1 + $0x40] sm:$0xff]   ;;  %v696_v4 = vld [vmem:[%s936_s1 + $0x48] sm:$0xff]   ;;  %v700_v8 = vld [vmem:[%s936_s1 + $0x50] sm:$0xff]   ;;  %527 = vst [vmem:[%s938_s3] sm:$0x1] %v742_v46 }
   0x2   :  { %v693_v1 = vld [vmem:[%s936_s1 + $0xc0] sm:$0xff]   ;;  %617 = vmatprep.subr.bf16.mxu0 %v692_v0  ;;  %v697_v5 = vld [vmem:[%s936_s1 + $0xc8] sm:$0xff]   ;;  %v701_v9 = vld [vmem:[%s936_s1 + $0xd0] sm:$0xff]   ;;  %528 = vst [vmem:[%s939_s4] sm:$0x1] %v742_v46 }
   0x3   :  { %v694_v2 = vld [vmem:[%s936_s1] sm:$0xff]   ;;  %645 = vmatprep.subr.bf16.mxu1 %v693_v1  ;;  %v698_v6 = vld [vmem:[%s936_s1 + $0x8] sm:$0xff]   ;;  %v702_v10 = vld [vmem:[%s936_s1 + $0x10] sm:$0xff]  }
   0x4   :  { %v695_v3 = vld [vmem:[%s936_s1 + $0x80] sm:$0xff]   ;;  %618 = vmatpush3.bf16.msra.mxu0 %v694_v2  ;;  %v699_v7 = vld [vmem:[%s936_s1 + $0x88] sm:$0xff]   ;;  %v703_v11 = vld [vmem:[%s936_s1 + $0x90] sm:$0xff]  }
   0x5   :  { %646 = vmatpush3.bf16.msra.mxu1 %v695_v3  ;;  %619 = vmatprep.subr.bf16.mxu0 %v696_v4  ;;  %v704_v12 = vld [vmem:[%s936_s1 + $0x58] sm:$0xff]   ;;  %v708_v16 = vld [vmem:[%s936_s1 + $0x60] sm:$0xff]   ;;  %v712_v20 = vld [vmem:[%s936_s1 + $0x68] sm:$0xff]  }
   0x6   :  { %647 = vmatprep.subr.bf16.mxu1 %v697_v5  ;;  %v705_v13 = vld [vmem:[%s936_s1 + $0xd8] sm:$0xff]   ;;  %v709_v17 = vld [vmem:[%s936_s1 + $0xe0] sm:$0xff]   ;;  %v713_v21 = vld [vmem:[%s936_s1 + $0xe8] sm:$0xff]  }
   0x7   :  { %v706_v14 = vld [vmem:[%s936_s1 + $0x18] sm:$0xff]   ;;  %v710_v18 = vld [vmem:[%s936_s1 + $0x20] sm:$0xff]   ;;  %v714_v22 = vld [vmem:[%s936_s1 + $0x28] sm:$0xff]  }
   0x8   :  { %620 = vmatpush3.bf16.msra.mxu0 %v698_v6  ;;  %v707_v15 = vld [vmem:[%s936_s1 + $0x98] sm:$0xff]   ;;  %v711_v19 = vld [vmem:[%s936_s1 + $0xa0] sm:$0xff]   ;;  %v715_v23 = vld [vmem:[%s936_s1 + $0xa8] sm:$0xff]  }
   0x9   :  { %648 = vmatpush3.bf16.msra.mxu1 %v699_v7  ;;  %621 = vmatprep.subr.bf16.mxu0 %v700_v8  ;;  %v716_v24 = vld [vmem:[%s936_s1 + $0x70] sm:$0xff]   ;;  %v720_v28 = vld [vmem:[%s936_s1 + $0x78] sm:$0xff]   ;;  %v729_v35 = vld [vmem:[%s937_s0 + $0xc] ss:$20 sps:$4 sm:$0xff]  }
   0xa   :  { %649 = vmatprep.subr.bf16.mxu1 %v701_v9  ;;  %v717_v25 = vld [vmem:[%s936_s1 + $0xf0] sm:$0xff]   ;;  %v721_v29 = vld [vmem:[%s936_s1 + $0xf8] sm:$0xff]   ;;  %v730_v36 = vld [vmem:[%s936_s1 + $0x100] sm:$0xff]   ;;  %453 = vmatprep.mubr.bf16.mxu1 %v729_v35 }
   0xb   :  { %v718_v26 = vld [vmem:[%s936_s1 + $0x30] sm:$0xff]   ;;  %v722_v30 = vld [vmem:[%s936_s1 + $0x38] sm:$0xff]   ;;  %v731_v37 = vld [vmem:[%s936_s1 + $0x108] sm:$0xff]  }
   0xc   :  { %622 = vmatpush3.bf16.msra.mxu0 %v702_v10  ;;  %v719_v27 = vld [vmem:[%s936_s1 + $0xb0] sm:$0xff]   ;;  %v723_v31 = vld [vmem:[%s936_s1 + $0xb8] sm:$0xff]   ;;  %v732_v38 = vld [vmem:[%s937_s0 + $0x2c] ss:$20 sps:$4 sm:$0xff]  }
   0xd   :  { %650 = vmatpush3.bf16.msra.mxu1 %v703_v11  ;;  %623 = vmatprep.subr.bf16.mxu0 %v704_v12  ;;  %v724_v32 = vld [vmem:[%s937_s0] ss:$20 sps:$4 sm:$0xff]   ;;  %v726_v33 = vld [vmem:[%s937_s0 + $0x4] ss:$20 sps:$4 sm:$0xff]   ;;  %v727_v34 = vld [vmem:[%s937_s0 + $0x8] ss:$20 sps:$4 sm:$0xff]  }
   0xe   :  { %651 = vmatprep.subr.bf16.mxu1 %v705_v13  ;;  %404 = vmatprep.mubr.bf16.mxu0 %v726_v33  ;;  %v734_v39 = vld [vmem:[%s937_s0 + $0x34] ss:$20 sps:$4 sm:$0xff]   ;;  %v737_v42 = vld [vmem:[%s937_s0 + $0x30] ss:$20 sps:$4 sm:$0xff]   ;;  %v739_v44 = vld [vmem:[%s936_s1 + $0x118] sm:$0xff]  }
   0xf   :  { %v736_v40 = vld [vmem:[%s937_s0 + $0x28] ss:$20 sps:$4 sm:$0xff]   ;;  %v738_v41 = vld [vmem:[%s936_s1 + $0x110] sm:$0xff]   ;;  %v741_v45 = vld [vmem:[%s937_s0 + $0x38] ss:$20 sps:$4 sm:$0xff]  }
  0x10   :  { %624 = vmatpush3.bf16.msra.mxu0 %v706_v14  ;;  %v740_v43 = vld [vmem:[%s937_s0 + $0x10] ss:$20 sps:$4 sm:$0xff]  }
  0x11   :  { %652 = vmatpush3.bf16.msra.mxu1 %v707_v15  ;;  %625 = vmatprep.subr.bf16.mxu0 %v708_v16 }
  0x12   :  { %653 = vmatprep.subr.bf16.mxu1 %v709_v17 }
  0x14   :  { %626 = vmatpush3.bf16.msra.mxu0 %v710_v18 }
  0x15   :  { %654 = vmatpush3.bf16.msra.mxu1 %v711_v19  ;;  %627 = vmatprep.subr.bf16.mxu0 %v712_v20 }
  0x16   :  { %655 = vmatprep.subr.bf16.mxu1 %v713_v21 }
  0x18   :  { %628 = vmatpush3.bf16.msra.mxu0 %v714_v22 }
  0x19   :  { %656 = vmatpush3.bf16.msra.mxu1 %v715_v23  ;;  %629 = vmatprep.subr.bf16.mxu0 %v716_v24 }
  0x1a   :  { %657 = vmatprep.subr.bf16.mxu1 %v717_v25 }
  0x1c   :  { %630 = vmatpush3.bf16.msra.mxu0 %v718_v26 }
  0x1d   :  { %658 = vmatpush3.bf16.msra.mxu1 %v719_v27  ;;  %631 = vmatprep.subr.bf16.mxu0 %v720_v28 }
  0x1e   :  { %659 = vmatprep.subr.bf16.mxu1 %v721_v29 }
  0x20   :  { %632 = vmatpush3.bf16.msra.mxu0 %v722_v30 }
  0x21   :  { %660 = vmatpush3.bf16.msra.mxu1 %v723_v31  ;;  %679 = vmatprep.subr.bf16.mxu0 %v730_v36 }
  0x23   :  { %405 = vmatmul.mubr.bf16.vlgmr.msra.gmra.mrb[0].mxu0 %v724_v32 }
  0x24   :  { %454 = vmatmul.mubr.bf16.vlgmr.msra.gmra.mrb[0].mxu1 %v727_v34  ;;  %680 = vmatpush3.bf16.msra.mxu0 %v730_v36 }
  0x25   :  { %681 = vmatprep.subr.bf16.mxu0 %v731_v37  ;;  %412 = vmatprep.mubr.bf16.mxu0 %v732_v38  ;;  %v529_v38 = vld [vmem:[%s938_s3] sm:$0x1] }
  0x26   :  { %461 = vmatprep.mubr.bf16.mxu1 %v734_v39 }
  0x28   :  { %682 = vmatpush3.bf16.msra.mxu0 %v731_v37 }
  0x29   :  { %683 = vmatprep.subr.bf16.mxu0 %v738_v41 }
  0x2b   :  { %413 = vmatmul.mubr.bf16.gmra.mrb[4].mxu0 %v736_v40 }
  0x2c   :  { %462 = vmatmul.mubr.bf16.gmra.mrb[4].mxu1 %v737_v42  ;;  %687 = vmatprep.mubr.msk.bf16.mxu0 %vm365_vm0, %v740_v43 }
  0x2d   :  { %684 = vmatpush3.bf16.msra.mxu0 %v738_v41  ;;  %v541_v41 = vld [vmem:[%s939_s4] sm:$0x1] }
  0x2e   :  { %685 = vmatprep.subr.bf16.mxu0 %v739_v44 }
  0x31   :  { %686 = vmatpush3.bf16.msra.mxu0 %v739_v44 }
  0x34   :  { %688 = vmatmul.mubr.msk.bf16.vlgmr.msra.gmra.mrb[8].mxu0 %vm365_vm0, %v741_v45 }
  0xf6   :  { %v633_v47 = vpop.f32.mrb[0].mxu0 }
  0xf7   :  { %v661_v48 = vpop.f32.mrb[0].mxu1  ;;  %v634_v49 = vpop.f32.mrb[1].mxu0 }
  0xf8   :  { %v635_v50 = vadd.f32 %v634_v49, %v633_v47  ;;  %v662_v51 = vpop.f32.mrb[1].mxu1  ;;  %v636_v52 = vpop.f32.mrb[2].mxu0 }
  0xf9   :  { %v663_v53 = vadd.f32 %v662_v51, %v661_v48  ;;  %v664_v54 = vpop.f32.mrb[2].mxu1  ;;  %v637_v55 = vpop.f32.mrb[3].mxu0 }
  0xfa   :  { %v638_v56 = vadd.f32 %v637_v55, %v636_v52  ;;  %v665_v57 = vpop.f32.mrb[3].mxu1 }
  0xfb   :  { %v666_v58 = vadd.f32 %v665_v57, %v664_v54  ;;  %v456_v59 = vadd.f32 %v663_v53, %v635_v50 }
  0xfd   :  { %v459_v60 = vadd.f32 %v666_v58, %v638_v56 }
  0xfe   :  { %v639_v61 = vpop.f32.mrb[4].mxu0 }
  0xff   :  { %v667_v62 = vpop.f32.mrb[4].mxu1  ;;  %v640_v63 = vpop.f32.mrb[5].mxu0 }
 0x100   :  { %v641_v0 = vadd.f32 %v640_v63, %v639_v61  ;;  %v668_v1 = vpop.f32.mrb[5].mxu1  ;;  %v642_v2 = vpop.f32.mrb[6].mxu0 }
 0x101   :  { %v669_v3 = vadd.f32 %v668_v1, %v667_v62  ;;  %v670_v4 = vpop.f32.mrb[6].mxu1  ;;  %v643_v5 = vpop.f32.mrb[7].mxu0 }
 0x102   :  { %v644_v6 = vadd.f32 %v643_v5, %v642_v2  ;;  %v671_v7 = vpop.f32.mrb[7].mxu1 }
 0x103   :  { %v672_v8 = vadd.f32 %v671_v7, %v670_v4  ;;  %v464_v9 = vadd.f32 %v669_v3, %v641_v0 }
 0x105   :  { %v467_v10 = vadd.f32 %v672_v8, %v644_v6 }
 0x107   :  { %v689_v11 = vpop.f32.mrb[8].mxu0 }
 0x108   :  { %v513_v12 = vadd.f32 %v689_v11, %v464_v9  ;;  %v504_v13 = vpop.f32.mrb[9].mxu0 }
 0x109   :  { %v505_v14 = vadd.f32 %v504_v13, %v456_v59  ;;  %v690_v15 = vpop.f32.mrb[10].mxu0 }
 0x10a   :  { %521 = vst [vmem:[%s940_s2 + $0x10] sm:$0xff] %v513_v12  ;;  %v516_v16 = vadd.f32 %v690_v15, %v467_v10  ;;  %v507_v17 = vpop.f32.mrb[11].mxu0  ;;  %v544_v22 = vmul.f32 %v513_v12, %v513_v12 }
 0x10b   :  { %519 = vst [vmem:[%s940_s2] sm:$0xff] %v505_v14  ;;  %v508_v18 = vadd.f32 %v507_v17, %v459_v60  ;;  %v542_v19 = vmul.f32 %v505_v14, %v505_v14 }
 0x10c   :  { %522 = vst [vmem:[%s940_s2 + $0x18] sm:$0xff] %v516_v16  ;;  %v545_v25 = vmul.f32 %v516_v16, %v516_v16 }
 0x10d   :  { %520 = vst [vmem:[%s940_s2 + $0x8] sm:$0xff] %v508_v18  ;;  %v530_v20 = vadd.f32 %v508_v18, %v505_v14  ;;  %v543_v21 = vmul.f32 %v508_v18, %v508_v18 }
 0x10f   :  { %v531_v23 = vadd.f32 %v530_v20, %v513_v12  ;;  %v546_v24 = vadd.f32 %v543_v21, %v542_v19 }
 0x111   :  { %v532_v26 = vadd.f32 %v531_v23, %v516_v16  ;;  %v547_v27 = vadd.f32 %v546_v24, %v544_v22 }
 0x113   :  { %v533_v28 = vrot.slane %v532_v26, 4  ;;  %v548_v29 = vadd.f32 %v547_v27, %v545_v25 }
 0x115   :  { %v534_v30 = vadd.f32 %v533_v28, %v532_v26  ;;  %v549_v31 = vrot.slane %v548_v29, 4 }
 0x117   :  { %v535_v32 = vrot.slane %v534_v30, 2  ;;  %v550_v33 = vadd.f32 %v549_v31, %v548_v29 }
 0x119   :  { %v536_v34 = vadd.f32 %v535_v32, %v534_v30  ;;  %v551_v35 = vrot.slane %v550_v33, 2 }
 0x11b   :  { %v537_v36 = vrot.slane %v536_v34, 1  ;;  %v552_v37 = vadd.f32 %v551_v35, %v550_v33 }
 0x11d   :  { %v538_v39 = vadd.f32 %v537_v36, %v536_v34  ;;  %v553_v40 = vrot.slane %v552_v37, 1 }
 0x11f   :  { %v539_v42 = vadd.f32 %v538_v39, %v529_v38  ;;  %v554_v43 = vadd.f32 %v553_v40, %v552_v37 }
 0x121   :  { %540 = vst [vmem:[%s938_s3] sm:$0x1] %v539_v42  ;;  %v555_v44 = vadd.f32 %v554_v43, %v541_v41 }
 0x123   :  { %556 = vst [vmem:[%s939_s4] sm:$0x1] %v555_v44 }

// kernel: resnet_forward.44
= control target key start
LH: loop header
LB: loop body
LE: loop exit
PB: predicated region body
PF: predicated region fallthrough
CT: control target
= control target key end

     0   :  { %s132_s0 = inlined_call_operand.vmem [shape: f32[32,128], index: 0, kind: input, shape index: {}]   ;;  %s133_s1 = inlined_call_operand.vmem [shape: f32[1,128], index: 1, kind: input, shape index: {}]   ;;  %s134_s2 = inlined_call_operand.vmem [shape: f32[1,128], index: 2, kind: input, shape index: {}]   ;;  %s135_s3 = inlined_call_operand.vmem [shape: f32[32,128], index: 3, kind: input, shape index: {}]   ;;  %s136_s4 = inlined_call_operand.vmem [shape: f32[32,128], index: 4, kind: output, shape index: {}]  }
   0x1   :  { %v17_v0 = vld [vmem:[%s132_s0] sm:$0xff]  ;;  %v18_v4 = vld [vmem:[%s132_s0 + $0x8] sm:$0xff]  ;;  %v19_v7 = vld [vmem:[%s132_s0 + $0x10] sm:$0xff] }
   0x2   :  { %v63_v1 = vld [vmem:[%s133_s1] ss:$0 sm:$0xff]  ;;  %v20_v8 = vld [vmem:[%s132_s0 + $0x18] sm:$0xff]  ;;  %v44_v10 = vld [vmem:[%s135_s3 + $0x8] sm:$0xff] }
   0x3   :  { %v64_v2 = vld [vmem:[%s134_s2] ss:$0 sm:$0xff]  ;;  %v28_v3 = vmul.f32 %v63_v1, %v17_v0  ;;  %v29_v6 = vmul.f32 %v63_v1, %v18_v4  ;;  %v30_v11 = vmul.f32 %v63_v1, %v19_v7  ;;  %v31_v12 = vmul.f32 %v63_v1, %v20_v8  ;;  %v45_v14 = vld [vmem:[%s135_s3 + $0x10] sm:$0xff]  ;;  %v46_v15 = vld [vmem:[%s135_s3 + $0x18] sm:$0xff] }
   0x4   :  { %v43_v5 = vld [vmem:[%s135_s3] sm:$0xff] }
   0x5   :  { %v39_v9 = vadd.f32 %v64_v2, %v28_v3  ;;  %v40_v13 = vadd.f32 %v64_v2, %v29_v6  ;;  %v41_v17 = vadd.f32 %v64_v2, %v30_v11  ;;  %v42_v18 = vadd.f32 %v64_v2, %v31_v12 }
   0x7   :  { %v47_v16 = vadd.f32 %v43_v5, %v39_v9  ;;  %v48_v19 = vadd.f32 %v44_v10, %v40_v13  ;;  %v49_v21 = vadd.f32 %v45_v14, %v41_v17  ;;  %v50_v22 = vadd.f32 %v46_v15, %v42_v18 }
   0x9   :  { %v51_v20 = vmax.f32 %v47_v16, 0.0  ;;  %v52_v23 = vmax.f32 %v48_v19, 0.0  ;;  %v53_v24 = vmax.f32 %v49_v21, 0.0  ;;  %v54_v25 = vmax.f32 %v50_v22, 0.0 }
   0xb   :  { %55 = vst [vmem:[%s136_s4] sm:$0xff] %v51_v20  ;;  %56 = vst [vmem:[%s136_s4 + $0x8] sm:$0xff] %v52_v23 }
   0xc   :  { %57 = vst [vmem:[%s136_s4 + $0x10] sm:$0xff] %v53_v24  ;;  %58 = vst [vmem:[%s136_s4 + $0x18] sm:$0xff] %v54_v25 }

// kernel: resnet_forward.43
= control target key start
LH: loop header
LB: loop body
LE: loop exit
PB: predicated region body
PF: predicated region fallthrough
CT: control target
= control target key end

     0   :  { %vm58_vm0 = vcmask 523264   ;;  %s199_s1 = inlined_call_operand.vmem [shape: bf16[64,128], index: 1, kind: input, shape index: {}]   ;;  %s200_s0 = inlined_call_operand.vmem [shape: bf16[32,64], index: 0, kind: input, shape index: {}]   ;;  %s201_s2 = inlined_call_operand.vmem [shape: f32[32,128], index: 2, kind: output, shape index: {}]  }
   0x1   :  { %v148_v0 = vld [vmem:[%s199_s1] sm:$0xff]   ;;  %v149_v1 = vld [vmem:[%s199_s1 + $0x8] sm:$0xff]   ;;  %v150_v2 = vld [vmem:[%s199_s1 + $0x10] sm:$0xff]  }
   0x2   :  { %136 = vmatprep.subr.bf16.mxu0 %v148_v0  ;;  %v152_v3 = vld [vmem:[%s200_s0] sm:$0xff]   ;;  %v151_v4 = vld [vmem:[%s199_s1 + $0x18] sm:$0xff]   ;;  %v153_v5 = vld [vmem:[%s200_s0 + $0x8] sm:$0xff]  }
   0x3   :  { %137 = vmatpush3.bf16.msra.mxu0 %v148_v0  ;;  %144 = vmatprep.mubr.msk.bf16.mxu0 %vm58_vm0, %v152_v3 }
   0x4   :  { %138 = vmatprep.subr.bf16.mxu0 %v149_v1 }
   0x7   :  { %139 = vmatpush3.bf16.msra.mxu0 %v149_v1 }
   0x8   :  { %140 = vmatprep.subr.bf16.mxu0 %v150_v2 }
   0xb   :  { %141 = vmatpush3.bf16.msra.mxu0 %v150_v2 }
   0xc   :  { %142 = vmatprep.subr.bf16.mxu0 %v151_v4 }
   0xf   :  { %143 = vmatpush3.bf16.msra.mxu0 %v151_v4 }
  0x12   :  { %145 = vmatmul.mubr.msk.bf16.vlgmr.msra.gmra.mrb[0].mxu0 %vm58_vm0, %v153_v5 }
  0xe5   :  { %v146_v6 = vpop.f32.mrb[0].mxu0 }
  0xe6   :  { %116 = vst [vmem:[%s201_s2 + $0x10] sm:$0xff] %v146_v6  ;;  %v99_v7 = vpop.f32.mrb[1].mxu0 }
  0xe7   :  { %114 = vst [vmem:[%s201_s2] sm:$0xff] %v99_v7  ;;  %v147_v8 = vpop.f32.mrb[2].mxu0 }
  0xe8   :  { %117 = vst [vmem:[%s201_s2 + $0x18] sm:$0xff] %v147_v8  ;;  %v102_v9 = vpop.f32.mrb[3].mxu0 }
  0xe9   :  { %115 = vst [vmem:[%s201_s2 + $0x8] sm:$0xff] %v102_v9 }

// kernel: resnet_forward.42
= control target key start
LH: loop header
LB: loop body
LE: loop exit
PB: predicated region body
PF: predicated region fallthrough
CT: control target
= control target key end

     0   :  { %s1655_s1 = inlined_call_operand.vmem [shape: bf16[1152,128], index: 1, kind: input, shape index: {}]   ;;  %s1656_s0 = inlined_call_operand.vmem [shape: bf16[32,1152], index: 0, kind: input, shape index: {}]   ;;  %s1657_s3 = inlined_call_operand.vmem [shape: f32[1,128], index: 3, kind: output, shape index: {1}]   ;;  %s1658_s4 = inlined_call_operand.vmem [shape: f32[1,128], index: 4, kind: output, shape index: {2}]   ;;  %s1659_s2 = inlined_call_operand.vmem [shape: f32[32,128], index: 2, kind: output, shape index: {0}]  }
   0x1   :  { %v1231_v0 = vld [vmem:[%s1655_s1 + $0x40] sm:$0xff]   ;;  %v1235_v4 = vld [vmem:[%s1655_s1 + $0x48] sm:$0xff]   ;;  %v1239_v8 = vld [vmem:[%s1655_s1 + $0x50] sm:$0xff]  }
   0x2   :  { %v1232_v1 = vld [vmem:[%s1655_s1 + $0xc0] sm:$0xff]   ;;  %1088 = vmatprep.subr.bf16.mxu0 %v1231_v0  ;;  %v1236_v5 = vld [vmem:[%s1655_s1 + $0xc8] sm:$0xff]   ;;  %v1240_v9 = vld [vmem:[%s1655_s1 + $0xd0] sm:$0xff]  }
   0x3   :  { %v1233_v2 = vld [vmem:[%s1655_s1] sm:$0xff]   ;;  %1116 = vmatprep.subr.bf16.mxu1 %v1232_v1  ;;  %v1237_v6 = vld [vmem:[%s1655_s1 + $0x8] sm:$0xff]   ;;  %v1241_v10 = vld [vmem:[%s1655_s1 + $0x10] sm:$0xff]  }
   0x4   :  { %v1234_v3 = vld [vmem:[%s1655_s1 + $0x80] sm:$0xff]   ;;  %1089 = vmatpush3.bf16.msra.mxu0 %v1233_v2  ;;  %v1238_v7 = vld [vmem:[%s1655_s1 + $0x88] sm:$0xff]   ;;  %v1242_v11 = vld [vmem:[%s1655_s1 + $0x90] sm:$0xff]  }
   0x5   :  { %1117 = vmatpush3.bf16.msra.mxu1 %v1234_v3  ;;  %1090 = vmatprep.subr.bf16.mxu0 %v1235_v4  ;;  %v1243_v12 = vld [vmem:[%s1655_s1 + $0x58] sm:$0xff]   ;;  %v1247_v16 = vld [vmem:[%s1655_s1 + $0x60] sm:$0xff]   ;;  %v1251_v20 = vld [vmem:[%s1655_s1 + $0x68] sm:$0xff]  }
   0x6   :  { %1118 = vmatprep.subr.bf16.mxu1 %v1236_v5  ;;  %v1244_v13 = vld [vmem:[%s1655_s1 + $0xd8] sm:$0xff]   ;;  %v1248_v17 = vld [vmem:[%s1655_s1 + $0xe0] sm:$0xff]   ;;  %v1252_v21 = vld [vmem:[%s1655_s1 + $0xe8] sm:$0xff]  }
   0x7   :  { %v1245_v14 = vld [vmem:[%s1655_s1 + $0x18] sm:$0xff]   ;;  %v1249_v18 = vld [vmem:[%s1655_s1 + $0x20] sm:$0xff]   ;;  %v1253_v22 = vld [vmem:[%s1655_s1 + $0x28] sm:$0xff]  }
   0x8   :  { %1091 = vmatpush3.bf16.msra.mxu0 %v1237_v6  ;;  %v1246_v15 = vld [vmem:[%s1655_s1 + $0x98] sm:$0xff]   ;;  %v1250_v19 = vld [vmem:[%s1655_s1 + $0xa0] sm:$0xff]   ;;  %v1254_v23 = vld [vmem:[%s1655_s1 + $0xa8] sm:$0xff]  }
   0x9   :  { %1119 = vmatpush3.bf16.msra.mxu1 %v1238_v7  ;;  %1092 = vmatprep.subr.bf16.mxu0 %v1239_v8  ;;  %v1255_v24 = vld [vmem:[%s1655_s1 + $0x70] sm:$0xff]   ;;  %v1259_v28 = vld [vmem:[%s1655_s1 + $0x78] sm:$0xff]   ;;  %v1263_v32 = vld [vmem:[%s1656_s0] ss:$36 sps:$4 sm:$0xff]  }
   0xa   :  { %1120 = vmatprep.subr.bf16.mxu1 %v1240_v9  ;;  %v1256_v25 = vld [vmem:[%s1655_s1 + $0xf0] sm:$0xff]   ;;  %v1260_v29 = vld [vmem:[%s1655_s1 + $0xf8] sm:$0xff]   ;;  %v1265_v33 = vld [vmem:[%s1656_s0 + $0x4] ss:$36 sps:$4 sm:$0xff]  }
   0xb   :  { %v1257_v26 = vld [vmem:[%s1655_s1 + $0x30] sm:$0xff]   ;;  %v1261_v30 = vld [vmem:[%s1655_s1 + $0x38] sm:$0xff]   ;;  %v1266_v34 = vld [vmem:[%s1656_s0 + $0x8] ss:$36 sps:$4 sm:$0xff]   ;;  %735 = vmatprep.mubr.bf16.mxu0 %v1265_v33 }
   0xc   :  { %1093 = vmatpush3.bf16.msra.mxu0 %v1241_v10  ;;  %v1258_v27 = vld [vmem:[%s1655_s1 + $0xb0] sm:$0xff]   ;;  %v1262_v31 = vld [vmem:[%s1655_s1 + $0xb8] sm:$0xff]   ;;  %v1269_v36 = vld [vmem:[%s1655_s1 + $0x140] sm:$0xff]  }
   0xd   :  { %1121 = vmatpush3.bf16.msra.mxu1 %v1242_v11  ;;  %1094 = vmatprep.subr.bf16.mxu0 %v1243_v12  ;;  %v1268_v35 = vld [vmem:[%s1656_s0 + $0xc] ss:$36 sps:$4 sm:$0xff]   ;;  %v1270_v37 = vld [vmem:[%s1655_s1 + $0x100] sm:$0xff]   ;;  %v1281_v48 = vld [vmem:[%s1655_s1 + $0x158] sm:$0xff]  }
   0xe   :  { %1122 = vmatprep.subr.bf16.mxu1 %v1244_v13  ;;  %784 = vmatprep.mubr.bf16.mxu1 %v1268_v35  ;;  %v1271_v38 = vld [vmem:[%s1655_s1 + $0x1c0] sm:$0xff]   ;;  %v1273_v40 = vld [vmem:[%s1655_s1 + $0x148] sm:$0xff]   ;;  %v1277_v44 = vld [vmem:[%s1655_s1 + $0x150] sm:$0xff]  }
   0xf   :  { %v1272_v39 = vld [vmem:[%s1655_s1 + $0x180] sm:$0xff]   ;;  %v1274_v41 = vld [vmem:[%s1655_s1 + $0x108] sm:$0xff]   ;;  %v1278_v45 = vld [vmem:[%s1655_s1 + $0x110] sm:$0xff]  }
  0x10   :  { %1095 = vmatpush3.bf16.msra.mxu0 %v1245_v14  ;;  %v1275_v42 = vld [vmem:[%s1655_s1 + $0x1c8] sm:$0xff]   ;;  %v1279_v46 = vld [vmem:[%s1655_s1 + $0x1d0] sm:$0xff]   ;;  %v1282_v49 = vld [vmem:[%s1655_s1 + $0x118] sm:$0xff]  }
  0x11   :  { %1123 = vmatpush3.bf16.msra.mxu1 %v1246_v15  ;;  %1096 = vmatprep.subr.bf16.mxu0 %v1247_v16  ;;  %v1276_v43 = vld [vmem:[%s1655_s1 + $0x188] sm:$0xff]   ;;  %v1280_v47 = vld [vmem:[%s1655_s1 + $0x190] sm:$0xff]   ;;  %v1283_v50 = vld [vmem:[%s1655_s1 + $0x1d8] sm:$0xff]  }
  0x12   :  { %1124 = vmatprep.subr.bf16.mxu1 %v1248_v17  ;;  %v1284_v51 = vld [vmem:[%s1655_s1 + $0x198] sm:$0xff]   ;;  %v1285_v52 = vld [vmem:[%s1655_s1 + $0x160] sm:$0xff]   ;;  %v1289_v56 = vld [vmem:[%s1655_s1 + $0x168] sm:$0xff]  }
  0x13   :  { %v1286_v53 = vld [vmem:[%s1655_s1 + $0x120] sm:$0xff]   ;;  %v1290_v57 = vld [vmem:[%s1656_s0 + $0x4c] ss:$36 sps:$4 sm:$0xff]   ;;  %v1292_v58 = vld [vmem:[%s1656_s0 + $0x54] ss:$36 sps:$4 sm:$0xff]  }
  0x14   :  { %1097 = vmatpush3.bf16.msra.mxu0 %v1249_v18  ;;  %v1287_v54 = vld [vmem:[%s1655_s1 + $0x1e0] sm:$0xff]   ;;  %v1294_v59 = vld [vmem:[%s1655_s1 + $0x128] sm:$0xff]   ;;  %v1296_v61 = vld [vmem:[%s1656_s0 + $0x50] ss:$36 sps:$4 sm:$0xff]  }
  0x15   :  { %1125 = vmatpush3.bf16.msra.mxu1 %v1250_v19  ;;  %1098 = vmatprep.subr.bf16.mxu0 %v1251_v20  ;;  %v1288_v55 = vld [vmem:[%s1655_s1 + $0x1a0] sm:$0xff]   ;;  %v1295_v60 = vld [vmem:[%s1656_s0 + $0x48] ss:$36 sps:$4 sm:$0xff]   ;;  %v1299_v0 = vld [vmem:[%s1655_s1 + $0x170] sm:$0xff]  }
  0x16   :  { %1126 = vmatprep.subr.bf16.mxu1 %v1252_v21  ;;  %v1297_v62 = vld [vmem:[%s1655_s1 + $0x1e8] sm:$0xff]   ;;  %v1300_v1 = vld [vmem:[%s1655_s1 + $0x130] sm:$0xff]   ;;  %v1303_v4 = vld [vmem:[%s1655_s1 + $0x178] sm:$0xff]  }
  0x17   :  { %v1298_v63 = vld [vmem:[%s1655_s1 + $0x1a8] sm:$0xff]   ;;  %v1301_v2 = vld [vmem:[%s1655_s1 + $0x1f0] sm:$0xff]   ;;  %v1304_v5 = vld [vmem:[%s1655_s1 + $0x138] sm:$0xff]  }
  0x18   :  { %1099 = vmatpush3.bf16.msra.mxu0 %v1253_v22  ;;  %v1302_v3 = vld [vmem:[%s1655_s1 + $0x1b0] sm:$0xff]   ;;  %v1305_v6 = vld [vmem:[%s1655_s1 + $0x1f8] sm:$0xff]   ;;  %v1310_v10 = vld [vmem:[%s1655_s1 + $0x200] sm:$0xff]  }
  0x19   :  { %1127 = vmatpush3.bf16.msra.mxu1 %v1254_v23  ;;  %1100 = vmatprep.subr.bf16.mxu0 %v1255_v24  ;;  %v1306_v7 = vld [vmem:[%s1656_s0 + $0x10] ss:$36 sps:$4 sm:$0xff]   ;;  %v1309_v9 = vld [vmem:[%s1655_s1 + $0x1b8] sm:$0xff]   ;;  %v1314_v13 = vld [vmem:[%s1655_s1 + $0x208] sm:$0xff]  }
  0x1a   :  { %1128 = vmatprep.subr.bf16.mxu1 %v1256_v25  ;;  %v1308_v8 = vld [vmem:[%s1656_s0 + $0x14] ss:$36 sps:$4 sm:$0xff]   ;;  %v1313_v12 = vld [vmem:[%s1656_s0 + $0x1c] ss:$36 sps:$4 sm:$0xff]   ;;  %v1319_v17 = vld [vmem:[%s1656_s0 + $0x64] ss:$36 sps:$4 sm:$0xff]  }
  0x1b   :  { %v1311_v11 = vld [vmem:[%s1656_s0 + $0x18] ss:$36 sps:$4 sm:$0xff]   ;;  %v1318_v16 = vld [vmem:[%s1655_s1 + $0x210] sm:$0xff]   ;;  %v1321_v18 = vld [vmem:[%s1656_s0 + $0x60] ss:$36 sps:$4 sm:$0xff]  }
  0x1c   :  { %1101 = vmatpush3.bf16.msra.mxu0 %v1257_v26  ;;  %v1315_v14 = vld [vmem:[%s1656_s0 + $0x5c] ss:$36 sps:$4 sm:$0xff]   ;;  %v1324_v22 = vld [vmem:[%s1655_s1 + $0x228] sm:$0xff]   ;;  %v1325_v23 = vld [vmem:[%s1655_s1 + $0x230] sm:$0xff]   ;;  %v1329_v26 = vmov 0.0  }
  0x1d   :  { %1129 = vmatpush3.bf16.msra.mxu1 %v1258_v27  ;;  %1102 = vmatprep.subr.bf16.mxu0 %v1259_v28  ;;  %v1317_v15 = vld [vmem:[%s1656_s0 + $0x58] ss:$36 sps:$4 sm:$0xff]   ;;  %v1323_v20 = vld [vmem:[%s1655_s1 + $0x220] sm:$0xff]   ;;  %v1328_v25 = vld [vmem:[%s1656_s0 + $0x68] ss:$36 sps:$4 sm:$0xff]   ;;  %956 = vst [vmem:[%s1657_s3] sm:$0x1] %v1329_v26 }
  0x1e   :  { %1130 = vmatprep.subr.bf16.mxu1 %v1260_v29  ;;  %v1322_v19 = vld [vmem:[%s1655_s1 + $0x218] sm:$0xff]   ;;  %v1327_v21 = vld [vmem:[%s1656_s0 + $0x20] ss:$36 sps:$4 sm:$0xff]   ;;  %957 = vst [vmem:[%s1658_s4] sm:$0x1] %v1329_v26 }
  0x1f   :  { %v1326_v24 = vld [vmem:[%s1655_s1 + $0x238] sm:$0xff]  }
  0x20   :  { %1103 = vmatpush3.bf16.msra.mxu0 %v1261_v30 }
  0x21   :  { %1131 = vmatpush3.bf16.msra.mxu1 %v1262_v31  ;;  %1144 = vmatprep.subr.bf16.mxu0 %v1269_v36 }
  0x22   :  { %1172 = vmatprep.subr.bf16.mxu1 %v1271_v38 }
  0x23   :  { %736 = vmatmul.mubr.bf16.vlgmr.msra.gmra.mrb[0].mxu0 %v1263_v32 }
  0x24   :  { %785 = vmatmul.mubr.bf16.vlgmr.msra.gmra.mrb[0].mxu1 %v1266_v34  ;;  %1145 = vmatpush3.bf16.msra.mxu0 %v1270_v37 }
  0x25   :  { %1173 = vmatpush3.bf16.msra.mxu1 %v1272_v39  ;;  %1146 = vmatprep.subr.bf16.mxu0 %v1273_v40 }
  0x26   :  { %1174 = vmatprep.subr.bf16.mxu1 %v1275_v42  ;;  %743 = vmatprep.mubr.bf16.mxu0 %v1290_v57 }
  0x27   :  { %792 = vmatprep.mubr.bf16.mxu1 %v1292_v58 }
  0x28   :  { %1147 = vmatpush3.bf16.msra.mxu0 %v1274_v41 }
  0x29   :  { %1175 = vmatpush3.bf16.msra.mxu1 %v1276_v43  ;;  %1148 = vmatprep.subr.bf16.mxu0 %v1277_v44 }
  0x2a   :  { %1176 = vmatprep.subr.bf16.mxu1 %v1279_v46 }
  0x2b   :  { %744 = vmatmul.mubr.bf16.gmra.mrb[4].mxu0 %v1295_v60 }
  0x2c   :  { %1149 = vmatpush3.bf16.msra.mxu0 %v1278_v45  ;;  %793 = vmatmul.mubr.bf16.gmra.mrb[4].mxu1 %v1296_v61 }
  0x2d   :  { %1177 = vmatpush3.bf16.msra.mxu1 %v1280_v47  ;;  %1150 = vmatprep.subr.bf16.mxu0 %v1281_v48 }
  0x2e   :  { %1178 = vmatprep.subr.bf16.mxu1 %v1283_v50  ;;  %833 = vmatprep.mubr.bf16.mxu0 %v1308_v8 }
  0x2f   :  { %882 = vmatprep.mubr.bf16.mxu1 %v1313_v12 }
  0x30   :  { %1151 = vmatpush3.bf16.msra.mxu0 %v1282_v49 }
  0x31   :  { %1179 = vmatpush3.bf16.msra.mxu1 %v1284_v51  ;;  %1152 = vmatprep.subr.bf16.mxu0 %v1285_v52 }
  0x32   :  { %1180 = vmatprep.subr.bf16.mxu1 %v1287_v54 }
  0x34   :  { %1153 = vmatpush3.bf16.msra.mxu0 %v1286_v53 }
  0x35   :  { %1181 = vmatpush3.bf16.msra.mxu1 %v1288_v55  ;;  %1154 = vmatprep.subr.bf16.mxu0 %v1289_v56 }
  0x36   :  { %1182 = vmatprep.subr.bf16.mxu1 %v1297_v62 }
  0x38   :  { %1155 = vmatpush3.bf16.msra.mxu0 %v1294_v59 }
  0x39   :  { %1183 = vmatpush3.bf16.msra.mxu1 %v1298_v63  ;;  %1156 = vmatprep.subr.bf16.mxu0 %v1299_v0 }
  0x3a   :  { %1184 = vmatprep.subr.bf16.mxu1 %v1301_v2 }
  0x3c   :  { %1157 = vmatpush3.bf16.msra.mxu0 %v1300_v1 }
  0x3d   :  { %1185 = vmatpush3.bf16.msra.mxu1 %v1302_v3  ;;  %1158 = vmatprep.subr.bf16.mxu0 %v1303_v4 }
  0x3e   :  { %1186 = vmatprep.subr.bf16.mxu1 %v1305_v6 }
  0x40   :  { %1159 = vmatpush3.bf16.msra.mxu0 %v1304_v5 }
  0x41   :  { %1187 = vmatpush3.bf16.msra.mxu1 %v1309_v9  ;;  %1210 = vmatprep.subr.bf16.mxu0 %v1310_v10 }
  0x43   :  { %834 = vmatmul.mubr.bf16.vlgmr.msra.gmra.mrb[8].mxu0 %v1306_v7 }
  0x44   :  { %1211 = vmatpush3.bf16.msra.mxu0 %v1310_v10  ;;  %883 = vmatmul.mubr.bf16.vlgmr.msra.gmra.mrb[8].mxu1 %v1311_v11 }
  0x45   :  { %1212 = vmatprep.subr.bf16.mxu0 %v1314_v13  ;;  %841 = vmatprep.mubr.bf16.mxu0 %v1315_v14 }
  0x46   :  { %890 = vmatprep.mubr.bf16.mxu1 %v1319_v17 }
  0x48   :  { %1213 = vmatpush3.bf16.msra.mxu0 %v1314_v13 }
  0x49   :  { %1214 = vmatprep.subr.bf16.mxu0 %v1318_v16 }
  0x4b   :  { %842 = vmatmul.mubr.bf16.gmra.mrb[12].mxu0 %v1317_v15 }
  0x4c   :  { %1215 = vmatpush3.bf16.msra.mxu0 %v1318_v16  ;;  %891 = vmatmul.mubr.bf16.gmra.mrb[12].mxu1 %v1321_v18 }
  0x4d   :  { %1216 = vmatprep.subr.bf16.mxu0 %v1322_v19  ;;  %1226 = vmatprep.mubr.bf16.mxu0 %v1327_v21 }
  0x50   :  { %1217 = vmatpush3.bf16.msra.mxu0 %v1322_v19 }
  0x51   :  { %1218 = vmatprep.subr.bf16.mxu0 %v1323_v20 }
  0x54   :  { %1219 = vmatpush3.bf16.msra.mxu0 %v1323_v20 }
  0x55   :  { %1220 = vmatprep.subr.bf16.mxu0 %v1324_v22 }
  0x58   :  { %1221 = vmatpush3.bf16.msra.mxu0 %v1324_v22 }
  0x59   :  { %1222 = vmatprep.subr.bf16.mxu0 %v1325_v23 }
  0x5c   :  { %1223 = vmatpush3.bf16.msra.mxu0 %v1325_v23 }
  0x5d   :  { %1224 = vmatprep.subr.bf16.mxu0 %v1326_v24 }
  0x60   :  { %1225 = vmatpush3.bf16.msra.mxu0 %v1326_v24 }
  0x63   :  { %1227 = vmatmul.mubr.bf16.vlgmr.msra.gmra.mrb[16].mxu0 %v1328_v25 }
  0xf6   :  { %v1104_v27 = vpop.f32.mrb[0].mxu0 }
  0xf7   :  { %v1132_v28 = vpop.f32.mrb[0].mxu1  ;;  %v1105_v29 = vpop.f32.mrb[1].mxu0 }
  0xf8   :  { %v1106_v30 = vadd.f32 %v1105_v29, %v1104_v27  ;;  %v1133_v31 = vpop.f32.mrb[1].mxu1  ;;  %v1107_v32 = vpop.f32.mrb[2].mxu0 }
  0xf9   :  { %v1134_v33 = vadd.f32 %v1133_v31, %v1132_v28  ;;  %v1135_v34 = vpop.f32.mrb[2].mxu1  ;;  %v1108_v35 = vpop.f32.mrb[3].mxu0 }
  0xfa   :  { %v1109_v36 = vadd.f32 %v1108_v35, %v1107_v32  ;;  %v1136_v37 = vpop.f32.mrb[3].mxu1 }
  0xfb   :  { %v787_v38 = vadd.f32 %v1134_v33, %v1106_v30  ;;  %v1137_v39 = vadd.f32 %v1136_v37, %v1135_v34 }
  0xfd   :  { %v790_v40 = vadd.f32 %v1137_v39, %v1109_v36 }
  0xfe   :  { %v1110_v41 = vpop.f32.mrb[4].mxu0 }
  0xff   :  { %v1138_v42 = vpop.f32.mrb[4].mxu1  ;;  %v1111_v43 = vpop.f32.mrb[5].mxu0 }
 0x100   :  { %v1139_v44 = vpop.f32.mrb[5].mxu1  ;;  %v1112_v45 = vadd.f32 %v1111_v43, %v1110_v41  ;;  %v1113_v47 = vpop.f32.mrb[6].mxu0 }
 0x101   :  { %v1140_v46 = vadd.f32 %v1139_v44, %v1138_v42  ;;  %v1141_v48 = vpop.f32.mrb[6].mxu1  ;;  %v1114_v49 = vpop.f32.mrb[7].mxu0 }
 0x102   :  { %v1142_v50 = vpop.f32.mrb[7].mxu1  ;;  %v1115_v52 = vadd.f32 %v1114_v49, %v1113_v47 }
 0x103   :  { %v795_v51 = vadd.f32 %v1140_v46, %v1112_v45  ;;  %v1143_v53 = vadd.f32 %v1142_v50, %v1141_v48  ;;  %v958_v50 = vld [vmem:[%s1657_s3] sm:$0x1] }
 0x105   :  { %v798_v54 = vadd.f32 %v1143_v53, %v1115_v52  ;;  %v970_v53 = vld [vmem:[%s1658_s4] sm:$0x1] }
 0x116   :  { %v1160_v55 = vpop.f32.mrb[8].mxu0 }
 0x117   :  { %v1161_v56 = vpop.f32.mrb[9].mxu0  ;;  %v1188_v59 = vpop.f32.mrb[8].mxu1 }
 0x118   :  { %v1162_v57 = vadd.f32 %v1161_v56, %v1160_v55  ;;  %v1163_v58 = vpop.f32.mrb[10].mxu0  ;;  %v1189_v63 = vpop.f32.mrb[9].mxu1 }
 0x119   :  { %v1164_v60 = vpop.f32.mrb[11].mxu0  ;;  %v1190_v0 = vadd.f32 %v1189_v63, %v1188_v59  ;;  %v1191_v1 = vpop.f32.mrb[10].mxu1 }
 0x11a   :  { %v836_v61 = vadd.f32 %v1162_v57, %v787_v38  ;;  %v1165_v62 = vadd.f32 %v1164_v60, %v1163_v58  ;;  %v1192_v3 = vpop.f32.mrb[11].mxu1 }
 0x11b   :  { %v1193_v4 = vadd.f32 %v1192_v3, %v1191_v1 }
 0x11c   :  { %v839_v2 = vadd.f32 %v1165_v62, %v790_v40  ;;  %v885_v5 = vadd.f32 %v1190_v0, %v836_v61 }
 0x11e   :  { %v1166_v6 = vpop.f32.mrb[12].mxu0  ;;  %v888_v8 = vadd.f32 %v1193_v4, %v839_v2 }
 0x11f   :  { %v1167_v7 = vpop.f32.mrb[13].mxu0  ;;  %v1194_v11 = vpop.f32.mrb[12].mxu1 }
 0x120   :  { %v1168_v9 = vadd.f32 %v1167_v7, %v1166_v6  ;;  %v1169_v10 = vpop.f32.mrb[14].mxu0  ;;  %v1195_v15 = vpop.f32.mrb[13].mxu1 }
 0x121   :  { %v1170_v12 = vpop.f32.mrb[15].mxu0  ;;  %v1196_v16 = vadd.f32 %v1195_v15, %v1194_v11  ;;  %v1197_v17 = vpop.f32.mrb[14].mxu1 }
 0x122   :  { %v844_v13 = vadd.f32 %v1168_v9, %v795_v51  ;;  %v1171_v14 = vadd.f32 %v1170_v12, %v1169_v10  ;;  %v1198_v19 = vpop.f32.mrb[15].mxu1 }
 0x123   :  { %v1199_v20 = vadd.f32 %v1198_v19, %v1197_v17 }
 0x124   :  { %v847_v18 = vadd.f32 %v1171_v14, %v798_v54  ;;  %v893_v21 = vadd.f32 %v1196_v16, %v844_v13 }
 0x126   :  { %v896_v22 = vadd.f32 %v1199_v20, %v847_v18 }
 0x136   :  { %v1228_v23 = vpop.f32.mrb[16].mxu0 }
 0x137   :  { %v942_v24 = vadd.f32 %v1228_v23, %v893_v21  ;;  %v933_v25 = vpop.f32.mrb[17].mxu0 }
 0x138   :  { %v934_v26 = vadd.f32 %v933_v25, %v885_v5  ;;  %v1229_v27 = vpop.f32.mrb[18].mxu0 }
 0x139   :  { %950 = vst [vmem:[%s1659_s2 + $0x10] sm:$0xff] %v942_v24  ;;  %v945_v28 = vadd.f32 %v1229_v27, %v896_v22  ;;  %v936_v29 = vpop.f32.mrb[19].mxu0  ;;  %v973_v34 = vmul.f32 %v942_v24, %v942_v24 }
 0x13a   :  { %948 = vst [vmem:[%s1659_s2] sm:$0xff] %v934_v26  ;;  %v937_v30 = vadd.f32 %v936_v29, %v888_v8  ;;  %v971_v31 = vmul.f32 %v934_v26, %v934_v26 }
 0x13b   :  { %951 = vst [vmem:[%s1659_s2 + $0x18] sm:$0xff] %v945_v28  ;;  %v974_v37 = vmul.f32 %v945_v28, %v945_v28 }
 0x13c   :  { %949 = vst [vmem:[%s1659_s2 + $0x8] sm:$0xff] %v937_v30  ;;  %v959_v32 = vadd.f32 %v937_v30, %v934_v26  ;;  %v972_v33 = vmul.f32 %v937_v30, %v937_v30 }
 0x13e   :  { %v960_v35 = vadd.f32 %v959_v32, %v942_v24  ;;  %v975_v36 = vadd.f32 %v972_v33, %v971_v31 }
 0x140   :  { %v961_v38 = vadd.f32 %v960_v35, %v945_v28  ;;  %v976_v39 = vadd.f32 %v975_v36, %v973_v34 }
 0x142   :  { %v962_v40 = vrot.slane %v961_v38, 4  ;;  %v977_v41 = vadd.f32 %v976_v39, %v974_v37 }
 0x144   :  { %v963_v42 = vadd.f32 %v962_v40, %v961_v38  ;;  %v978_v43 = vrot.slane %v977_v41, 4 }
 0x146   :  { %v964_v44 = vrot.slane %v963_v42, 2  ;;  %v979_v45 = vadd.f32 %v978_v43, %v977_v41 }
 0x148   :  { %v965_v46 = vadd.f32 %v964_v44, %v963_v42  ;;  %v980_v47 = vrot.slane %v979_v45, 2 }
 0x14a   :  { %v966_v48 = vrot.slane %v965_v46, 1  ;;  %v981_v49 = vadd.f32 %v980_v47, %v979_v45 }
 0x14c   :  { %v967_v51 = vadd.f32 %v966_v48, %v965_v46  ;;  %v982_v52 = vrot.slane %v981_v49, 1 }
 0x14e   :  { %v968_v54 = vadd.f32 %v967_v51, %v958_v50  ;;  %v983_v55 = vadd.f32 %v982_v52, %v981_v49 }
 0x150   :  { %969 = vst [vmem:[%s1657_s3] sm:$0x1] %v968_v54  ;;  %v984_v56 = vadd.f32 %v983_v55, %v970_v53 }
 0x152   :  { %985 = vst [vmem:[%s1658_s4] sm:$0x1] %v984_v56 }

// kernel: resnet_forward.70
= control target key start
LH: loop header
LB: loop body
LE: loop exit
PB: predicated region body
PF: predicated region fallthrough
CT: control target
= control target key end

     0   :  { %vm92_vm0 = vcmask 523264   ;;  %s271_s0 = inlined_call_operand.vmem [shape: f32[128,64], index: 0, kind: input, shape index: {}]   ;;  %s272_s1 = inlined_call_operand.vmem [shape: f32[1,64], index: 1, kind: input, shape index: {}]   ;;  %s273_s2 = inlined_call_operand.vmem [shape: f32[1,64], index: 2, kind: input, shape index: {}]   ;;  %s274_s3 = inlined_call_operand.vmem [shape: f32[128,64], index: 3, kind: output, shape index: {}]  }
   0x1   :  { %v14_v0 = vld [vmem:[%s271_s0] sm:$0xff]  ;;  %v15_v4 = vld [vmem:[%s271_s0 + $0x8] sm:$0xff]  ;;  %v16_v5 = vld [vmem:[%s271_s0 + $0x10] sm:$0xff] }
   0x2   :  { %v113_v1 = vld [vmem:[%s272_s1] ss:$0 sm:$0xff]  ;;  %v17_v6 = vld [vmem:[%s271_s0 + $0x18] sm:$0xff]  ;;  %v19_v11 = vld [vmem:[%s271_s0 + $0x28] sm:$0xff] }
   0x3   :  { %v144_v2 = vld [vmem:[%s273_s2] ss:$0 sm:$0xff]  ;;  %v37_v3 = vmul.f32 %v113_v1, %v14_v0  ;;  %v38_v7 = vmul.f32 %v113_v1, %v15_v4  ;;  %v39_v8 = vmul.f32 %v113_v1, %v16_v5  ;;  %v40_v9 = vmul.f32 %v113_v1, %v17_v6  ;;  %v20_v12 = vld [vmem:[%s271_s0 + $0x30] sm:$0xff]  ;;  %v21_v17 = vld [vmem:[%s271_s0 + $0x38] sm:$0xff] }
   0x4   :  { %v18_v10 = vld [vmem:[%s271_s0 + $0x20] sm:$0xff]  ;;  %v42_v15 = vmul.f32 %v113_v1, %v19_v11  ;;  %v43_v16 = vmul.f32 %v113_v1, %v20_v12  ;;  %v44_v21 = vmul.f32 %v113_v1, %v21_v17  ;;  %v23_v27 = vld [vmem:[%s271_s0 + $0x48] sm:$0xff]  ;;  %v24_v28 = vld [vmem:[%s271_s0 + $0x50] sm:$0xff] }
   0x5   :  { %v60_v13 = vadd.f32 %v144_v2, %v37_v3  ;;  %v41_v14 = vmul.f32 %v113_v1, %v18_v10  ;;  %v61_v18 = vadd.f32 %v144_v2, %v38_v7  ;;  %v62_v19 = vadd.f32 %v144_v2, %v39_v8  ;;  %v22_v22 = vld [vmem:[%s271_s0 + $0x40] sm:$0xff]  ;;  %v25_v29 = vld [vmem:[%s271_s0 + $0x58] sm:$0xff]  ;;  %v27_v35 = vld [vmem:[%s271_s0 + $0x68] sm:$0xff] }
   0x6   :  { %v63_v20 = vadd.f32 %v144_v2, %v40_v9  ;;  %v65_v25 = vadd.f32 %v144_v2, %v42_v15  ;;  %v66_v26 = vadd.f32 %v144_v2, %v43_v16  ;;  %v67_v33 = vadd.f32 %v144_v2, %v44_v21  ;;  %v26_v34 = vld [vmem:[%s271_s0 + $0x60] sm:$0xff]  ;;  %v28_v36 = vld [vmem:[%s271_s0 + $0x70] sm:$0xff]  ;;  %v29_v41 = vld [vmem:[%s271_s0 + $0x78] sm:$0xff] }
   0x7   :  { %v76_v23 = vmax.f32 %v60_v13, 0.0  ;;  %v64_v24 = vadd.f32 %v144_v2, %v41_v14  ;;  %v77_v30 = vmax.f32 %v61_v18, 0.0  ;;  %v78_v31 = vmax.f32 %v62_v19, 0.0 }
   0x8   :  { %v79_v32 = vmax.f32 %v63_v20, 0.0  ;;  %v81_v38 = vmax.f32 %v65_v25, 0.0  ;;  %v82_v39 = vmax.f32 %v66_v26, 0.0  ;;  %v45_v40 = vmul.f32 %v113_v1, %v22_v22 }
   0x9   :  { %93 = vst.msk [vmem:[%s274_s3] sm:$0xff] %vm92_vm0, %v76_v23  ;;  %v80_v37 = vmax.f32 %v64_v24, 0.0  ;;  %94 = vst.msk [vmem:[%s274_s3 + $0x8] sm:$0xff] %vm92_vm0, %v77_v30  ;;  %v83_v42 = vmax.f32 %v67_v33, 0.0  ;;  %v46_v43 = vmul.f32 %v113_v1, %v23_v27  ;;  %v47_v44 = vmul.f32 %v113_v1, %v24_v28 }
   0xa   :  { %95 = vst.msk [vmem:[%s274_s3 + $0x10] sm:$0xff] %vm92_vm0, %v78_v31  ;;  %96 = vst.msk [vmem:[%s274_s3 + $0x18] sm:$0xff] %vm92_vm0, %v79_v32  ;;  %v48_v45 = vmul.f32 %v113_v1, %v25_v29  ;;  %v68_v46 = vadd.f32 %v144_v2, %v45_v40  ;;  %v49_v47 = vmul.f32 %v113_v1, %v26_v34 }
   0xb   :  { %97 = vst.msk [vmem:[%s274_s3 + $0x20] sm:$0xff] %vm92_vm0, %v80_v37  ;;  %98 = vst.msk [vmem:[%s274_s3 + $0x28] sm:$0xff] %vm92_vm0, %v81_v38  ;;  %v50_v48 = vmul.f32 %v113_v1, %v27_v35  ;;  %v51_v49 = vmul.f32 %v113_v1, %v28_v36  ;;  %v69_v50 = vadd.f32 %v144_v2, %v46_v43 }
   0xc   :  { %99 = vst.msk [vmem:[%s274_s3 + $0x30] sm:$0xff] %vm92_vm0, %v82_v39  ;;  %100 = vst.msk [vmem:[%s274_s3 + $0x38] sm:$0xff] %vm92_vm0, %v83_v42  ;;  %v70_v51 = vadd.f32 %v144_v2, %v47_v44  ;;  %v71_v52 = vadd.f32 %v144_v2, %v48_v45  ;;  %v52_v53 = vmul.f32 %v113_v1, %v29_v41  ;;  %v84_v54 = vmax.f32 %v68_v46, 0.0 }
   0xd   :  { %v72_v55 = vadd.f32 %v144_v2, %v49_v47  ;;  %v73_v56 = vadd.f32 %v144_v2, %v50_v48  ;;  %v74_v57 = vadd.f32 %v144_v2, %v51_v49  ;;  %v85_v58 = vmax.f32 %v69_v50, 0.0 }
   0xe   :  { %v86_v59 = vmax.f32 %v70_v51, 0.0  ;;  %v87_v60 = vmax.f32 %v71_v52, 0.0  ;;  %v75_v61 = vadd.f32 %v144_v2, %v52_v53  ;;  %101 = vst.msk [vmem:[%s274_s3 + $0x40] sm:$0xff] %vm92_vm0, %v84_v54 }
   0xf   :  { %v88_v62 = vmax.f32 %v72_v55, 0.0  ;;  %v89_v63 = vmax.f32 %v73_v56, 0.0  ;;  %v90_v0 = vmax.f32 %v74_v57, 0.0  ;;  %102 = vst.msk [vmem:[%s274_s3 + $0x48] sm:$0xff] %vm92_vm0, %v85_v58 }
  0x10   :  { %103 = vst.msk [vmem:[%s274_s3 + $0x50] sm:$0xff] %vm92_vm0, %v86_v59  ;;  %104 = vst.msk [vmem:[%s274_s3 + $0x58] sm:$0xff] %vm92_vm0, %v87_v60  ;;  %v91_v1 = vmax.f32 %v75_v61, 0.0 }
  0x11   :  { %105 = vst.msk [vmem:[%s274_s3 + $0x60] sm:$0xff] %vm92_vm0, %v88_v62  ;;  %106 = vst.msk [vmem:[%s274_s3 + $0x68] sm:$0xff] %vm92_vm0, %v89_v63 }
  0x12   :  { %107 = vst.msk [vmem:[%s274_s3 + $0x70] sm:$0xff] %vm92_vm0, %v90_v0  ;;  %108 = vst.msk [vmem:[%s274_s3 + $0x78] sm:$0xff] %vm92_vm0, %v91_v1 }

// kernel: resnet_forward.69
= control target key start
LH: loop header
LB: loop body
LE: loop exit
PB: predicated region body
PF: predicated region fallthrough
CT: control target
= control target key end

     0   :  { %s2877_s1 = inlined_call_operand.vmem [shape: bf16[1152,128], index: 1, kind: input, shape index: {}]   ;;  %s2878_s0 = inlined_call_operand.vmem [shape: bf16[128,1152], index: 0, kind: input, shape index: {}]   ;;  %s2879_s3 = inlined_call_operand.vmem [shape: f32[1,128], index: 3, kind: output, shape index: {1}]   ;;  %s2880_s4 = inlined_call_operand.vmem [shape: f32[1,128], index: 4, kind: output, shape index: {2}]   ;;  %s2881_s2 = inlined_call_operand.vmem [shape: f32[128,128], index: 2, kind: output, shape index: {0}]  }
   0x1   :  { %v2087_v0 = vld [vmem:[%s2877_s1 + $0x40] sm:$0xff]   ;;  %v2091_v4 = vld [vmem:[%s2877_s1 + $0x48] sm:$0xff]   ;;  %v2095_v8 = vld [vmem:[%s2877_s1 + $0x50] sm:$0xff]  }
   0x2   :  { %v2088_v1 = vld [vmem:[%s2877_s1 + $0xc0] sm:$0xff]   ;;  %1766 = vmatprep.subr.bf16.mxu0 %v2087_v0  ;;  %v2092_v5 = vld [vmem:[%s2877_s1 + $0xc8] sm:$0xff]   ;;  %v2096_v9 = vld [vmem:[%s2877_s1 + $0xd0] sm:$0xff]  }
   0x3   :  { %v2089_v2 = vld [vmem:[%s2877_s1] sm:$0xff]   ;;  %1830 = vmatprep.subr.bf16.mxu1 %v2088_v1  ;;  %v2093_v6 = vld [vmem:[%s2877_s1 + $0x8] sm:$0xff]   ;;  %v2097_v10 = vld [vmem:[%s2877_s1 + $0x10] sm:$0xff]  }
   0x4   :  { %v2090_v3 = vld [vmem:[%s2877_s1 + $0x80] sm:$0xff]   ;;  %1767 = vmatpush3.bf16.msra.mxu0 %v2089_v2  ;;  %v2094_v7 = vld [vmem:[%s2877_s1 + $0x88] sm:$0xff]   ;;  %v2098_v11 = vld [vmem:[%s2877_s1 + $0x90] sm:$0xff]  }
   0x5   :  { %1831 = vmatpush3.bf16.msra.mxu1 %v2090_v3  ;;  %1768 = vmatprep.subr.bf16.mxu0 %v2091_v4  ;;  %v2099_v12 = vld [vmem:[%s2877_s1 + $0x58] sm:$0xff]   ;;  %v2103_v16 = vld [vmem:[%s2877_s1 + $0x60] sm:$0xff]   ;;  %v2107_v20 = vld [vmem:[%s2877_s1 + $0x68] sm:$0xff]  }
   0x6   :  { %1832 = vmatprep.subr.bf16.mxu1 %v2092_v5  ;;  %v2100_v13 = vld [vmem:[%s2877_s1 + $0xd8] sm:$0xff]   ;;  %v2104_v17 = vld [vmem:[%s2877_s1 + $0xe0] sm:$0xff]   ;;  %v2108_v21 = vld [vmem:[%s2877_s1 + $0xe8] sm:$0xff]  }
   0x7   :  { %v2101_v14 = vld [vmem:[%s2877_s1 + $0x18] sm:$0xff]   ;;  %v2105_v18 = vld [vmem:[%s2877_s1 + $0x20] sm:$0xff]   ;;  %v2109_v22 = vld [vmem:[%s2877_s1 + $0x28] sm:$0xff]  }
   0x8   :  { %1769 = vmatpush3.bf16.msra.mxu0 %v2093_v6  ;;  %v2102_v15 = vld [vmem:[%s2877_s1 + $0x98] sm:$0xff]   ;;  %v2106_v19 = vld [vmem:[%s2877_s1 + $0xa0] sm:$0xff]   ;;  %v2110_v23 = vld [vmem:[%s2877_s1 + $0xa8] sm:$0xff]  }
   0x9   :  { %1833 = vmatpush3.bf16.msra.mxu1 %v2094_v7  ;;  %1770 = vmatprep.subr.bf16.mxu0 %v2095_v8  ;;  %v2111_v24 = vld [vmem:[%s2877_s1 + $0x70] sm:$0xff]   ;;  %v2115_v28 = vld [vmem:[%s2877_s1 + $0x78] sm:$0xff]   ;;  %v2119_v32 = vld [vmem:[%s2878_s0] ss:$36 sps:$4 sm:$0xff]  }
   0xa   :  { %1834 = vmatprep.subr.bf16.mxu1 %v2096_v9  ;;  %v2112_v25 = vld [vmem:[%s2877_s1 + $0xf0] sm:$0xff]   ;;  %v2116_v29 = vld [vmem:[%s2877_s1 + $0xf8] sm:$0xff]   ;;  %v2121_v33 = vld [vmem:[%s2878_s0 + $0x4] ss:$36 sps:$4 sm:$0xff]  }
   0xb   :  { %v2113_v26 = vld [vmem:[%s2877_s1 + $0x30] sm:$0xff]   ;;  %v2117_v30 = vld [vmem:[%s2877_s1 + $0x38] sm:$0xff]   ;;  %v2122_v34 = vld [vmem:[%s2878_s0 + $0x8] ss:$36 sps:$4 sm:$0xff]   ;;  %1071 = vmatprep.mubr.bf16.mxu0 %v2121_v33 }
   0xc   :  { %1771 = vmatpush3.bf16.msra.mxu0 %v2097_v10  ;;  %v2114_v27 = vld [vmem:[%s2877_s1 + $0xb0] sm:$0xff]   ;;  %v2118_v31 = vld [vmem:[%s2877_s1 + $0xb8] sm:$0xff]   ;;  %v2125_v36 = vld [vmem:[%s2877_s1 + $0x140] sm:$0xff]  }
   0xd   :  { %1835 = vmatpush3.bf16.msra.mxu1 %v2098_v11  ;;  %1772 = vmatprep.subr.bf16.mxu0 %v2099_v12  ;;  %v2124_v35 = vld [vmem:[%s2878_s0 + $0xc] ss:$36 sps:$4 sm:$0xff]   ;;  %v2126_v37 = vld [vmem:[%s2877_s1 + $0x100] sm:$0xff]   ;;  %v2129_v39 = vld [vmem:[%s2878_s0 + $0x54] ss:$36 sps:$4 sm:$0xff]  }
   0xe   :  { %1836 = vmatprep.subr.bf16.mxu1 %v2100_v13  ;;  %1168 = vmatprep.mubr.bf16.mxu1 %v2124_v35  ;;  %v2127_v38 = vld [vmem:[%s2878_s0 + $0x4c] ss:$36 sps:$4 sm:$0xff]   ;;  %v2135_v44 = vld [vmem:[%s2878_s0 + $0x94] ss:$36 sps:$4 sm:$0xff]   ;;  %v2137_v45 = vld [vmem:[%s2878_s0 + $0x9c] ss:$36 sps:$4 sm:$0xff]  }
   0xf   :  { %v2131_v40 = vld [vmem:[%s2878_s0 + $0x48] ss:$36 sps:$4 sm:$0xff]   ;;  %v2132_v41 = vld [vmem:[%s2878_s0 + $0x50] ss:$36 sps:$4 sm:$0xff]   ;;  %v2142_v47 = vld [vmem:[%s2877_s1 + $0x1c0] sm:$0xff]  }
  0x10   :  { %1773 = vmatpush3.bf16.msra.mxu0 %v2101_v14  ;;  %v2133_v42 = vld [vmem:[%s2877_s1 + $0x148] sm:$0xff]   ;;  %v2141_v46 = vld [vmem:[%s2877_s1 + $0x150] sm:$0xff]   ;;  %v2144_v50 = vld [vmem:[%s2877_s1 + $0x180] sm:$0xff]  }
  0x11   :  { %1837 = vmatpush3.bf16.msra.mxu1 %v2102_v15  ;;  %1774 = vmatprep.subr.bf16.mxu0 %v2103_v16  ;;  %v2134_v43 = vld [vmem:[%s2877_s1 + $0x108] sm:$0xff]   ;;  %v2139_v48 = vld [vmem:[%s2878_s0 + $0x90] ss:$36 sps:$4 sm:$0xff]   ;;  %v2140_v51 = vld [vmem:[%s2878_s0 + $0x98] ss:$36 sps:$4 sm:$0xff]  }
  0x12   :  { %1838 = vmatprep.subr.bf16.mxu1 %v2104_v17  ;;  %v2143_v49 = vld [vmem:[%s2877_s1 + $0x110] sm:$0xff]   ;;  %v2145_v52 = vld [vmem:[%s2878_s0 + $0xdc] ss:$36 sps:$4 sm:$0xff]   ;;  %v2147_v53 = vld [vmem:[%s2878_s0 + $0xe4] ss:$36 sps:$4 sm:$0xff]  }
  0x13   :  { %v2151_v54 = vld [vmem:[%s2877_s1 + $0x158] sm:$0xff]   ;;  %v2152_v55 = vld [vmem:[%s2877_s1 + $0x1c8] sm:$0xff]   ;;  %v2150_v59 = vld [vmem:[%s2878_s0 + $0xe0] ss:$36 sps:$4 sm:$0xff]  }
  0x14   :  { %1775 = vmatpush3.bf16.msra.mxu0 %v2105_v18  ;;  %v2153_v56 = vld [vmem:[%s2877_s1 + $0x118] sm:$0xff]   ;;  %v2154_v57 = vld [vmem:[%s2877_s1 + $0x188] sm:$0xff]   ;;  %v2161_v62 = vld [vmem:[%s2877_s1 + $0x160] sm:$0xff]  }
  0x15   :  { %1839 = vmatpush3.bf16.msra.mxu1 %v2106_v19  ;;  %1776 = vmatprep.subr.bf16.mxu0 %v2107_v20  ;;  %v2149_v58 = vld [vmem:[%s2878_s0 + $0xd8] ss:$36 sps:$4 sm:$0xff]   ;;  %v2155_v60 = vld [vmem:[%s2878_s0 + $0x124] ss:$36 sps:$4 sm:$0xff]   ;;  %v2157_v61 = vld [vmem:[%s2878_s0 + $0x12c] ss:$36 sps:$4 sm:$0xff]  }
  0x16   :  { %1840 = vmatprep.subr.bf16.mxu1 %v2108_v21  ;;  %v2162_v63 = vld [vmem:[%s2877_s1 + $0x1d0] sm:$0xff]   ;;  %v2163_v0 = vld [vmem:[%s2877_s1 + $0x120] sm:$0xff]   ;;  %v2160_v3 = vld [vmem:[%s2878_s0 + $0x128] ss:$36 sps:$4 sm:$0xff]  }
  0x17   :  { %v2164_v1 = vld [vmem:[%s2877_s1 + $0x190] sm:$0xff]   ;;  %v2159_v2 = vld [vmem:[%s2878_s0 + $0x120] ss:$36 sps:$4 sm:$0xff]   ;;  %v2171_v6 = vld [vmem:[%s2877_s1 + $0x168] sm:$0xff]  }
  0x18   :  { %1777 = vmatpush3.bf16.msra.mxu0 %v2109_v22  ;;  %v2165_v4 = vld [vmem:[%s2878_s0 + $0x16c] ss:$36 sps:$4 sm:$0xff]   ;;  %v2167_v5 = vld [vmem:[%s2878_s0 + $0x174] ss:$36 sps:$4 sm:$0xff]   ;;  %v2177_v14 = vld [vmem:[%s2878_s0 + $0x1bc] ss:$36 sps:$4 sm:$0xff]  }
  0x19   :  { %1841 = vmatpush3.bf16.msra.mxu1 %v2110_v23  ;;  %1778 = vmatprep.subr.bf16.mxu0 %v2111_v24  ;;  %v2172_v7 = vld [vmem:[%s2877_s1 + $0x1d8] sm:$0xff]   ;;  %v2173_v8 = vld [vmem:[%s2877_s1 + $0x128] sm:$0xff]   ;;  %v2170_v11 = vld [vmem:[%s2878_s0 + $0x170] ss:$36 sps:$4 sm:$0xff]  }
  0x1a   :  { %1842 = vmatprep.subr.bf16.mxu1 %v2112_v25  ;;  %v2174_v9 = vld [vmem:[%s2877_s1 + $0x198] sm:$0xff]   ;;  %v2169_v10 = vld [vmem:[%s2878_s0 + $0x168] ss:$36 sps:$4 sm:$0xff]   ;;  %v2181_v13 = vld [vmem:[%s2877_s1 + $0x170] sm:$0xff]  }
  0x1b   :  { %v2175_v12 = vld [vmem:[%s2878_s0 + $0x1b4] ss:$36 sps:$4 sm:$0xff]   ;;  %v2182_v15 = vld [vmem:[%s2877_s1 + $0x1e0] sm:$0xff]   ;;  %v2185_v18 = vld [vmem:[%s2877_s1 + $0x1e8] sm:$0xff]  }
  0x1c   :  { %1779 = vmatpush3.bf16.msra.mxu0 %v2113_v26  ;;  %v2183_v16 = vld [vmem:[%s2877_s1 + $0x130] sm:$0xff]   ;;  %v2184_v17 = vld [vmem:[%s2877_s1 + $0x1a0] sm:$0xff]   ;;  %v2186_v19 = vld [vmem:[%s2877_s1 + $0x1a8] sm:$0xff]  }
  0x1d   :  { %1843 = vmatpush3.bf16.msra.mxu1 %v2114_v27  ;;  %1780 = vmatprep.subr.bf16.mxu0 %v2115_v28  ;;  %v2179_v20 = vld [vmem:[%s2878_s0 + $0x1b0] ss:$36 sps:$4 sm:$0xff]   ;;  %v2180_v21 = vld [vmem:[%s2878_s0 + $0x1b8] ss:$36 sps:$4 sm:$0xff]   ;;  %v2189_v23 = vld [vmem:[%s2878_s0 + $0x204] ss:$36 sps:$4 sm:$0xff]  }
  0x1e   :  { %1844 = vmatprep.subr.bf16.mxu1 %v2116_v29  ;;  %v2187_v22 = vld [vmem:[%s2878_s0 + $0x1fc] ss:$36 sps:$4 sm:$0xff]   ;;  %v2194_v25 = vld [vmem:[%s2877_s1 + $0x1f0] sm:$0xff]  }
  0x1f   :  { %v2193_v24 = vld [vmem:[%s2877_s1 + $0x178] sm:$0xff]   ;;  %v2196_v27 = vld [vmem:[%s2877_s1 + $0x1b0] sm:$0xff]  }
  0x20   :  { %1781 = vmatpush3.bf16.msra.mxu0 %v2117_v30  ;;  %v2195_v26 = vld [vmem:[%s2877_s1 + $0x138] sm:$0xff]   ;;  %v2192_v30 = vld [vmem:[%s2878_s0 + $0x200] ss:$36 sps:$4 sm:$0xff]   ;;  %v2199_v35 = vld [vmem:[%s2878_s0 + $0x10] ss:$36 sps:$4 sm:$0xff]  }
  0x21   :  { %1845 = vmatpush3.bf16.msra.mxu1 %v2118_v31  ;;  %1894 = vmatprep.subr.bf16.mxu0 %v2125_v36  ;;  %v2197_v28 = vld [vmem:[%s2877_s1 + $0x1f8] sm:$0xff]  }
  0x22   :  { %1958 = vmatprep.subr.bf16.mxu1 %v2142_v47  ;;  %v2191_v29 = vld [vmem:[%s2878_s0 + $0x1f8] ss:$36 sps:$4 sm:$0xff]   ;;  %v2217_v47 = vld [vmem:[%s2878_s0 + $0xa0] ss:$36 sps:$4 sm:$0xff]  }
  0x23   :  { %1072 = vmatmul.mubr.bf16.vlgmr.msra.gmra.mrb[0].mxu0 %v2119_v32  ;;  %v2198_v31 = vld [vmem:[%s2877_s1 + $0x1b8] sm:$0xff]   ;;  %v2205_v32 = vld [vmem:[%s2877_s1 + $0x200] sm:$0xff]  }
  0x24   :  { %1169 = vmatmul.mubr.bf16.vlgmr.msra.gmra.mrb[0].mxu1 %v2122_v34  ;;  %1895 = vmatpush3.bf16.msra.mxu0 %v2126_v37  ;;  %v2201_v33 = vld [vmem:[%s2878_s0 + $0x14] ss:$36 sps:$4 sm:$0xff]   ;;  %v2204_v34 = vld [vmem:[%s2878_s0 + $0x1c] ss:$36 sps:$4 sm:$0xff]  }
  0x25   :  { %1079 = vmatprep.mubr.bf16.mxu0 %v2127_v38  ;;  %1176 = vmatprep.mubr.bf16.mxu1 %v2129_v39  ;;  %v2202_v36 = vld [vmem:[%s2878_s0 + $0x18] ss:$36 sps:$4 sm:$0xff]   ;;  %v2208_v38 = vld [vmem:[%s2878_s0 + $0x64] ss:$36 sps:$4 sm:$0xff]  }
  0x26   :  { %1896 = vmatprep.subr.bf16.mxu0 %v2133_v42  ;;  %1959 = vmatpush3.bf16.msra.mxu1 %v2144_v50  ;;  %v2206_v37 = vld [vmem:[%s2878_s0 + $0x5c] ss:$36 sps:$4 sm:$0xff]   ;;  %v2212_v39 = vld [vmem:[%s2877_s1 + $0x208] sm:$0xff]   ;;  %v2222_v50 = vld [vmem:[%s2878_s0 + $0xf4] ss:$36 sps:$4 sm:$0xff]  }
  0x27   :  { %1960 = vmatprep.subr.bf16.mxu1 %v2152_v55  ;;  %v2211_v42 = vld [vmem:[%s2878_s0 + $0x60] ss:$36 sps:$4 sm:$0xff]   ;;  %v2227_v55 = vld [vmem:[%s2878_s0 + $0x134] ss:$36 sps:$4 sm:$0xff]  }
  0x28   :  { %1897 = vmatpush3.bf16.msra.mxu0 %v2134_v43  ;;  %v2213_v43 = vld [vmem:[%s2878_s0 + $0xa4] ss:$36 sps:$4 sm:$0xff]  }
  0x29   :  { %1898 = vmatprep.subr.bf16.mxu0 %v2141_v46  ;;  %v2233_v46 = vld [vmem:[%s2877_s1 + $0x220] sm:$0xff]  }
  0x2a   :  { %1961 = vmatpush3.bf16.msra.mxu1 %v2154_v57  ;;  %v2254_v57 = vld [vmem:[%s2877_s1 + $0x238] sm:$0xff]  }
  0x2b   :  { %1080 = vmatmul.mubr.bf16.gmra.mrb[4].mxu0 %v2131_v40  ;;  %1962 = vmatprep.subr.bf16.mxu1 %v2162_v63  ;;  %v2219_v40 = vld [vmem:[%s2877_s1 + $0x210] sm:$0xff]   ;;  %v2239_v63 = vld [vmem:[%s2878_s0 + $0x180] ss:$36 sps:$4 sm:$0xff]  }
  0x2c   :  { %1177 = vmatmul.mubr.bf16.gmra.mrb[4].mxu1 %v2132_v41  ;;  %1087 = vmatprep.mubr.bf16.mxu0 %v2135_v44  ;;  %v2210_v41 = vld [vmem:[%s2878_s0 + $0x58] ss:$36 sps:$4 sm:$0xff]   ;;  %v2215_v44 = vld [vmem:[%s2878_s0 + $0xac] ss:$36 sps:$4 sm:$0xff]  }
  0x2d   :  { %1184 = vmatprep.mubr.bf16.mxu1 %v2137_v45  ;;  %1899 = vmatpush3.bf16.msra.mxu0 %v2143_v49  ;;  %v2226_v45 = vld [vmem:[%s2877_s1 + $0x218] sm:$0xff]   ;;  %v2220_v49 = vld [vmem:[%s2878_s0 + $0xec] ss:$36 sps:$4 sm:$0xff]  }
  0x2e   :  { %1900 = vmatprep.subr.bf16.mxu0 %v2151_v54  ;;  %1963 = vmatpush3.bf16.msra.mxu1 %v2164_v1  ;;  %v2225_v54 = vld [vmem:[%s2878_s0 + $0xf0] ss:$36 sps:$4 sm:$0xff]  }
  0x2f   :  { %1964 = vmatprep.subr.bf16.mxu1 %v2172_v7  ;;  %v2243_v1 = vld [vmem:[%s2878_s0 + $0x1cc] ss:$36 sps:$4 sm:$0xff]  }
  0x30   :  { %v2253_v7 = vld [vmem:[%s2878_s0 + $0x210] ss:$36 sps:$4 sm:$0xff]  }
  0x31   :  { %1901 = vmatpush3.bf16.msra.mxu0 %v2153_v56  ;;  %v2229_v56 = vld [vmem:[%s2878_s0 + $0x13c] ss:$36 sps:$4 sm:$0xff]  }
  0x32   :  { %1902 = vmatprep.subr.bf16.mxu0 %v2161_v62  ;;  %1965 = vmatpush3.bf16.msra.mxu1 %v2174_v9  ;;  %v2238_v62 = vld [vmem:[%s2878_s0 + $0x178] ss:$36 sps:$4 sm:$0xff]   ;;  %v2256_v9 = vld [vmem:[%s2878_s0 + $0x140] ss:$36 sps:$4 sm:$0xff]  }
  0x33   :  { %1088 = vmatmul.mubr.bf16.gmra.mrb[8].mxu0 %v2139_v48  ;;  %1966 = vmatprep.subr.bf16.mxu1 %v2182_v15  ;;  %v2218_v48 = vld [vmem:[%s2878_s0 + $0xa8] ss:$36 sps:$4 sm:$0xff]   ;;  %v2262_v15 = vld [vmem:[%s2878_s0 + $0x218] ss:$36 sps:$4 sm:$0xff]  }
  0x34   :  { %1185 = vmatmul.mubr.bf16.gmra.mrb[8].mxu1 %v2140_v51  ;;  %1095 = vmatprep.mubr.bf16.mxu0 %v2145_v52  ;;  %v2240_v51 = vld [vmem:[%s2877_s1 + $0x228] sm:$0xff]  }
  0x35   :  { %1192 = vmatprep.mubr.bf16.mxu1 %v2147_v53  ;;  %1903 = vmatpush3.bf16.msra.mxu0 %v2163_v0  ;;  %v2224_v52 = vld [vmem:[%s2878_s0 + $0xe8] ss:$36 sps:$4 sm:$0xff]   ;;  %v2247_v53 = vld [vmem:[%s2877_s1 + $0x230] sm:$0xff]  }
  0x36   :  { %1904 = vmatprep.subr.bf16.mxu0 %v2171_v6  ;;  %1967 = vmatpush3.bf16.msra.mxu1 %v2184_v17  ;;  %v2241_v0 = vld [vmem:[%s2878_s0 + $0x1c4] ss:$36 sps:$4 sm:$0xff]  }
  0x37   :  { %1968 = vmatprep.subr.bf16.mxu1 %v2185_v18  ;;  %v2252_v6 = vld [vmem:[%s2878_s0 + $0x208] ss:$36 sps:$4 sm:$0xff]  }
  0x39   :  { %1905 = vmatpush3.bf16.msra.mxu0 %v2173_v8  ;;  %v2255_v8 = vld [vmem:[%s2878_s0 + $0x20] ss:$36 sps:$4 sm:$0xff]  }
  0x3a   :  { %1906 = vmatprep.subr.bf16.mxu0 %v2181_v13  ;;  %1969 = vmatpush3.bf16.msra.mxu1 %v2186_v19  ;;  %v2260_v13 = vld [vmem:[%s2878_s0 + $0x1d0] ss:$36 sps:$4 sm:$0xff]  }
  0x3b   :  { %1096 = vmatmul.mubr.bf16.gmra.mrb[12].mxu0 %v2149_v58  ;;  %1970 = vmatprep.subr.bf16.mxu1 %v2194_v25  ;;  %v2231_v58 = vld [vmem:[%s2878_s0 + $0x130] ss:$36 sps:$4 sm:$0xff]  }
  0x3c   :  { %1193 = vmatmul.mubr.bf16.gmra.mrb[12].mxu1 %v2150_v59  ;;  %1103 = vmatprep.mubr.bf16.mxu0 %v2155_v60  ;;  %v2232_v59 = vld [vmem:[%s2878_s0 + $0x138] ss:$36 sps:$4 sm:$0xff]  }
  0x3d   :  { %1200 = vmatprep.mubr.bf16.mxu1 %v2157_v61  ;;  %1907 = vmatpush3.bf16.msra.mxu0 %v2183_v16  ;;  %v2234_v60 = vld [vmem:[%s2878_s0 + $0x17c] ss:$36 sps:$4 sm:$0xff]   ;;  %v2236_v61 = vld [vmem:[%s2878_s0 + $0x184] ss:$36 sps:$4 sm:$0xff]  }
  0x3e   :  { %1908 = vmatprep.subr.bf16.mxu0 %v2193_v24  ;;  %1971 = vmatpush3.bf16.msra.mxu1 %v2196_v27 }
  0x3f   :  { %1972 = vmatprep.subr.bf16.mxu1 %v2197_v28 }
  0x41   :  { %1909 = vmatpush3.bf16.msra.mxu0 %v2195_v26 }
  0x42   :  { %2038 = vmatprep.subr.bf16.mxu0 %v2205_v32  ;;  %1973 = vmatpush3.bf16.msra.mxu1 %v2198_v31 }
  0x43   :  { %1104 = vmatmul.mubr.bf16.gmra.mrb[16].mxu0 %v2159_v2  ;;  %2070 = vmatprep.subr.bf16.mxu1 %v2205_v32  ;;  %v2245_v2 = vld [vmem:[%s2878_s0 + $0x1c0] ss:$36 sps:$4 sm:$0xff]  }
  0x44   :  { %1201 = vmatmul.mubr.bf16.gmra.mrb[16].mxu1 %v2160_v3  ;;  %1111 = vmatprep.mubr.bf16.mxu0 %v2165_v4  ;;  %v2246_v3 = vld [vmem:[%s2878_s0 + $0x1c8] ss:$36 sps:$4 sm:$0xff]  }
  0x45   :  { %1208 = vmatprep.mubr.bf16.mxu1 %v2167_v5  ;;  %v2248_v4 = vld [vmem:[%s2878_s0 + $0x20c] ss:$36 sps:$4 sm:$0xff]   ;;  %v2250_v5 = vld [vmem:[%s2878_s0 + $0x214] ss:$36 sps:$4 sm:$0xff]  }
  0x4b   :  { %1112 = vmatmul.mubr.bf16.gmra.mrb[20].mxu0 %v2169_v10  ;;  %v2257_v10 = vld [vmem:[%s2878_s0 + $0x68] ss:$36 sps:$4 sm:$0xff]  }
  0x4c   :  { %1209 = vmatmul.mubr.bf16.gmra.mrb[20].mxu1 %v2170_v11  ;;  %1119 = vmatprep.mubr.bf16.mxu0 %v2175_v12  ;;  %v2258_v11 = vld [vmem:[%s2878_s0 + $0x188] ss:$36 sps:$4 sm:$0xff]   ;;  %v2259_v12 = vld [vmem:[%s2878_s0 + $0xb0] ss:$36 sps:$4 sm:$0xff]  }
  0x4d   :  { %1216 = vmatprep.mubr.bf16.mxu1 %v2177_v14  ;;  %v2261_v14 = vld [vmem:[%s2878_s0 + $0xf8] ss:$36 sps:$4 sm:$0xff]  }
  0x53   :  { %1120 = vmatmul.mubr.bf16.gmra.mrb[24].mxu0 %v2179_v20 }
  0x54   :  { %1217 = vmatmul.mubr.bf16.gmra.mrb[24].mxu1 %v2180_v21  ;;  %1127 = vmatprep.mubr.bf16.mxu0 %v2187_v22 }
  0x55   :  { %1224 = vmatprep.mubr.bf16.mxu1 %v2189_v23 }
  0x5b   :  { %1128 = vmatmul.mubr.bf16.gmra.mrb[28].mxu0 %v2191_v29 }
  0x5c   :  { %1225 = vmatmul.mubr.bf16.gmra.mrb[28].mxu1 %v2192_v30  ;;  %1265 = vmatprep.mubr.bf16.mxu0 %v2201_v33 }
  0x5d   :  { %1362 = vmatprep.mubr.bf16.mxu1 %v2204_v34 }
  0x63   :  { %1266 = vmatmul.mubr.bf16.vlgmr.msra.gmra.mrb[32].mxu0 %v2199_v35 }
  0x64   :  { %1363 = vmatmul.mubr.bf16.vlgmr.msra.gmra.mrb[32].mxu1 %v2202_v36  ;;  %2039 = vmatpush3.bf16.msra.mxu0 %v2205_v32 }
  0x65   :  { %1273 = vmatprep.mubr.bf16.mxu0 %v2206_v37  ;;  %1370 = vmatprep.mubr.bf16.mxu1 %v2208_v38 }
  0x66   :  { %2040 = vmatprep.subr.bf16.mxu0 %v2212_v39  ;;  %2078 = vmatpush3.bf16.msra.mxu1 %v2205_v32 }
  0x67   :  { %2071 = vmatprep.subr.bf16.mxu1 %v2212_v39 }
  0x68   :  { %2041 = vmatpush3.bf16.msra.mxu0 %v2212_v39 }
  0x69   :  { %2042 = vmatprep.subr.bf16.mxu0 %v2219_v40 }
  0x6a   :  { %2079 = vmatpush3.bf16.msra.mxu1 %v2212_v39 }
  0x6b   :  { %1274 = vmatmul.mubr.bf16.gmra.mrb[36].mxu0 %v2210_v41  ;;  %2072 = vmatprep.subr.bf16.mxu1 %v2219_v40 }
  0x6c   :  { %1371 = vmatmul.mubr.bf16.gmra.mrb[36].mxu1 %v2211_v42  ;;  %1281 = vmatprep.mubr.bf16.mxu0 %v2213_v43 }
  0x6d   :  { %1378 = vmatprep.mubr.bf16.mxu1 %v2215_v44  ;;  %2043 = vmatpush3.bf16.msra.mxu0 %v2219_v40 }
  0x6e   :  { %2044 = vmatprep.subr.bf16.mxu0 %v2226_v45  ;;  %2080 = vmatpush3.bf16.msra.mxu1 %v2219_v40 }
  0x6f   :  { %2073 = vmatprep.subr.bf16.mxu1 %v2226_v45 }
  0x71   :  { %2045 = vmatpush3.bf16.msra.mxu0 %v2226_v45 }
  0x72   :  { %2046 = vmatprep.subr.bf16.mxu0 %v2233_v46  ;;  %2081 = vmatpush3.bf16.msra.mxu1 %v2226_v45 }
  0x73   :  { %1282 = vmatmul.mubr.bf16.gmra.mrb[40].mxu0 %v2217_v47  ;;  %2074 = vmatprep.subr.bf16.mxu1 %v2233_v46 }
  0x74   :  { %1379 = vmatmul.mubr.bf16.gmra.mrb[40].mxu1 %v2218_v48  ;;  %1289 = vmatprep.mubr.bf16.mxu0 %v2220_v49 }
  0x75   :  { %1386 = vmatprep.mubr.bf16.mxu1 %v2222_v50  ;;  %2047 = vmatpush3.bf16.msra.mxu0 %v2233_v46 }
  0x76   :  { %2048 = vmatprep.subr.bf16.mxu0 %v2240_v51  ;;  %2082 = vmatpush3.bf16.msra.mxu1 %v2233_v46 }
  0x77   :  { %2075 = vmatprep.subr.bf16.mxu1 %v2240_v51 }
  0x79   :  { %2049 = vmatpush3.bf16.msra.mxu0 %v2240_v51 }
  0x7a   :  { %2050 = vmatprep.subr.bf16.mxu0 %v2247_v53  ;;  %2083 = vmatpush3.bf16.msra.mxu1 %v2240_v51 }
  0x7b   :  { %1290 = vmatmul.mubr.bf16.gmra.mrb[44].mxu0 %v2224_v52  ;;  %2076 = vmatprep.subr.bf16.mxu1 %v2247_v53 }
  0x7c   :  { %1387 = vmatmul.mubr.bf16.gmra.mrb[44].mxu1 %v2225_v54  ;;  %1297 = vmatprep.mubr.bf16.mxu0 %v2227_v55 }
  0x7d   :  { %1394 = vmatprep.mubr.bf16.mxu1 %v2229_v56  ;;  %2051 = vmatpush3.bf16.msra.mxu0 %v2247_v53 }
  0x7e   :  { %2052 = vmatprep.subr.bf16.mxu0 %v2254_v57  ;;  %2084 = vmatpush3.bf16.msra.mxu1 %v2247_v53 }
  0x7f   :  { %2077 = vmatprep.subr.bf16.mxu1 %v2254_v57 }
  0x81   :  { %2053 = vmatpush3.bf16.msra.mxu0 %v2254_v57 }
  0x82   :  { %2085 = vmatpush3.bf16.msra.mxu1 %v2254_v57 }
  0x83   :  { %1298 = vmatmul.mubr.bf16.gmra.mrb[48].mxu0 %v2231_v58 }
  0x84   :  { %1395 = vmatmul.mubr.bf16.gmra.mrb[48].mxu1 %v2232_v59  ;;  %1305 = vmatprep.mubr.bf16.mxu0 %v2234_v60  ;;  %v2263_v59 = vmov 0.0  }
  0x85   :  { %1402 = vmatprep.mubr.bf16.mxu1 %v2236_v61  ;;  %1544 = vst [vmem:[%s2879_s3] sm:$0x1] %v2263_v59  ;;  %1545 = vst [vmem:[%s2880_s4] sm:$0x1] %v2263_v59 }
  0x8b   :  { %1306 = vmatmul.mubr.bf16.gmra.mrb[52].mxu0 %v2238_v62 }
  0x8c   :  { %1403 = vmatmul.mubr.bf16.gmra.mrb[52].mxu1 %v2239_v63  ;;  %1313 = vmatprep.mubr.bf16.mxu0 %v2241_v0 }
  0x8d   :  { %1410 = vmatprep.mubr.bf16.mxu1 %v2243_v1 }
  0x93   :  { %1314 = vmatmul.mubr.bf16.gmra.mrb[56].mxu0 %v2245_v2 }
  0x94   :  { %1411 = vmatmul.mubr.bf16.gmra.mrb[56].mxu1 %v2246_v3  ;;  %1321 = vmatprep.mubr.bf16.mxu0 %v2248_v4 }
  0x95   :  { %1418 = vmatprep.mubr.bf16.mxu1 %v2250_v5 }
  0x9b   :  { %1322 = vmatmul.mubr.bf16.gmra.mrb[60].mxu0 %v2252_v6 }
  0x9c   :  { %1419 = vmatmul.mubr.bf16.gmra.mrb[60].mxu1 %v2253_v7  ;;  %2054 = vmatprep.mubr.bf16.mxu0 %v2255_v8 }
  0x9d   :  { %2062 = vmatprep.mubr.bf16.mxu1 %v2256_v9 }
  0xa3   :  { %2055 = vmatmul.mubr.bf16.vlgmr.msra.gmra.mrb[64].mxu0 %v2257_v10 }
  0xa4   :  { %2063 = vmatmul.mubr.bf16.vlgmr.msra.gmra.mrb[64].mxu1 %v2258_v11  ;;  %2058 = vmatprep.mubr.bf16.mxu0 %v2259_v12 }
  0xa5   :  { %2066 = vmatprep.mubr.bf16.mxu1 %v2260_v13 }
  0xab   :  { %2059 = vmatmul.mubr.bf16.gmra.mrb[68].mxu0 %v2261_v14 }
  0xac   :  { %2067 = vmatmul.mubr.bf16.gmra.mrb[68].mxu1 %v2262_v15 }
  0xf6   :  { %v1782_v16 = vpop.f32.mrb[0].mxu0 }
  0xf7   :  { %v1846_v17 = vpop.f32.mrb[0].mxu1  ;;  %v1783_v18 = vpop.f32.mrb[1].mxu0 }
  0xf8   :  { %v1784_v19 = vadd.f32 %v1783_v18, %v1782_v16  ;;  %v1847_v20 = vpop.f32.mrb[1].mxu1  ;;  %v1785_v21 = vpop.f32.mrb[2].mxu0 }
  0xf9   :  { %v1848_v22 = vadd.f32 %v1847_v20, %v1846_v17  ;;  %v1849_v23 = vpop.f32.mrb[2].mxu1  ;;  %v1786_v24 = vpop.f32.mrb[3].mxu0 }
  0xfa   :  { %v1787_v25 = vadd.f32 %v1786_v24, %v1785_v21  ;;  %v1850_v26 = vpop.f32.mrb[3].mxu1 }
  0xfb   :  { %v2721_v27 = vadd.f32 %v1848_v22, %v1784_v19  ;;  %v1851_v28 = vadd.f32 %v1850_v26, %v1849_v23 }
  0xfd   :  { %v2723_v29 = vadd.f32 %v1851_v28, %v1787_v25 }
  0xfe   :  { %v1788_v30 = vpop.f32.mrb[4].mxu0 }
  0xff   :  { %v1852_v31 = vpop.f32.mrb[4].mxu1  ;;  %v1789_v32 = vpop.f32.mrb[5].mxu0 }
 0x100   :  { %v1790_v33 = vadd.f32 %v1789_v32, %v1788_v30  ;;  %v1853_v34 = vpop.f32.mrb[5].mxu1  ;;  %v1791_v35 = vpop.f32.mrb[6].mxu0 }
 0x101   :  { %v1854_v36 = vadd.f32 %v1853_v34, %v1852_v31  ;;  %v1855_v37 = vpop.f32.mrb[6].mxu1  ;;  %v1792_v38 = vpop.f32.mrb[7].mxu0 }
 0x102   :  { %v1793_v39 = vadd.f32 %v1792_v38, %v1791_v35  ;;  %v1856_v40 = vpop.f32.mrb[7].mxu1 }
 0x103   :  { %v2725_v41 = vadd.f32 %v1854_v36, %v1790_v33  ;;  %v1857_v42 = vadd.f32 %v1856_v40, %v1855_v37 }
 0x105   :  { %v2727_v43 = vadd.f32 %v1857_v42, %v1793_v39 }
 0x106   :  { %v1794_v44 = vpop.f32.mrb[8].mxu0 }
 0x107   :  { %v1858_v45 = vpop.f32.mrb[8].mxu1  ;;  %v1795_v46 = vpop.f32.mrb[9].mxu0 }
 0x108   :  { %v1796_v47 = vadd.f32 %v1795_v46, %v1794_v44  ;;  %v1859_v48 = vpop.f32.mrb[9].mxu1  ;;  %v1797_v49 = vpop.f32.mrb[10].mxu0 }
 0x109   :  { %v1860_v50 = vadd.f32 %v1859_v48, %v1858_v45  ;;  %v1861_v51 = vpop.f32.mrb[10].mxu1  ;;  %v1798_v52 = vpop.f32.mrb[11].mxu0 }
 0x10a   :  { %v1799_v53 = vadd.f32 %v1798_v52, %v1797_v49  ;;  %v1862_v54 = vpop.f32.mrb[11].mxu1 }
 0x10b   :  { %v2729_v55 = vadd.f32 %v1860_v50, %v1796_v47  ;;  %v1863_v56 = vadd.f32 %v1862_v54, %v1861_v51 }
 0x10d   :  { %v2731_v57 = vadd.f32 %v1863_v56, %v1799_v53 }
 0x10e   :  { %v1800_v58 = vpop.f32.mrb[12].mxu0 }
 0x10f   :  { %v1864_v60 = vpop.f32.mrb[12].mxu1  ;;  %v1801_v61 = vpop.f32.mrb[13].mxu0 }
 0x110   :  { %v1802_v62 = vadd.f32 %v1801_v61, %v1800_v58  ;;  %v1865_v63 = vpop.f32.mrb[13].mxu1  ;;  %v1803_v0 = vpop.f32.mrb[14].mxu0 }
 0x111   :  { %v1866_v1 = vadd.f32 %v1865_v63, %v1864_v60  ;;  %v1867_v2 = vpop.f32.mrb[14].mxu1  ;;  %v1804_v3 = vpop.f32.mrb[15].mxu0 }
 0x112   :  { %v1805_v4 = vadd.f32 %v1804_v3, %v1803_v0  ;;  %v1868_v5 = vpop.f32.mrb[15].mxu1 }
 0x113   :  { %v2739_v6 = vadd.f32 %v1866_v1, %v1802_v62  ;;  %v1869_v7 = vadd.f32 %v1868_v5, %v1867_v2 }
 0x115   :  { %v2741_v8 = vadd.f32 %v1869_v7, %v1805_v4 }
 0x116   :  { %v1806_v9 = vpop.f32.mrb[16].mxu0 }
 0x117   :  { %v1870_v10 = vpop.f32.mrb[16].mxu1  ;;  %v1807_v11 = vpop.f32.mrb[17].mxu0 }
 0x118   :  { %v1808_v12 = vadd.f32 %v1807_v11, %v1806_v9  ;;  %v1871_v13 = vpop.f32.mrb[17].mxu1  ;;  %v1809_v14 = vpop.f32.mrb[18].mxu0 }
 0x119   :  { %v1872_v15 = vadd.f32 %v1871_v13, %v1870_v10  ;;  %v1873_v16 = vpop.f32.mrb[18].mxu1  ;;  %v1810_v17 = vpop.f32.mrb[19].mxu0 }
 0x11a   :  { %v1811_v18 = vadd.f32 %v1810_v17, %v1809_v14  ;;  %v1874_v19 = vpop.f32.mrb[19].mxu1 }
 0x11b   :  { %v2743_v20 = vadd.f32 %v1872_v15, %v1808_v12  ;;  %v1875_v21 = vadd.f32 %v1874_v19, %v1873_v16 }
 0x11d   :  { %v2745_v22 = vadd.f32 %v1875_v21, %v1811_v18 }
 0x11e   :  { %v1812_v23 = vpop.f32.mrb[20].mxu0 }
 0x11f   :  { %v1876_v24 = vpop.f32.mrb[20].mxu1  ;;  %v1813_v25 = vpop.f32.mrb[21].mxu0 }
 0x120   :  { %v1814_v26 = vadd.f32 %v1813_v25, %v1812_v23  ;;  %v1877_v28 = vpop.f32.mrb[21].mxu1  ;;  %v1815_v30 = vpop.f32.mrb[22].mxu0 }
 0x121   :  { %v1878_v31 = vadd.f32 %v1877_v28, %v1876_v24  ;;  %v1879_v32 = vpop.f32.mrb[22].mxu1  ;;  %v1816_v33 = vpop.f32.mrb[23].mxu0 }
 0x122   :  { %v1817_v34 = vadd.f32 %v1816_v33, %v1815_v30  ;;  %v1880_v35 = vpop.f32.mrb[23].mxu1 }
 0x123   :  { %v2747_v36 = vadd.f32 %v1878_v31, %v1814_v26  ;;  %v1881_v37 = vadd.f32 %v1880_v35, %v1879_v32 }
 0x125   :  { %v2749_v38 = vadd.f32 %v1881_v37, %v1817_v34 }
 0x126   :  { %v1818_v39 = vpop.f32.mrb[24].mxu0 }
 0x127   :  { %v1882_v40 = vpop.f32.mrb[24].mxu1  ;;  %v1819_v42 = vpop.f32.mrb[25].mxu0 }
 0x128   :  { %v1820_v44 = vadd.f32 %v1819_v42, %v1818_v39  ;;  %v1883_v45 = vpop.f32.mrb[25].mxu1  ;;  %v1821_v46 = vpop.f32.mrb[26].mxu0 }
 0x129   :  { %v1884_v47 = vadd.f32 %v1883_v45, %v1882_v40  ;;  %v1885_v48 = vpop.f32.mrb[26].mxu1  ;;  %v1822_v49 = vpop.f32.mrb[27].mxu0 }
 0x12a   :  { %v1823_v50 = vadd.f32 %v1822_v49, %v1821_v46  ;;  %v1886_v51 = vpop.f32.mrb[27].mxu1 }
 0x12b   :  { %v2751_v52 = vadd.f32 %v1884_v47, %v1820_v44  ;;  %v1887_v53 = vadd.f32 %v1886_v51, %v1885_v48 }
 0x12d   :  { %v2753_v54 = vadd.f32 %v1887_v53, %v1823_v50 }
 0x12e   :  { %v1824_v56 = vpop.f32.mrb[28].mxu0 }
 0x12f   :  { %v1888_v58 = vpop.f32.mrb[28].mxu1  ;;  %v1825_v59 = vpop.f32.mrb[29].mxu0 }
 0x130   :  { %v1826_v60 = vadd.f32 %v1825_v59, %v1824_v56  ;;  %v1889_v61 = vpop.f32.mrb[29].mxu1  ;;  %v1827_v62 = vpop.f32.mrb[30].mxu0 }
 0x131   :  { %v1890_v63 = vadd.f32 %v1889_v61, %v1888_v58  ;;  %v1891_v0 = vpop.f32.mrb[30].mxu1  ;;  %v1828_v1 = vpop.f32.mrb[31].mxu0 }
 0x132   :  { %v1829_v2 = vadd.f32 %v1828_v1, %v1827_v62  ;;  %v1892_v3 = vpop.f32.mrb[31].mxu1 }
 0x133   :  { %v2755_v4 = vadd.f32 %v1890_v63, %v1826_v60  ;;  %v1893_v5 = vadd.f32 %v1892_v3, %v1891_v0 }
 0x135   :  { %v2757_v7 = vadd.f32 %v1893_v5, %v1829_v2 }
 0x136   :  { %v1910_v9 = vpop.f32.mrb[32].mxu0 }
 0x137   :  { %v1911_v10 = vpop.f32.mrb[33].mxu0  ;;  %v1974_v11 = vpop.f32.mrb[32].mxu1 }
 0x138   :  { %v1912_v12 = vadd.f32 %v1911_v10, %v1910_v9  ;;  %v1913_v13 = vpop.f32.mrb[34].mxu0  ;;  %v1975_v14 = vpop.f32.mrb[33].mxu1 }
 0x139   :  { %v1914_v15 = vpop.f32.mrb[35].mxu0  ;;  %v1976_v16 = vadd.f32 %v1975_v14, %v1974_v11  ;;  %v1977_v17 = vpop.f32.mrb[34].mxu1 }
 0x13a   :  { %v1268_v18 = vadd.f32 %v1912_v12, %v2721_v27  ;;  %v1915_v19 = vadd.f32 %v1914_v15, %v1913_v13  ;;  %v1978_v21 = vpop.f32.mrb[35].mxu1 }
 0x13b   :  { %v1979_v23 = vadd.f32 %v1978_v21, %v1977_v17 }
 0x13c   :  { %v1271_v24 = vadd.f32 %v1915_v19, %v2723_v29  ;;  %v2761_v25 = vadd.f32 %v1976_v16, %v1268_v18 }
 0x13e   :  { %v1916_v26 = vpop.f32.mrb[36].mxu0  ;;  %v2763_v28 = vadd.f32 %v1979_v23, %v1271_v24 }
 0x13f   :  { %v1917_v30 = vpop.f32.mrb[37].mxu0  ;;  %v1980_v31 = vpop.f32.mrb[36].mxu1 }
 0x140   :  { %v1918_v32 = vadd.f32 %v1917_v30, %v1916_v26  ;;  %v1919_v33 = vpop.f32.mrb[38].mxu0  ;;  %v1981_v34 = vpop.f32.mrb[37].mxu1 }
 0x141   :  { %v1920_v35 = vpop.f32.mrb[39].mxu0  ;;  %v1982_v37 = vadd.f32 %v1981_v34, %v1980_v31  ;;  %v1983_v39 = vpop.f32.mrb[38].mxu1 }
 0x142   :  { %v1276_v27 = vadd.f32 %v1918_v32, %v2725_v41  ;;  %v1921_v40 = vadd.f32 %v1920_v35, %v1919_v33  ;;  %v1984_v42 = vpop.f32.mrb[39].mxu1 }
 0x143   :  { %v1985_v44 = vadd.f32 %v1984_v42, %v1983_v39 }
 0x144   :  { %v1279_v29 = vadd.f32 %v1921_v40, %v2727_v43  ;;  %v2767_v45 = vadd.f32 %v1982_v37, %v1276_v27 }
 0x146   :  { %v1922_v46 = vpop.f32.mrb[40].mxu0  ;;  %v2769_v47 = vadd.f32 %v1985_v44, %v1279_v29 }
 0x147   :  { %v1923_v48 = vpop.f32.mrb[41].mxu0  ;;  %v1986_v49 = vpop.f32.mrb[40].mxu1 }
 0x148   :  { %v1924_v50 = vadd.f32 %v1923_v48, %v1922_v46  ;;  %v1925_v51 = vpop.f32.mrb[42].mxu0  ;;  %v1987_v53 = vpop.f32.mrb[41].mxu1 }
 0x149   :  { %v1926_v56 = vpop.f32.mrb[43].mxu0  ;;  %v1988_v58 = vadd.f32 %v1987_v53, %v1986_v49  ;;  %v1989_v59 = vpop.f32.mrb[42].mxu1 }
 0x14a   :  { %v1284_v41 = vadd.f32 %v1924_v50, %v2729_v55  ;;  %v1927_v60 = vadd.f32 %v1926_v56, %v1925_v51  ;;  %v1990_v61 = vpop.f32.mrb[43].mxu1 }
 0x14b   :  { %v1991_v62 = vadd.f32 %v1990_v61, %v1989_v59 }
 0x14c   :  { %v1287_v43 = vadd.f32 %v1927_v60, %v2731_v57  ;;  %v2773_v63 = vadd.f32 %v1988_v58, %v1284_v41 }
 0x14e   :  { %v1928_v0 = vpop.f32.mrb[44].mxu0  ;;  %v2775_v1 = vadd.f32 %v1991_v62, %v1287_v43 }
 0x14f   :  { %v1929_v2 = vpop.f32.mrb[45].mxu0  ;;  %v1992_v3 = vpop.f32.mrb[44].mxu1 }
 0x150   :  { %v1930_v5 = vadd.f32 %v1929_v2, %v1928_v0  ;;  %v1931_v9 = vpop.f32.mrb[46].mxu0  ;;  %v1993_v10 = vpop.f32.mrb[45].mxu1 }
 0x151   :  { %v1932_v11 = vpop.f32.mrb[47].mxu0  ;;  %v1994_v12 = vadd.f32 %v1993_v10, %v1992_v3  ;;  %v1995_v13 = vpop.f32.mrb[46].mxu1 }
 0x152   :  { %v1292_v55 = vadd.f32 %v1930_v5, %v2739_v6  ;;  %v1933_v14 = vadd.f32 %v1932_v11, %v1931_v9  ;;  %v1996_v15 = vpop.f32.mrb[47].mxu1 }
 0x153   :  { %v1997_v16 = vadd.f32 %v1996_v15, %v1995_v13 }
 0x154   :  { %v1295_v57 = vadd.f32 %v1933_v14, %v2741_v8  ;;  %v2779_v17 = vadd.f32 %v1994_v12, %v1292_v55 }
 0x156   :  { %v1934_v18 = vpop.f32.mrb[48].mxu0  ;;  %v2781_v19 = vadd.f32 %v1997_v16, %v1295_v57 }
 0x157   :  { %v1935_v21 = vpop.f32.mrb[49].mxu0  ;;  %v1998_v23 = vpop.f32.mrb[48].mxu1 }
 0x158   :  { %v1936_v24 = vadd.f32 %v1935_v21, %v1934_v18  ;;  %v1937_v26 = vpop.f32.mrb[50].mxu0  ;;  %v1999_v30 = vpop.f32.mrb[49].mxu1 }
 0x159   :  { %v1938_v31 = vpop.f32.mrb[51].mxu0  ;;  %v2000_v32 = vadd.f32 %v1999_v30, %v1998_v23  ;;  %v2001_v33 = vpop.f32.mrb[50].mxu1 }
 0x15a   :  { %v1300_v6 = vadd.f32 %v1936_v24, %v2743_v20  ;;  %v1939_v34 = vadd.f32 %v1938_v31, %v1937_v26  ;;  %v2002_v35 = vpop.f32.mrb[51].mxu1 }
 0x15b   :  { %v2003_v37 = vadd.f32 %v2002_v35, %v2001_v33 }
 0x15c   :  { %v1303_v8 = vadd.f32 %v1939_v34, %v2745_v22  ;;  %v1397_v39 = vadd.f32 %v2000_v32, %v1300_v6 }
 0x15e   :  { %v1940_v27 = vpop.f32.mrb[52].mxu0  ;;  %v2785_v40 = vadd.f32 %v2003_v37, %v1303_v8 }
 0x15f   :  { %v1941_v42 = vpop.f32.mrb[53].mxu0  ;;  %v2004_v44 = vpop.f32.mrb[52].mxu1 }
 0x160   :  { %v1942_v29 = vadd.f32 %v1941_v42, %v1940_v27  ;;  %v1943_v46 = vpop.f32.mrb[54].mxu0  ;;  %v2005_v48 = vpop.f32.mrb[53].mxu1 }
 0x161   :  { %v1944_v49 = vpop.f32.mrb[55].mxu0  ;;  %v2006_v50 = vadd.f32 %v2005_v48, %v2004_v44  ;;  %v2007_v51 = vpop.f32.mrb[54].mxu1 }
 0x162   :  { %v1308_v53 = vadd.f32 %v1942_v29, %v2747_v36  ;;  %v1945_v20 = vadd.f32 %v1944_v49, %v1943_v46  ;;  %v2008_v56 = vpop.f32.mrb[55].mxu1 }
 0x163   :  { %v2009_v58 = vadd.f32 %v2008_v56, %v2007_v51 }
 0x164   :  { %v1311_v59 = vadd.f32 %v1945_v20, %v2749_v38  ;;  %v1405_v22 = vadd.f32 %v2006_v50, %v1308_v53 }
 0x166   :  { %v1946_v41 = vpop.f32.mrb[56].mxu0  ;;  %v1408_v60 = vadd.f32 %v2009_v58, %v1311_v59 }
 0x167   :  { %v1947_v61 = vpop.f32.mrb[57].mxu0  ;;  %v2010_v62 = vpop.f32.mrb[56].mxu1 }
 0x168   :  { %v1948_v43 = vadd.f32 %v1947_v61, %v1946_v41  ;;  %v1949_v0 = vpop.f32.mrb[58].mxu0  ;;  %v2011_v2 = vpop.f32.mrb[57].mxu1 }
 0x169   :  { %v1950_v3 = vpop.f32.mrb[59].mxu0  ;;  %v2012_v5 = vadd.f32 %v2011_v2, %v2010_v62  ;;  %v2013_v9 = vpop.f32.mrb[58].mxu1 }
 0x16a   :  { %v1316_v10 = vadd.f32 %v1948_v43, %v2751_v52  ;;  %v1951_v11 = vadd.f32 %v1950_v3, %v1949_v0  ;;  %v2014_v36 = vpop.f32.mrb[59].mxu1 }
 0x16b   :  { %v2015_v12 = vadd.f32 %v2014_v36, %v2013_v9 }
 0x16c   :  { %v1319_v13 = vadd.f32 %v1951_v11, %v2753_v54  ;;  %v1413_v55 = vadd.f32 %v2012_v5, %v1316_v10 }
 0x16e   :  { %v1952_v38 = vpop.f32.mrb[60].mxu0  ;;  %v2791_v14 = vadd.f32 %v2015_v12, %v1319_v13 }
 0x16f   :  { %v1953_v15 = vpop.f32.mrb[61].mxu0  ;;  %v2016_v16 = vpop.f32.mrb[60].mxu1 }
 0x170   :  { %v1954_v57 = vadd.f32 %v1953_v15, %v1952_v38  ;;  %v1955_v18 = vpop.f32.mrb[62].mxu0  ;;  %v2017_v21 = vpop.f32.mrb[61].mxu1 }
 0x171   :  { %v1956_v23 = vpop.f32.mrb[63].mxu0  ;;  %v2018_v24 = vadd.f32 %v2017_v21, %v2016_v16  ;;  %v2019_v26 = vpop.f32.mrb[62].mxu1 }
 0x172   :  { %v1324_v30 = vadd.f32 %v1954_v57, %v2755_v4  ;;  %v1957_v52 = vadd.f32 %v1956_v23, %v1955_v18  ;;  %v2020_v31 = vpop.f32.mrb[63].mxu1 }
 0x173   :  { %v2021_v32 = vadd.f32 %v2020_v31, %v2019_v26 }
 0x174   :  { %v1327_v33 = vadd.f32 %v1957_v52, %v2757_v7  ;;  %v1421_v54 = vadd.f32 %v2018_v24, %v1324_v30 }
 0x176   :  { %v2056_v6 = vpop.f32.mrb[64].mxu0  ;;  %v1424_v34 = vadd.f32 %v2021_v32, %v1327_v33 }
 0x177   :  { %v1470_v35 = vadd.f32 %v2056_v6, %v2767_v45  ;;  %v2064_v37 = vpop.f32.mrb[64].mxu1  ;;  %v1461_v8 = vpop.f32.mrb[65].mxu0 }
 0x178   :  { %v2796_v27 = vadd.f32 %v2064_v37, %v1405_v22  ;;  %v1462_v42 = vadd.f32 %v1461_v8, %v2761_v25  ;;  %v1493_v44 = vpop.f32.mrb[65].mxu1  ;;  %v2057_v29 = vpop.f32.mrb[66].mxu0 }
 0x179   :  { %1526 = vst [vmem:[%s2881_s2 + $0x10] sm:$0xff] %v1470_v35  ;;  %v1494_v4 = vadd.f32 %v1493_v44, %v1397_v39  ;;  %v1473_v7 = vadd.f32 %v2057_v29, %v2769_v47  ;;  %v2065_v46 = vpop.f32.mrb[66].mxu1  ;;  %v1464_v48 = vpop.f32.mrb[67].mxu0  ;;  %v1573_v51 = vmul.f32 %v1470_v35, %v1470_v35 }
 0x17a   :  { %1534 = vst [vmem:[%s2881_s2 + $0x50] sm:$0xff] %v2796_v27  ;;  %1524 = vst [vmem:[%s2881_s2] sm:$0xff] %v1462_v42  ;;  %v2810_v25 = vadd.f32 %v2065_v46, %v1408_v60  ;;  %v1465_v45 = vadd.f32 %v1464_v48, %v2763_v28  ;;  %v1496_v49 = vpop.f32.mrb[67].mxu1  ;;  %v1571_v39 = vmul.f32 %v1462_v42, %v1462_v42 }
 0x17b   :  { %1532 = vst [vmem:[%s2881_s2 + $0x40] sm:$0xff] %v1494_v4  ;;  %1527 = vst [vmem:[%s2881_s2 + $0x18] sm:$0xff] %v1473_v7  ;;  %v1497_v47 = vadd.f32 %v1496_v49, %v2785_v40  ;;  %v1574_v56 = vmul.f32 %v1473_v7, %v1473_v7  ;;  %v1579_v21 = vmul.f32 %v1494_v4, %v1494_v4 }
 0x17c   :  { %1535 = vst [vmem:[%s2881_s2 + $0x58] sm:$0xff] %v2810_v25  ;;  %1525 = vst [vmem:[%s2881_s2 + $0x8] sm:$0xff] %v1465_v45  ;;  %v1547_v28 = vadd.f32 %v1465_v45, %v1462_v42  ;;  %v1572_v50 = vmul.f32 %v1465_v45, %v1465_v45  ;;  %v1581_v31 = vmul.f32 %v2796_v27, %v2796_v27 }
 0x17d   :  { %1533 = vst [vmem:[%s2881_s2 + $0x48] sm:$0xff] %v1497_v47  ;;  %v1580_v26 = vmul.f32 %v1497_v47, %v1497_v47 }
 0x17e   :  { %v1548_v53 = vadd.f32 %v1547_v28, %v1470_v35  ;;  %v1587_v20 = vadd.f32 %v1572_v50, %v1571_v39  ;;  %v2060_v40 = vpop.f32.mrb[68].mxu0 }
 0x17f   :  { %v1486_v58 = vadd.f32 %v2060_v40, %v2779_v17  ;;  %v2068_v59 = vpop.f32.mrb[68].mxu1  ;;  %v1477_v22 = vpop.f32.mrb[69].mxu0 }
 0x180   :  { %v1588_v41 = vadd.f32 %v1587_v20, %v1573_v51  ;;  %v1518_v60 = vadd.f32 %v2068_v59, %v1421_v54  ;;  %v1478_v61 = vadd.f32 %v1477_v22, %v2773_v63  ;;  %v1549_v62 = vadd.f32 %v1548_v53, %v1473_v7  ;;  %v1509_v43 = vpop.f32.mrb[69].mxu1  ;;  %v2061_v0 = vpop.f32.mrb[70].mxu0  ;;  %v1570_v22 = vld [vmem:[%s2880_s4] sm:$0x1] }
 0x181   :  { %1530 = vst [vmem:[%s2881_s2 + $0x30] sm:$0xff] %v1486_v58  ;;  %v1510_v2 = vadd.f32 %v1509_v43, %v1413_v55  ;;  %v1489_v3 = vadd.f32 %v2061_v0, %v2781_v19  ;;  %v2069_v5 = vpop.f32.mrb[70].mxu1  ;;  %v1480_v9 = vpop.f32.mrb[71].mxu0  ;;  %v1577_v15 = vmul.f32 %v1486_v58, %v1486_v58  ;;  %v1582_v54 = vmul.f32 %v2810_v25, %v2810_v25 }
 0x182   :  { %1538 = vst [vmem:[%s2881_s2 + $0x70] sm:$0xff] %v1518_v60  ;;  %1528 = vst [vmem:[%s2881_s2 + $0x20] sm:$0xff] %v1478_v61  ;;  %v1550_v63 = vadd.f32 %v1549_v62, %v1478_v61  ;;  %v1575_v17 = vmul.f32 %v1478_v61, %v1478_v61  ;;  %v1589_v10 = vadd.f32 %v1588_v41, %v1574_v56  ;;  %v1512_v11 = vpop.f32.mrb[71].mxu1  ;;  %v1546_v56 = vld [vmem:[%s2879_s3] sm:$0x1] }
 0x183   :  { %1536 = vst [vmem:[%s2881_s2 + $0x60] sm:$0xff] %v1510_v2  ;;  %1531 = vst [vmem:[%s2881_s2 + $0x38] sm:$0xff] %v1489_v3  ;;  %v1521_v19 = vadd.f32 %v2069_v5, %v1424_v34  ;;  %v1481_v36 = vadd.f32 %v1480_v9, %v2775_v1  ;;  %v1513_v13 = vadd.f32 %v1512_v11, %v2791_v14 }
 0x184   :  { %v1590_v12 = vadd.f32 %v1589_v10, %v1575_v17  ;;  %v1578_v57 = vmul.f32 %v1489_v3, %v1489_v3  ;;  %v1583_v35 = vmul.f32 %v1510_v2, %v1510_v2 }
 0x185   :  { %1539 = vst [vmem:[%s2881_s2 + $0x78] sm:$0xff] %v1521_v19  ;;  %1529 = vst [vmem:[%s2881_s2 + $0x28] sm:$0xff] %v1481_v36  ;;  %v1551_v55 = vadd.f32 %v1550_v63, %v1481_v36  ;;  %v1576_v38 = vmul.f32 %v1481_v36, %v1481_v36  ;;  %v1584_v44 = vmul.f32 %v1513_v13, %v1513_v13 }
 0x186   :  { %1537 = vst [vmem:[%s2881_s2 + $0x68] sm:$0xff] %v1513_v13  ;;  %v1586_v48 = vmul.f32 %v1521_v19, %v1521_v19 }
 0x187   :  { %v1552_v16 = vadd.f32 %v1551_v55, %v1486_v58  ;;  %v1591_v1 = vadd.f32 %v1590_v12, %v1576_v38 }
 0x189   :  { %v1553_v18 = vadd.f32 %v1552_v16, %v1489_v3  ;;  %v1592_v14 = vadd.f32 %v1591_v1, %v1577_v15 }
 0x18b   :  { %v1554_v23 = vadd.f32 %v1553_v18, %v1494_v4  ;;  %v1593_v24 = vadd.f32 %v1592_v14, %v1578_v57  ;;  %v1585_v4 = vmul.f32 %v1518_v60, %v1518_v60 }
 0x18d   :  { %v1594_v30 = vadd.f32 %v1593_v24, %v1579_v21  ;;  %v1555_v52 = vadd.f32 %v1554_v23, %v1497_v47 }
 0x18f   :  { %v1556_v32 = vadd.f32 %v1555_v52, %v2796_v27  ;;  %v1595_v33 = vadd.f32 %v1594_v30, %v1580_v26 }
 0x191   :  { %v1557_v6 = vadd.f32 %v1556_v32, %v2810_v25  ;;  %v1596_v34 = vadd.f32 %v1595_v33, %v1581_v31 }
 0x193   :  { %v1558_v37 = vadd.f32 %v1557_v6, %v1510_v2  ;;  %v1597_v8 = vadd.f32 %v1596_v34, %v1582_v54 }
 0x195   :  { %v1559_v42 = vadd.f32 %v1558_v37, %v1513_v13  ;;  %v1598_v29 = vadd.f32 %v1597_v8, %v1583_v35 }
 0x197   :  { %v1560_v7 = vadd.f32 %v1559_v42, %v1518_v60  ;;  %v1599_v46 = vadd.f32 %v1598_v29, %v1584_v44 }
 0x199   :  { %v1561_v45 = vadd.f32 %v1560_v7, %v1521_v19  ;;  %v1600_v49 = vadd.f32 %v1599_v46, %v1585_v4 }
 0x19b   :  { %v1562_v27 = vrot.slane %v1561_v45, 4  ;;  %v1601_v47 = vadd.f32 %v1600_v49, %v1586_v48 }
 0x19d   :  { %v1563_v39 = vadd.f32 %v1562_v27, %v1561_v45  ;;  %v1602_v28 = vrot.slane %v1601_v47, 4 }
 0x19f   :  { %v1564_v50 = vrot.slane %v1563_v39, 2  ;;  %v1603_v51 = vadd.f32 %v1602_v28, %v1601_v47 }
 0x1a1   :  { %v1565_v25 = vadd.f32 %v1564_v50, %v1563_v39  ;;  %v1604_v53 = vrot.slane %v1603_v51, 2 }
 0x1a3   :  { %v1566_v20 = vrot.slane %v1565_v25, 1  ;;  %v1605_v40 = vadd.f32 %v1604_v53, %v1603_v51 }
 0x1a5   :  { %v1567_v58 = vadd.f32 %v1566_v20, %v1565_v25  ;;  %v1606_v59 = vrot.slane %v1605_v40, 1 }
 0x1a7   :  { %v1568_v41 = vadd.f32 %v1567_v58, %v1546_v56  ;;  %v1607_v60 = vadd.f32 %v1606_v59, %v1605_v40 }
 0x1a9   :  { %1569 = vst [vmem:[%s2879_s3] sm:$0x1] %v1568_v41  ;;  %v1608_v61 = vadd.f32 %v1607_v60, %v1570_v22 }
 0x1ab   :  { %1609 = vst [vmem:[%s2880_s4] sm:$0x1] %v1608_v61 }

// kernel: resnet_forward.72
= control target key start
LH: loop header
LB: loop body
LE: loop exit
PB: predicated region body
PF: predicated region fallthrough
CT: control target
= control target key end

     0   :  { %s256_s1 = inlined_call_operand.vmem [shape: bf16[128,128], index: 1, kind: input, shape index: {}]   ;;  %s257_s0 = inlined_call_operand.vmem [shape: bf16[32,128], index: 0, kind: input, shape index: {}]   ;;  %s258_s2 = inlined_call_operand.vmem [shape: f32[32,128], index: 2, kind: output, shape index: {}]  }
   0x1   :  { %v189_v0 = vld [vmem:[%s256_s1] sm:$0xff]   ;;  %v190_v1 = vld [vmem:[%s256_s1 + $0x8] sm:$0xff]   ;;  %v191_v2 = vld [vmem:[%s256_s1 + $0x10] sm:$0xff]  }
   0x2   :  { %169 = vmatprep.subr.bf16.mxu0 %v189_v0  ;;  %v192_v3 = vld [vmem:[%s256_s1 + $0x18] sm:$0xff]   ;;  %v197_v4 = vld [vmem:[%s257_s0] sm:$0xff]   ;;  %v194_v6 = vld [vmem:[%s256_s1 + $0x28] sm:$0xff]  }
   0x3   :  { %170 = vmatpush3.bf16.msra.mxu0 %v189_v0  ;;  %185 = vmatprep.mubr.bf16.mxu0 %v197_v4  ;;  %v193_v5 = vld [vmem:[%s256_s1 + $0x20] sm:$0xff]   ;;  %v195_v7 = vld [vmem:[%s256_s1 + $0x30] sm:$0xff]   ;;  %v196_v8 = vld [vmem:[%s256_s1 + $0x38] sm:$0xff]  }
   0x4   :  { %171 = vmatprep.subr.bf16.mxu0 %v190_v1  ;;  %v198_v9 = vld [vmem:[%s257_s0 + $0x8] sm:$0xff]  }
   0x7   :  { %172 = vmatpush3.bf16.msra.mxu0 %v190_v1 }
   0x8   :  { %173 = vmatprep.subr.bf16.mxu0 %v191_v2 }
   0xb   :  { %174 = vmatpush3.bf16.msra.mxu0 %v191_v2 }
   0xc   :  { %175 = vmatprep.subr.bf16.mxu0 %v192_v3 }
   0xf   :  { %176 = vmatpush3.bf16.msra.mxu0 %v192_v3 }
  0x10   :  { %177 = vmatprep.subr.bf16.mxu0 %v193_v5 }
  0x13   :  { %178 = vmatpush3.bf16.msra.mxu0 %v193_v5 }
  0x14   :  { %179 = vmatprep.subr.bf16.mxu0 %v194_v6 }
  0x17   :  { %180 = vmatpush3.bf16.msra.mxu0 %v194_v6 }
  0x18   :  { %181 = vmatprep.subr.bf16.mxu0 %v195_v7 }
  0x1b   :  { %182 = vmatpush3.bf16.msra.mxu0 %v195_v7 }
  0x1c   :  { %183 = vmatprep.subr.bf16.mxu0 %v196_v8 }
  0x1f   :  { %184 = vmatpush3.bf16.msra.mxu0 %v196_v8 }
  0x22   :  { %186 = vmatmul.mubr.bf16.vlgmr.msra.gmra.mrb[0].mxu0 %v198_v9 }
  0xf5   :  { %v187_v10 = vpop.f32.mrb[0].mxu0 }
  0xf6   :  { %143 = vst [vmem:[%s258_s2 + $0x10] sm:$0xff] %v187_v10  ;;  %v126_v11 = vpop.f32.mrb[1].mxu0 }
  0xf7   :  { %141 = vst [vmem:[%s258_s2] sm:$0xff] %v126_v11  ;;  %v188_v12 = vpop.f32.mrb[2].mxu0 }
  0xf8   :  { %144 = vst [vmem:[%s258_s2 + $0x18] sm:$0xff] %v188_v12  ;;  %v129_v13 = vpop.f32.mrb[3].mxu0 }
  0xf9   :  { %142 = vst [vmem:[%s258_s2 + $0x8] sm:$0xff] %v129_v13 }

// kernel: resnet_forward.71
= control target key start
LH: loop header
LB: loop body
LE: loop exit
PB: predicated region body
PF: predicated region fallthrough
CT: control target
= control target key end

     0   :  { %vm551_vm0 = vcmask 523264   ;;  %s1684_s1 = inlined_call_operand.vmem [shape: bf16[576,128], index: 1, kind: input, shape index: {}]   ;;  %s1685_s0 = inlined_call_operand.vmem [shape: bf16[128,576], index: 0, kind: input, shape index: {}]   ;;  %s1686_s3 = inlined_call_operand.vmem [shape: f32[1,128], index: 3, kind: output, shape index: {1}]   ;;  %s1687_s4 = inlined_call_operand.vmem [shape: f32[1,128], index: 4, kind: output, shape index: {2}]   ;;  %s1688_s2 = inlined_call_operand.vmem [shape: f32[128,128], index: 2, kind: output, shape index: {0}]  }
   0x1   :  { %v1222_v0 = vld [vmem:[%s1684_s1 + $0x40] sm:$0xff]   ;;  %v1226_v4 = vld [vmem:[%s1684_s1 + $0x48] sm:$0xff]   ;;  %v1230_v8 = vld [vmem:[%s1684_s1 + $0x50] sm:$0xff]  }
   0x2   :  { %v1223_v1 = vld [vmem:[%s1684_s1 + $0xc0] sm:$0xff]   ;;  %1049 = vmatprep.subr.bf16.mxu0 %v1222_v0  ;;  %v1227_v5 = vld [vmem:[%s1684_s1 + $0xc8] sm:$0xff]   ;;  %v1231_v9 = vld [vmem:[%s1684_s1 + $0xd0] sm:$0xff]  }
   0x3   :  { %v1224_v2 = vld [vmem:[%s1684_s1] sm:$0xff]   ;;  %1113 = vmatprep.subr.bf16.mxu1 %v1223_v1  ;;  %v1228_v6 = vld [vmem:[%s1684_s1 + $0x8] sm:$0xff]   ;;  %v1232_v10 = vld [vmem:[%s1684_s1 + $0x10] sm:$0xff]  }
   0x4   :  { %v1225_v3 = vld [vmem:[%s1684_s1 + $0x80] sm:$0xff]   ;;  %1050 = vmatpush3.bf16.msra.mxu0 %v1224_v2  ;;  %v1229_v7 = vld [vmem:[%s1684_s1 + $0x88] sm:$0xff]   ;;  %v1233_v11 = vld [vmem:[%s1684_s1 + $0x90] sm:$0xff]  }
   0x5   :  { %1114 = vmatpush3.bf16.msra.mxu1 %v1225_v3  ;;  %1051 = vmatprep.subr.bf16.mxu0 %v1226_v4  ;;  %v1234_v12 = vld [vmem:[%s1684_s1 + $0x58] sm:$0xff]   ;;  %v1238_v16 = vld [vmem:[%s1684_s1 + $0x60] sm:$0xff]   ;;  %v1242_v20 = vld [vmem:[%s1684_s1 + $0x68] sm:$0xff]  }
   0x6   :  { %1115 = vmatprep.subr.bf16.mxu1 %v1227_v5  ;;  %v1235_v13 = vld [vmem:[%s1684_s1 + $0xd8] sm:$0xff]   ;;  %v1239_v17 = vld [vmem:[%s1684_s1 + $0xe0] sm:$0xff]   ;;  %v1243_v21 = vld [vmem:[%s1684_s1 + $0xe8] sm:$0xff]  }
   0x7   :  { %v1236_v14 = vld [vmem:[%s1684_s1 + $0x18] sm:$0xff]   ;;  %v1240_v18 = vld [vmem:[%s1684_s1 + $0x20] sm:$0xff]   ;;  %v1244_v22 = vld [vmem:[%s1684_s1 + $0x28] sm:$0xff]  }
   0x8   :  { %1052 = vmatpush3.bf16.msra.mxu0 %v1228_v6  ;;  %v1237_v15 = vld [vmem:[%s1684_s1 + $0x98] sm:$0xff]   ;;  %v1241_v19 = vld [vmem:[%s1684_s1 + $0xa0] sm:$0xff]   ;;  %v1245_v23 = vld [vmem:[%s1684_s1 + $0xa8] sm:$0xff]  }
   0x9   :  { %1116 = vmatpush3.bf16.msra.mxu1 %v1229_v7  ;;  %1053 = vmatprep.subr.bf16.mxu0 %v1230_v8  ;;  %v1246_v24 = vld [vmem:[%s1684_s1 + $0x70] sm:$0xff]   ;;  %v1250_v28 = vld [vmem:[%s1684_s1 + $0x78] sm:$0xff]   ;;  %v1259_v35 = vld [vmem:[%s1685_s0 + $0xc] ss:$20 sps:$4 sm:$0xff]  }
   0xa   :  { %1117 = vmatprep.subr.bf16.mxu1 %v1231_v9  ;;  %v1247_v25 = vld [vmem:[%s1684_s1 + $0xf0] sm:$0xff]   ;;  %v1251_v29 = vld [vmem:[%s1684_s1 + $0xf8] sm:$0xff]   ;;  %v1260_v36 = vld [vmem:[%s1684_s1 + $0x100] sm:$0xff]   ;;  %705 = vmatprep.mubr.bf16.mxu1 %v1259_v35 }
   0xb   :  { %v1248_v26 = vld [vmem:[%s1684_s1 + $0x30] sm:$0xff]   ;;  %v1252_v30 = vld [vmem:[%s1684_s1 + $0x38] sm:$0xff]   ;;  %v1261_v37 = vld [vmem:[%s1685_s0 + $0x2c] ss:$20 sps:$4 sm:$0xff]  }
   0xc   :  { %1054 = vmatpush3.bf16.msra.mxu0 %v1232_v10  ;;  %v1249_v27 = vld [vmem:[%s1684_s1 + $0xb0] sm:$0xff]   ;;  %v1253_v31 = vld [vmem:[%s1684_s1 + $0xb8] sm:$0xff]   ;;  %v1273_v42 = vld [vmem:[%s1684_s1 + $0x108] sm:$0xff]  }
   0xd   :  { %1118 = vmatpush3.bf16.msra.mxu1 %v1233_v11  ;;  %1055 = vmatprep.subr.bf16.mxu0 %v1234_v12  ;;  %v1254_v32 = vld [vmem:[%s1685_s0] ss:$20 sps:$4 sm:$0xff]   ;;  %v1256_v33 = vld [vmem:[%s1685_s0 + $0x4] ss:$20 sps:$4 sm:$0xff]   ;;  %v1257_v34 = vld [vmem:[%s1685_s0 + $0x8] ss:$20 sps:$4 sm:$0xff]  }
   0xe   :  { %1119 = vmatprep.subr.bf16.mxu1 %v1235_v13  ;;  %608 = vmatprep.mubr.bf16.mxu0 %v1256_v33  ;;  %v1263_v38 = vld [vmem:[%s1685_s0 + $0x34] ss:$20 sps:$4 sm:$0xff]   ;;  %v1266_v40 = vld [vmem:[%s1685_s0 + $0x30] ss:$20 sps:$4 sm:$0xff]   ;;  %v1272_v45 = vld [vmem:[%s1685_s0 + $0x58] ss:$20 sps:$4 sm:$0xff]  }
   0xf   :  { %v1265_v39 = vld [vmem:[%s1685_s0 + $0x28] ss:$20 sps:$4 sm:$0xff]   ;;  %v1271_v44 = vld [vmem:[%s1685_s0 + $0x50] ss:$20 sps:$4 sm:$0xff]   ;;  %v1278_v50 = vld [vmem:[%s1685_s0 + $0x78] ss:$20 sps:$4 sm:$0xff]  }
  0x10   :  { %1056 = vmatpush3.bf16.msra.mxu0 %v1236_v14  ;;  %v1267_v41 = vld [vmem:[%s1685_s0 + $0x54] ss:$20 sps:$4 sm:$0xff]   ;;  %v1269_v43 = vld [vmem:[%s1685_s0 + $0x5c] ss:$20 sps:$4 sm:$0xff]   ;;  %v1276_v48 = vld [vmem:[%s1685_s0 + $0x84] ss:$20 sps:$4 sm:$0xff]  }
  0x11   :  { %1120 = vmatpush3.bf16.msra.mxu1 %v1237_v15  ;;  %1057 = vmatprep.subr.bf16.mxu0 %v1238_v16  ;;  %v1286_v46 = vld [vmem:[%s1684_s1 + $0x110] sm:$0xff]   ;;  %v1299_v49 = vld [vmem:[%s1684_s1 + $0x118] sm:$0xff]   ;;  %v1282_v53 = vld [vmem:[%s1685_s0 + $0xac] ss:$20 sps:$4 sm:$0xff]   ;;  %v1314_v12 = vmov 0.0  }
  0x12   :  { %1121 = vmatprep.subr.bf16.mxu1 %v1239_v17  ;;  %v1274_v47 = vld [vmem:[%s1685_s0 + $0x7c] ss:$20 sps:$4 sm:$0xff]   ;;  %v1279_v51 = vld [vmem:[%s1685_s0 + $0x80] ss:$20 sps:$4 sm:$0xff]   ;;  %v1280_v52 = vld [vmem:[%s1685_s0 + $0xa4] ss:$20 sps:$4 sm:$0xff]  }
  0x13   :  { %v1284_v54 = vld [vmem:[%s1685_s0 + $0xa0] ss:$20 sps:$4 sm:$0xff]   ;;  %v1285_v55 = vld [vmem:[%s1685_s0 + $0xa8] ss:$20 sps:$4 sm:$0xff]   ;;  %v1292_v59 = vld [vmem:[%s1685_s0 + $0xd0] ss:$20 sps:$4 sm:$0xff]  }
  0x14   :  { %1058 = vmatpush3.bf16.msra.mxu0 %v1240_v18  ;;  %v1287_v56 = vld [vmem:[%s1685_s0 + $0xcc] ss:$20 sps:$4 sm:$0xff]   ;;  %v1289_v57 = vld [vmem:[%s1685_s0 + $0xd4] ss:$20 sps:$4 sm:$0xff]   ;;  %v1295_v61 = vld [vmem:[%s1685_s0 + $0xfc] ss:$20 sps:$4 sm:$0xff]  }
  0x15   :  { %1122 = vmatpush3.bf16.msra.mxu1 %v1241_v19  ;;  %1059 = vmatprep.subr.bf16.mxu0 %v1242_v20  ;;  %v1291_v58 = vld [vmem:[%s1685_s0 + $0xc8] ss:$20 sps:$4 sm:$0xff]   ;;  %v1297_v62 = vld [vmem:[%s1685_s0 + $0xf0] ss:$20 sps:$4 sm:$0xff]   ;;  %v1298_v63 = vld [vmem:[%s1685_s0 + $0xf8] ss:$20 sps:$4 sm:$0xff]  }
  0x16   :  { %1123 = vmatprep.subr.bf16.mxu1 %v1243_v21  ;;  %v1293_v60 = vld [vmem:[%s1685_s0 + $0xf4] ss:$20 sps:$4 sm:$0xff]   ;;  %v1300_v0 = vld [vmem:[%s1685_s0 + $0x11c] ss:$20 sps:$4 sm:$0xff]   ;;  %v1302_v1 = vld [vmem:[%s1685_s0 + $0x124] ss:$20 sps:$4 sm:$0xff]  }
  0x17   :  { %v1304_v2 = vld [vmem:[%s1685_s0 + $0x118] ss:$20 sps:$4 sm:$0xff]   ;;  %v1305_v3 = vld [vmem:[%s1685_s0 + $0x120] ss:$20 sps:$4 sm:$0xff]   ;;  %v1306_v4 = vld [vmem:[%s1685_s0 + $0x10] ss:$20 sps:$4 sm:$0xff]  }
  0x18   :  { %1060 = vmatpush3.bf16.msra.mxu0 %v1244_v22  ;;  %v1307_v5 = vld [vmem:[%s1685_s0 + $0xb0] ss:$20 sps:$4 sm:$0xff]   ;;  %v1308_v6 = vld [vmem:[%s1685_s0 + $0x38] ss:$20 sps:$4 sm:$0xff]   ;;  %v1310_v8 = vld [vmem:[%s1685_s0 + $0x60] ss:$20 sps:$4 sm:$0xff]  }
  0x19   :  { %1124 = vmatpush3.bf16.msra.mxu1 %v1245_v23  ;;  %1061 = vmatprep.subr.bf16.mxu0 %v1246_v24  ;;  %v1309_v7 = vld [vmem:[%s1685_s0 + $0xd8] ss:$20 sps:$4 sm:$0xff]   ;;  %v1311_v9 = vld [vmem:[%s1685_s0 + $0x100] ss:$20 sps:$4 sm:$0xff]   ;;  %v1312_v10 = vld [vmem:[%s1685_s0 + $0x88] ss:$20 sps:$4 sm:$0xff]  }
  0x1a   :  { %1125 = vmatprep.subr.bf16.mxu1 %v1247_v25  ;;  %v1313_v11 = vld [vmem:[%s1685_s0 + $0x128] ss:$20 sps:$4 sm:$0xff]   ;;  %887 = vst [vmem:[%s1686_s3] sm:$0x1] %v1314_v12  ;;  %888 = vst [vmem:[%s1687_s4] sm:$0x1] %v1314_v12 }
  0x1c   :  { %1062 = vmatpush3.bf16.msra.mxu0 %v1248_v26 }
  0x1d   :  { %1126 = vmatpush3.bf16.msra.mxu1 %v1249_v27  ;;  %1063 = vmatprep.subr.bf16.mxu0 %v1250_v28 }
  0x1e   :  { %1127 = vmatprep.subr.bf16.mxu1 %v1251_v29 }
  0x20   :  { %1064 = vmatpush3.bf16.msra.mxu0 %v1252_v30 }
  0x21   :  { %1128 = vmatpush3.bf16.msra.mxu1 %v1253_v31  ;;  %1189 = vmatprep.subr.bf16.mxu0 %v1260_v36 }
  0x22   :  { %1213 = vmatprep.subr.bf16.mxu1 %v1260_v36 }
  0x23   :  { %609 = vmatmul.mubr.bf16.vlgmr.msra.gmra.mrb[0].mxu0 %v1254_v32 }
  0x24   :  { %706 = vmatmul.mubr.bf16.vlgmr.msra.gmra.mrb[0].mxu1 %v1257_v34  ;;  %1190 = vmatpush3.bf16.msra.mxu0 %v1260_v36 }
  0x25   :  { %616 = vmatprep.mubr.bf16.mxu0 %v1261_v37  ;;  %713 = vmatprep.mubr.bf16.mxu1 %v1263_v38 }
  0x26   :  { %1217 = vmatpush3.bf16.msra.mxu1 %v1260_v36  ;;  %1191 = vmatprep.subr.bf16.mxu0 %v1273_v42 }
  0x27   :  { %1214 = vmatprep.subr.bf16.mxu1 %v1273_v42 }
  0x28   :  { %1192 = vmatpush3.bf16.msra.mxu0 %v1273_v42 }
  0x29   :  { %1193 = vmatprep.subr.bf16.mxu0 %v1286_v46 }
  0x2a   :  { %1218 = vmatpush3.bf16.msra.mxu1 %v1273_v42 }
  0x2b   :  { %617 = vmatmul.mubr.bf16.gmra.mrb[4].mxu0 %v1265_v39  ;;  %1215 = vmatprep.subr.bf16.mxu1 %v1286_v46 }
  0x2c   :  { %714 = vmatmul.mubr.bf16.gmra.mrb[4].mxu1 %v1266_v40  ;;  %624 = vmatprep.mubr.bf16.mxu0 %v1267_v41 }
  0x2d   :  { %721 = vmatprep.mubr.bf16.mxu1 %v1269_v43  ;;  %1194 = vmatpush3.bf16.msra.mxu0 %v1286_v46 }
  0x2e   :  { %1219 = vmatpush3.bf16.msra.mxu1 %v1286_v46  ;;  %1195 = vmatprep.subr.bf16.mxu0 %v1299_v49 }
  0x2f   :  { %1216 = vmatprep.subr.bf16.mxu1 %v1299_v49 }
  0x31   :  { %1196 = vmatpush3.bf16.msra.mxu0 %v1299_v49 }
  0x32   :  { %1220 = vmatpush3.bf16.msra.mxu1 %v1299_v49 }
  0x33   :  { %625 = vmatmul.mubr.bf16.gmra.mrb[8].mxu0 %v1271_v44 }
  0x34   :  { %722 = vmatmul.mubr.bf16.gmra.mrb[8].mxu1 %v1272_v45  ;;  %632 = vmatprep.mubr.bf16.mxu0 %v1274_v47 }
  0x35   :  { %729 = vmatprep.mubr.bf16.mxu1 %v1276_v48 }
  0x3b   :  { %633 = vmatmul.mubr.bf16.gmra.mrb[12].mxu0 %v1278_v50 }
  0x3c   :  { %730 = vmatmul.mubr.bf16.gmra.mrb[12].mxu1 %v1279_v51  ;;  %640 = vmatprep.mubr.bf16.mxu0 %v1280_v52 }
  0x3d   :  { %737 = vmatprep.mubr.bf16.mxu1 %v1282_v53 }
  0x43   :  { %641 = vmatmul.mubr.bf16.gmra.mrb[16].mxu0 %v1284_v54 }
  0x44   :  { %738 = vmatmul.mubr.bf16.gmra.mrb[16].mxu1 %v1285_v55  ;;  %648 = vmatprep.mubr.bf16.mxu0 %v1287_v56 }
  0x45   :  { %745 = vmatprep.mubr.bf16.mxu1 %v1289_v57 }
  0x4b   :  { %649 = vmatmul.mubr.bf16.gmra.mrb[20].mxu0 %v1291_v58 }
  0x4c   :  { %746 = vmatmul.mubr.bf16.gmra.mrb[20].mxu1 %v1292_v59  ;;  %656 = vmatprep.mubr.bf16.mxu0 %v1293_v60 }
  0x4d   :  { %753 = vmatprep.mubr.bf16.mxu1 %v1295_v61 }
  0x53   :  { %657 = vmatmul.mubr.bf16.gmra.mrb[24].mxu0 %v1297_v62 }
  0x54   :  { %754 = vmatmul.mubr.bf16.gmra.mrb[24].mxu1 %v1298_v63  ;;  %664 = vmatprep.mubr.bf16.mxu0 %v1300_v0 }
  0x55   :  { %761 = vmatprep.mubr.bf16.mxu1 %v1302_v1 }
  0x5b   :  { %665 = vmatmul.mubr.bf16.gmra.mrb[28].mxu0 %v1304_v2 }
  0x5c   :  { %762 = vmatmul.mubr.bf16.gmra.mrb[28].mxu1 %v1305_v3  ;;  %1197 = vmatprep.mubr.msk.bf16.mxu0 %vm551_vm0, %v1306_v4 }
  0x5d   :  { %1205 = vmatprep.mubr.msk.bf16.mxu1 %vm551_vm0, %v1307_v5 }
  0x63   :  { %1198 = vmatmul.mubr.msk.bf16.vlgmr.msra.gmra.mrb[32].mxu0 %vm551_vm0, %v1308_v6 }
  0x64   :  { %1206 = vmatmul.mubr.msk.bf16.vlgmr.msra.gmra.mrb[32].mxu1 %vm551_vm0, %v1309_v7  ;;  %1201 = vmatprep.mubr.msk.bf16.mxu0 %vm551_vm0, %v1310_v8 }
  0x65   :  { %1209 = vmatprep.mubr.msk.bf16.mxu1 %vm551_vm0, %v1311_v9 }
  0x6b   :  { %1202 = vmatmul.mubr.msk.bf16.gmra.mrb[36].mxu0 %vm551_vm0, %v1312_v10 }
  0x6c   :  { %1210 = vmatmul.mubr.msk.bf16.gmra.mrb[36].mxu1 %vm551_vm0, %v1313_v11 }
  0xf6   :  { %v1065_v13 = vpop.f32.mrb[0].mxu0 }
  0xf7   :  { %v1129_v14 = vpop.f32.mrb[0].mxu1  ;;  %v1066_v15 = vpop.f32.mrb[1].mxu0 }
  0xf8   :  { %v1067_v16 = vadd.f32 %v1066_v15, %v1065_v13  ;;  %v1130_v17 = vpop.f32.mrb[1].mxu1  ;;  %v1068_v18 = vpop.f32.mrb[2].mxu0 }
  0xf9   :  { %v1131_v19 = vadd.f32 %v1130_v17, %v1129_v14  ;;  %v1132_v20 = vpop.f32.mrb[2].mxu1  ;;  %v1069_v21 = vpop.f32.mrb[3].mxu0 }
  0xfa   :  { %v1070_v22 = vadd.f32 %v1069_v21, %v1068_v18  ;;  %v1133_v23 = vpop.f32.mrb[3].mxu1 }
  0xfb   :  { %v1134_v24 = vadd.f32 %v1133_v23, %v1132_v20  ;;  %v1582_v25 = vadd.f32 %v1131_v19, %v1067_v16 }
  0xfd   :  { %v1584_v26 = vadd.f32 %v1134_v24, %v1070_v22 }
  0xfe   :  { %v1071_v27 = vpop.f32.mrb[4].mxu0 }
  0xff   :  { %v1135_v28 = vpop.f32.mrb[4].mxu1  ;;  %v1072_v29 = vpop.f32.mrb[5].mxu0 }
 0x100   :  { %v1073_v30 = vadd.f32 %v1072_v29, %v1071_v27  ;;  %v1136_v31 = vpop.f32.mrb[5].mxu1  ;;  %v1074_v32 = vpop.f32.mrb[6].mxu0 }
 0x101   :  { %v1137_v33 = vadd.f32 %v1136_v31, %v1135_v28  ;;  %v1138_v34 = vpop.f32.mrb[6].mxu1  ;;  %v1075_v35 = vpop.f32.mrb[7].mxu0 }
 0x102   :  { %v1076_v36 = vadd.f32 %v1075_v35, %v1074_v32  ;;  %v1139_v37 = vpop.f32.mrb[7].mxu1 }
 0x103   :  { %v1140_v38 = vadd.f32 %v1139_v37, %v1138_v34  ;;  %v1586_v39 = vadd.f32 %v1137_v33, %v1073_v30 }
 0x105   :  { %v1588_v40 = vadd.f32 %v1140_v38, %v1076_v36 }
 0x106   :  { %v1077_v41 = vpop.f32.mrb[8].mxu0 }
 0x107   :  { %v1141_v42 = vpop.f32.mrb[8].mxu1  ;;  %v1078_v43 = vpop.f32.mrb[9].mxu0 }
 0x108   :  { %v1079_v44 = vadd.f32 %v1078_v43, %v1077_v41  ;;  %v1142_v45 = vpop.f32.mrb[9].mxu1  ;;  %v1080_v46 = vpop.f32.mrb[10].mxu0 }
 0x109   :  { %v1143_v47 = vadd.f32 %v1142_v45, %v1141_v42  ;;  %v1144_v48 = vpop.f32.mrb[10].mxu1  ;;  %v1081_v49 = vpop.f32.mrb[11].mxu0 }
 0x10a   :  { %v1082_v50 = vadd.f32 %v1081_v49, %v1080_v46  ;;  %v1145_v51 = vpop.f32.mrb[11].mxu1 }
 0x10b   :  { %v1146_v52 = vadd.f32 %v1145_v51, %v1144_v48  ;;  %v1590_v53 = vadd.f32 %v1143_v47, %v1079_v44 }
 0x10d   :  { %v1592_v54 = vadd.f32 %v1146_v52, %v1082_v50 }
 0x10e   :  { %v1083_v55 = vpop.f32.mrb[12].mxu0 }
 0x10f   :  { %v1147_v56 = vpop.f32.mrb[12].mxu1  ;;  %v1084_v57 = vpop.f32.mrb[13].mxu0 }
 0x110   :  { %v1085_v58 = vadd.f32 %v1084_v57, %v1083_v55  ;;  %v1148_v59 = vpop.f32.mrb[13].mxu1  ;;  %v1086_v60 = vpop.f32.mrb[14].mxu0 }
 0x111   :  { %v1149_v61 = vadd.f32 %v1148_v59, %v1147_v56  ;;  %v1150_v62 = vpop.f32.mrb[14].mxu1  ;;  %v1087_v63 = vpop.f32.mrb[15].mxu0 }
 0x112   :  { %v1088_v0 = vadd.f32 %v1087_v63, %v1086_v60  ;;  %v1151_v1 = vpop.f32.mrb[15].mxu1 }
 0x113   :  { %v1152_v2 = vadd.f32 %v1151_v1, %v1150_v62  ;;  %v1594_v3 = vadd.f32 %v1149_v61, %v1085_v58 }
 0x115   :  { %v1596_v4 = vadd.f32 %v1152_v2, %v1088_v0 }
 0x116   :  { %v1089_v5 = vpop.f32.mrb[16].mxu0 }
 0x117   :  { %v1153_v6 = vpop.f32.mrb[16].mxu1  ;;  %v1090_v7 = vpop.f32.mrb[17].mxu0 }
 0x118   :  { %v1091_v8 = vadd.f32 %v1090_v7, %v1089_v5  ;;  %v1154_v9 = vpop.f32.mrb[17].mxu1  ;;  %v1092_v10 = vpop.f32.mrb[18].mxu0 }
 0x119   :  { %v1155_v11 = vadd.f32 %v1154_v9, %v1153_v6  ;;  %v1156_v12 = vpop.f32.mrb[18].mxu1  ;;  %v1093_v13 = vpop.f32.mrb[19].mxu0 }
 0x11a   :  { %v1094_v14 = vadd.f32 %v1093_v13, %v1092_v10  ;;  %v1157_v15 = vpop.f32.mrb[19].mxu1 }
 0x11b   :  { %v1158_v16 = vadd.f32 %v1157_v15, %v1156_v12  ;;  %v740_v17 = vadd.f32 %v1155_v11, %v1091_v8 }
 0x11d   :  { %v1598_v18 = vadd.f32 %v1158_v16, %v1094_v14 }
 0x11e   :  { %v1095_v19 = vpop.f32.mrb[20].mxu0 }
 0x11f   :  { %v1159_v20 = vpop.f32.mrb[20].mxu1  ;;  %v1096_v21 = vpop.f32.mrb[21].mxu0 }
 0x120   :  { %v1097_v22 = vadd.f32 %v1096_v21, %v1095_v19  ;;  %v1160_v23 = vpop.f32.mrb[21].mxu1  ;;  %v1098_v24 = vpop.f32.mrb[22].mxu0 }
 0x121   :  { %v1161_v27 = vadd.f32 %v1160_v23, %v1159_v20  ;;  %v1162_v28 = vpop.f32.mrb[22].mxu1  ;;  %v1099_v29 = vpop.f32.mrb[23].mxu0 }
 0x122   :  { %v1100_v30 = vadd.f32 %v1099_v29, %v1098_v24  ;;  %v1163_v31 = vpop.f32.mrb[23].mxu1 }
 0x123   :  { %v1164_v32 = vadd.f32 %v1163_v31, %v1162_v28  ;;  %v748_v33 = vadd.f32 %v1161_v27, %v1097_v22 }
 0x125   :  { %v751_v34 = vadd.f32 %v1164_v32, %v1100_v30 }
 0x126   :  { %v1101_v35 = vpop.f32.mrb[24].mxu0 }
 0x127   :  { %v1165_v36 = vpop.f32.mrb[24].mxu1  ;;  %v1102_v37 = vpop.f32.mrb[25].mxu0 }
 0x128   :  { %v1103_v38 = vadd.f32 %v1102_v37, %v1101_v35  ;;  %v1166_v41 = vpop.f32.mrb[25].mxu1  ;;  %v1104_v42 = vpop.f32.mrb[26].mxu0 }
 0x129   :  { %v1167_v43 = vadd.f32 %v1166_v41, %v1165_v36  ;;  %v1168_v44 = vpop.f32.mrb[26].mxu1  ;;  %v1105_v45 = vpop.f32.mrb[27].mxu0 }
 0x12a   :  { %v1106_v46 = vadd.f32 %v1105_v45, %v1104_v42  ;;  %v1169_v47 = vpop.f32.mrb[27].mxu1 }
 0x12b   :  { %v1170_v48 = vadd.f32 %v1169_v47, %v1168_v44  ;;  %v756_v49 = vadd.f32 %v1167_v43, %v1103_v38 }
 0x12d   :  { %v1600_v50 = vadd.f32 %v1170_v48, %v1106_v46 }
 0x12e   :  { %v1107_v51 = vpop.f32.mrb[28].mxu0 }
 0x12f   :  { %v1171_v52 = vpop.f32.mrb[28].mxu1  ;;  %v1108_v55 = vpop.f32.mrb[29].mxu0 }
 0x130   :  { %v1109_v56 = vadd.f32 %v1108_v55, %v1107_v51  ;;  %v1172_v57 = vpop.f32.mrb[29].mxu1  ;;  %v1110_v58 = vpop.f32.mrb[30].mxu0 }
 0x131   :  { %v1173_v59 = vadd.f32 %v1172_v57, %v1171_v52  ;;  %v1174_v60 = vpop.f32.mrb[30].mxu1  ;;  %v1111_v61 = vpop.f32.mrb[31].mxu0 }
 0x132   :  { %v1112_v62 = vadd.f32 %v1111_v61, %v1110_v58  ;;  %v1175_v63 = vpop.f32.mrb[31].mxu1 }
 0x133   :  { %v1176_v0 = vadd.f32 %v1175_v63, %v1174_v60  ;;  %v764_v1 = vadd.f32 %v1173_v59, %v1109_v56 }
 0x135   :  { %v767_v2 = vadd.f32 %v1176_v0, %v1112_v62 }
 0x136   :  { %v1199_v5 = vpop.f32.mrb[32].mxu0 }
 0x137   :  { %v813_v6 = vadd.f32 %v1199_v5, %v1586_v39  ;;  %v1207_v7 = vpop.f32.mrb[32].mxu1  ;;  %v804_v8 = vpop.f32.mrb[33].mxu0 }
 0x138   :  { %v1603_v9 = vadd.f32 %v1207_v7, %v748_v33  ;;  %v805_v10 = vadd.f32 %v804_v8, %v1582_v25  ;;  %v836_v11 = vpop.f32.mrb[33].mxu1  ;;  %v1200_v12 = vpop.f32.mrb[34].mxu0 }
 0x139   :  { %869 = vst [vmem:[%s1688_s2 + $0x10] sm:$0xff] %v813_v6  ;;  %v837_v13 = vadd.f32 %v836_v11, %v740_v17  ;;  %v816_v14 = vadd.f32 %v1200_v12, %v1588_v40  ;;  %v1208_v15 = vpop.f32.mrb[34].mxu1  ;;  %v807_v16 = vpop.f32.mrb[35].mxu0  ;;  %v916_v21 = vmul.f32 %v813_v6, %v813_v6 }
 0x13a   :  { %877 = vst [vmem:[%s1688_s2 + $0x50] sm:$0xff] %v1603_v9  ;;  %867 = vst [vmem:[%s1688_s2] sm:$0xff] %v805_v10  ;;  %v1617_v25 = vadd.f32 %v1208_v15, %v751_v34  ;;  %v808_v39 = vadd.f32 %v807_v16, %v1584_v26  ;;  %v839_v19 = vpop.f32.mrb[35].mxu1  ;;  %v914_v17 = vmul.f32 %v805_v10, %v805_v10 }
 0x13b   :  { %875 = vst [vmem:[%s1688_s2 + $0x40] sm:$0xff] %v837_v13  ;;  %870 = vst [vmem:[%s1688_s2 + $0x18] sm:$0xff] %v816_v14  ;;  %v840_v40 = vadd.f32 %v839_v19, %v1598_v18  ;;  %v917_v24 = vmul.f32 %v816_v14, %v816_v14  ;;  %v922_v56 = vmul.f32 %v837_v13, %v837_v13 }
 0x13c   :  { %878 = vst [vmem:[%s1688_s2 + $0x58] sm:$0xff] %v1617_v25  ;;  %868 = vst [vmem:[%s1688_s2 + $0x8] sm:$0xff] %v808_v39  ;;  %v890_v26 = vadd.f32 %v808_v39, %v805_v10  ;;  %v915_v20 = vmul.f32 %v808_v39, %v808_v39  ;;  %v924_v62 = vmul.f32 %v1603_v9, %v1603_v9 }
 0x13d   :  { %876 = vst [vmem:[%s1688_s2 + $0x48] sm:$0xff] %v840_v40  ;;  %v923_v59 = vmul.f32 %v840_v40, %v840_v40 }
 0x13e   :  { %v891_v22 = vadd.f32 %v890_v26, %v813_v6  ;;  %v930_v23 = vadd.f32 %v915_v20, %v914_v17  ;;  %v1203_v18 = vpop.f32.mrb[36].mxu0 }
 0x13f   :  { %v829_v27 = vadd.f32 %v1203_v18, %v1594_v3  ;;  %v1211_v28 = vpop.f32.mrb[36].mxu1  ;;  %v820_v29 = vpop.f32.mrb[37].mxu0 }
 0x140   :  { %v931_v30 = vadd.f32 %v930_v23, %v916_v21  ;;  %v861_v31 = vadd.f32 %v1211_v28, %v764_v1  ;;  %v821_v32 = vadd.f32 %v820_v29, %v1590_v53  ;;  %v892_v33 = vadd.f32 %v891_v22, %v816_v14  ;;  %v852_v34 = vpop.f32.mrb[37].mxu1  ;;  %v1204_v35 = vpop.f32.mrb[38].mxu0  ;;  %v913_v29 = vld [vmem:[%s1687_s4] sm:$0x1] }
 0x141   :  { %873 = vst [vmem:[%s1688_s2 + $0x30] sm:$0xff] %v829_v27  ;;  %v853_v36 = vadd.f32 %v852_v34, %v756_v49  ;;  %v832_v37 = vadd.f32 %v1204_v35, %v1596_v4  ;;  %v1212_v38 = vpop.f32.mrb[38].mxu1  ;;  %v823_v41 = vpop.f32.mrb[39].mxu0  ;;  %v920_v49 = vmul.f32 %v829_v27, %v829_v27  ;;  %v925_v1 = vmul.f32 %v1617_v25, %v1617_v25 }
 0x142   :  { %881 = vst [vmem:[%s1688_s2 + $0x70] sm:$0xff] %v861_v31  ;;  %871 = vst [vmem:[%s1688_s2 + $0x20] sm:$0xff] %v821_v32  ;;  %v893_v53 = vadd.f32 %v892_v33, %v821_v32  ;;  %v918_v3 = vmul.f32 %v821_v32, %v821_v32  ;;  %v932_v42 = vadd.f32 %v931_v30, %v917_v24  ;;  %v855_v43 = vpop.f32.mrb[39].mxu1  ;;  %v889_v24 = vld [vmem:[%s1686_s3] sm:$0x1] }
 0x143   :  { %879 = vst [vmem:[%s1688_s2 + $0x60] sm:$0xff] %v853_v36  ;;  %874 = vst [vmem:[%s1688_s2 + $0x38] sm:$0xff] %v832_v37  ;;  %v864_v4 = vadd.f32 %v1212_v38, %v767_v2  ;;  %v824_v44 = vadd.f32 %v823_v41, %v1592_v54  ;;  %v856_v46 = vadd.f32 %v855_v43, %v1600_v50 }
 0x144   :  { %v933_v45 = vadd.f32 %v932_v42, %v918_v3  ;;  %v921_v52 = vmul.f32 %v832_v37, %v832_v37  ;;  %v926_v6 = vmul.f32 %v853_v36, %v853_v36 }
 0x145   :  { %882 = vst [vmem:[%s1688_s2 + $0x78] sm:$0xff] %v864_v4  ;;  %872 = vst [vmem:[%s1688_s2 + $0x28] sm:$0xff] %v824_v44  ;;  %v894_v47 = vadd.f32 %v893_v53, %v824_v44  ;;  %v919_v48 = vmul.f32 %v824_v44, %v824_v44  ;;  %v927_v11 = vmul.f32 %v856_v46, %v856_v46 }
 0x146   :  { %880 = vst [vmem:[%s1688_s2 + $0x68] sm:$0xff] %v856_v46  ;;  %v929_v16 = vmul.f32 %v864_v4, %v864_v4 }
 0x147   :  { %v895_v51 = vadd.f32 %v894_v47, %v829_v27  ;;  %v934_v54 = vadd.f32 %v933_v45, %v919_v48 }
 0x149   :  { %v896_v55 = vadd.f32 %v895_v51, %v832_v37  ;;  %v935_v50 = vadd.f32 %v934_v54, %v920_v49 }
 0x14b   :  { %v897_v57 = vadd.f32 %v896_v55, %v837_v13  ;;  %v936_v58 = vadd.f32 %v935_v50, %v921_v52  ;;  %v928_v13 = vmul.f32 %v861_v31, %v861_v31 }
 0x14d   :  { %v937_v60 = vadd.f32 %v936_v58, %v922_v56  ;;  %v898_v61 = vadd.f32 %v897_v57, %v840_v40 }
 0x14f   :  { %v899_v63 = vadd.f32 %v898_v61, %v1603_v9  ;;  %v938_v0 = vadd.f32 %v937_v60, %v923_v59 }
 0x151   :  { %v900_v2 = vadd.f32 %v899_v63, %v1617_v25  ;;  %v939_v5 = vadd.f32 %v938_v0, %v924_v62 }
 0x153   :  { %v901_v7 = vadd.f32 %v900_v2, %v853_v36  ;;  %v940_v8 = vadd.f32 %v939_v5, %v925_v1 }
 0x155   :  { %v902_v10 = vadd.f32 %v901_v7, %v856_v46  ;;  %v941_v12 = vadd.f32 %v940_v8, %v926_v6 }
 0x157   :  { %v903_v14 = vadd.f32 %v902_v10, %v861_v31  ;;  %v942_v15 = vadd.f32 %v941_v12, %v927_v11 }
 0x159   :  { %v904_v39 = vadd.f32 %v903_v14, %v864_v4  ;;  %v943_v19 = vadd.f32 %v942_v15, %v928_v13 }
 0x15b   :  { %v905_v9 = vrot.slane %v904_v39, 4  ;;  %v944_v40 = vadd.f32 %v943_v19, %v929_v16 }
 0x15d   :  { %v906_v17 = vadd.f32 %v905_v9, %v904_v39  ;;  %v945_v26 = vrot.slane %v944_v40, 4 }
 0x15f   :  { %v907_v20 = vrot.slane %v906_v17, 2  ;;  %v946_v21 = vadd.f32 %v945_v26, %v944_v40 }
 0x161   :  { %v908_v25 = vadd.f32 %v907_v20, %v906_v17  ;;  %v947_v22 = vrot.slane %v946_v21, 2 }
 0x163   :  { %v909_v23 = vrot.slane %v908_v25, 1  ;;  %v948_v18 = vadd.f32 %v947_v22, %v946_v21 }
 0x165   :  { %v910_v27 = vadd.f32 %v909_v23, %v908_v25  ;;  %v949_v28 = vrot.slane %v948_v18, 1 }
 0x167   :  { %v911_v30 = vadd.f32 %v910_v27, %v889_v24  ;;  %v950_v31 = vadd.f32 %v949_v28, %v948_v18 }
 0x169   :  { %912 = vst [vmem:[%s1686_s3] sm:$0x1] %v911_v30  ;;  %v951_v32 = vadd.f32 %v950_v31, %v913_v29 }
 0x16b   :  { %952 = vst [vmem:[%s1687_s4] sm:$0x1] %v951_v32 }

// kernel: resnet_forward.73
= control target key start
LH: loop header
LB: loop body
LE: loop exit
PB: predicated region body
PF: predicated region fallthrough
CT: control target
= control target key end

     0   :  { %vm127_vm0 = vcmask 523264   ;;  %s377_s0 = inlined_call_operand.vmem [shape: f32[128,64], index: 0, kind: input, shape index: {}]   ;;  %s378_s1 = inlined_call_operand.vmem [shape: f32[1,64], index: 1, kind: input, shape index: {}]   ;;  %s379_s2 = inlined_call_operand.vmem [shape: f32[1,64], index: 2, kind: input, shape index: {}]   ;;  %s380_s3 = inlined_call_operand.vmem [shape: f32[128,64], index: 3, kind: input, shape index: {}]   ;;  %s381_s4 = inlined_call_operand.vmem [shape: f32[128,64], index: 4, kind: output, shape index: {}]  }
   0x1   :  { %v17_v0 = vld [vmem:[%s377_s0] sm:$0xff]  ;;  %v18_v4 = vld [vmem:[%s377_s0 + $0x8] sm:$0xff]  ;;  %v19_v7 = vld [vmem:[%s377_s0 + $0x10] sm:$0xff] }
   0x2   :  { %v181_v1 = vld [vmem:[%s378_s1] ss:$0 sm:$0xff]  ;;  %v20_v8 = vld [vmem:[%s377_s0 + $0x18] sm:$0xff]  ;;  %v80_v10 = vld [vmem:[%s380_s3 + $0x8] sm:$0xff] }
   0x3   :  { %v186_v2 = vld [vmem:[%s379_s2] ss:$0 sm:$0xff]  ;;  %v40_v3 = vmul.f32 %v181_v1, %v17_v0  ;;  %v41_v6 = vmul.f32 %v181_v1, %v18_v4  ;;  %v42_v11 = vmul.f32 %v181_v1, %v19_v7  ;;  %v81_v12 = vld [vmem:[%s380_s3 + $0x10] sm:$0xff]  ;;  %v43_v13 = vmul.f32 %v181_v1, %v20_v8  ;;  %v82_v16 = vld [vmem:[%s380_s3 + $0x18] sm:$0xff] }
   0x4   :  { %v79_v5 = vld [vmem:[%s380_s3] sm:$0xff]  ;;  %v22_v18 = vld [vmem:[%s377_s0 + $0x28] sm:$0xff]  ;;  %v23_v19 = vld [vmem:[%s377_s0 + $0x30] sm:$0xff] }
   0x5   :  { %v63_v9 = vadd.f32 %v186_v2, %v40_v3  ;;  %v21_v14 = vld [vmem:[%s377_s0 + $0x20] sm:$0xff]  ;;  %v64_v15 = vadd.f32 %v186_v2, %v41_v6  ;;  %v65_v21 = vadd.f32 %v186_v2, %v42_v11  ;;  %v66_v22 = vadd.f32 %v186_v2, %v43_v13  ;;  %v24_v25 = vld [vmem:[%s377_s0 + $0x38] sm:$0xff]  ;;  %v84_v28 = vld [vmem:[%s380_s3 + $0x28] sm:$0xff] }
   0x6   :  { %v44_v17 = vmul.f32 %v181_v1, %v21_v14  ;;  %v83_v23 = vld [vmem:[%s380_s3 + $0x20] sm:$0xff]  ;;  %v45_v24 = vmul.f32 %v181_v1, %v22_v18  ;;  %v46_v29 = vmul.f32 %v181_v1, %v23_v19  ;;  %v47_v30 = vmul.f32 %v181_v1, %v24_v25  ;;  %v85_v36 = vld [vmem:[%s380_s3 + $0x30] sm:$0xff]  ;;  %v86_v37 = vld [vmem:[%s380_s3 + $0x38] sm:$0xff] }
   0x7   :  { %v95_v20 = vadd.f32 %v79_v5, %v63_v9  ;;  %v96_v26 = vadd.f32 %v80_v10, %v64_v15  ;;  %v25_v31 = vld [vmem:[%s377_s0 + $0x40] sm:$0xff]  ;;  %v97_v33 = vadd.f32 %v81_v12, %v65_v21  ;;  %v98_v34 = vadd.f32 %v82_v16, %v66_v22  ;;  %v26_v38 = vld [vmem:[%s377_s0 + $0x48] sm:$0xff]  ;;  %v27_v43 = vld [vmem:[%s377_s0 + $0x50] sm:$0xff] }
   0x8   :  { %v67_v27 = vadd.f32 %v186_v2, %v44_v17  ;;  %v68_v35 = vadd.f32 %v186_v2, %v45_v24  ;;  %v69_v41 = vadd.f32 %v186_v2, %v46_v29  ;;  %v70_v42 = vadd.f32 %v186_v2, %v47_v30  ;;  %v28_v44 = vld [vmem:[%s377_s0 + $0x58] sm:$0xff]  ;;  %v29_v49 = vld [vmem:[%s377_s0 + $0x60] sm:$0xff]  ;;  %v30_v55 = vld [vmem:[%s377_s0 + $0x68] sm:$0xff] }
   0x9   :  { %v111_v32 = vmax.f32 %v95_v20, 0.0  ;;  %v112_v39 = vmax.f32 %v96_v26, 0.0  ;;  %v113_v45 = vmax.f32 %v97_v33, 0.0  ;;  %v114_v46 = vmax.f32 %v98_v34, 0.0  ;;  %v87_v53 = vld [vmem:[%s380_s3 + $0x40] sm:$0xff]  ;;  %v88_v58 = vld [vmem:[%s380_s3 + $0x48] sm:$0xff] }
   0xa   :  { %v99_v40 = vadd.f32 %v83_v23, %v67_v27  ;;  %v100_v47 = vadd.f32 %v84_v28, %v68_v35  ;;  %v48_v48 = vmul.f32 %v181_v1, %v25_v31  ;;  %v101_v51 = vadd.f32 %v85_v36, %v69_v41  ;;  %v31_v61 = vld [vmem:[%s377_s0 + $0x70] sm:$0xff]  ;;  %v32_v62 = vld [vmem:[%s377_s0 + $0x78] sm:$0xff]  ;;  %v91_v10 = vld [vmem:[%s380_s3 + $0x60] sm:$0xff] }
   0xb   :  { %128 = vst.msk [vmem:[%s381_s4] sm:$0xff] %vm127_vm0, %v111_v32  ;;  %129 = vst.msk [vmem:[%s381_s4 + $0x8] sm:$0xff] %vm127_vm0, %v112_v39  ;;  %v102_v52 = vadd.f32 %v86_v37, %v70_v42  ;;  %v49_v54 = vmul.f32 %v181_v1, %v26_v38  ;;  %v50_v59 = vmul.f32 %v181_v1, %v27_v43  ;;  %v89_v4 = vld [vmem:[%s380_s3 + $0x50] sm:$0xff]  ;;  %v90_v5 = vld [vmem:[%s380_s3 + $0x58] sm:$0xff] }
   0xc   :  { %v115_v50 = vmax.f32 %v99_v40, 0.0  ;;  %130 = vst.msk [vmem:[%s381_s4 + $0x10] sm:$0xff] %vm127_vm0, %v113_v45  ;;  %131 = vst.msk [vmem:[%s381_s4 + $0x18] sm:$0xff] %vm127_vm0, %v114_v46  ;;  %v116_v56 = vmax.f32 %v100_v47, 0.0  ;;  %v71_v57 = vadd.f32 %v186_v2, %v48_v48  ;;  %v51_v60 = vmul.f32 %v181_v1, %v28_v44  ;;  %v92_v14 = vld [vmem:[%s380_s3 + $0x68] sm:$0xff]  ;;  %v93_v21 = vld [vmem:[%s380_s3 + $0x70] sm:$0xff] }
   0xd   :  { %v117_v63 = vmax.f32 %v101_v51, 0.0  ;;  %v118_v0 = vmax.f32 %v102_v52, 0.0  ;;  %v72_v3 = vadd.f32 %v186_v2, %v49_v54  ;;  %v52_v6 = vmul.f32 %v181_v1, %v29_v49  ;;  %v94_v22 = vld [vmem:[%s380_s3 + $0x78] sm:$0xff] }
   0xe   :  { %132 = vst.msk [vmem:[%s381_s4 + $0x20] sm:$0xff] %vm127_vm0, %v115_v50  ;;  %133 = vst.msk [vmem:[%s381_s4 + $0x28] sm:$0xff] %vm127_vm0, %v116_v56  ;;  %v103_v7 = vadd.f32 %v87_v53, %v71_v57  ;;  %v73_v8 = vadd.f32 %v186_v2, %v50_v59  ;;  %v74_v9 = vadd.f32 %v186_v2, %v51_v60 }
   0xf   :  { %v53_v11 = vmul.f32 %v181_v1, %v30_v55  ;;  %134 = vst.msk [vmem:[%s381_s4 + $0x30] sm:$0xff] %vm127_vm0, %v117_v63  ;;  %135 = vst.msk [vmem:[%s381_s4 + $0x38] sm:$0xff] %vm127_vm0, %v118_v0  ;;  %v104_v12 = vadd.f32 %v88_v58, %v72_v3  ;;  %v75_v13 = vadd.f32 %v186_v2, %v52_v6 }
  0x10   :  { %v54_v15 = vmul.f32 %v181_v1, %v31_v61  ;;  %v55_v16 = vmul.f32 %v181_v1, %v32_v62  ;;  %v119_v17 = vmax.f32 %v103_v7, 0.0  ;;  %v105_v18 = vadd.f32 %v89_v4, %v73_v8 }
  0x11   :  { %v106_v19 = vadd.f32 %v90_v5, %v74_v9  ;;  %v76_v20 = vadd.f32 %v186_v2, %v53_v11  ;;  %v120_v23 = vmax.f32 %v104_v12, 0.0  ;;  %v107_v24 = vadd.f32 %v91_v10, %v75_v13 }
  0x12   :  { %v77_v25 = vadd.f32 %v186_v2, %v54_v15  ;;  %v78_v26 = vadd.f32 %v186_v2, %v55_v16  ;;  %136 = vst.msk [vmem:[%s381_s4 + $0x40] sm:$0xff] %vm127_vm0, %v119_v17  ;;  %v121_v1 = vmax.f32 %v105_v18, 0.0 }
  0x13   :  { %v122_v27 = vmax.f32 %v106_v19, 0.0  ;;  %v108_v28 = vadd.f32 %v92_v14, %v76_v20  ;;  %137 = vst.msk [vmem:[%s381_s4 + $0x48] sm:$0xff] %vm127_vm0, %v120_v23  ;;  %v123_v29 = vmax.f32 %v107_v24, 0.0 }
  0x14   :  { %v109_v30 = vadd.f32 %v93_v21, %v77_v25  ;;  %v110_v31 = vadd.f32 %v94_v22, %v78_v26  ;;  %138 = vst.msk [vmem:[%s381_s4 + $0x50] sm:$0xff] %vm127_vm0, %v121_v1 }
  0x15   :  { %139 = vst.msk [vmem:[%s381_s4 + $0x58] sm:$0xff] %vm127_vm0, %v122_v27  ;;  %v124_v2 = vmax.f32 %v108_v28, 0.0  ;;  %140 = vst.msk [vmem:[%s381_s4 + $0x60] sm:$0xff] %vm127_vm0, %v123_v29 }
  0x16   :  { %v125_v32 = vmax.f32 %v109_v30, 0.0  ;;  %v126_v33 = vmax.f32 %v110_v31, 0.0 }
  0x17   :  { %141 = vst.msk [vmem:[%s381_s4 + $0x68] sm:$0xff] %vm127_vm0, %v124_v2 }
  0x18   :  { %142 = vst.msk [vmem:[%s381_s4 + $0x70] sm:$0xff] %vm127_vm0, %v125_v32  ;;  %143 = vst.msk [vmem:[%s381_s4 + $0x78] sm:$0xff] %vm127_vm0, %v126_v33 }

// kernel: resnet_forward.74
= control target key start
LH: loop header
LB: loop body
LE: loop exit
PB: predicated region body
PF: predicated region fallthrough
CT: control target
= control target key end

     0   :  { %s5030_s9 = smov 0   ;;  %s6152_s0 = inlined_call_operand.vmem [shape: bf16[512,1600], index: 0, kind: input, shape index: {}]   ;;  %s6153_s1 = inlined_call_operand.vmem [shape: bf16[1600,128], index: 1, kind: input, shape index: {}]   ;;  %s6154_s2 = inlined_call_operand.vmem [shape: f32[512,128], index: 2, kind: output, shape index: {}]  }
   0x1 LB: > { %s3511_s10 = sadd.s32 4294967295, %s5013_s9   ;;  %p3515_p0 = scmp.ge.s32.totalorder %s5013_s9, 1  ;;  %s5013_s9 = sphi %s5030_s9, %s12_s9  }
   0x2   : > { %p114_p1 = scmp.lt.s32.totalorder %s5013_s9, 3 }
   0x4   : > { %p115_p2 = pnand %p3515_p0, %p114_p1 }
   0x5   : > { %v4603_v0 = vld [vmem:[%s6153_s1 + $0x40] sm:$0xff] (!%p115_p2)   ;;  %s3516_s13 = sshll.u32 (!%p115_p2), %s3511_s10, 5  ;;  %v4605_v2 = vld [vmem:[%s6153_s1 + $0x48] sm:$0xff] (!%p115_p2)   ;;  %v4607_v4 = vld [vmem:[%s6153_s1 + $0x50] sm:$0xff] (!%p115_p2)   ;;  %vm2215_vm0 = vcmask (!%p115_p2), 523264  }
   0x6   : > { %118 = sbr.rel (%p115_p2) target bundleno = 670 (0x29e), region = 28  ;;  %v4604_v1 = vld [vmem:[%s6153_s1] sm:$0xff] (!%p115_p2)   ;;  %3846 = vmatprep.subr.bf16.mxu0 (!%p115_p2), %v4603_v0  ;;  %4578 = vmatprep.subr.bf16.mxu1 (!%p115_p2), %v4603_v0  ;;  %p138_p3 = scmp.lt.s32.totalorder (!%p115_p2), %s3516_s13, 63  ;;  %v4606_v3 = vld [vmem:[%s6153_s1 + $0x8] sm:$0xff] (!%p115_p2)   ;;  %v4608_v5 = vld [vmem:[%s6153_s1 + $0x10] sm:$0xff] (!%p115_p2)  }
   0x7   : > { %3847 = vmatpush3.bf16.msra.mxu0 (!%p115_p2), %v4604_v1  ;;  %4586 = vmatpush3.bf16.msra.mxu1 (!%p115_p2), %v4604_v1  ;;  %v4609_v6 = vld [vmem:[%s6153_s1 + $0x58] sm:$0xff] (!%p115_p2)   ;;  %v4611_v8 = vld [vmem:[%s6153_s1 + $0x60] sm:$0xff] (!%p115_p2)   ;;  %v4613_v10 = vld [vmem:[%s6153_s1 + $0x68] sm:$0xff] (!%p115_p2)  }
   0x8   : > { %3848 = vmatprep.subr.bf16.mxu0 (!%p115_p2), %v4605_v2  ;;  %4579 = vmatprep.subr.bf16.mxu1 (!%p115_p2), %v4605_v2  ;;  %v4610_v7 = vld [vmem:[%s6153_s1 + $0x18] sm:$0xff] (!%p115_p2)   ;;  %v4612_v9 = vld [vmem:[%s6153_s1 + $0x20] sm:$0xff] (!%p115_p2)   ;;  %v4614_v13 = vld [vmem:[%s6153_s1 + $0x28] sm:$0xff] (!%p115_p2)  }
   0x9   : > { %v4615_v14 = vld [vmem:[%s6153_s1 + $0x70] sm:$0xff] (!%p115_p2)   ;;  %v4617_v16 = vld [vmem:[%s6153_s1 + $0x78] sm:$0xff] (!%p115_p2)   ;;  %v4625_v18 = vld [vmem:[%s6153_s1 + $0xc0] sm:$0xff] (!%p115_p2)  }
   0xa   : > { %v4616_v15 = vld [vmem:[%s6153_s1 + $0x30] sm:$0xff] (!%p115_p2)   ;;  %v4618_v17 = vld [vmem:[%s6153_s1 + $0x38] sm:$0xff] (!%p115_p2)   ;;  %v4628_v21 = vld [vmem:[%s6153_s1 + $0x140] sm:$0xff] (!%p115_p2)  }
   0xb   : > { %3849 = vmatpush3.bf16.msra.mxu0 (!%p115_p2), %v4606_v3  ;;  %4587 = vmatpush3.bf16.msra.mxu1 (!%p115_p2), %v4606_v3  ;;  %v4626_v22 = vld [vmem:[%s6153_s1 + $0x80] sm:$0xff] (!%p115_p2)   ;;  %v4627_v23 = vld [vmem:[%s6153_s1 + $0xc8] sm:$0xff] (!%p115_p2)   ;;  %v4637_v31 = vld [vmem:[%s6153_s1 + $0xd0] sm:$0xff] (!%p115_p2)  }
   0xc   : > { %3850 = vmatprep.subr.bf16.mxu0 (!%p115_p2), %v4607_v4  ;;  %4580 = vmatprep.subr.bf16.mxu1 (!%p115_p2), %v4607_v4  ;;  %v4630_v24 = vld [vmem:[%s6153_s1 + $0x100] sm:$0xff] (!%p115_p2)   ;;  %v4629_v27 = vld [vmem:[%s6153_s1 + $0x88] sm:$0xff] (!%p115_p2)   ;;  %v4638_v32 = vld [vmem:[%s6153_s1 + $0x90] sm:$0xff] (!%p115_p2)  }
   0xd   : > { %s6156_s13 = smov (!%p138_p3, %s3516_s13), 63  ;;  %v4648_v28 = vld [vmem:[%s6153_s1 + $0x148] sm:$0xff]   ;;  %v4639_v34 = vld [vmem:[%s6153_s1 + $0xd8] sm:$0xff]   ;;  %v4647_v40 = vld [vmem:[%s6153_s1 + $0xe0] sm:$0xff]  }
   0xe   : > { %s4594_s26 = smul.u32 52, %s6156_s13  ;;  %v4650_v33 = vld [vmem:[%s6153_s1 + $0x108] sm:$0xff]   ;;  %v4640_v37 = vld [vmem:[%s6153_s1 + $0x98] sm:$0xff]   ;;  %v4649_v41 = vld [vmem:[%s6153_s1 + $0xa0] sm:$0xff]  }
   0xf   : > { %3851 = vmatpush3.bf16.msra.mxu0 %v4608_v5  ;;  %4588 = vmatpush3.bf16.msra.mxu1 %v4608_v5  ;;  %v4651_v42 = vld [vmem:[%s6153_s1 + $0xe8] sm:$0xff]   ;;  %v4662_v43 = vld [vmem:[%s6153_s1 + $0x150] sm:$0xff]   ;;  %v4661_v52 = vld [vmem:[%s6153_s1 + $0xf8] sm:$0xff]  }
  0x10   : > { %3852 = vmatprep.subr.bf16.mxu0 %v4609_v6  ;;  %4581 = vmatprep.subr.bf16.mxu1 %v4609_v6  ;;  %s5071_s5 = scalar_lea.vmem %s6152_s0, %s4594_s26  ;;  %v4664_v46 = vld [vmem:[%s6153_s1 + $0x110] sm:$0xff]   ;;  %v4652_v47 = vld [vmem:[%s6153_s1 + $0xa8] sm:$0xff]   ;;  %v4679_v55 = vld [vmem:[%s6153_s1 + $0x158] sm:$0xff]  }
  0x11   : > { %v4621_v11 = vld [vmem:[%s5071_s5 + $0x4] ss:$52 sps:$4 sm:$0xff]   ;;  %v4619_v19 = vld [vmem:[%s5071_s5] ss:$52 sps:$4 sm:$0xff]   ;;  %v4635_v29 = vld [vmem:[%s5071_s5 + $0x68] ss:$52 sps:$4 sm:$0xff]  }
  0x12   : > { %v4624_v12 = vld [vmem:[%s5071_s5 + $0x4e4] ss:$52 sps:$4 sm:$0xff]   ;;  %2296 = vmatprep.mubr.bf16.mxu0 %v4621_v11  ;;  %v4622_v20 = vld [vmem:[%s5071_s5 + $0x4e0] ss:$52 sps:$4 sm:$0xff]   ;;  %v4636_v30 = vld [vmem:[%s5071_s5 + $0x548] ss:$52 sps:$4 sm:$0xff]  }
  0x13   : > { %3853 = vmatpush3.bf16.msra.mxu0 %v4610_v7  ;;  %4589 = vmatpush3.bf16.msra.mxu1 %v4610_v7  ;;  %v4631_v25 = vld [vmem:[%s5071_s5 + $0x6c] ss:$52 sps:$4 sm:$0xff]   ;;  %v4641_v35 = vld [vmem:[%s5071_s5 + $0xd4] ss:$52 sps:$4 sm:$0xff]   ;;  %v4645_v38 = vld [vmem:[%s5071_s5 + $0xd0] ss:$52 sps:$4 sm:$0xff]  }
  0x14   : > { %3854 = vmatprep.subr.bf16.mxu0 %v4611_v8  ;;  %4582 = vmatprep.subr.bf16.mxu1 %v4611_v8  ;;  %v4633_v26 = vld [vmem:[%s5071_s5 + $0x54c] ss:$52 sps:$4 sm:$0xff]   ;;  %v4643_v36 = vld [vmem:[%s5071_s5 + $0x5b4] ss:$52 sps:$4 sm:$0xff]   ;;  %v4646_v39 = vld [vmem:[%s5071_s5 + $0x5b0] ss:$52 sps:$4 sm:$0xff]  }
  0x15   : > { %2392 = vmatprep.mubr.bf16.mxu1 %v4624_v12  ;;  %v4653_v44 = vld [vmem:[%s5071_s5 + $0x13c] ss:$52 sps:$4 sm:$0xff]   ;;  %v4657_v49 = vld [vmem:[%s5071_s5 + $0x138] ss:$52 sps:$4 sm:$0xff]   ;;  %v4670_v59 = vld [vmem:[%s5071_s5 + $0x1a0] ss:$52 sps:$4 sm:$0xff]  }
  0x16   : > { %v4655_v45 = vld [vmem:[%s5071_s5 + $0x61c] ss:$52 sps:$4 sm:$0xff]   ;;  %v4658_v50 = vld [vmem:[%s5071_s5 + $0x618] ss:$52 sps:$4 sm:$0xff]   ;;  %v4671_v60 = vld [vmem:[%s6153_s1 + $0x1c0] sm:$0xff]  }
  0x17   : > { %3855 = vmatpush3.bf16.msra.mxu0 %v4612_v9  ;;  %4590 = vmatpush3.bf16.msra.mxu1 %v4612_v9  ;;  %v4659_v48 = vld [vmem:[%s6153_s1 + $0xf0] sm:$0xff]   ;;  %v4665_v53 = vld [vmem:[%s5071_s5 + $0x1a4] ss:$52 sps:$4 sm:$0xff]   ;;  %v4669_v54 = vld [vmem:[%s5071_s5 + $0xc] ss:$52 sps:$4 sm:$0xff]  }
  0x18   : > { %3856 = vmatprep.subr.bf16.mxu0 %v4613_v10  ;;  %4583 = vmatprep.subr.bf16.mxu1 %v4613_v10  ;;  %v4660_v51 = vld [vmem:[%s6153_s1 + $0xb0] sm:$0xff]   ;;  %v4680_v56 = vld [vmem:[%s6153_s1 + $0x118] sm:$0xff]   ;;  %v4672_v61 = vld [vmem:[%s6153_s1 + $0x180] sm:$0xff]  }
  0x19   : > { %v4663_v57 = vld [vmem:[%s6153_s1 + $0xb8] sm:$0xff]   ;;  %v4673_v62 = vld [vmem:[%s5071_s5 + $0x20c] ss:$52 sps:$4 sm:$0xff]   ;;  %v4675_v63 = vld [vmem:[%s5071_s5 + $0x74] ss:$52 sps:$4 sm:$0xff]  }
  0x1a   : > { %v4667_v58 = vld [vmem:[%s5071_s5 + $0x8] ss:$52 sps:$4 sm:$0xff]   ;;  %v4689_v0 = vld [vmem:[%s6153_s1 + $0x160] sm:$0xff]   ;;  %v4704_v9 = vld [vmem:[%s6153_s1 + $0x1d0] sm:$0xff]  }
  0x1b   : > { %3857 = vmatpush3.bf16.msra.mxu0 %v4614_v13  ;;  %4591 = vmatpush3.bf16.msra.mxu1 %v4614_v13  ;;  %v4687_v1 = vld [vmem:[%s6153_s1 + $0x1c8] sm:$0xff]   ;;  %v4690_v2 = vld [vmem:[%s6153_s1 + $0x120] sm:$0xff]   ;;  %v4683_v7 = vld [vmem:[%s5071_s5 + $0xdc] ss:$52 sps:$4 sm:$0xff]  }
  0x1c   : > { %3858 = vmatprep.subr.bf16.mxu0 %v4615_v14  ;;  %4584 = vmatprep.subr.bf16.mxu1 %v4615_v14  ;;  %v4688_v3 = vld [vmem:[%s6153_s1 + $0x188] sm:$0xff]   ;;  %v4678_v5 = vld [vmem:[%s5071_s5 + $0x70] ss:$52 sps:$4 sm:$0xff]  }
  0x1d   : > { %v4677_v4 = vld [vmem:[%s5071_s5 + $0x208] ss:$52 sps:$4 sm:$0xff]   ;;  %v4706_v11 = vld [vmem:[%s6153_s1 + $0x190] sm:$0xff]   ;;  %v4686_v13 = vld [vmem:[%s5071_s5 + $0xd8] ss:$52 sps:$4 sm:$0xff]  }
  0x1e   : > { %v4681_v6 = vld [vmem:[%s5071_s5 + $0x274] ss:$52 sps:$4 sm:$0xff]   ;;  %v4685_v12 = vld [vmem:[%s5071_s5 + $0x270] ss:$52 sps:$4 sm:$0xff]  }
  0x1f   : > { %3859 = vmatpush3.bf16.msra.mxu0 %v4616_v15  ;;  %4592 = vmatpush3.bf16.msra.mxu1 %v4616_v15  ;;  %v4703_v8 = vld [vmem:[%s6153_s1 + $0x168] sm:$0xff]   ;;  %v4691_v14 = vld [vmem:[%s5071_s5 + $0x2dc] ss:$52 sps:$4 sm:$0xff]  }
  0x20   : > { %3860 = vmatprep.subr.bf16.mxu0 %v4617_v16  ;;  %4585 = vmatprep.subr.bf16.mxu1 %v4617_v16  ;;  %v4705_v10 = vld [vmem:[%s6153_s1 + $0x128] sm:$0xff]   ;;  %v4713_v15 = vld [vmem:[%s6153_s1 + $0x170] sm:$0xff]  }
  0x21   : > { %v4714_v16 = vld [vmem:[%s6153_s1 + $0x130] sm:$0xff]  }
  0x23   : > { %3861 = vmatpush3.bf16.msra.mxu0 %v4618_v17  ;;  %4593 = vmatpush3.bf16.msra.mxu1 %v4618_v17  ;;  %v4693_v17 = vld [vmem:[%s5071_s5 + $0x144] ss:$52 sps:$4 sm:$0xff]  }
  0x24   : > { %3958 = vmatprep.subr.bf16.mxu1 %v4625_v18  ;;  %4070 = vmatprep.subr.bf16.mxu0 %v4628_v21  ;;  %v4721_v18 = vld [vmem:[%s6153_s1 + $0x1d8] sm:$0xff]   ;;  %v4696_v21 = vld [vmem:[%s5071_s5 + $0x140] ss:$52 sps:$4 sm:$0xff]  }
  0x26   : > { %2297 = vmatmul.mubr.bf16.vlgmr.msra.gmra.mrb[0].mxu0 %v4619_v19  ;;  %2393 = vmatmul.mubr.bf16.vlgmr.msra.gmra.mrb[0].mxu1 %v4622_v20  ;;  %v4722_v19 = vld [vmem:[%s6153_s1 + $0x198] sm:$0xff]  }
  0x27   : > { %3959 = vmatpush3.bf16.msra.mxu1 %v4626_v22  ;;  %4071 = vmatpush3.bf16.msra.mxu0 %v4630_v24  ;;  %v4695_v20 = vld [vmem:[%s5071_s5 + $0x2d8] ss:$52 sps:$4 sm:$0xff]  }
  0x28   : > { %3960 = vmatprep.subr.bf16.mxu1 %v4627_v23  ;;  %2304 = vmatprep.mubr.bf16.mxu0 %v4631_v25  ;;  %v4697_v22 = vld [vmem:[%s5071_s5 + $0x344] ss:$52 sps:$4 sm:$0xff]   ;;  %v4699_v23 = vld [vmem:[%s5071_s5 + $0x1ac] ss:$52 sps:$4 sm:$0xff]  }
  0x29   : > { %2400 = vmatprep.mubr.bf16.mxu1 %v4633_v26  ;;  %4072 = vmatprep.subr.bf16.mxu0 %v4648_v28  ;;  %v4729_v24 = vld [vmem:[%s6153_s1 + $0x178] sm:$0xff]   ;;  %v4737_v26 = vld [vmem:[%s6153_s1 + $0x1e0] sm:$0xff]  }
  0x2a   : > { %v4730_v25 = vld [vmem:[%s6153_s1 + $0x138] sm:$0xff]  }
  0x2b   : > { %3961 = vmatpush3.bf16.msra.mxu1 %v4629_v27  ;;  %4073 = vmatpush3.bf16.msra.mxu0 %v4650_v33  ;;  %v4701_v27 = vld [vmem:[%s5071_s5 + $0x340] ss:$52 sps:$4 sm:$0xff]   ;;  %v4702_v28 = vld [vmem:[%s5071_s5 + $0x1a8] ss:$52 sps:$4 sm:$0xff]  }
  0x2c   : > { %3962 = vmatprep.subr.bf16.mxu1 %v4637_v31  ;;  %4074 = vmatprep.subr.bf16.mxu0 %v4662_v43  ;;  %v4707_v31 = vld [vmem:[%s5071_s5 + $0x3ac] ss:$52 sps:$4 sm:$0xff]   ;;  %v4711_v33 = vld [vmem:[%s5071_s5 + $0x3a8] ss:$52 sps:$4 sm:$0xff]   ;;  %v4769_v43 = vld [vmem:[%s6153_s1 + $0x1f0] sm:$0xff]  }
  0x2e   : > { %2305 = vmatmul.mubr.bf16.gmra.mrb[4].mxu0 %v4635_v29  ;;  %2401 = vmatmul.mubr.bf16.gmra.mrb[4].mxu1 %v4636_v30  ;;  %v4738_v29 = vld [vmem:[%s6153_s1 + $0x1a0] sm:$0xff]  }
  0x2f   : > { %3963 = vmatpush3.bf16.msra.mxu1 %v4638_v32  ;;  %2312 = vmatprep.mubr.bf16.mxu0 %v4641_v35  ;;  %v4739_v30 = vld [vmem:[%s6153_s1 + $0x240] sm:$0xff]   ;;  %v4709_v32 = vld [vmem:[%s5071_s5 + $0x214] ss:$52 sps:$4 sm:$0xff]  }
  0x30   : > { %3964 = vmatprep.subr.bf16.mxu1 %v4639_v34  ;;  %2408 = vmatprep.mubr.bf16.mxu1 %v4643_v36  ;;  %v4712_v34 = vld [vmem:[%s5071_s5 + $0x210] ss:$52 sps:$4 sm:$0xff]   ;;  %v4753_v35 = vld [vmem:[%s6153_s1 + $0x1e8] sm:$0xff]  }
  0x31   : > { %4075 = vmatpush3.bf16.msra.mxu0 %v4664_v46  ;;  %v4754_v36 = vld [vmem:[%s6153_s1 + $0x1a8] sm:$0xff]   ;;  %v4728_v46 = vld [vmem:[%s5071_s5 + $0x2e0] ss:$52 sps:$4 sm:$0xff]  }
  0x32   : > { %4076 = vmatprep.subr.bf16.mxu0 %v4679_v55  ;;  %v4743_v55 = vld [vmem:[%s5071_s5 + $0x7c] ss:$52 sps:$4 sm:$0xff]  }
  0x33   : > { %3965 = vmatpush3.bf16.msra.mxu1 %v4640_v37  ;;  %v4715_v37 = vld [vmem:[%s5071_s5 + $0x414] ss:$52 sps:$4 sm:$0xff]  }
  0x34   : > { %3966 = vmatprep.subr.bf16.mxu1 %v4647_v40  ;;  %v4720_v40 = vld [vmem:[%s5071_s5 + $0x278] ss:$52 sps:$4 sm:$0xff]  }
  0x35   : > { %4077 = vmatpush3.bf16.msra.mxu0 %v4680_v56  ;;  %v4755_v56 = vld [vmem:[%s6153_s1 + $0x248] sm:$0xff]  }
  0x36   : > { %2313 = vmatmul.mubr.bf16.gmra.mrb[8].mxu0 %v4645_v38  ;;  %2409 = vmatmul.mubr.bf16.gmra.mrb[8].mxu1 %v4646_v39  ;;  %v4717_v38 = vld [vmem:[%s5071_s5 + $0x27c] ss:$52 sps:$4 sm:$0xff]  }
  0x37   : > { %3967 = vmatpush3.bf16.msra.mxu1 %v4649_v41  ;;  %2320 = vmatprep.mubr.bf16.mxu0 %v4653_v44  ;;  %v4719_v39 = vld [vmem:[%s5071_s5 + $0x410] ss:$52 sps:$4 sm:$0xff]  }
  0x38   : > { %3968 = vmatprep.subr.bf16.mxu1 %v4651_v42  ;;  %2416 = vmatprep.mubr.bf16.mxu1 %v4655_v45  ;;  %v4723_v41 = vld [vmem:[%s5071_s5 + $0x47c] ss:$52 sps:$4 sm:$0xff]   ;;  %v4725_v42 = vld [vmem:[%s5071_s5 + $0x2e4] ss:$52 sps:$4 sm:$0xff]  }
  0x39   : > { %4078 = vmatprep.subr.bf16.mxu0 %v4689_v0  ;;  %v4770_v44 = vld [vmem:[%s6153_s1 + $0x1b0] sm:$0xff]   ;;  %v4727_v45 = vld [vmem:[%s5071_s5 + $0x478] ss:$52 sps:$4 sm:$0xff]  }
  0x3a   : > { %4079 = vmatpush3.bf16.msra.mxu0 %v4690_v2  ;;  %v4772_v0 = vld [vmem:[%s6153_s1 + $0x210] sm:$0xff]   ;;  %v4751_v2 = vld [vmem:[%s5071_s5 + $0x418] ss:$52 sps:$4 sm:$0xff]  }
  0x3b   : > { %3969 = vmatpush3.bf16.msra.mxu1 %v4652_v47  ;;  %4080 = vmatprep.subr.bf16.mxu0 %v4703_v8  ;;  %v4731_v47 = vld [vmem:[%s5071_s5 + $0x34c] ss:$52 sps:$4 sm:$0xff]  }
  0x3c   : > { %3970 = vmatprep.subr.bf16.mxu1 %v4659_v48  ;;  %v4735_v48 = vld [vmem:[%s5071_s5 + $0x14] ss:$52 sps:$4 sm:$0xff]   ;;  %v4804_v8 = vld [vmem:[%s6153_s1 + $0x220] sm:$0xff]  }
  0x3e   : > { %2321 = vmatmul.mubr.bf16.gmra.mrb[12].mxu0 %v4657_v49  ;;  %2417 = vmatmul.mubr.bf16.gmra.mrb[12].mxu1 %v4658_v50  ;;  %v4785_v49 = vld [vmem:[%s6153_s1 + $0x1f8] sm:$0xff]  }
  0x3f   : > { %3971 = vmatpush3.bf16.msra.mxu1 %v4660_v51  ;;  %2328 = vmatprep.mubr.bf16.mxu0 %v4665_v53  ;;  %v4786_v50 = vld [vmem:[%s6153_s1 + $0x1b8] sm:$0xff]   ;;  %v4733_v51 = vld [vmem:[%s5071_s5 + $0x10] ss:$52 sps:$4 sm:$0xff]  }
  0x40   : > { %3972 = vmatprep.subr.bf16.mxu1 %v4661_v52  ;;  %2457 = vmatprep.mubr.bf16.mxu1 %v4669_v54  ;;  %v4736_v52 = vld [vmem:[%s5071_s5 + $0x348] ss:$52 sps:$4 sm:$0xff]   ;;  %v4740_v53 = vld [vmem:[%s6153_s1 + $0x200] sm:$0xff]  }
  0x41   : > { %4081 = vmatpush3.bf16.msra.mxu0 %v4705_v10  ;;  %v4741_v54 = vld [vmem:[%s5071_s5 + $0x3b4] ss:$52 sps:$4 sm:$0xff]  }
  0x42   : > { %4082 = vmatprep.subr.bf16.mxu0 %v4713_v15  ;;  %v4761_v10 = vld [vmem:[%s5071_s5 + $0x480] ss:$52 sps:$4 sm:$0xff]  }
  0x43   : > { %3973 = vmatpush3.bf16.msra.mxu1 %v4663_v57  ;;  %v4801_v57 = vld [vmem:[%s6153_s1 + $0x2c0] sm:$0xff]   ;;  %v4765_v15 = vld [vmem:[%s5071_s5 + $0x1b4] ss:$52 sps:$4 sm:$0xff]  }
  0x44   : > { %4182 = vmatprep.subr.bf16.mxu1 %v4671_v60  ;;  %v4745_v60 = vld [vmem:[%s5071_s5 + $0x3b0] ss:$52 sps:$4 sm:$0xff]  }
  0x45   : > { %4083 = vmatpush3.bf16.msra.mxu0 %v4714_v16  ;;  %v4836_v16 = vld [vmem:[%s6153_s1 + $0x230] sm:$0xff]  }
  0x46   : > { %2329 = vmatmul.mubr.bf16.gmra.mrb[16].mxu0 %v4670_v59  ;;  %2458 = vmatmul.mubr.bf16.vlgmr.msra.gmra.mrb[16].mxu1 %v4667_v58  ;;  %v4756_v58 = vld [vmem:[%s6153_s1 + $0x208] sm:$0xff]   ;;  %v4771_v59 = vld [vmem:[%s6153_s1 + $0x250] sm:$0xff]  }
  0x47   : > { %4183 = vmatpush3.bf16.msra.mxu1 %v4672_v61  ;;  %2336 = vmatprep.mubr.bf16.mxu0 %v4673_v62  ;;  %v4746_v61 = vld [vmem:[%s5071_s5 + $0x78] ss:$52 sps:$4 sm:$0xff]   ;;  %v4747_v62 = vld [vmem:[%s5071_s5 + $0x41c] ss:$52 sps:$4 sm:$0xff]  }
  0x48   : > { %2465 = vmatprep.mubr.bf16.mxu1 %v4675_v63  ;;  %4184 = vmatprep.subr.bf16.mxu1 %v4687_v1  ;;  %v4749_v63 = vld [vmem:[%s5071_s5 + $0xe4] ss:$52 sps:$4 sm:$0xff]  }
  0x49   : > { %4084 = vmatprep.subr.bf16.mxu0 %v4729_v24  ;;  %v4787_v1 = vld [vmem:[%s6153_s1 + $0x258] sm:$0xff]  }
  0x4a   : > { %4085 = vmatpush3.bf16.msra.mxu0 %v4730_v25  ;;  %v4778_v24 = vld [vmem:[%s5071_s5 + $0x218] ss:$52 sps:$4 sm:$0xff]   ;;  %v4779_v25 = vld [vmem:[%s5071_s5 + $0x5bc] ss:$52 sps:$4 sm:$0xff]  }
  0x4b   : > { %4185 = vmatpush3.bf16.msra.mxu1 %v4688_v3  ;;  %4294 = vmatprep.subr.bf16.mxu0 %v4739_v30  ;;  %v4788_v3 = vld [vmem:[%s6153_s1 + $0x218] sm:$0xff]  }
  0x4c   : > { %4186 = vmatprep.subr.bf16.mxu1 %v4704_v9  ;;  %v4819_v9 = vld [vmem:[%s6153_s1 + $0x268] sm:$0xff]   ;;  %v4789_v30 = vld [vmem:[%s5071_s5 + $0x624] ss:$52 sps:$4 sm:$0xff]  }
  0x4e   : > { %2337 = vmatmul.mubr.bf16.gmra.mrb[20].mxu0 %v4677_v4  ;;  %2466 = vmatmul.mubr.bf16.gmra.mrb[20].mxu1 %v4678_v5  ;;  %v4803_v4 = vld [vmem:[%s6153_s1 + $0x260] sm:$0xff]  }
  0x4f   : > { %2344 = vmatprep.mubr.bf16.mxu0 %v4681_v6  ;;  %2473 = vmatprep.mubr.bf16.mxu1 %v4683_v7  ;;  %v4752_v5 = vld [vmem:[%s5071_s5 + $0xe0] ss:$52 sps:$4 sm:$0xff]   ;;  %v4757_v6 = vld [vmem:[%s5071_s5 + $0x484] ss:$52 sps:$4 sm:$0xff]  }
  0x50   : > { %4187 = vmatpush3.bf16.msra.mxu1 %v4706_v11  ;;  %v4759_v7 = vld [vmem:[%s5071_s5 + $0x14c] ss:$52 sps:$4 sm:$0xff]   ;;  %v4762_v11 = vld [vmem:[%s5071_s5 + $0x148] ss:$52 sps:$4 sm:$0xff]  }
  0x51   : > { %4188 = vmatprep.subr.bf16.mxu1 %v4721_v18  ;;  %v4768_v18 = vld [vmem:[%s5071_s5 + $0x1b0] ss:$52 sps:$4 sm:$0xff]  }
  0x54   : > { %4189 = vmatpush3.bf16.msra.mxu1 %v4722_v19  ;;  %v4773_v19 = vld [vmem:[%s5071_s5 + $0x554] ss:$52 sps:$4 sm:$0xff]  }
  0x55   : > { %4190 = vmatprep.subr.bf16.mxu1 %v4737_v26  ;;  %v4781_v26 = vld [vmem:[%s5071_s5 + $0x284] ss:$52 sps:$4 sm:$0xff]  }
  0x56   : > { %2345 = vmatmul.mubr.bf16.gmra.mrb[24].mxu0 %v4685_v12  ;;  %2474 = vmatmul.mubr.bf16.gmra.mrb[24].mxu1 %v4686_v13  ;;  %v4820_v12 = vld [vmem:[%s6153_s1 + $0x228] sm:$0xff]   ;;  %v4835_v13 = vld [vmem:[%s6153_s1 + $0x270] sm:$0xff]  }
  0x57   : > { %2352 = vmatprep.mubr.bf16.mxu0 %v4691_v14  ;;  %2481 = vmatprep.mubr.bf16.mxu1 %v4693_v17  ;;  %v4763_v14 = vld [vmem:[%s5071_s5 + $0x4ec] ss:$52 sps:$4 sm:$0xff]   ;;  %v4767_v17 = vld [vmem:[%s5071_s5 + $0x4e8] ss:$52 sps:$4 sm:$0xff]  }
  0x58   : > { %4191 = vmatpush3.bf16.msra.mxu1 %v4738_v29  ;;  %v4784_v29 = vld [vmem:[%s5071_s5 + $0x280] ss:$52 sps:$4 sm:$0xff]  }
  0x59   : > { %4192 = vmatprep.subr.bf16.mxu1 %v4753_v35  ;;  %v4799_v35 = vld [vmem:[%s5071_s5 + $0x1c] ss:$52 sps:$4 sm:$0xff]  }
  0x5c   : > { %4193 = vmatpush3.bf16.msra.mxu1 %v4754_v36  ;;  %v4797_v36 = vld [vmem:[%s5071_s5 + $0x18] ss:$52 sps:$4 sm:$0xff]  }
  0x5d   : > { %4194 = vmatprep.subr.bf16.mxu1 %v4769_v43  ;;  %v4809_v43 = vld [vmem:[%s5071_s5 + $0x3b8] ss:$52 sps:$4 sm:$0xff]  }
  0x5e   : > { %2353 = vmatmul.mubr.bf16.gmra.mrb[28].mxu0 %v4695_v20  ;;  %2482 = vmatmul.mubr.bf16.gmra.mrb[28].mxu1 %v4696_v21  ;;  %v4775_v20 = vld [vmem:[%s5071_s5 + $0x21c] ss:$52 sps:$4 sm:$0xff]  }
  0x5f   : > { %2360 = vmatprep.mubr.bf16.mxu0 %v4697_v22  ;;  %2489 = vmatprep.mubr.bf16.mxu1 %v4699_v23  ;;  %v4851_v21 = vld [vmem:[%s6153_s1 + $0x278] sm:$0xff]   ;;  %v4777_v23 = vld [vmem:[%s5071_s5 + $0x550] ss:$52 sps:$4 sm:$0xff]  }
  0x60   : > { %4195 = vmatpush3.bf16.msra.mxu1 %v4770_v44  ;;  %v4852_v22 = vld [vmem:[%s6153_s1 + $0x238] sm:$0xff]   ;;  %v4810_v44 = vld [vmem:[%s5071_s5 + $0x80] ss:$52 sps:$4 sm:$0xff]  }
  0x61   : > { %4196 = vmatprep.subr.bf16.mxu1 %v4785_v49  ;;  %v4849_v49 = vld [vmem:[%s6153_s1 + $0x2d8] sm:$0xff]  }
  0x64   : > { %4197 = vmatpush3.bf16.msra.mxu1 %v4786_v50  ;;  %v4850_v50 = vld [vmem:[%s6153_s1 + $0x298] sm:$0xff]  }
  0x65   : > { %4406 = vmatprep.subr.bf16.mxu1 %v4801_v57  ;;  %v4880_v57 = vld [vmem:[%s6153_s1 + $0x2e8] sm:$0xff]  }
  0x66   : > { %2361 = vmatmul.mubr.bf16.gmra.mrb[32].mxu0 %v4701_v27  ;;  %2490 = vmatmul.mubr.bf16.gmra.mrb[32].mxu1 %v4702_v28  ;;  %v5366_v27 = vld [vmem:[%s6153_s1 + $0x300] sm:$0xff]   ;;  %v4783_v28 = vld [vmem:[%s5071_s5 + $0x5b8] ss:$52 sps:$4 sm:$0xff]  }
  0x67   : > { %2368 = vmatprep.mubr.bf16.mxu0 %v4707_v31  ;;  %2497 = vmatprep.mubr.bf16.mxu1 %v4709_v32  ;;  %v4791_v31 = vld [vmem:[%s5071_s5 + $0x2ec] ss:$52 sps:$4 sm:$0xff]  }
  0x68   : > { %v4793_v32 = vld [vmem:[%s5071_s5 + $0x620] ss:$52 sps:$4 sm:$0xff]  }
  0x6e   : > { %2369 = vmatmul.mubr.bf16.gmra.mrb[36].mxu0 %v4711_v33  ;;  %2498 = vmatmul.mubr.bf16.gmra.mrb[36].mxu1 %v4712_v34  ;;  %v4794_v33 = vld [vmem:[%s5071_s5 + $0x2e8] ss:$52 sps:$4 sm:$0xff]  }
  0x6f   : > { %2376 = vmatprep.mubr.bf16.mxu0 %v4715_v37  ;;  %2505 = vmatprep.mubr.bf16.mxu1 %v4717_v38  ;;  %v4795_v34 = vld [vmem:[%s5071_s5 + $0x354] ss:$52 sps:$4 sm:$0xff]   ;;  %v4800_v37 = vld [vmem:[%s5071_s5 + $0x350] ss:$52 sps:$4 sm:$0xff]  }
  0x70   : > { %v4802_v38 = vld [vmem:[%s6153_s1 + $0x280] sm:$0xff]  }
  0x76   : > { %2377 = vmatmul.mubr.bf16.gmra.mrb[40].mxu0 %v4719_v39  ;;  %2506 = vmatmul.mubr.bf16.gmra.mrb[40].mxu1 %v4720_v40  ;;  %v4805_v39 = vld [vmem:[%s5071_s5 + $0x3bc] ss:$52 sps:$4 sm:$0xff]   ;;  %v4807_v40 = vld [vmem:[%s5071_s5 + $0x84] ss:$52 sps:$4 sm:$0xff]  }
  0x77   : > { %2384 = vmatprep.mubr.bf16.mxu0 %v4723_v41  ;;  %2513 = vmatprep.mubr.bf16.mxu1 %v4725_v42  ;;  %v4817_v41 = vld [vmem:[%s6153_s1 + $0x2c8] sm:$0xff]  }
  0x78   : > { %v4818_v42 = vld [vmem:[%s6153_s1 + $0x288] sm:$0xff]  }
  0x7e   : > { %2385 = vmatmul.mubr.bf16.gmra.mrb[44].mxu0 %v4727_v45  ;;  %2514 = vmatmul.mubr.bf16.gmra.mrb[44].mxu1 %v4728_v46  ;;  %v4833_v45 = vld [vmem:[%s6153_s1 + $0x2d0] sm:$0xff]   ;;  %v4811_v46 = vld [vmem:[%s5071_s5 + $0x424] ss:$52 sps:$4 sm:$0xff]  }
  0x7f   : > { %2521 = vmatprep.mubr.bf16.mxu1 %v4731_v47  ;;  %2618 = vmatprep.mubr.bf16.mxu0 %v4735_v48  ;;  %v4813_v47 = vld [vmem:[%s5071_s5 + $0xec] ss:$52 sps:$4 sm:$0xff]   ;;  %v4834_v48 = vld [vmem:[%s6153_s1 + $0x290] sm:$0xff]  }
  0x86   : > { %2522 = vmatmul.mubr.bf16.gmra.mrb[48].mxu1 %v4736_v52  ;;  %2619 = vmatmul.mubr.bf16.vlgmr.msra.gmra.mrb[48].mxu0 %v4733_v51  ;;  %v4865_v51 = vld [vmem:[%s6153_s1 + $0x2e0] sm:$0xff]  }
  0x87   : > { %4295 = vmatpush3.bf16.msra.mxu0 %v4740_v53  ;;  %2529 = vmatprep.mubr.bf16.mxu1 %v4741_v54  ;;  %v4815_v52 = vld [vmem:[%s5071_s5 + $0x420] ss:$52 sps:$4 sm:$0xff]   ;;  %v4816_v53 = vld [vmem:[%s5071_s5 + $0xe8] ss:$52 sps:$4 sm:$0xff]  }
  0x88   : > { %2626 = vmatprep.mubr.bf16.mxu0 %v4743_v55  ;;  %4296 = vmatprep.subr.bf16.mxu0 %v4755_v56  ;;  %v4821_v54 = vld [vmem:[%s5071_s5 + $0x48c] ss:$52 sps:$4 sm:$0xff]   ;;  %v4823_v55 = vld [vmem:[%s5071_s5 + $0x154] ss:$52 sps:$4 sm:$0xff]  }
  0x89   : > { %v4866_v56 = vld [vmem:[%s6153_s1 + $0x2a0] sm:$0xff]  }
  0x8b   : > { %4297 = vmatpush3.bf16.msra.mxu0 %v4756_v58  ;;  %v4881_v58 = vld [vmem:[%s6153_s1 + $0x2a8] sm:$0xff]  }
  0x8c   : > { %4298 = vmatprep.subr.bf16.mxu0 %v4771_v59  ;;  %v4894_v59 = vld [vmem:[%s6153_s1 + $0x2f0] sm:$0xff]  }
  0x8e   : > { %2530 = vmatmul.mubr.bf16.gmra.mrb[52].mxu1 %v4745_v60  ;;  %2627 = vmatmul.mubr.bf16.gmra.mrb[52].mxu0 %v4746_v61  ;;  %v4825_v60 = vld [vmem:[%s5071_s5 + $0x488] ss:$52 sps:$4 sm:$0xff]   ;;  %v4826_v61 = vld [vmem:[%s5071_s5 + $0x150] ss:$52 sps:$4 sm:$0xff]  }
  0x8f   : > { %2537 = vmatprep.mubr.bf16.mxu1 %v4747_v62  ;;  %2634 = vmatprep.mubr.bf16.mxu0 %v4749_v63  ;;  %v4827_v62 = vld [vmem:[%s5071_s5 + $0x4f4] ss:$52 sps:$4 sm:$0xff]   ;;  %v4829_v63 = vld [vmem:[%s5071_s5 + $0x1bc] ss:$52 sps:$4 sm:$0xff]  }
  0x90   : > { %4299 = vmatpush3.bf16.msra.mxu0 %v4772_v0  ;;  %v4895_v0 = vld [vmem:[%s6153_s1 + $0x2b0] sm:$0xff]  }
  0x91   : > { %4300 = vmatprep.subr.bf16.mxu0 %v4787_v1  ;;  %v4909_v1 = vld [vmem:[%s6153_s1 + $0x2f8] sm:$0xff]  }
  0x94   : > { %4301 = vmatpush3.bf16.msra.mxu0 %v4788_v3  ;;  %v4831_v3 = vld [vmem:[%s5071_s5 + $0x4f0] ss:$52 sps:$4 sm:$0xff]  }
  0x95   : > { %4302 = vmatprep.subr.bf16.mxu0 %v4803_v4  ;;  %v4832_v4 = vld [vmem:[%s5071_s5 + $0x1b8] ss:$52 sps:$4 sm:$0xff]  }
  0x96   : > { %2538 = vmatmul.mubr.bf16.gmra.mrb[56].mxu1 %v4751_v2  ;;  %2635 = vmatmul.mubr.bf16.gmra.mrb[56].mxu0 %v4752_v5  ;;  %v4910_v2 = vld [vmem:[%s6153_s1 + $0x2b8] sm:$0xff]  }
  0x97   : > { %2545 = vmatprep.mubr.bf16.mxu1 %v4757_v6  ;;  %2642 = vmatprep.mubr.bf16.mxu0 %v4759_v7  ;;  %v4837_v5 = vld [vmem:[%s5071_s5 + $0x55c] ss:$52 sps:$4 sm:$0xff]   ;;  %v4839_v6 = vld [vmem:[%s5071_s5 + $0x224] ss:$52 sps:$4 sm:$0xff]  }
  0x98   : > { %4303 = vmatpush3.bf16.msra.mxu0 %v4804_v8  ;;  %v4841_v7 = vld [vmem:[%s5071_s5 + $0x558] ss:$52 sps:$4 sm:$0xff]   ;;  %v4842_v8 = vld [vmem:[%s5071_s5 + $0x220] ss:$52 sps:$4 sm:$0xff]  }
  0x99   : > { %4304 = vmatprep.subr.bf16.mxu0 %v4819_v9  ;;  %v4843_v9 = vld [vmem:[%s5071_s5 + $0x5c4] ss:$52 sps:$4 sm:$0xff]  }
  0x9c   : > { %4305 = vmatpush3.bf16.msra.mxu0 %v4820_v12  ;;  %v4848_v12 = vld [vmem:[%s5071_s5 + $0x288] ss:$52 sps:$4 sm:$0xff]  }
  0x9d   : > { %4306 = vmatprep.subr.bf16.mxu0 %v4835_v13  ;;  %v4853_v13 = vld [vmem:[%s5071_s5 + $0x62c] ss:$52 sps:$4 sm:$0xff]  }
  0x9e   : > { %2546 = vmatmul.mubr.bf16.gmra.mrb[60].mxu1 %v4761_v10  ;;  %2643 = vmatmul.mubr.bf16.gmra.mrb[60].mxu0 %v4762_v11  ;;  %v4845_v10 = vld [vmem:[%s5071_s5 + $0x28c] ss:$52 sps:$4 sm:$0xff]  }
  0x9f   : > { %2553 = vmatprep.mubr.bf16.mxu1 %v4763_v14  ;;  %2650 = vmatprep.mubr.bf16.mxu0 %v4765_v15  ;;  %v4847_v11 = vld [vmem:[%s5071_s5 + $0x5c0] ss:$52 sps:$4 sm:$0xff]  }
  0xa0   : > { %4307 = vmatpush3.bf16.msra.mxu0 %v4836_v16  ;;  %v4855_v14 = vld [vmem:[%s5071_s5 + $0x2f4] ss:$52 sps:$4 sm:$0xff]  }
  0xa1   : > { %4308 = vmatprep.subr.bf16.mxu0 %v4851_v21 }
  0xa4   : > { %4309 = vmatpush3.bf16.msra.mxu0 %v4852_v22 }
  0xa5   : > { %4538 = vmatprep.subr.bf16.mxu0 %v5366_v27 }
  0xa6   : > { %2554 = vmatmul.mubr.bf16.gmra.mrb[64].mxu1 %v4767_v17  ;;  %2651 = vmatmul.mubr.bf16.gmra.mrb[64].mxu0 %v4768_v18 }
  0xa7   : > { %2561 = vmatprep.mubr.bf16.mxu1 %v4773_v19  ;;  %2658 = vmatprep.mubr.bf16.mxu0 %v4775_v20  ;;  %v4857_v19 = vld [vmem:[%s5071_s5 + $0x628] ss:$52 sps:$4 sm:$0xff]   ;;  %v4858_v20 = vld [vmem:[%s5071_s5 + $0x2f0] ss:$52 sps:$4 sm:$0xff]  }
  0xae   : > { %2562 = vmatmul.mubr.bf16.gmra.mrb[68].mxu1 %v4777_v23  ;;  %2659 = vmatmul.mubr.bf16.gmra.mrb[68].mxu0 %v4778_v24 }
  0xaf   : > { %2569 = vmatprep.mubr.bf16.mxu1 %v4779_v25  ;;  %2666 = vmatprep.mubr.bf16.mxu0 %v4781_v26  ;;  %v4859_v25 = vld [vmem:[%s5071_s5 + $0x35c] ss:$52 sps:$4 sm:$0xff]   ;;  %v4863_v26 = vld [vmem:[%s5071_s5 + $0x24] ss:$52 sps:$4 sm:$0xff]  }
  0xb6   : > { %2570 = vmatmul.mubr.bf16.gmra.mrb[72].mxu1 %v4783_v28  ;;  %2667 = vmatmul.mubr.bf16.gmra.mrb[72].mxu0 %v4784_v29 }
  0xb7   : > { %2577 = vmatprep.mubr.bf16.mxu1 %v4789_v30  ;;  %2674 = vmatprep.mubr.bf16.mxu0 %v4791_v31 }
  0xbe   : > { %2578 = vmatmul.mubr.bf16.gmra.mrb[76].mxu1 %v4793_v32  ;;  %2675 = vmatmul.mubr.bf16.gmra.mrb[76].mxu0 %v4794_v33 }
  0xbf   : > { %2682 = vmatprep.mubr.bf16.mxu0 %v4795_v34  ;;  %2779 = vmatprep.mubr.bf16.mxu1 %v4799_v35 }
  0xc6   : > { %2683 = vmatmul.mubr.bf16.gmra.mrb[80].mxu0 %v4800_v37  ;;  %2780 = vmatmul.mubr.bf16.vlgmr.msra.gmra.mrb[80].mxu1 %v4797_v36  ;;  %v4861_v36 = vld [vmem:[%s5071_s5 + $0x20] ss:$52 sps:$4 sm:$0xff]   ;;  %v4864_v37 = vld [vmem:[%s5071_s5 + $0x358] ss:$52 sps:$4 sm:$0xff]  }
  0xc7   : > { %4407 = vmatpush3.bf16.msra.mxu1 %v4802_v38  ;;  %2690 = vmatprep.mubr.bf16.mxu0 %v4805_v39 }
  0xc8   : > { %2787 = vmatprep.mubr.bf16.mxu1 %v4807_v40  ;;  %4408 = vmatprep.subr.bf16.mxu1 %v4817_v41 }
  0xcb   : > { %4409 = vmatpush3.bf16.msra.mxu1 %v4818_v42  ;;  %v4868_v42 = vld [vmem:[%s5071_s5 + $0x3c4] ss:$52 sps:$4 sm:$0xff]  }
  0xcc   : > { %4410 = vmatprep.subr.bf16.mxu1 %v4833_v45  ;;  %v4870_v45 = vld [vmem:[%s5071_s5 + $0x8c] ss:$52 sps:$4 sm:$0xff]  }
  0xce   : > { %2691 = vmatmul.mubr.bf16.gmra.mrb[84].mxu0 %v4809_v43  ;;  %2788 = vmatmul.mubr.bf16.gmra.mrb[84].mxu1 %v4810_v44 }
  0xcf   : > { %2698 = vmatprep.mubr.bf16.mxu0 %v4811_v46  ;;  %2795 = vmatprep.mubr.bf16.mxu1 %v4813_v47  ;;  %v4896_v46 = vld [vmem:[%s6153_s1 + $0x308] sm:$0xff]  }
  0xd0   : > { %4411 = vmatpush3.bf16.msra.mxu1 %v4834_v48 }
  0xd1   : > { %4412 = vmatprep.subr.bf16.mxu1 %v4849_v49  ;;  %v4923_v49 = vld [vmem:[%s6153_s1 + $0x310] sm:$0xff]  }
  0xd4   : > { %4413 = vmatpush3.bf16.msra.mxu1 %v4850_v50 }
  0xd5   : > { %4414 = vmatprep.subr.bf16.mxu1 %v4865_v51 }
  0xd6   : > { %2699 = vmatmul.mubr.bf16.gmra.mrb[88].mxu0 %v4815_v52  ;;  %2796 = vmatmul.mubr.bf16.gmra.mrb[88].mxu1 %v4816_v53 }
  0xd7   : > { %2706 = vmatprep.mubr.bf16.mxu0 %v4821_v54  ;;  %2803 = vmatprep.mubr.bf16.mxu1 %v4823_v55  ;;  %v4872_v54 = vld [vmem:[%s5071_s5 + $0x3c0] ss:$52 sps:$4 sm:$0xff]   ;;  %v4873_v55 = vld [vmem:[%s5071_s5 + $0x88] ss:$52 sps:$4 sm:$0xff]  }
  0xd8   : > { %4415 = vmatpush3.bf16.msra.mxu1 %v4866_v56 }
  0xd9   : > { %4416 = vmatprep.subr.bf16.mxu1 %v4880_v57 }
  0xdc   : > { %4417 = vmatpush3.bf16.msra.mxu1 %v4881_v58 }
  0xdd   : > { %4418 = vmatprep.subr.bf16.mxu1 %v4894_v59  ;;  %v4874_v59 = vld [vmem:[%s5071_s5 + $0x42c] ss:$52 sps:$4 sm:$0xff]  }
  0xde   : > { %2707 = vmatmul.mubr.bf16.gmra.mrb[92].mxu0 %v4825_v60  ;;  %2804 = vmatmul.mubr.bf16.gmra.mrb[92].mxu1 %v4826_v61  ;;  %v4876_v60 = vld [vmem:[%s5071_s5 + $0xf4] ss:$52 sps:$4 sm:$0xff]  }
  0xdf   : > { %2714 = vmatprep.mubr.bf16.mxu0 %v4827_v62  ;;  %2811 = vmatprep.mubr.bf16.mxu1 %v4829_v63 }
  0xe0   : > { %4419 = vmatpush3.bf16.msra.mxu1 %v4895_v0 }
  0xe1   : > { %4420 = vmatprep.subr.bf16.mxu1 %v4909_v1  ;;  %v4948_v1 = vld [vmem:[%s6153_s1 + $0x318] sm:$0xff]  }
  0xe4   : > { %4421 = vmatpush3.bf16.msra.mxu1 %v4910_v2 }
  0xe6   : > { %2715 = vmatmul.mubr.bf16.gmra.mrb[96].mxu0 %v4831_v3  ;;  %2812 = vmatmul.mubr.bf16.gmra.mrb[96].mxu1 %v4832_v4 }
  0xe7   : > { %2722 = vmatprep.mubr.bf16.mxu0 %v4837_v5  ;;  %2819 = vmatprep.mubr.bf16.mxu1 %v4839_v6  ;;  %v4878_v6 = vld [vmem:[%s5071_s5 + $0x428] ss:$52 sps:$4 sm:$0xff]  }
  0xee   : > { %2723 = vmatmul.mubr.bf16.gmra.mrb[100].mxu0 %v4841_v7  ;;  %2820 = vmatmul.mubr.bf16.gmra.mrb[100].mxu1 %v4842_v8  ;;  %v4879_v7 = vld [vmem:[%s5071_s5 + $0xf0] ss:$52 sps:$4 sm:$0xff]  }
  0xef   : > { %2730 = vmatprep.mubr.bf16.mxu0 %v4843_v9  ;;  %2827 = vmatprep.mubr.bf16.mxu1 %v4845_v10 }
  0xf6   : > { %2731 = vmatmul.mubr.bf16.gmra.mrb[104].mxu0 %v4847_v11  ;;  %2828 = vmatmul.mubr.bf16.gmra.mrb[104].mxu1 %v4848_v12  ;;  %v4882_v12 = vld [vmem:[%s5071_s5 + $0x494] ss:$52 sps:$4 sm:$0xff]  }
  0xf7   : > { %2738 = vmatprep.mubr.bf16.mxu0 %v4853_v13  ;;  %2835 = vmatprep.mubr.bf16.mxu1 %v4855_v14  ;;  %v4884_v13 = vld [vmem:[%s5071_s5 + $0x15c] ss:$52 sps:$4 sm:$0xff]  }
  0xf9   : > { %v3934_v15 = vpop.f32.mrb[0].mxu1  ;;  %v3862_v16 = vpop.f32.mrb[0].mxu0 }
  0xfa   : > { %v3935_v17 = vpop.f32.mrb[1].mxu1  ;;  %v3863_v18 = vpop.f32.mrb[1].mxu0 }
  0xfb   : > { %v5452_v21 = vadd.f32 %v3935_v17, %v3934_v15  ;;  %v3937_v22 = vpop.f32.mrb[2].mxu1  ;;  %v5454_v23 = vadd.f32 %v3863_v18, %v3862_v16  ;;  %v3865_v24 = vpop.f32.mrb[2].mxu0 }
  0xfc   : > { %v3938_v28 = vpop.f32.mrb[3].mxu1  ;;  %v3866_v29 = vpop.f32.mrb[3].mxu0 }
  0xfd   : > { %v5458_v30 = vadd.f32 %v3938_v28, %v3937_v22  ;;  %v5460_v31 = vadd.f32 %v3866_v29, %v3865_v24  ;;  %v4886_v24 = vld [vmem:[%s5071_s5 + $0x490] ss:$52 sps:$4 sm:$0xff]  }
  0xfe   : > { %2739 = vmatmul.mubr.bf16.gmra.mrb[108].mxu0 %v4857_v19  ;;  %2836 = vmatmul.mubr.bf16.gmra.mrb[108].mxu1 %v4858_v20 }
  0xff   : > { %2843 = vmatprep.mubr.bf16.mxu1 %v4859_v25  ;;  %2940 = vmatprep.mubr.bf16.mxu0 %v4863_v26  ;;  %v4887_v25 = vld [vmem:[%s5071_s5 + $0x158] ss:$52 sps:$4 sm:$0xff]  }
 0x101   : > { %v3940_v32 = vpop.f32.mrb[4].mxu1  ;;  %v3868_v33 = vpop.f32.mrb[4].mxu0 }
 0x102   : > { %v3941_v34 = vpop.f32.mrb[5].mxu1  ;;  %v3869_v35 = vpop.f32.mrb[5].mxu0 }
 0x103   : > { %v5464_v38 = vadd.f32 %v3941_v34, %v3940_v32  ;;  %v3943_v39 = vpop.f32.mrb[6].mxu1  ;;  %v5466_v40 = vadd.f32 %v3869_v35, %v3868_v33  ;;  %v3871_v41 = vpop.f32.mrb[6].mxu0  ;;  %v4888_v33 = vld [vmem:[%s5071_s5 + $0x4fc] ss:$52 sps:$4 sm:$0xff]   ;;  %v4890_v34 = vld [vmem:[%s5071_s5 + $0x1c4] ss:$52 sps:$4 sm:$0xff]  }
 0x104   : > { %v3944_v43 = vpop.f32.mrb[7].mxu1  ;;  %v3872_v44 = vpop.f32.mrb[7].mxu0 }
 0x105   : > { %v5473_v47 = vadd.f32 %v3944_v43, %v3943_v39  ;;  %v5475_v48 = vadd.f32 %v3872_v44, %v3871_v41 }
 0x106   : > { %2844 = vmatmul.mubr.bf16.gmra.mrb[112].mxu1 %v4864_v37  ;;  %2941 = vmatmul.mubr.bf16.vlgmr.msra.gmra.mrb[112].mxu0 %v4861_v36 }
 0x107   : > { %4539 = vmatpush3.bf16.msra.mxu0 %v5366_v27  ;;  %2851 = vmatprep.mubr.bf16.mxu1 %v4868_v42 }
 0x108   : > { %2948 = vmatprep.mubr.bf16.mxu0 %v4870_v45  ;;  %4540 = vmatprep.subr.bf16.mxu0 %v4896_v46 }
 0x109   : > { %v3946_v50 = vpop.f32.mrb[8].mxu1  ;;  %v3874_v51 = vpop.f32.mrb[8].mxu0 }
 0x10a   : > { %v3947_v52 = vpop.f32.mrb[9].mxu1  ;;  %v3875_v53 = vpop.f32.mrb[9].mxu0 }
 0x10b   : > { %v5483_v56 = vadd.f32 %v3947_v52, %v3946_v50  ;;  %v3949_v57 = vpop.f32.mrb[10].mxu1  ;;  %v5485_v58 = vadd.f32 %v3875_v53, %v3874_v51  ;;  %v3877_v27 = vpop.f32.mrb[10].mxu0  ;;  %4541 = vmatpush3.bf16.msra.mxu0 %v4896_v46  ;;  %v4893_v50 = vld [vmem:[%s5071_s5 + $0x1c0] ss:$52 sps:$4 sm:$0xff]  }
 0x10c   : > { %v3950_v61 = vpop.f32.mrb[11].mxu1  ;;  %v3878_v62 = vpop.f32.mrb[11].mxu0  ;;  %4542 = vmatprep.subr.bf16.mxu0 %v4923_v49 }
 0x10d   : > { %v5489_v63 = vadd.f32 %v3950_v61, %v3949_v57  ;;  %v5491_v0 = vadd.f32 %v3878_v62, %v3877_v27 }
 0x10e   : > { %2852 = vmatmul.mubr.bf16.gmra.mrb[116].mxu1 %v4872_v54  ;;  %2949 = vmatmul.mubr.bf16.gmra.mrb[116].mxu0 %v4873_v55  ;;  %v4897_v54 = vld [vmem:[%s5071_s5 + $0x564] ss:$52 sps:$4 sm:$0xff]   ;;  %v4899_v55 = vld [vmem:[%s5071_s5 + $0x22c] ss:$52 sps:$4 sm:$0xff]  }
 0x10f   : > { %2859 = vmatprep.mubr.bf16.mxu1 %v4874_v59  ;;  %2956 = vmatprep.mubr.bf16.mxu0 %v4876_v60 }
 0x110   : > { %4543 = vmatpush3.bf16.msra.mxu0 %v4923_v49  ;;  %v4892_v49 = vld [vmem:[%s5071_s5 + $0x4f8] ss:$52 sps:$4 sm:$0xff]  }
 0x111   : > { %v3952_v2 = vpop.f32.mrb[12].mxu1  ;;  %v3880_v3 = vpop.f32.mrb[12].mxu0  ;;  %4544 = vmatprep.subr.bf16.mxu0 %v4948_v1 }
 0x112   : > { %v3953_v4 = vpop.f32.mrb[13].mxu1  ;;  %v3881_v5 = vpop.f32.mrb[13].mxu0 }
 0x113   : > { %v5498_v8 = vadd.f32 %v3953_v4, %v3952_v2  ;;  %v3955_v9 = vpop.f32.mrb[14].mxu1  ;;  %v5500_v10 = vadd.f32 %v3881_v5, %v3880_v3  ;;  %v3883_v11 = vpop.f32.mrb[14].mxu0  ;;  %v4901_v4 = vld [vmem:[%s5071_s5 + $0x560] ss:$52 sps:$4 sm:$0xff]   ;;  %v4902_v5 = vld [vmem:[%s5071_s5 + $0x228] ss:$52 sps:$4 sm:$0xff]  }
 0x114   : > { %v3956_v14 = vpop.f32.mrb[15].mxu1  ;;  %v3884_v15 = vpop.f32.mrb[15].mxu0  ;;  %4545 = vmatpush3.bf16.msra.mxu0 %v4948_v1 }
 0x115   : > { %v5504_v16 = vadd.f32 %v3956_v14, %v3955_v9  ;;  %v5506_v17 = vadd.f32 %v3884_v15, %v3883_v11  ;;  %v4903_v11 = vld [vmem:[%s5071_s5 + $0x5cc] ss:$52 sps:$4 sm:$0xff]  }
 0x116   : > { %2860 = vmatmul.mubr.bf16.gmra.mrb[120].mxu1 %v4878_v6  ;;  %2957 = vmatmul.mubr.bf16.gmra.mrb[120].mxu0 %v4879_v7 }
 0x117   : > { %2867 = vmatprep.mubr.bf16.mxu1 %v4882_v12  ;;  %2964 = vmatprep.mubr.bf16.mxu0 %v4884_v13  ;;  %v4905_v12 = vld [vmem:[%s5071_s5 + $0x294] ss:$52 sps:$4 sm:$0xff]  }
 0x119   : > { %v3974_v18 = vpop.f32.mrb[16].mxu1  ;;  %v3886_v19 = vpop.f32.mrb[16].mxu0 }
 0x11a   : > { %v3975_v20 = vpop.f32.mrb[17].mxu1  ;;  %v3887_v22 = vpop.f32.mrb[17].mxu0 }
 0x11b   : > { %v3976_v26 = vadd.f32 %v3975_v20, %v3974_v18  ;;  %v3977_v28 = vpop.f32.mrb[18].mxu1  ;;  %v5510_v29 = vadd.f32 %v3887_v22, %v3886_v19  ;;  %v3889_v32 = vpop.f32.mrb[18].mxu0 }
 0x11c   : > { %v3978_v35 = vpop.f32.mrb[19].mxu1  ;;  %v3890_v36 = vpop.f32.mrb[19].mxu0 }
 0x11d   : > { %v5515_v37 = vadd.f32 %v3976_v26, %v5454_v23  ;;  %v3979_v39 = vadd.f32 %v3978_v35, %v3977_v28  ;;  %v5517_v41 = vadd.f32 %v3890_v36, %v3889_v32  ;;  %v4907_v26 = vld [vmem:[%s5071_s5 + $0x5c8] ss:$52 sps:$4 sm:$0xff]   ;;  %v4908_v28 = vld [vmem:[%s5071_s5 + $0x290] ss:$52 sps:$4 sm:$0xff]  }
 0x11e   : > { %2868 = vmatmul.mubr.bf16.gmra.mrb[124].mxu1 %v4886_v24  ;;  %2965 = vmatmul.mubr.bf16.gmra.mrb[124].mxu0 %v4887_v25  ;;  %v4911_v35 = vld [vmem:[%s5071_s5 + $0x634] ss:$52 sps:$4 sm:$0xff]   ;;  %v4913_v36 = vld [vmem:[%s5071_s5 + $0x2fc] ss:$52 sps:$4 sm:$0xff]  }
 0x11f   : > { %v5520_v42 = vadd.f32 %v3979_v39, %v5460_v31  ;;  %2875 = vmatprep.mubr.bf16.mxu1 %v4888_v33  ;;  %2972 = vmatprep.mubr.bf16.mxu0 %v4890_v34 }
 0x121   : > { %v3980_v43 = vpop.f32.mrb[20].mxu1  ;;  %v3892_v44 = vpop.f32.mrb[20].mxu0 }
 0x122   : > { %v3981_v45 = vpop.f32.mrb[21].mxu1  ;;  %v3893_v46 = vpop.f32.mrb[21].mxu0 }
 0x123   : > { %v3982_v23 = vadd.f32 %v3981_v45, %v3980_v43  ;;  %v3983_v51 = vpop.f32.mrb[22].mxu1  ;;  %v5524_v52 = vadd.f32 %v3893_v46, %v3892_v44  ;;  %v3895_v53 = vpop.f32.mrb[22].mxu0 }
 0x124   : > { %v3984_v57 = vpop.f32.mrb[23].mxu1  ;;  %v3896_v31 = vpop.f32.mrb[23].mxu0 }
 0x125   : > { %v5529_v27 = vadd.f32 %v3982_v23, %v5466_v40  ;;  %v3985_v59 = vadd.f32 %v3984_v57, %v3983_v51  ;;  %v5531_v60 = vadd.f32 %v3896_v31, %v3895_v53  ;;  %v4915_v53 = vld [vmem:[%s5071_s5 + $0x630] ss:$52 sps:$4 sm:$0xff]  }
 0x126   : > { %2876 = vmatmul.mubr.bf16.gmra.mrb[128].mxu1 %v4892_v49  ;;  %2973 = vmatmul.mubr.bf16.gmra.mrb[128].mxu0 %v4893_v50 }
 0x127   : > { %v5534_v61 = vadd.f32 %v3985_v59, %v5475_v48  ;;  %2883 = vmatprep.mubr.bf16.mxu1 %v4897_v54  ;;  %2980 = vmatprep.mubr.bf16.mxu0 %v4899_v55  ;;  %v4916_v54 = vld [vmem:[%s5071_s5 + $0x2f8] ss:$52 sps:$4 sm:$0xff]  }
 0x128   : > { %v4917_v59 = vld [vmem:[%s5071_s5 + $0x364] ss:$52 sps:$4 sm:$0xff]  }
 0x129   : > { %v3986_v62 = vpop.f32.mrb[24].mxu1  ;;  %v3898_v1 = vpop.f32.mrb[24].mxu0 }
 0x12a   : > { %v3987_v2 = vpop.f32.mrb[25].mxu1  ;;  %v3899_v3 = vpop.f32.mrb[25].mxu0 }
 0x12b   : > { %v3988_v40 = vadd.f32 %v3987_v2, %v3986_v62  ;;  %v3989_v6 = vpop.f32.mrb[26].mxu1  ;;  %v5538_v7 = vadd.f32 %v3899_v3, %v3898_v1  ;;  %v3901_v9 = vpop.f32.mrb[26].mxu0  ;;  %v4921_v62 = vld [vmem:[%s5071_s5 + $0x2c] ss:$52 sps:$4 sm:$0xff]  }
 0x12c   : > { %v3990_v13 = vpop.f32.mrb[27].mxu1  ;;  %v3902_v48 = vpop.f32.mrb[27].mxu0 }
 0x12d   : > { %v5543_v14 = vadd.f32 %v3988_v40, %v5485_v58  ;;  %v3991_v15 = vadd.f32 %v3990_v13, %v3989_v6  ;;  %v5545_v18 = vadd.f32 %v3902_v48, %v3901_v9  ;;  %v4922_v13 = vld [vmem:[%s5071_s5 + $0x360] ss:$52 sps:$4 sm:$0xff]  }
 0x12e   : > { %2884 = vmatmul.mubr.bf16.gmra.mrb[132].mxu1 %v4901_v4  ;;  %2981 = vmatmul.mubr.bf16.gmra.mrb[132].mxu0 %v4902_v5 }
 0x12f   : > { %v5548_v19 = vadd.f32 %v3991_v15, %v5491_v0  ;;  %2891 = vmatprep.mubr.bf16.mxu1 %v4903_v11  ;;  %2988 = vmatprep.mubr.bf16.mxu0 %v4905_v12  ;;  %v4919_v12 = vld [vmem:[%s5071_s5 + $0x28] ss:$52 sps:$4 sm:$0xff]  }
 0x131   : > { %v3992_v20 = vpop.f32.mrb[28].mxu1  ;;  %v3904_v22 = vpop.f32.mrb[28].mxu0 }
 0x132   : > { %v3993_v24 = vpop.f32.mrb[29].mxu1  ;;  %v3905_v25 = vpop.f32.mrb[29].mxu0 }
 0x133   : > { %v3994_v58 = vadd.f32 %v3993_v24, %v3992_v20  ;;  %v3995_v32 = vpop.f32.mrb[30].mxu1  ;;  %v5552_v33 = vadd.f32 %v3905_v25, %v3904_v22  ;;  %v3907_v34 = vpop.f32.mrb[30].mxu0  ;;  %v4924_v22 = vld [vmem:[%s5071_s5 + $0x3cc] ss:$52 sps:$4 sm:$0xff]   ;;  %v4926_v24 = vld [vmem:[%s5071_s5 + $0x94] ss:$52 sps:$4 sm:$0xff]  }
 0x134   : > { %v3996_v39 = vpop.f32.mrb[31].mxu1  ;;  %v3908_v0 = vpop.f32.mrb[31].mxu0 }
 0x135   : > { %v5557_v43 = vadd.f32 %v3994_v58, %v5500_v10  ;;  %v3997_v44 = vadd.f32 %v3996_v39, %v3995_v32  ;;  %v5559_v45 = vadd.f32 %v3908_v0, %v3907_v34  ;;  %v4928_v0 = vld [vmem:[%s5071_s5 + $0x3c8] ss:$52 sps:$4 sm:$0xff]  }
 0x136   : > { %2892 = vmatmul.mubr.bf16.gmra.mrb[136].mxu1 %v4907_v26  ;;  %2989 = vmatmul.mubr.bf16.gmra.mrb[136].mxu0 %v4908_v28 }
 0x137   : > { %v5562_v46 = vadd.f32 %v3997_v44, %v5506_v17  ;;  %2899 = vmatprep.mubr.bf16.mxu1 %v4911_v35  ;;  %2996 = vmatprep.mubr.bf16.mxu0 %v4913_v36  ;;  %v4929_v44 = vld [vmem:[%s5071_s5 + $0x90] ss:$52 sps:$4 sm:$0xff]  }
 0x139   : > { %v3998_v49 = vpop.f32.mrb[32].mxu1  ;;  %v3910_v50 = vpop.f32.mrb[32].mxu0 }
 0x13a   : > { %v3999_v23 = vpop.f32.mrb[33].mxu1  ;;  %v3911_v51 = vpop.f32.mrb[33].mxu0 }
 0x13b   : > { %v4000_v10 = vadd.f32 %v3999_v23, %v3998_v49  ;;  %v4001_v55 = vpop.f32.mrb[34].mxu1  ;;  %v5566_v57 = vadd.f32 %v3911_v51, %v3910_v50  ;;  %v3913_v31 = vpop.f32.mrb[34].mxu0  ;;  %v4930_v51 = vld [vmem:[%s5071_s5 + $0x434] ss:$52 sps:$4 sm:$0xff]  }
 0x13c   : > { %v4002_v1 = vpop.f32.mrb[35].mxu1  ;;  %v3914_v17 = vpop.f32.mrb[35].mxu0 }
 0x13d   : > { %v5571_v2 = vadd.f32 %v4000_v10, %v5510_v29  ;;  %v4003_v3 = vadd.f32 %v4002_v1, %v4001_v55  ;;  %v5573_v4 = vadd.f32 %v3914_v17, %v3913_v31 }
 0x13e   : > { %2900 = vmatmul.mubr.bf16.gmra.mrb[140].mxu1 %v4915_v53  ;;  %2997 = vmatmul.mubr.bf16.gmra.mrb[140].mxu0 %v4916_v54  ;;  %v4932_v53 = vld [vmem:[%s5071_s5 + $0xfc] ss:$52 sps:$4 sm:$0xff]  }
 0x13f   : > { %v5576_v5 = vadd.f32 %v4003_v3, %v5517_v41  ;;  %3004 = vmatprep.mubr.bf16.mxu0 %v4917_v59  ;;  %3101 = vmatprep.mubr.bf16.mxu1 %v4921_v62 }
 0x141   : > { %v4004_v40 = vpop.f32.mrb[36].mxu1  ;;  %v3916_v6 = vpop.f32.mrb[36].mxu0 }
 0x142   : > { %v4005_v9 = vpop.f32.mrb[37].mxu1  ;;  %v3917_v11 = vpop.f32.mrb[37].mxu0 }
 0x143   : > { %v4006_v29 = vadd.f32 %v4005_v9, %v4004_v40  ;;  %v4007_v48 = vpop.f32.mrb[38].mxu1  ;;  %v5580_v15 = vadd.f32 %v3917_v11, %v3916_v6  ;;  %v3919_v20 = vpop.f32.mrb[38].mxu0  ;;  %v4934_v40 = vld [vmem:[%s5071_s5 + $0x430] ss:$52 sps:$4 sm:$0xff]   ;;  %v4935_v6 = vld [vmem:[%s5071_s5 + $0xf8] ss:$52 sps:$4 sm:$0xff]  }
 0x144   : > { %v4008_v25 = vpop.f32.mrb[39].mxu1  ;;  %v3920_v41 = vpop.f32.mrb[39].mxu0 }
 0x145   : > { %v5585_v26 = vadd.f32 %v4006_v29, %v5524_v52  ;;  %v4009_v28 = vadd.f32 %v4008_v25, %v4007_v48  ;;  %v5587_v58 = vadd.f32 %v3920_v41, %v3919_v20  ;;  %v4938_v29 = vld [vmem:[%s5071_s5 + $0x164] ss:$52 sps:$4 sm:$0xff]  }
 0x146   : > { %3005 = vmatmul.mubr.bf16.gmra.mrb[144].mxu0 %v4922_v13  ;;  %3102 = vmatmul.mubr.bf16.vlgmr.msra.gmra.mrb[144].mxu1 %v4919_v12  ;;  %v4936_v13 = vld [vmem:[%s5071_s5 + $0x49c] ss:$52 sps:$4 sm:$0xff]  }
 0x147   : > { %v5590_v32 = vadd.f32 %v4009_v28, %v5531_v60  ;;  %3012 = vmatprep.mubr.bf16.mxu0 %v4924_v22  ;;  %3109 = vmatprep.mubr.bf16.mxu1 %v4926_v24 }
 0x149   : > { %v4010_v34 = vpop.f32.mrb[40].mxu1  ;;  %v3922_v35 = vpop.f32.mrb[40].mxu0 }
 0x14a   : > { %v4011_v36 = vpop.f32.mrb[41].mxu1  ;;  %v3923_v39 = vpop.f32.mrb[41].mxu0 }
 0x14b   : > { %v4012_v52 = vadd.f32 %v4011_v36, %v4010_v34  ;;  %v4013_v49 = vpop.f32.mrb[42].mxu1  ;;  %v5594_v50 = vadd.f32 %v3923_v39, %v3922_v35  ;;  %v3925_v23 = vpop.f32.mrb[42].mxu0  ;;  %v4940_v36 = vld [vmem:[%s5071_s5 + $0x498] ss:$52 sps:$4 sm:$0xff]   ;;  %v4941_v39 = vld [vmem:[%s5071_s5 + $0x160] ss:$52 sps:$4 sm:$0xff]  }
 0x14c   : > { %v4014_v54 = vpop.f32.mrb[43].mxu1  ;;  %v3926_v60 = vpop.f32.mrb[43].mxu0 }
 0x14d   : > { %v5599_v10 = vadd.f32 %v4012_v52, %v5538_v7  ;;  %v4015_v55 = vadd.f32 %v4014_v54, %v4013_v49  ;;  %v5601_v31 = vadd.f32 %v3926_v60, %v3925_v23  ;;  %v4942_v49 = vld [vmem:[%s5071_s5 + $0x504] ss:$52 sps:$4 sm:$0xff]   ;;  %v4944_v23 = vld [vmem:[%s5071_s5 + $0x1cc] ss:$52 sps:$4 sm:$0xff]  }
 0x14e   : > { %3013 = vmatmul.mubr.bf16.gmra.mrb[148].mxu0 %v4928_v0  ;;  %3110 = vmatmul.mubr.bf16.gmra.mrb[148].mxu1 %v4929_v44 }
 0x14f   : > { %v5604_v59 = vadd.f32 %v4015_v55, %v5545_v18  ;;  %3020 = vmatprep.mubr.bf16.mxu0 %v4930_v51  ;;  %3117 = vmatprep.mubr.bf16.mxu1 %v4932_v53 }
 0x151   : > { %v4016_v62 = vpop.f32.mrb[44].mxu1  ;;  %v3928_v1 = vpop.f32.mrb[44].mxu0 }
 0x152   : > { %v4017_v17 = vpop.f32.mrb[45].mxu1  ;;  %v3929_v3 = vpop.f32.mrb[45].mxu0 }
 0x153   : > { %v4018_v7 = vadd.f32 %v4017_v17, %v4016_v62  ;;  %v4019_v9 = vpop.f32.mrb[46].mxu1  ;;  %v5608_v11 = vadd.f32 %v3929_v3, %v3928_v1  ;;  %v3931_v12 = vpop.f32.mrb[46].mxu0 }
 0x154   : > { %v4020_v48 = vpop.f32.mrb[47].mxu1  ;;  %v3932_v18 = vpop.f32.mrb[47].mxu0 }
 0x155   : > { %v5613_v20 = vadd.f32 %v4018_v7, %v5552_v33  ;;  %v4021_v22 = vadd.f32 %v4020_v48, %v4019_v9  ;;  %v5615_v24 = vadd.f32 %v3932_v18, %v3931_v12  ;;  %v4951_v48 = vld [vmem:[%s5071_s5 + $0x234] ss:$52 sps:$4 sm:$0xff]  }
 0x156   : > { %3021 = vmatmul.mubr.bf16.gmra.mrb[152].mxu0 %v4934_v40  ;;  %3118 = vmatmul.mubr.bf16.gmra.mrb[152].mxu1 %v4935_v6  ;;  %v4947_v6 = vld [vmem:[%s5071_s5 + $0x1c8] ss:$52 sps:$4 sm:$0xff]  }
 0x157   : > { %v5618_v25 = vadd.f32 %v4021_v22, %v5559_v45  ;;  %3028 = vmatprep.mubr.bf16.mxu0 %v4936_v13  ;;  %3125 = vmatprep.mubr.bf16.mxu1 %v4938_v29  ;;  %v4949_v29 = vld [vmem:[%s5071_s5 + $0x56c] ss:$52 sps:$4 sm:$0xff]  }
 0x159   : > { %v4022_v41 = vpop.f32.mrb[48].mxu1  ;;  %v4086_v28 = vpop.f32.mrb[48].mxu0 }
 0x15a   : > { %v4023_v34 = vpop.f32.mrb[49].mxu1  ;;  %v4087_v35 = vpop.f32.mrb[49].mxu0 }
 0x15b   : > { %v4024_v33 = vadd.f32 %v4023_v34, %v4022_v41  ;;  %v4088_v0 = vadd.f32 %v4087_v35, %v4086_v28  ;;  %v4025_v44 = vpop.f32.mrb[50].mxu1  ;;  %v4089_v52 = vpop.f32.mrb[50].mxu0 }
 0x15c   : > { %v4026_v51 = vpop.f32.mrb[51].mxu1  ;;  %v4090_v53 = vpop.f32.mrb[51].mxu0 }
 0x15d   : > { %v5625_v45 = vadd.f32 %v4024_v33, %v5566_v57  ;;  %v5628_v54 = vadd.f32 %v4088_v0, %v5515_v37  ;;  %v4027_v60 = vadd.f32 %v4026_v51, %v4025_v44  ;;  %v4091_v55 = vadd.f32 %v4090_v53, %v4089_v52  ;;  %v4946_v37 = vld [vmem:[%s5071_s5 + $0x500] ss:$52 sps:$4 sm:$0xff]   ;;  %v4954_v0 = vld [vmem:[%s5071_s5 + $0x230] ss:$52 sps:$4 sm:$0xff]  }
 0x15e   : > { %3029 = vmatmul.mubr.bf16.gmra.mrb[156].mxu0 %v4940_v36  ;;  %3126 = vmatmul.mubr.bf16.gmra.mrb[156].mxu1 %v4941_v39  ;;  %v4955_v51 = vld [vmem:[%s5071_s5 + $0x5d4] ss:$52 sps:$4 sm:$0xff]   ;;  %v4957_v53 = vld [vmem:[%s5071_s5 + $0x29c] ss:$52 sps:$4 sm:$0xff]  }
 0x15f   : > { %v5631_v62 = vadd.f32 %v4027_v60, %v5573_v4  ;;  %v5634_v1 = vadd.f32 %v4091_v55, %v5520_v42  ;;  %3036 = vmatprep.mubr.bf16.mxu0 %v4942_v49  ;;  %3133 = vmatprep.mubr.bf16.mxu1 %v4944_v23 }
 0x161   : > { %v4028_v17 = vpop.f32.mrb[52].mxu1  ;;  %v4092_v57 = vpop.f32.mrb[52].mxu0 }
 0x162   : > { %v4029_v3 = vpop.f32.mrb[53].mxu1  ;;  %v4093_v40 = vpop.f32.mrb[53].mxu0 }
 0x163   : > { %v4030_v7 = vadd.f32 %v4029_v3, %v4028_v17  ;;  %v4094_v9 = vadd.f32 %v4093_v40, %v4092_v57  ;;  %v4031_v12 = vpop.f32.mrb[54].mxu1  ;;  %v4095_v13 = vpop.f32.mrb[54].mxu0 }
 0x164   : > { %v4032_v18 = vpop.f32.mrb[55].mxu1  ;;  %v4096_v4 = vpop.f32.mrb[55].mxu0 }
 0x165   : > { %v5641_v42 = vadd.f32 %v4030_v7, %v5580_v15  ;;  %v5644_v22 = vadd.f32 %v4094_v9, %v5529_v27  ;;  %v4033_v41 = vadd.f32 %v4032_v18, %v4031_v12  ;;  %v4097_v28 = vadd.f32 %v4096_v4, %v4095_v13  ;;  %v4953_v27 = vld [vmem:[%s5071_s5 + $0x568] ss:$52 sps:$4 sm:$0xff]   ;;  %v4960_v9 = vld [vmem:[%s5071_s5 + $0x298] ss:$52 sps:$4 sm:$0xff]  }
 0x166   : > { %3037 = vmatmul.mubr.bf16.gmra.mrb[160].mxu0 %v4946_v37  ;;  %3134 = vmatmul.mubr.bf16.gmra.mrb[160].mxu1 %v4947_v6  ;;  %v4961_v18 = vld [vmem:[%s5071_s5 + $0x63c] ss:$52 sps:$4 sm:$0xff]   ;;  %v4963_v4 = vld [vmem:[%s5071_s5 + $0x304] ss:$52 sps:$4 sm:$0xff]  }
 0x167   : > { %v5647_v34 = vadd.f32 %v4033_v41, %v5587_v58  ;;  %v5650_v35 = vadd.f32 %v4097_v28, %v5534_v61  ;;  %3044 = vmatprep.mubr.bf16.mxu0 %v4949_v29  ;;  %3141 = vmatprep.mubr.bf16.mxu1 %v4951_v48 }
 0x169   : > { %v4034_v36 = vpop.f32.mrb[56].mxu1  ;;  %v4098_v15 = vpop.f32.mrb[56].mxu0 }
 0x16a   : > { %v4035_v39 = vpop.f32.mrb[57].mxu1  ;;  %v4099_v33 = vpop.f32.mrb[57].mxu0 }
 0x16b   : > { %v4036_v44 = vadd.f32 %v4035_v39, %v4034_v36  ;;  %v4100_v52 = vadd.f32 %v4099_v33, %v4098_v15  ;;  %v4037_v49 = vpop.f32.mrb[58].mxu1  ;;  %v4101_v23 = vpop.f32.mrb[58].mxu0 }
 0x16c   : > { %v4038_v60 = vpop.f32.mrb[59].mxu1  ;;  %v4102_v58 = vpop.f32.mrb[59].mxu0 }
 0x16d   : > { %v5657_v61 = vadd.f32 %v4036_v44, %v5594_v50  ;;  %v5660_v55 = vadd.f32 %v4100_v52, %v5543_v14  ;;  %v4039_v17 = vadd.f32 %v4038_v60, %v4037_v49  ;;  %v4103_v57 = vadd.f32 %v4102_v58, %v4101_v23  ;;  %v4959_v14 = vld [vmem:[%s5071_s5 + $0x5d0] ss:$52 sps:$4 sm:$0xff]   ;;  %v4966_v52 = vld [vmem:[%s5071_s5 + $0x300] ss:$52 sps:$4 sm:$0xff]  }
 0x16e   : > { %3045 = vmatmul.mubr.bf16.gmra.mrb[164].mxu0 %v4953_v27  ;;  %3142 = vmatmul.mubr.bf16.gmra.mrb[164].mxu1 %v4954_v0  ;;  %v4967_v60 = vld [vmem:[%s5071_s5 + $0x36c] ss:$52 sps:$4 sm:$0xff]   ;;  %v4969_v58 = vld [vmem:[%s5071_s5 + $0x30] ss:$52 sps:$4 sm:$0xff]  }
 0x16f   : > { %v5663_v3 = vadd.f32 %v4039_v17, %v5601_v31  ;;  %v5666_v40 = vadd.f32 %v4103_v57, %v5548_v19  ;;  %3052 = vmatprep.mubr.bf16.mxu0 %v4955_v51  ;;  %3149 = vmatprep.mubr.bf16.mxu1 %v4957_v53 }
 0x171   : > { %v4040_v37 = vpop.f32.mrb[60].mxu1  ;;  %v4104_v50 = vpop.f32.mrb[60].mxu0 }
 0x172   : > { %v4041_v6 = vpop.f32.mrb[61].mxu1  ;;  %v4105_v7 = vpop.f32.mrb[61].mxu0 }
 0x173   : > { %v4042_v12 = vadd.f32 %v4041_v6, %v4040_v37  ;;  %v4106_v13 = vadd.f32 %v4105_v7, %v4104_v50  ;;  %v4043_v29 = vpop.f32.mrb[62].mxu1  ;;  %v4107_v48 = vpop.f32.mrb[62].mxu0 }
 0x174   : > { %v4044_v41 = vpop.f32.mrb[63].mxu1  ;;  %v4108_v31 = vpop.f32.mrb[63].mxu0 }
 0x175   : > { %v5673_v19 = vadd.f32 %v4042_v12, %v5608_v11  ;;  %v5676_v28 = vadd.f32 %v4106_v13, %v5557_v43  ;;  %v4045_v36 = vadd.f32 %v4044_v41, %v4043_v29  ;;  %v4109_v15 = vadd.f32 %v4108_v31, %v4107_v48  ;;  %v4965_v43 = vld [vmem:[%s5071_s5 + $0x638] ss:$52 sps:$4 sm:$0xff]   ;;  %v4970_v12 = vld [vmem:[%s5071_s5 + $0x368] ss:$52 sps:$4 sm:$0xff]   ;;  %v4974_v31 = vld [vmem:[%s5071_s5 + $0x100] ss:$52 sps:$4 sm:$0xff]  }
 0x176   : > { %3053 = vmatmul.mubr.bf16.gmra.mrb[168].mxu0 %v4959_v14  ;;  %3150 = vmatmul.mubr.bf16.gmra.mrb[168].mxu1 %v4960_v9  ;;  %v4971_v13 = vld [vmem:[%s5071_s5 + $0x98] ss:$52 sps:$4 sm:$0xff]   ;;  %v4972_v41 = vld [vmem:[%s5071_s5 + $0x3d4] ss:$52 sps:$4 sm:$0xff]  }
 0x177   : > { %v5679_v39 = vadd.f32 %v4045_v36, %v5615_v24  ;;  %v5682_v33 = vadd.f32 %v4109_v15, %v5562_v46  ;;  %3060 = vmatprep.mubr.bf16.mxu0 %v4961_v18  ;;  %3157 = vmatprep.mubr.bf16.mxu1 %v4963_v4 }
 0x179   : > { %v4046_v27 = vpop.f32.mrb[64].mxu1  ;;  %v4110_v11 = vpop.f32.mrb[64].mxu0 }
 0x17a   : > { %v4047_v0 = vpop.f32.mrb[65].mxu1  ;;  %v4111_v44 = vpop.f32.mrb[65].mxu0 }
 0x17b   : > { %v4048_v49 = vadd.f32 %v4047_v0, %v4046_v27  ;;  %v4112_v23 = vadd.f32 %v4111_v44, %v4110_v11  ;;  %v4049_v51 = vpop.f32.mrb[66].mxu1  ;;  %v4113_v53 = vpop.f32.mrb[66].mxu0 }
 0x17c   : > { %v4050_v17 = vpop.f32.mrb[67].mxu1  ;;  %v4114_v24 = vpop.f32.mrb[67].mxu0 }
 0x17d   : > { %v5689_v46 = vadd.f32 %v4048_v49, %v5452_v21  ;;  %v5692_v57 = vadd.f32 %v4112_v23, %v5571_v2  ;;  %v4051_v37 = vadd.f32 %v4050_v17, %v4049_v51  ;;  %v4115_v50 = vadd.f32 %v4114_v24, %v4113_v53  ;;  %v4975_v49 = vld [vmem:[%s5071_s5 + $0x3d0] ss:$52 sps:$4 sm:$0xff]   ;;  %v4976_v23 = vld [vmem:[%s5071_s5 + $0x168] ss:$52 sps:$4 sm:$0xff]  }
 0x17e   : > { %3061 = vmatmul.mubr.bf16.gmra.mrb[172].mxu0 %v4965_v43  ;;  %3158 = vmatmul.mubr.bf16.gmra.mrb[172].mxu1 %v4966_v52  ;;  %v4977_v17 = vld [vmem:[%s5071_s5 + $0x43c] ss:$52 sps:$4 sm:$0xff]  }
 0x17f   : > { %v5695_v6 = vadd.f32 %v4051_v37, %v5458_v30  ;;  %v5698_v7 = vadd.f32 %v4115_v50, %v5576_v5  ;;  %3165 = vmatprep.mubr.bf16.mxu1 %v4967_v60  ;;  %4546 = vmatprep.mubr.msk.bf16.mxu0 %vm2215_vm0, %v4969_v58  ;;  %v4979_v24 = vld [vmem:[%s5071_s5 + $0x1d0] ss:$52 sps:$4 sm:$0xff]  }
 0x181   : > { %v4052_v21 = vpop.f32.mrb[68].mxu1  ;;  %v4116_v14 = vpop.f32.mrb[68].mxu0 }
 0x182   : > { %v4053_v9 = vpop.f32.mrb[69].mxu1  ;;  %v4117_v2 = vpop.f32.mrb[69].mxu0 }
 0x183   : > { %v4054_v29 = vadd.f32 %v4053_v9, %v4052_v21  ;;  %v4118_v48 = vadd.f32 %v4117_v2, %v4116_v14  ;;  %v4055_v18 = vpop.f32.mrb[70].mxu1  ;;  %v4119_v4 = vpop.f32.mrb[70].mxu0 }
 0x184   : > { %v4056_v30 = vpop.f32.mrb[71].mxu1  ;;  %v4120_v36 = vpop.f32.mrb[71].mxu0 }
 0x185   : > { %v5706_v5 = vadd.f32 %v4054_v29, %v5464_v38  ;;  %v5709_v15 = vadd.f32 %v4118_v48, %v5585_v26  ;;  %v4057_v27 = vadd.f32 %v4056_v30, %v4055_v18  ;;  %v4121_v11 = vadd.f32 %v4120_v36, %v4119_v4  ;;  %v4980_v29 = vld [vmem:[%s5071_s5 + $0x438] ss:$52 sps:$4 sm:$0xff]   ;;  %v4984_v36 = vld [vmem:[%s5071_s5 + $0x2a0] ss:$52 sps:$4 sm:$0xff]  }
 0x186   : > { %3166 = vmatmul.mubr.bf16.gmra.mrb[176].mxu1 %v4970_v12  ;;  %4547 = vmatmul.mubr.msk.bf16.vlgmr.msra.gmra.mrb[176].mxu0 %vm2215_vm0, %v4971_v13  ;;  %v4981_v48 = vld [vmem:[%s5071_s5 + $0x238] ss:$52 sps:$4 sm:$0xff]  }
 0x187   : > { %v5713_v0 = vadd.f32 %v4057_v27, %v5473_v47  ;;  %v5716_v44 = vadd.f32 %v4121_v11, %v5590_v32  ;;  %3173 = vmatprep.mubr.bf16.mxu1 %v4972_v41  ;;  %4550 = vmatprep.mubr.msk.bf16.mxu0 %vm2215_vm0, %v4974_v31  ;;  %v4982_v30 = vld [vmem:[%s5071_s5 + $0x4a4] ss:$52 sps:$4 sm:$0xff]  }
 0x189   : > { %v4058_v38 = vpop.f32.mrb[72].mxu1  ;;  %v4122_v43 = vpop.f32.mrb[72].mxu0 }
 0x18a   : > { %v4059_v26 = vpop.f32.mrb[73].mxu1  ;;  %v4123_v52 = vpop.f32.mrb[73].mxu0 }
 0x18b   : > { %v4060_v51 = vadd.f32 %v4059_v26, %v4058_v38  ;;  %v4124_v53 = vadd.f32 %v4123_v52, %v4122_v43  ;;  %v4061_v60 = vpop.f32.mrb[74].mxu1  ;;  %v4125_v58 = vpop.f32.mrb[74].mxu0 }
 0x18c   : > { %v4062_v47 = vpop.f32.mrb[75].mxu1  ;;  %v4126_v37 = vpop.f32.mrb[75].mxu0 }
 0x18d   : > { %v5724_v32 = vadd.f32 %v4060_v51, %v5483_v56  ;;  %v5727_v50 = vadd.f32 %v4124_v53, %v5599_v10  ;;  %v4063_v21 = vadd.f32 %v4062_v47, %v4061_v60  ;;  %v4127_v14 = vadd.f32 %v4126_v37, %v4125_v58  ;;  %v4985_v51 = vld [vmem:[%s5071_s5 + $0x4a0] ss:$52 sps:$4 sm:$0xff]   ;;  %v4986_v53 = vld [vmem:[%s5071_s5 + $0x308] ss:$52 sps:$4 sm:$0xff]   ;;  %v4989_v37 = vld [vmem:[%s5071_s5 + $0x370] ss:$52 sps:$4 sm:$0xff]  }
 0x18e   : > { %3174 = vmatmul.mubr.bf16.gmra.mrb[180].mxu1 %v4975_v49  ;;  %4551 = vmatmul.mubr.msk.bf16.gmra.mrb[180].mxu0 %vm2215_vm0, %v4976_v23  ;;  %v4987_v47 = vld [vmem:[%s5071_s5 + $0x50c] ss:$52 sps:$4 sm:$0xff]  }
 0x18f   : > { %v5731_v9 = vadd.f32 %v4063_v21, %v5489_v63  ;;  %v5734_v2 = vadd.f32 %v4127_v14, %v5604_v59  ;;  %3181 = vmatprep.mubr.bf16.mxu1 %v4977_v17  ;;  %4554 = vmatprep.mubr.msk.bf16.mxu0 %vm2215_vm0, %v4979_v24 }
 0x191   : > { %v4064_v56 = vpop.f32.mrb[76].mxu1  ;;  %v4128_v12 = vpop.f32.mrb[76].mxu0 }
 0x192   : > { %v4065_v10 = vpop.f32.mrb[77].mxu1  ;;  %v4129_v13 = vpop.f32.mrb[77].mxu0 }
 0x193   : > { %v4066_v18 = vadd.f32 %v4065_v10, %v4064_v56  ;;  %v4130_v4 = vadd.f32 %v4129_v13, %v4128_v12  ;;  %v4067_v41 = vpop.f32.mrb[78].mxu1  ;;  %v4131_v31 = vpop.f32.mrb[78].mxu0 }
 0x194   : > { %v4068_v63 = vpop.f32.mrb[79].mxu1  ;;  %v4132_v27 = vpop.f32.mrb[79].mxu0 }
 0x195   : > { %v5742_v59 = vadd.f32 %v4066_v18, %v5498_v8  ;;  %v5745_v11 = vadd.f32 %v4130_v4, %v5613_v20  ;;  %v4069_v38 = vadd.f32 %v4068_v63, %v4067_v41  ;;  %v4133_v43 = vadd.f32 %v4132_v27, %v4131_v31  ;;  %v4990_v18 = vld [vmem:[%s5071_s5 + $0x508] ss:$52 sps:$4 sm:$0xff]   ;;  %v4991_v4 = vld [vmem:[%s5071_s5 + $0x3d8] ss:$52 sps:$4 sm:$0xff]   ;;  %v4994_v27 = vld [vmem:[%s5071_s5 + $0x440] ss:$52 sps:$4 sm:$0xff]  }
 0x196   : > { %3182 = vmatmul.mubr.bf16.gmra.mrb[184].mxu1 %v4980_v29  ;;  %4555 = vmatmul.mubr.msk.bf16.gmra.mrb[184].mxu0 %vm2215_vm0, %v4981_v48  ;;  %v4992_v63 = vld [vmem:[%s5071_s5 + $0x574] ss:$52 sps:$4 sm:$0xff]  }
 0x197   : > { %v5749_v26 = vadd.f32 %v4069_v38, %v5504_v16  ;;  %v5752_v52 = vadd.f32 %v4133_v43, %v5618_v25  ;;  %3189 = vmatprep.mubr.bf16.mxu1 %v4982_v30  ;;  %4558 = vmatprep.mubr.msk.bf16.mxu0 %vm2215_vm0, %v4984_v36 }
 0x199   : > { %v4134_v8 = vpop.f32.mrb[80].mxu0  ;;  %v4198_v49 = vpop.f32.mrb[80].mxu1 }
 0x19a   : > { %v4135_v20 = vpop.f32.mrb[81].mxu0  ;;  %v4199_v23 = vpop.f32.mrb[81].mxu1 }
 0x19b   : > { %v4136_v60 = vadd.f32 %v4135_v20, %v4134_v8  ;;  %v4200_v58 = vadd.f32 %v4199_v23, %v4198_v49  ;;  %v4137_v17 = vpop.f32.mrb[82].mxu0  ;;  %v4201_v24 = vpop.f32.mrb[82].mxu1 }
 0x19c   : > { %v4138_v16 = vpop.f32.mrb[83].mxu0  ;;  %v4202_v21 = vpop.f32.mrb[83].mxu1 }
 0x19d   : > { %v5760_v25 = vadd.f32 %v4136_v60, %v5625_v45  ;;  %v5763_v14 = vadd.f32 %v4200_v58, %v5628_v54  ;;  %v4139_v56 = vadd.f32 %v4138_v16, %v4137_v17  ;;  %v4203_v12 = vadd.f32 %v4202_v21, %v4201_v24  ;;  %v4995_v60 = vld [vmem:[%s5071_s5 + $0x570] ss:$52 sps:$4 sm:$0xff]   ;;  %v4996_v58 = vld [vmem:[%s5071_s5 + $0x4a8] ss:$52 sps:$4 sm:$0xff]  }
 0x19e   : > { %3190 = vmatmul.mubr.bf16.gmra.mrb[188].mxu1 %v4985_v51  ;;  %4559 = vmatmul.mubr.msk.bf16.gmra.mrb[188].mxu0 %vm2215_vm0, %v4986_v53  ;;  %v4997_v16 = vld [vmem:[%s5071_s5 + $0x5dc] ss:$52 sps:$4 sm:$0xff]  }
 0x19f   : > { %v5767_v10 = vadd.f32 %v4139_v56, %v5631_v62  ;;  %v5770_v13 = vadd.f32 %v4203_v12, %v5634_v1  ;;  %3197 = vmatprep.mubr.bf16.mxu1 %v4987_v47  ;;  %4562 = vmatprep.mubr.msk.bf16.mxu0 %vm2215_vm0, %v4989_v37  ;;  %v4999_v21 = vld [vmem:[%s5071_s5 + $0x510] ss:$52 sps:$4 sm:$0xff]  }
 0x1a1   : > { %v4140_v45 = vpop.f32.mrb[84].mxu0  ;;  %v4204_v29 = vpop.f32.mrb[84].mxu1 }
 0x1a2   : > { %v4141_v54 = vpop.f32.mrb[85].mxu0  ;;  %v4205_v48 = vpop.f32.mrb[85].mxu1 }
 0x1a3   : > { %v4142_v41 = vadd.f32 %v4141_v54, %v4140_v45  ;;  %v4206_v31 = vadd.f32 %v4205_v48, %v4204_v29  ;;  %v4143_v30 = vpop.f32.mrb[86].mxu0  ;;  %v4207_v36 = vpop.f32.mrb[86].mxu1 }
 0x1a4   : > { %v4144_v62 = vpop.f32.mrb[87].mxu0  ;;  %v4208_v38 = vpop.f32.mrb[87].mxu1 }
 0x1a5   : > { %v5778_v1 = vadd.f32 %v4142_v41, %v5641_v42  ;;  %v5781_v43 = vadd.f32 %v4206_v31, %v5644_v22  ;;  %v4145_v8 = vadd.f32 %v4144_v62, %v4143_v30  ;;  %v4209_v49 = vadd.f32 %v4208_v38, %v4207_v36  ;;  %v5000_v41 = vld [vmem:[%s5071_s5 + $0x5d8] ss:$52 sps:$4 sm:$0xff]   ;;  %v5004_v38 = vld [vmem:[%s5071_s5 + $0x5e0] ss:$52 sps:$4 sm:$0xff]  }
 0x1a6   : > { %3198 = vmatmul.mubr.bf16.gmra.mrb[192].mxu1 %v4990_v18  ;;  %4563 = vmatmul.mubr.msk.bf16.gmra.mrb[192].mxu0 %vm2215_vm0, %v4991_v4  ;;  %v5001_v31 = vld [vmem:[%s5071_s5 + $0x578] ss:$52 sps:$4 sm:$0xff]  }
 0x1a7   : > { %v5785_v20 = vadd.f32 %v4145_v8, %v5647_v34  ;;  %v5788_v23 = vadd.f32 %v4209_v49, %v5650_v35  ;;  %3205 = vmatprep.mubr.bf16.mxu1 %v4992_v63  ;;  %4566 = vmatprep.mubr.msk.bf16.mxu0 %vm2215_vm0, %v4994_v27  ;;  %v5002_v62 = vld [vmem:[%s5071_s5 + $0x644] ss:$52 sps:$4 sm:$0xff]  }
 0x1a9   : > { %v4146_v42 = vpop.f32.mrb[88].mxu0  ;;  %v4210_v51 = vpop.f32.mrb[88].mxu1 }
 0x1aa   : > { %v4147_v22 = vpop.f32.mrb[89].mxu0  ;;  %v4211_v53 = vpop.f32.mrb[89].mxu1 }
 0x1ab   : > { %v4148_v17 = vadd.f32 %v4147_v22, %v4146_v42  ;;  %v4212_v24 = vadd.f32 %v4211_v53, %v4210_v51  ;;  %v4149_v47 = vpop.f32.mrb[90].mxu0  ;;  %v4213_v37 = vpop.f32.mrb[90].mxu1 }
 0x1ac   : > { %v4150_v34 = vpop.f32.mrb[91].mxu0  ;;  %v4214_v56 = vpop.f32.mrb[91].mxu1 }
 0x1ad   : > { %v5796_v35 = vadd.f32 %v4148_v17, %v5657_v61  ;;  %v5799_v12 = vadd.f32 %v4212_v24, %v5660_v55  ;;  %v4151_v45 = vadd.f32 %v4150_v34, %v4149_v47  ;;  %v4215_v29 = vadd.f32 %v4214_v56, %v4213_v37  ;;  %v5006_v24 = vld [vmem:[%s5071_s5 + $0x648] ss:$52 sps:$4 sm:$0xff]  }
 0x1ae   : > { %3206 = vmatmul.mubr.bf16.gmra.mrb[196].mxu1 %v4995_v60  ;;  %4567 = vmatmul.mubr.msk.bf16.gmra.mrb[196].mxu0 %vm2215_vm0, %v4996_v58 }
 0x1af   : > { %v5803_v54 = vadd.f32 %v4151_v45, %v5663_v3  ;;  %v5806_v48 = vadd.f32 %v4215_v29, %v5666_v40  ;;  %3213 = vmatprep.mubr.bf16.mxu1 %v4997_v16  ;;  %4570 = vmatprep.mubr.msk.bf16.mxu0 %vm2215_vm0, %v4999_v21 }
 0x1b1   : > { %v4152_v61 = vpop.f32.mrb[92].mxu0  ;;  %v4216_v18 = vpop.f32.mrb[92].mxu1 }
 0x1b2   : > { %v4153_v55 = vpop.f32.mrb[93].mxu0  ;;  %v4217_v4 = vpop.f32.mrb[93].mxu1 }
 0x1b3   : > { %v4154_v30 = vadd.f32 %v4153_v55, %v4152_v61  ;;  %v4218_v36 = vadd.f32 %v4217_v4, %v4216_v18  ;;  %v4155_v63 = vpop.f32.mrb[94].mxu0  ;;  %v4219_v27 = vpop.f32.mrb[94].mxu1 }
 0x1b4   : > { %v4156_v3 = vpop.f32.mrb[95].mxu0  ;;  %v4220_v8 = vpop.f32.mrb[95].mxu1 }
 0x1b5   : > { %v5814_v40 = vadd.f32 %v4154_v30, %v5673_v19  ;;  %v5817_v49 = vadd.f32 %v4218_v36, %v5676_v28  ;;  %v4157_v42 = vadd.f32 %v4156_v3, %v4155_v63  ;;  %v4221_v51 = vadd.f32 %v4220_v8, %v4219_v27  ;;  %v5005_v28 = vld [vmem:[%s5071_s5 + $0x640] ss:$52 sps:$4 sm:$0xff]   ;;  %s3519_s5 = sshll.u32 %s6156_s13, 3 }
 0x1b6   : > { %3214 = vmatmul.mubr.bf16.gmra.mrb[200].mxu1 %v5000_v41  ;;  %4571 = vmatmul.mubr.msk.bf16.gmra.mrb[200].mxu0 %vm2215_vm0, %v5001_v31  ;;  %s6075_s17 = scalar_lea.vmem %s6154_s2, %s3519_s5 }
 0x1b7   : > { %v5821_v22 = vadd.f32 %v4157_v42, %v5679_v39  ;;  %v5824_v53 = vadd.f32 %v4221_v51, %v5682_v33  ;;  %3221 = vmatprep.mubr.bf16.mxu1 %v5002_v62  ;;  %4574 = vmatprep.mubr.msk.bf16.mxu0 %vm2215_vm0, %v5004_v38 }
 0x1b9   : > { %v4158_v60 = vpop.f32.mrb[96].mxu0  ;;  %v4222_v19 = vpop.f32.mrb[96].mxu1 }
 0x1ba   : > { %v4159_v58 = vpop.f32.mrb[97].mxu0  ;;  %v4223_v17 = vpop.f32.mrb[97].mxu1 }
 0x1bb   : > { %v4160_v47 = vadd.f32 %v4159_v58, %v4158_v60  ;;  %v4224_v37 = vadd.f32 %v4223_v17, %v4222_v19  ;;  %v4161_v16 = vpop.f32.mrb[98].mxu0  ;;  %v4225_v21 = vpop.f32.mrb[98].mxu1 }
 0x1bc   : > { %v4162_v34 = vpop.f32.mrb[99].mxu0  ;;  %v4226_v56 = vpop.f32.mrb[99].mxu1 }
 0x1bd   : > { %v5830_v39 = vadd.f32 %v4160_v47, %v5689_v46  ;;  %v5833_v33 = vadd.f32 %v4224_v37, %v5692_v57  ;;  %v4163_v45 = vadd.f32 %v4162_v34, %v4161_v16  ;;  %v4227_v29 = vadd.f32 %v4226_v56, %v4225_v21 }
 0x1be   : > { %3222 = vmatmul.mubr.bf16.gmra.mrb[204].mxu1 %v5005_v28  ;;  %4575 = vmatmul.mubr.msk.bf16.gmra.mrb[204].mxu0 %vm2215_vm0, %v5006_v24 }
 0x1bf   : > { %v5837_v61 = vadd.f32 %v4163_v45, %v5695_v6  ;;  %v5840_v18 = vadd.f32 %v4227_v29, %v5698_v7 }
 0x1c1   : > { %v4164_v55 = vpop.f32.mrb[100].mxu0  ;;  %v4228_v4 = vpop.f32.mrb[100].mxu1 }
 0x1c2   : > { %v4165_v41 = vpop.f32.mrb[101].mxu0  ;;  %v4229_v31 = vpop.f32.mrb[101].mxu1 }
 0x1c3   : > { %v4166_v46 = vadd.f32 %v4165_v41, %v4164_v55  ;;  %v4230_v30 = vadd.f32 %v4229_v31, %v4228_v4  ;;  %v4167_v36 = vpop.f32.mrb[102].mxu0  ;;  %v4231_v57 = vpop.f32.mrb[102].mxu1 }
 0x1c4   : > { %v4168_v63 = vpop.f32.mrb[103].mxu0  ;;  %v4232_v27 = vpop.f32.mrb[103].mxu1 }
 0x1c5   : > { %v5843_v62 = vadd.f32 %v4166_v46, %v5706_v5  ;;  %v5846_v38 = vadd.f32 %v4230_v30, %v5709_v15  ;;  %v4169_v6 = vadd.f32 %v4168_v63, %v4167_v36  ;;  %v4233_v3 = vadd.f32 %v4232_v27, %v4231_v57 }
 0x1c7   : > { %v5849_v7 = vadd.f32 %v4169_v6, %v5713_v0  ;;  %v5852_v8 = vadd.f32 %v4233_v3, %v5716_v44 }
 0x1c9   : > { %v4170_v42 = vpop.f32.mrb[104].mxu0  ;;  %v4234_v51 = vpop.f32.mrb[104].mxu1 }
 0x1ca   : > { %v4171_v60 = vpop.f32.mrb[105].mxu0  ;;  %v4235_v19 = vpop.f32.mrb[105].mxu1 }
 0x1cb   : > { %v4172_v58 = vadd.f32 %v4171_v60, %v4170_v42  ;;  %v4236_v17 = vadd.f32 %v4235_v19, %v4234_v51  ;;  %v4173_v28 = vpop.f32.mrb[106].mxu0  ;;  %v4237_v5 = vpop.f32.mrb[106].mxu1 }
 0x1cc   : > { %v4174_v24 = vpop.f32.mrb[107].mxu0  ;;  %v4238_v47 = vpop.f32.mrb[107].mxu1 }
 0x1cd   : > { %v5855_v15 = vadd.f32 %v4172_v58, %v5724_v32  ;;  %v5858_v37 = vadd.f32 %v4236_v17, %v5727_v50  ;;  %v4175_v0 = vadd.f32 %v4174_v24, %v4173_v28  ;;  %v4239_v16 = vadd.f32 %v4238_v47, %v4237_v5 }
 0x1cf   : > { %v5861_v44 = vadd.f32 %v4175_v0, %v5731_v9  ;;  %v5864_v21 = vadd.f32 %v4239_v16, %v5734_v2 }
 0x1d1   : > { %v4176_v34 = vpop.f32.mrb[108].mxu0  ;;  %v4240_v56 = vpop.f32.mrb[108].mxu1 }
 0x1d2   : > { %v4177_v45 = vpop.f32.mrb[109].mxu0  ;;  %v4241_v29 = vpop.f32.mrb[109].mxu1 }
 0x1d3   : > { %v4178_v55 = vadd.f32 %v4177_v45, %v4176_v34  ;;  %v4242_v4 = vadd.f32 %v4241_v29, %v4240_v56  ;;  %v4179_v41 = vpop.f32.mrb[110].mxu0  ;;  %v4243_v32 = vpop.f32.mrb[110].mxu1 }
 0x1d4   : > { %v4180_v31 = vpop.f32.mrb[111].mxu0  ;;  %v4244_v46 = vpop.f32.mrb[111].mxu1 }
 0x1d5   : > { %v5867_v50 = vadd.f32 %v4178_v55, %v5742_v59  ;;  %v5870_v30 = vadd.f32 %v4242_v4, %v5745_v11  ;;  %v4181_v9 = vadd.f32 %v4180_v31, %v4179_v41  ;;  %v4245_v36 = vadd.f32 %v4244_v46, %v4243_v32 }
 0x1d7   : > { %v5873_v2 = vadd.f32 %v4181_v9, %v5749_v26  ;;  %v5876_v57 = vadd.f32 %v4245_v36, %v5752_v52 }
 0x1d9   : > { %v4246_v63 = vpop.f32.mrb[112].mxu1  ;;  %v4310_v27 = vpop.f32.mrb[112].mxu0 }
 0x1da   : > { %v4247_v6 = vpop.f32.mrb[113].mxu1  ;;  %v4311_v3 = vpop.f32.mrb[113].mxu0 }
 0x1db   : > { %v4248_v42 = vadd.f32 %v4247_v6, %v4246_v63  ;;  %v4312_v51 = vadd.f32 %v4311_v3, %v4310_v27  ;;  %v4249_v60 = vpop.f32.mrb[114].mxu1  ;;  %v4313_v59 = vpop.f32.mrb[114].mxu0 }
 0x1dc   : > { %v4250_v19 = vpop.f32.mrb[115].mxu1  ;;  %v4314_v58 = vpop.f32.mrb[115].mxu0 }
 0x1dd   : > { %v5879_v11 = vadd.f32 %v4248_v42, %v5760_v25  ;;  %v5882_v17 = vadd.f32 %v4312_v51, %v5763_v14  ;;  %v4251_v26 = vadd.f32 %v4250_v19, %v4249_v60  ;;  %v4315_v28 = vadd.f32 %v4314_v58, %v4313_v59 }
 0x1df   : > { %v5885_v52 = vadd.f32 %v4251_v26, %v5767_v10  ;;  %v5888_v5 = vadd.f32 %v4315_v28, %v5770_v13 }
 0x1e1   : > { %v4252_v24 = vpop.f32.mrb[116].mxu1  ;;  %v4316_v47 = vpop.f32.mrb[116].mxu0 }
 0x1e2   : > { %v4253_v0 = vpop.f32.mrb[117].mxu1  ;;  %v4317_v16 = vpop.f32.mrb[117].mxu0 }
 0x1e3   : > { %v4254_v34 = vadd.f32 %v4253_v0, %v4252_v24  ;;  %v4318_v56 = vadd.f32 %v4317_v16, %v4316_v47  ;;  %v4255_v45 = vpop.f32.mrb[118].mxu1  ;;  %v4319_v25 = vpop.f32.mrb[118].mxu0 }
 0x1e4   : > { %v4256_v29 = vpop.f32.mrb[119].mxu1  ;;  %v4320_v55 = vpop.f32.mrb[119].mxu0 }
 0x1e5   : > { %v5891_v14 = vadd.f32 %v4254_v34, %v5778_v1  ;;  %v5894_v4 = vadd.f32 %v4318_v56, %v5781_v43  ;;  %v4257_v10 = vadd.f32 %v4256_v29, %v4255_v45  ;;  %v4321_v41 = vadd.f32 %v4320_v55, %v4319_v25 }
 0x1e7   : > { %v5897_v13 = vadd.f32 %v4257_v10, %v5785_v20  ;;  %v5900_v32 = vadd.f32 %v4321_v41, %v5788_v23 }
 0x1e9   : > { %v4258_v31 = vpop.f32.mrb[120].mxu1  ;;  %v4322_v46 = vpop.f32.mrb[120].mxu0 }
 0x1ea   : > { %v4259_v9 = vpop.f32.mrb[121].mxu1  ;;  %v4323_v36 = vpop.f32.mrb[121].mxu0 }
 0x1eb   : > { %v4260_v63 = vadd.f32 %v4259_v9, %v4258_v31  ;;  %v4324_v27 = vadd.f32 %v4323_v36, %v4322_v46  ;;  %v4261_v6 = vpop.f32.mrb[122].mxu1  ;;  %v4325_v1 = vpop.f32.mrb[122].mxu0 }
 0x1ec   : > { %v4262_v3 = vpop.f32.mrb[123].mxu1  ;;  %v4326_v42 = vpop.f32.mrb[123].mxu0 }
 0x1ed   : > { %v5903_v43 = vadd.f32 %v4260_v63, %v5796_v35  ;;  %v5906_v51 = vadd.f32 %v4324_v27, %v5799_v12  ;;  %v4263_v20 = vadd.f32 %v4262_v3, %v4261_v6  ;;  %v4327_v60 = vadd.f32 %v4326_v42, %v4325_v1 }
 0x1ef   : > { %v5909_v23 = vadd.f32 %v4263_v20, %v5803_v54  ;;  %v5912_v59 = vadd.f32 %v4327_v60, %v5806_v48 }
 0x1f1   : > { %v4264_v19 = vpop.f32.mrb[124].mxu1  ;;  %v4328_v58 = vpop.f32.mrb[124].mxu0 }
 0x1f2   : > { %v4265_v26 = vpop.f32.mrb[125].mxu1  ;;  %v4329_v28 = vpop.f32.mrb[125].mxu0 }
 0x1f3   : > { %v4266_v24 = vadd.f32 %v4265_v26, %v4264_v19  ;;  %v4330_v47 = vadd.f32 %v4329_v28, %v4328_v58  ;;  %v4267_v0 = vpop.f32.mrb[126].mxu1  ;;  %v4331_v35 = vpop.f32.mrb[126].mxu0 }
 0x1f4   : > { %v4268_v16 = vpop.f32.mrb[127].mxu1  ;;  %v4332_v34 = vpop.f32.mrb[127].mxu0 }
 0x1f5   : > { %v5915_v12 = vadd.f32 %v4266_v24, %v5814_v40  ;;  %v5918_v56 = vadd.f32 %v4330_v47, %v5817_v49  ;;  %v4269_v54 = vadd.f32 %v4268_v16, %v4267_v0  ;;  %v4333_v45 = vadd.f32 %v4332_v34, %v4331_v35 }
 0x1f7   : > { %v5921_v48 = vadd.f32 %v4269_v54, %v5821_v22  ;;  %v5924_v25 = vadd.f32 %v4333_v45, %v5824_v53 }
 0x1f9   : > { %v4270_v29 = vpop.f32.mrb[128].mxu1  ;;  %v4334_v55 = vpop.f32.mrb[128].mxu0 }
 0x1fa   : > { %v4271_v10 = vpop.f32.mrb[129].mxu1  ;;  %v4335_v41 = vpop.f32.mrb[129].mxu0 }
 0x1fb   : > { %v4272_v31 = vadd.f32 %v4271_v10, %v4270_v29  ;;  %v4336_v46 = vadd.f32 %v4335_v41, %v4334_v55  ;;  %v4273_v9 = vpop.f32.mrb[130].mxu1  ;;  %v4337_v40 = vpop.f32.mrb[130].mxu0 }
 0x1fc   : > { %v4274_v36 = vpop.f32.mrb[131].mxu1  ;;  %v4338_v63 = vpop.f32.mrb[131].mxu0 }
 0x1fd   : > { %v5927_v49 = vadd.f32 %v4272_v31, %v5830_v39  ;;  %v5930_v27 = vadd.f32 %v4336_v46, %v5833_v33  ;;  %v4275_v22 = vadd.f32 %v4274_v36, %v4273_v9  ;;  %v4339_v6 = vadd.f32 %v4338_v63, %v4337_v40 }
 0x1ff   : > { %v5933_v53 = vadd.f32 %v4275_v22, %v5837_v61  ;;  %v5936_v1 = vadd.f32 %v4339_v6, %v5840_v18 }
 0x201   : > { %v4276_v3 = vpop.f32.mrb[132].mxu1  ;;  %v4340_v42 = vpop.f32.mrb[132].mxu0 }
 0x202   : > { %v4277_v20 = vpop.f32.mrb[133].mxu1  ;;  %v4341_v60 = vpop.f32.mrb[133].mxu0 }
 0x203   : > { %v4278_v19 = vadd.f32 %v4277_v20, %v4276_v3  ;;  %v4342_v58 = vadd.f32 %v4341_v60, %v4340_v42  ;;  %v4279_v26 = vpop.f32.mrb[134].mxu1  ;;  %v4343_v39 = vpop.f32.mrb[134].mxu0 }
 0x204   : > { %v4280_v28 = vpop.f32.mrb[135].mxu1  ;;  %v4344_v24 = vpop.f32.mrb[135].mxu0 }
 0x205   : > { %v5939_v33 = vadd.f32 %v4278_v19, %v5843_v62  ;;  %v5942_v47 = vadd.f32 %v4342_v58, %v5846_v38  ;;  %v4281_v61 = vadd.f32 %v4280_v28, %v4279_v26  ;;  %v4345_v0 = vadd.f32 %v4344_v24, %v4343_v39 }
 0x207   : > { %v5945_v18 = vadd.f32 %v4281_v61, %v5849_v7  ;;  %v5948_v35 = vadd.f32 %v4345_v0, %v5852_v8 }
 0x209   : > { %v4282_v16 = vpop.f32.mrb[136].mxu1  ;;  %v4346_v34 = vpop.f32.mrb[136].mxu0 }
 0x20a   : > { %v4283_v54 = vpop.f32.mrb[137].mxu1  ;;  %v4347_v45 = vpop.f32.mrb[137].mxu0 }
 0x20b   : > { %v4284_v29 = vadd.f32 %v4283_v54, %v4282_v16  ;;  %v4348_v55 = vadd.f32 %v4347_v45, %v4346_v34  ;;  %v4285_v10 = vpop.f32.mrb[138].mxu1  ;;  %v4349_v62 = vpop.f32.mrb[138].mxu0 }
 0x20c   : > { %v4286_v41 = vpop.f32.mrb[139].mxu1  ;;  %v4350_v31 = vpop.f32.mrb[139].mxu0 }
 0x20d   : > { %v5951_v38 = vadd.f32 %v4284_v29, %v5855_v15  ;;  %v5954_v46 = vadd.f32 %v4348_v55, %v5858_v37  ;;  %v4287_v7 = vadd.f32 %v4286_v41, %v4285_v10  ;;  %v4351_v9 = vadd.f32 %v4350_v31, %v4349_v62 }
 0x20f   : > { %v5957_v8 = vadd.f32 %v4287_v7, %v5861_v44  ;;  %v5960_v40 = vadd.f32 %v4351_v9, %v5864_v21 }
 0x211   : > { %v4288_v36 = vpop.f32.mrb[140].mxu1  ;;  %v4352_v63 = vpop.f32.mrb[140].mxu0 }
 0x212   : > { %v4289_v22 = vpop.f32.mrb[141].mxu1  ;;  %v4353_v6 = vpop.f32.mrb[141].mxu0 }
 0x213   : > { %v4290_v3 = vadd.f32 %v4289_v22, %v4288_v36  ;;  %v4354_v42 = vadd.f32 %v4353_v6, %v4352_v63  ;;  %v4291_v20 = vpop.f32.mrb[142].mxu1  ;;  %v4355_v15 = vpop.f32.mrb[142].mxu0 }
 0x214   : > { %v4292_v60 = vpop.f32.mrb[143].mxu1  ;;  %v4356_v19 = vpop.f32.mrb[143].mxu0 }
 0x215   : > { %v5963_v37 = vadd.f32 %v4290_v3, %v5867_v50  ;;  %v5966_v58 = vadd.f32 %v4354_v42, %v5870_v30  ;;  %v4293_v44 = vadd.f32 %v4292_v60, %v4291_v20  ;;  %v4357_v26 = vadd.f32 %v4356_v19, %v4355_v15 }
 0x217   : > { %v5969_v21 = vadd.f32 %v4293_v44, %v5873_v2  ;;  %v5972_v39 = vadd.f32 %v4357_v26, %v5876_v57 }
 0x219   : > { %v4358_v28 = vpop.f32.mrb[144].mxu0  ;;  %v4422_v24 = vpop.f32.mrb[144].mxu1 }
 0x21a   : > { %v4359_v61 = vpop.f32.mrb[145].mxu0  ;;  %v4423_v0 = vpop.f32.mrb[145].mxu1 }
 0x21b   : > { %v4360_v16 = vadd.f32 %v4359_v61, %v4358_v28  ;;  %v4424_v34 = vadd.f32 %v4423_v0, %v4422_v24  ;;  %v4361_v54 = vpop.f32.mrb[146].mxu0  ;;  %v4425_v50 = vpop.f32.mrb[146].mxu1 }
 0x21c   : > { %v4362_v45 = vpop.f32.mrb[147].mxu0  ;;  %v4426_v29 = vpop.f32.mrb[147].mxu1 }
 0x21d   : > { %v5975_v30 = vadd.f32 %v4360_v16, %v5879_v11  ;;  %v4363_v55 = vadd.f32 %v4362_v45, %v4361_v54  ;;  %v4427_v10 = vadd.f32 %v4426_v29, %v4425_v50  ;;  %v5978_v2 = vadd.f32 %v4424_v34, %v5882_v17 }
 0x21f   : > { %v5981_v57 = vadd.f32 %v4363_v55, %v5885_v52  ;;  %v5984_v62 = vadd.f32 %v4427_v10, %v5888_v5 }
 0x221   : > { %v4364_v41 = vpop.f32.mrb[148].mxu0  ;;  %v4428_v31 = vpop.f32.mrb[148].mxu1 }
 0x222   : > { %v4365_v7 = vpop.f32.mrb[149].mxu0  ;;  %v4429_v9 = vpop.f32.mrb[149].mxu1 }
 0x223   : > { %v4366_v36 = vadd.f32 %v4365_v7, %v4364_v41  ;;  %v4430_v63 = vadd.f32 %v4429_v9, %v4428_v31  ;;  %v4367_v22 = vpop.f32.mrb[150].mxu0  ;;  %v4431_v11 = vpop.f32.mrb[150].mxu1 }
 0x224   : > { %v4368_v6 = vpop.f32.mrb[151].mxu0  ;;  %v4432_v3 = vpop.f32.mrb[151].mxu1 }
 0x225   : > { %v5987_v42 = vadd.f32 %v4366_v36, %v5891_v14  ;;  %v4369_v17 = vadd.f32 %v4368_v6, %v4367_v22  ;;  %v4433_v20 = vadd.f32 %v4432_v3, %v4431_v11  ;;  %v5990_v52 = vadd.f32 %v4430_v63, %v5894_v4 }
 0x227   : > { %v5993_v5 = vadd.f32 %v4369_v17, %v5897_v13  ;;  %v5996_v15 = vadd.f32 %v4433_v20, %v5900_v32 }
 0x229   : > { %v4370_v60 = vpop.f32.mrb[152].mxu0  ;;  %v4434_v19 = vpop.f32.mrb[152].mxu1 }
 0x22a   : > { %v4371_v44 = vpop.f32.mrb[153].mxu0  ;;  %v4435_v26 = vpop.f32.mrb[153].mxu1 }
 0x22b   : > { %v4372_v28 = vadd.f32 %v4371_v44, %v4370_v60  ;;  %v4436_v24 = vadd.f32 %v4435_v26, %v4434_v19  ;;  %v4373_v61 = vpop.f32.mrb[154].mxu0  ;;  %v4437_v14 = vpop.f32.mrb[154].mxu1 }
 0x22c   : > { %v4374_v0 = vpop.f32.mrb[155].mxu0  ;;  %v4438_v16 = vpop.f32.mrb[155].mxu1 }
 0x22d   : > { %v5999_v34 = vadd.f32 %v4372_v28, %v5903_v43  ;;  %v4375_v4 = vadd.f32 %v4374_v0, %v4373_v61  ;;  %v4439_v54 = vadd.f32 %v4438_v16, %v4437_v14  ;;  %v6002_v13 = vadd.f32 %v4436_v24, %v5906_v51 }
 0x22f   : > { %v6005_v32 = vadd.f32 %v4375_v4, %v5909_v23  ;;  %v6008_v50 = vadd.f32 %v4439_v54, %v5912_v59 }
 0x231   : > { %v4376_v45 = vpop.f32.mrb[156].mxu0  ;;  %v4440_v29 = vpop.f32.mrb[156].mxu1 }
 0x232   : > { %v4377_v55 = vpop.f32.mrb[157].mxu0  ;;  %v4441_v10 = vpop.f32.mrb[157].mxu1 }
 0x233   : > { %v4378_v41 = vadd.f32 %v4377_v55, %v4376_v45  ;;  %v4442_v31 = vadd.f32 %v4441_v10, %v4440_v29  ;;  %v4379_v7 = vpop.f32.mrb[158].mxu0  ;;  %v4443_v43 = vpop.f32.mrb[158].mxu1 }
 0x234   : > { %v4380_v9 = vpop.f32.mrb[159].mxu0  ;;  %v4444_v36 = vpop.f32.mrb[159].mxu1 }
 0x235   : > { %v6011_v63 = vadd.f32 %v4378_v41, %v5915_v12  ;;  %v4381_v51 = vadd.f32 %v4380_v9, %v4379_v7  ;;  %v4445_v22 = vadd.f32 %v4444_v36, %v4443_v43  ;;  %v6014_v23 = vadd.f32 %v4442_v31, %v5918_v56 }
 0x237   : > { %v6017_v59 = vadd.f32 %v4381_v51, %v5921_v48  ;;  %v6020_v11 = vadd.f32 %v4445_v22, %v5924_v25 }
 0x239   : > { %v4382_v6 = vpop.f32.mrb[160].mxu0  ;;  %v4446_v3 = vpop.f32.mrb[160].mxu1 }
 0x23a   : > { %v4383_v17 = vpop.f32.mrb[161].mxu0  ;;  %v4447_v20 = vpop.f32.mrb[161].mxu1 }
 0x23b   : > { %v4384_v60 = vadd.f32 %v4383_v17, %v4382_v6  ;;  %v4448_v19 = vadd.f32 %v4447_v20, %v4446_v3  ;;  %v4385_v44 = vpop.f32.mrb[162].mxu0  ;;  %v4449_v12 = vpop.f32.mrb[162].mxu1 }
 0x23c   : > { %v4386_v26 = vpop.f32.mrb[163].mxu0  ;;  %v4450_v28 = vpop.f32.mrb[163].mxu1 }
 0x23d   : > { %v6023_v24 = vadd.f32 %v4384_v60, %v5927_v49  ;;  %v4387_v56 = vadd.f32 %v4386_v26, %v4385_v44  ;;  %v4451_v61 = vadd.f32 %v4450_v28, %v4449_v12  ;;  %v6026_v48 = vadd.f32 %v4448_v19, %v5930_v27 }
 0x23f   : > { %v6029_v25 = vadd.f32 %v4387_v56, %v5933_v53  ;;  %v6032_v14 = vadd.f32 %v4451_v61, %v5936_v1 }
 0x241   : > { %v4388_v0 = vpop.f32.mrb[164].mxu0  ;;  %v4452_v16 = vpop.f32.mrb[164].mxu1 }
 0x242   : > { %v4389_v4 = vpop.f32.mrb[165].mxu0  ;;  %v4453_v54 = vpop.f32.mrb[165].mxu1 }
 0x243   : > { %v4390_v45 = vadd.f32 %v4389_v4, %v4388_v0  ;;  %v4454_v29 = vadd.f32 %v4453_v54, %v4452_v16  ;;  %v4391_v55 = vpop.f32.mrb[166].mxu0  ;;  %v4455_v49 = vpop.f32.mrb[166].mxu1 }
 0x244   : > { %v4392_v10 = vpop.f32.mrb[167].mxu0  ;;  %v4456_v41 = vpop.f32.mrb[167].mxu1 }
 0x245   : > { %v6035_v31 = vadd.f32 %v4390_v45, %v5939_v33  ;;  %v4393_v27 = vadd.f32 %v4392_v10, %v4391_v55  ;;  %v4457_v7 = vadd.f32 %v4456_v41, %v4455_v49  ;;  %v6038_v53 = vadd.f32 %v4454_v29, %v5942_v47 }
 0x247   : > { %v6041_v1 = vadd.f32 %v4393_v27, %v5945_v18  ;;  %v6044_v43 = vadd.f32 %v4457_v7, %v5948_v35 }
 0x249   : > { %v4394_v9 = vpop.f32.mrb[168].mxu0  ;;  %v4458_v36 = vpop.f32.mrb[168].mxu1 }
 0x24a   : > { %v4395_v51 = vpop.f32.mrb[169].mxu0  ;;  %v4459_v22 = vpop.f32.mrb[169].mxu1 }
 0x24b   : > { %v4396_v6 = vadd.f32 %v4395_v51, %v4394_v9  ;;  %v4460_v3 = vadd.f32 %v4459_v22, %v4458_v36  ;;  %v4397_v17 = vpop.f32.mrb[170].mxu0  ;;  %v4461_v33 = vpop.f32.mrb[170].mxu1 }
 0x24c   : > { %v4398_v20 = vpop.f32.mrb[171].mxu0  ;;  %v4462_v60 = vpop.f32.mrb[171].mxu1 }
 0x24d   : > { %v6047_v19 = vadd.f32 %v4396_v6, %v5951_v38  ;;  %v4399_v47 = vadd.f32 %v4398_v20, %v4397_v17  ;;  %v4463_v44 = vadd.f32 %v4462_v60, %v4461_v33  ;;  %v6050_v18 = vadd.f32 %v4460_v3, %v5954_v46 }
 0x24f   : > { %v6053_v35 = vadd.f32 %v4399_v47, %v5957_v8  ;;  %v6056_v12 = vadd.f32 %v4463_v44, %v5960_v40 }
 0x251   : > { %v4400_v26 = vpop.f32.mrb[172].mxu0  ;;  %v4464_v28 = vpop.f32.mrb[172].mxu1 }
 0x252   : > { %v4401_v56 = vpop.f32.mrb[173].mxu0  ;;  %v4465_v61 = vpop.f32.mrb[173].mxu1 }
 0x253   : > { %v4402_v0 = vadd.f32 %v4401_v56, %v4400_v26  ;;  %v4466_v16 = vadd.f32 %v4465_v61, %v4464_v28  ;;  %v4403_v38 = vpop.f32.mrb[174].mxu0  ;;  %v4467_v4 = vpop.f32.mrb[174].mxu1 }
 0x254   : > { %v4404_v54 = vpop.f32.mrb[175].mxu0  ;;  %v4468_v45 = vpop.f32.mrb[175].mxu1 }
 0x255   : > { %v6059_v46 = vadd.f32 %v4402_v0, %v5963_v37  ;;  %v4405_v29 = vadd.f32 %v4404_v54, %v4403_v38  ;;  %v4469_v8 = vadd.f32 %v4468_v45, %v4467_v4  ;;  %v6062_v55 = vadd.f32 %v4466_v16, %v5966_v58 }
 0x257   : > { %v6065_v40 = vadd.f32 %v4405_v29, %v5969_v21  ;;  %v6068_v49 = vadd.f32 %v4469_v8, %v5972_v39 }
 0x259   : > { %v4470_v10 = vpop.f32.mrb[176].mxu1  ;;  %v4548_v41 = vpop.f32.mrb[176].mxu0 }
 0x25a   : > { %v3273_v27 = vadd.f32 %v4548_v41, %v5990_v52  ;;  %v4471_v7 = vpop.f32.mrb[177].mxu1  ;;  %v3264_v9 = vpop.f32.mrb[177].mxu0 }
 0x25b   : > { %v4472_v37 = vadd.f32 %v4471_v7, %v4470_v10  ;;  %v3265_v58 = vadd.f32 %v3264_v9, %v5978_v2  ;;  %v4473_v21 = vpop.f32.mrb[178].mxu1  ;;  %v4549_v39 = vpop.f32.mrb[178].mxu0 }
 0x25c   : > { %v3393_v36 = vmax.f32 %v3273_v27, 0.0  ;;  %v3276_v51 = vadd.f32 %v4549_v39, %v5996_v15  ;;  %v4474_v52 = vpop.f32.mrb[179].mxu1  ;;  %v3267_v22 = vpop.f32.mrb[179].mxu0 }
 0x25d   : > { %v3391_v6 = vmax.f32 %v3265_v58, 0.0  ;;  %v4475_v3 = vadd.f32 %v4474_v52, %v4473_v21  ;;  %v3268_v17 = vadd.f32 %v3267_v22, %v5984_v62  ;;  %v6081_v33 = vadd.f32 %v4472_v37, %v5975_v30 }
 0x25e   : > { %3425 = vst [vmem:[%s6075_s17 + $0x10] sm:$0xff] %v3393_v36  ;;  %v3394_v20 = vmax.f32 %v3276_v51, 0.0 }
 0x25f   : > { %3423 = vst [vmem:[%s6075_s17] sm:$0xff] %v3391_v6  ;;  %v3392_v2 = vmax.f32 %v3268_v17, 0.0  ;;  %v6086_v60 = vadd.f32 %v4475_v3, %v5981_v57 }
 0x260   : > { %3426 = vst [vmem:[%s6075_s17 + $0x18] sm:$0xff] %v3394_v20 }
 0x261   : > { %3424 = vst [vmem:[%s6075_s17 + $0x8] sm:$0xff] %v3392_v2  ;;  %v4476_v47 = vpop.f32.mrb[180].mxu1  ;;  %v4552_v15 = vpop.f32.mrb[180].mxu0 }
 0x262   : > { %v3289_v44 = vadd.f32 %v4552_v15, %v6014_v23  ;;  %v4477_v26 = vpop.f32.mrb[181].mxu1  ;;  %v3280_v62 = vpop.f32.mrb[181].mxu0 }
 0x263   : > { %v4478_v28 = vadd.f32 %v4477_v26, %v4476_v47  ;;  %v3281_v30 = vadd.f32 %v3280_v62, %v6002_v13  ;;  %v4479_v56 = vpop.f32.mrb[182].mxu1  ;;  %v4553_v61 = vpop.f32.mrb[182].mxu0 }
 0x264   : > { %v3397_v0 = vmax.f32 %v3289_v44, 0.0  ;;  %v3292_v57 = vadd.f32 %v4553_v61, %v6020_v11  ;;  %v4480_v16 = vpop.f32.mrb[183].mxu1  ;;  %v3283_v38 = vpop.f32.mrb[183].mxu0 }
 0x265   : > { %v3395_v4 = vmax.f32 %v3281_v30, 0.0  ;;  %v4481_v54 = vadd.f32 %v4480_v16, %v4479_v56  ;;  %v3284_v45 = vadd.f32 %v3283_v38, %v6008_v50  ;;  %v3176_v23 = vadd.f32 %v4478_v28, %v5987_v42 }
 0x266   : > { %3429 = vst [vmem:[%s6075_s17 + $0x30] sm:$0xff] %v3397_v0  ;;  %v3398_v29 = vmax.f32 %v3292_v57, 0.0 }
 0x267   : > { %3427 = vst [vmem:[%s6075_s17 + $0x20] sm:$0xff] %v3395_v4  ;;  %v3396_v8 = vmax.f32 %v3284_v45, 0.0  ;;  %v3179_v13 = vadd.f32 %v4481_v54, %v5993_v5 }
 0x268   : > { %3430 = vst [vmem:[%s6075_s17 + $0x38] sm:$0xff] %v3398_v29 }
 0x269   : > { %3428 = vst [vmem:[%s6075_s17 + $0x28] sm:$0xff] %v3396_v8  ;;  %v4482_v10 = vpop.f32.mrb[184].mxu1  ;;  %v4556_v41 = vpop.f32.mrb[184].mxu0 }
 0x26a   : > { %v3305_v11 = vadd.f32 %v4556_v41, %v6038_v53  ;;  %v4483_v27 = vpop.f32.mrb[185].mxu1  ;;  %v3296_v7 = vpop.f32.mrb[185].mxu0 }
 0x26b   : > { %v4484_v9 = vadd.f32 %v4483_v27, %v4482_v10  ;;  %v3297_v50 = vadd.f32 %v3296_v7, %v6026_v48  ;;  %v4485_v42 = vpop.f32.mrb[186].mxu1  ;;  %v4557_v37 = vpop.f32.mrb[186].mxu0 }
 0x26c   : > { %v3401_v58 = vmax.f32 %v3305_v11, 0.0  ;;  %v3308_v5 = vadd.f32 %v4557_v37, %v6044_v43  ;;  %v4486_v21 = vpop.f32.mrb[187].mxu1  ;;  %v3299_v39 = vpop.f32.mrb[187].mxu0 }
 0x26d   : > { %v3399_v36 = vmax.f32 %v3297_v50, 0.0  ;;  %v4487_v51 = vadd.f32 %v4486_v21, %v4485_v42  ;;  %v3300_v52 = vadd.f32 %v3299_v39, %v6032_v14  ;;  %v3184_v53 = vadd.f32 %v4484_v9, %v5999_v34 }
 0x26e   : > { %3433 = vst [vmem:[%s6075_s17 + $0x50] sm:$0xff] %v3401_v58  ;;  %v3402_v22 = vmax.f32 %v3308_v5, 0.0 }
 0x26f   : > { %3431 = vst [vmem:[%s6075_s17 + $0x40] sm:$0xff] %v3399_v36  ;;  %v3400_v6 = vmax.f32 %v3300_v52, 0.0  ;;  %v6108_v48 = vadd.f32 %v4487_v51, %v6005_v32 }
 0x270   : > { %3434 = vst [vmem:[%s6075_s17 + $0x58] sm:$0xff] %v3402_v22 }
 0x271   : > { %3432 = vst [vmem:[%s6075_s17 + $0x48] sm:$0xff] %v3400_v6  ;;  %v4488_v3 = vpop.f32.mrb[188].mxu1  ;;  %v4560_v17 = vpop.f32.mrb[188].mxu0 }
 0x272   : > { %v3321_v43 = vadd.f32 %v4560_v17, %v6062_v55  ;;  %v4489_v20 = vpop.f32.mrb[189].mxu1  ;;  %v3312_v2 = vpop.f32.mrb[189].mxu0 }
 0x273   : > { %v4490_v14 = vadd.f32 %v4489_v20, %v4488_v3  ;;  %v3313_v34 = vadd.f32 %v3312_v2, %v6050_v18  ;;  %v4491_v47 = vpop.f32.mrb[190].mxu1  ;;  %v4561_v15 = vpop.f32.mrb[190].mxu0 }
 0x274   : > { %v3405_v44 = vmax.f32 %v3321_v43, 0.0  ;;  %v3324_v32 = vadd.f32 %v4561_v15, %v6068_v49  ;;  %v4492_v26 = vpop.f32.mrb[191].mxu1  ;;  %v3315_v62 = vpop.f32.mrb[191].mxu0 }
 0x275   : > { %v3403_v28 = vmax.f32 %v3313_v34, 0.0  ;;  %v4493_v30 = vadd.f32 %v4492_v26, %v4491_v47  ;;  %v3316_v56 = vadd.f32 %v3315_v62, %v6056_v12  ;;  %v3192_v55 = vadd.f32 %v4490_v14, %v6011_v63 }
 0x276   : > { %3437 = vst [vmem:[%s6075_s17 + $0x70] sm:$0xff] %v3405_v44  ;;  %v3406_v61 = vmax.f32 %v3324_v32, 0.0 }
 0x277   : > { %3435 = vst [vmem:[%s6075_s17 + $0x60] sm:$0xff] %v3403_v28  ;;  %v3404_v0 = vmax.f32 %v3316_v56, 0.0  ;;  %v3195_v18 = vadd.f32 %v4493_v30, %v6017_v59 }
 0x278   : > { %3438 = vst [vmem:[%s6075_s17 + $0x78] sm:$0xff] %v3406_v61 }
 0x279   : > { %3436 = vst [vmem:[%s6075_s17 + $0x68] sm:$0xff] %v3404_v0  ;;  %v4494_v57 = vpop.f32.mrb[192].mxu1  ;;  %v4564_v16 = vpop.f32.mrb[192].mxu0 }
 0x27a   : > { %v3337_v49 = vadd.f32 %v4564_v16, %v3176_v23  ;;  %v4495_v38 = vpop.f32.mrb[193].mxu1  ;;  %v3328_v4 = vpop.f32.mrb[193].mxu0 }
 0x27b   : > { %v4496_v54 = vadd.f32 %v4495_v38, %v4494_v57  ;;  %v3329_v12 = vadd.f32 %v3328_v4, %v6081_v33  ;;  %v4497_v63 = vpop.f32.mrb[194].mxu1  ;;  %v4565_v45 = vpop.f32.mrb[194].mxu0 }
 0x27c   : > { %v3409_v29 = vmax.f32 %v3337_v49, 0.0  ;;  %v3340_v8 = vadd.f32 %v4565_v45, %v3179_v13  ;;  %v4498_v10 = vpop.f32.mrb[195].mxu1  ;;  %v3331_v59 = vpop.f32.mrb[195].mxu0 }
 0x27d   : > { %v3407_v41 = vmax.f32 %v3329_v12, 0.0  ;;  %v4499_v11 = vadd.f32 %v4498_v10, %v4497_v63  ;;  %v3332_v27 = vadd.f32 %v3331_v59, %v6086_v60  ;;  %v3200_v23 = vadd.f32 %v4496_v54, %v6023_v24 }
 0x27e   : > { %3441 = vst [vmem:[%s6075_s17 + $0x90] sm:$0xff] %v3409_v29  ;;  %v3410_v7 = vmax.f32 %v3340_v8, 0.0 }
 0x27f   : > { %3439 = vst [vmem:[%s6075_s17 + $0x80] sm:$0xff] %v3407_v41  ;;  %v3408_v9 = vmax.f32 %v3332_v27, 0.0  ;;  %v3203_v33 = vadd.f32 %v4499_v11, %v6029_v25 }
 0x280   : > { %3442 = vst [vmem:[%s6075_s17 + $0x98] sm:$0xff] %v3410_v7 }
 0x281   : > { %3440 = vst [vmem:[%s6075_s17 + $0x88] sm:$0xff] %v3408_v9  ;;  %v4500_v50 = vpop.f32.mrb[196].mxu1  ;;  %v4568_v42 = vpop.f32.mrb[196].mxu0 }
 0x282   : > { %v3353_v13 = vadd.f32 %v4568_v42, %v3192_v55  ;;  %v4501_v37 = vpop.f32.mrb[197].mxu1  ;;  %v3344_v58 = vpop.f32.mrb[197].mxu0 }
 0x283   : > { %v4502_v5 = vadd.f32 %v4501_v37, %v4500_v50  ;;  %v3345_v21 = vadd.f32 %v3344_v58, %v3184_v53  ;;  %v4503_v60 = vpop.f32.mrb[198].mxu1  ;;  %v4569_v24 = vpop.f32.mrb[198].mxu0 }
 0x284   : > { %v3413_v39 = vmax.f32 %v3353_v13, 0.0  ;;  %v3356_v36 = vadd.f32 %v4569_v24, %v3195_v18  ;;  %v4504_v51 = vpop.f32.mrb[199].mxu1  ;;  %v3347_v52 = vpop.f32.mrb[199].mxu0 }
 0x285   : > { %v3411_v25 = vmax.f32 %v3345_v21, 0.0  ;;  %v4505_v22 = vadd.f32 %v4504_v51, %v4503_v60  ;;  %v3348_v6 = vadd.f32 %v3347_v52, %v6108_v48  ;;  %v3208_v3 = vadd.f32 %v4502_v5, %v6035_v31 }
 0x286   : > { %3445 = vst [vmem:[%s6075_s17 + $0xb0] sm:$0xff] %v3413_v39  ;;  %v3414_v17 = vmax.f32 %v3356_v36, 0.0 }
 0x287   : > { %3443 = vst [vmem:[%s6075_s17 + $0xa0] sm:$0xff] %v3411_v25  ;;  %v3412_v43 = vmax.f32 %v3348_v6, 0.0  ;;  %v3211_v53 = vadd.f32 %v4505_v22, %v6041_v1 }
 0x288   : > { %3446 = vst [vmem:[%s6075_s17 + $0xb8] sm:$0xff] %v3414_v17 }
 0x289   : > { %3444 = vst [vmem:[%s6075_s17 + $0xa8] sm:$0xff] %v3412_v43  ;;  %v4506_v20 = vpop.f32.mrb[200].mxu1  ;;  %v4572_v2 = vpop.f32.mrb[200].mxu0 }
 0x28a   : > { %v3369_v14 = vadd.f32 %v4572_v2, %v3208_v3  ;;  %v4507_v34 = vpop.f32.mrb[201].mxu1  ;;  %v3360_v47 = vpop.f32.mrb[201].mxu0 }
 0x28b   : > { %v4508_v15 = vadd.f32 %v4507_v34, %v4506_v20  ;;  %v3361_v44 = vadd.f32 %v3360_v47, %v3200_v23  ;;  %v4509_v48 = vpop.f32.mrb[202].mxu1  ;;  %v4573_v31 = vpop.f32.mrb[202].mxu0 }
 0x28c   : > { %v3417_v32 = vmax.f32 %v3369_v14, 0.0  ;;  %v3372_v26 = vadd.f32 %v4573_v31, %v3211_v53  ;;  %v4510_v62 = vpop.f32.mrb[203].mxu1  ;;  %v3363_v28 = vpop.f32.mrb[203].mxu0 }
 0x28d   : > { %v3415_v1 = vmax.f32 %v3361_v44, 0.0  ;;  %v4511_v30 = vadd.f32 %v4510_v62, %v4509_v48  ;;  %v3364_v56 = vadd.f32 %v3363_v28, %v3203_v33  ;;  %v3216_v55 = vadd.f32 %v4508_v15, %v6047_v19 }
 0x28e   : > { %3449 = vst [vmem:[%s6075_s17 + $0xd0] sm:$0xff] %v3417_v32  ;;  %v3418_v61 = vmax.f32 %v3372_v26, 0.0 }
 0x28f   : > { %3447 = vst [vmem:[%s6075_s17 + $0xc0] sm:$0xff] %v3415_v1  ;;  %v3416_v0 = vmax.f32 %v3364_v56, 0.0  ;;  %v3219_v18 = vadd.f32 %v4511_v30, %v6053_v35 }
 0x290   : > { %3450 = vst [vmem:[%s6075_s17 + $0xd8] sm:$0xff] %v3418_v61 }
 0x291   : > { %3448 = vst [vmem:[%s6075_s17 + $0xc8] sm:$0xff] %v3416_v0  ;;  %v4512_v57 = vpop.f32.mrb[204].mxu1  ;;  %v4576_v16 = vpop.f32.mrb[204].mxu0 }
 0x292   : > { %v4513_v49 = vpop.f32.mrb[205].mxu1  ;;  %v3376_v38 = vpop.f32.mrb[205].mxu0 }
 0x293   : > { %v4514_v4 = vadd.f32 %v4513_v49, %v4512_v57  ;;  %v3377_v54 = vadd.f32 %v3376_v38, %v3216_v55  ;;  %v4515_v12 = vpop.f32.mrb[206].mxu1  ;;  %v4577_v63 = vpop.f32.mrb[206].mxu0 }
 0x294   : > { %v4516_v19 = vpop.f32.mrb[207].mxu1  ;;  %v3379_v45 = vpop.f32.mrb[207].mxu0 }
 0x295   : > { %v3224_v29 = vadd.f32 %v4514_v4, %v6059_v46  ;;  %v3419_v8 = vmax.f32 %v3377_v54, 0.0  ;;  %v4517_v35 = vadd.f32 %v4516_v19, %v4515_v12  ;;  %v3380_v10 = vadd.f32 %v3379_v45, %v3219_v18 }
 0x297   : > { %v3385_v59 = vadd.f32 %v4576_v16, %v3224_v29  ;;  %3451 = vst [vmem:[%s6075_s17 + $0xe0] sm:$0xff] %v3419_v8  ;;  %v3227_v41 = vadd.f32 %v4517_v35, %v6065_v40  ;;  %v3420_v11 = vmax.f32 %v3380_v10, 0.0 }
 0x299   : > { %v3421_v27 = vmax.f32 %v3385_v59, 0.0  ;;  %v3388_v23 = vadd.f32 %v4577_v63, %v3227_v41  ;;  %3452 = vst [vmem:[%s6075_s17 + $0xe8] sm:$0xff] %v3420_v11 }
 0x29b   : > { %3453 = vst [vmem:[%s6075_s17 + $0xf0] sm:$0xff] %v3421_v27  ;;  %v3422_v7 = vmax.f32 %v3388_v23, 0.0 }
 0x29d   : > { %3454 = vst [vmem:[%s6075_s17 + $0xf8] sm:$0xff] %v3422_v7 }
 0x29e PF: > { %s12_s9 = sadd.s32 1, %s5013_s9  }
 0x29f   : > { %p9_p4 = scmp.ge.s32.totalorder %s12_s9, 4  }
 0x2a1   :  { %11 = sbr.rel (!%p9_p4) target bundleno = 1 (0x1), region = 58 }

// kernel: resnet_forward.75
= control target key start
LH: loop header
LB: loop body
LE: loop exit
PB: predicated region body
PF: predicated region fallthrough
CT: control target
= control target key end

     0   :  { %s5364_s12 = smov 0   ;;  %s6535_s0 = inlined_call_operand.vmem [shape: bf16[512,1568], index: 0, kind: input, shape index: {}]   ;;  %s6536_s1 = inlined_call_operand.vmem [shape: bf16[1568,128], index: 1, kind: input, shape index: {}]   ;;  %s6537_s2 = inlined_call_operand.vmem [shape: f32[1,128], index: 2, kind: input, shape index: {}]   ;;  %s6538_s3 = inlined_call_operand.vmem [shape: f32[512,128], index: 3, kind: output, shape index: {}]  }
   0x1 LB: > { %s3689_s13 = sadd.s32 4294967295, %s5342_s12   ;;  %p3693_p0 = scmp.ge.s32.totalorder %s5342_s12, 1  ;;  %s5342_s12 = sphi %s5364_s12, %s13_s12  }
   0x2   : > { %p139_p1 = scmp.lt.s32.totalorder %s5342_s12, 3 }
   0x4   : > { %p140_p2 = pnand %p3693_p0, %p139_p1 }
   0x5   : > { %v4806_v0 = vld [vmem:[%s6536_s1 + $0x40] sm:$0xff] (!%p140_p2)   ;;  %s3694_s16 = sshll.u32 (!%p140_p2), %s3689_s13, 5  ;;  %v4808_v2 = vld [vmem:[%s6536_s1 + $0x48] sm:$0xff] (!%p140_p2)   ;;  %v4810_v4 = vld [vmem:[%s6536_s1 + $0x50] sm:$0xff] (!%p140_p2)   ;;  %vm2233_vm0 = vcmask (!%p140_p2), 261120  }
   0x6   : > { %143 = sbr.rel (%p140_p2) target bundleno = 702 (0x2be), region = 32  ;;  %v4807_v1 = vld [vmem:[%s6536_s1] sm:$0xff] (!%p140_p2)   ;;  %4055 = vmatprep.subr.bf16.mxu0 (!%p140_p2), %v4806_v0  ;;  %4781 = vmatprep.subr.bf16.mxu1 (!%p140_p2), %v4806_v0  ;;  %p165_p3 = scmp.lt.s32.totalorder (!%p140_p2), %s3694_s16, 63  ;;  %v4809_v3 = vld [vmem:[%s6536_s1 + $0x8] sm:$0xff] (!%p140_p2)   ;;  %v4811_v5 = vld [vmem:[%s6536_s1 + $0x10] sm:$0xff] (!%p140_p2)  }
   0x7   : > { %4056 = vmatpush3.bf16.msra.mxu0 (!%p140_p2), %v4807_v1  ;;  %4789 = vmatpush3.bf16.msra.mxu1 (!%p140_p2), %v4807_v1  ;;  %v4812_v6 = vld [vmem:[%s6536_s1 + $0x58] sm:$0xff] (!%p140_p2)   ;;  %v4814_v8 = vld [vmem:[%s6536_s1 + $0x60] sm:$0xff] (!%p140_p2)   ;;  %v4816_v10 = vld [vmem:[%s6536_s1 + $0x68] sm:$0xff] (!%p140_p2)  }
   0x8   : > { %4057 = vmatprep.subr.bf16.mxu0 (!%p140_p2), %v4808_v2  ;;  %4782 = vmatprep.subr.bf16.mxu1 (!%p140_p2), %v4808_v2  ;;  %v4813_v7 = vld [vmem:[%s6536_s1 + $0x18] sm:$0xff] (!%p140_p2)   ;;  %v4815_v9 = vld [vmem:[%s6536_s1 + $0x20] sm:$0xff] (!%p140_p2)   ;;  %v4817_v13 = vld [vmem:[%s6536_s1 + $0x28] sm:$0xff] (!%p140_p2)  }
   0x9   : > { %v4818_v14 = vld [vmem:[%s6536_s1 + $0x70] sm:$0xff] (!%p140_p2)   ;;  %v4820_v16 = vld [vmem:[%s6536_s1 + $0x78] sm:$0xff] (!%p140_p2)   ;;  %v4828_v18 = vld [vmem:[%s6536_s1 + $0xc0] sm:$0xff] (!%p140_p2)  }
   0xa   : > { %v4819_v15 = vld [vmem:[%s6536_s1 + $0x30] sm:$0xff] (!%p140_p2)   ;;  %v4821_v17 = vld [vmem:[%s6536_s1 + $0x38] sm:$0xff] (!%p140_p2)   ;;  %v4831_v21 = vld [vmem:[%s6536_s1 + $0x140] sm:$0xff] (!%p140_p2)  }
   0xb   : > { %4058 = vmatpush3.bf16.msra.mxu0 (!%p140_p2), %v4809_v3  ;;  %4790 = vmatpush3.bf16.msra.mxu1 (!%p140_p2), %v4809_v3  ;;  %v4829_v22 = vld [vmem:[%s6536_s1 + $0x80] sm:$0xff] (!%p140_p2)   ;;  %v4830_v23 = vld [vmem:[%s6536_s1 + $0xc8] sm:$0xff] (!%p140_p2)   ;;  %v4840_v31 = vld [vmem:[%s6536_s1 + $0xd0] sm:$0xff] (!%p140_p2)  }
   0xc   : > { %4059 = vmatprep.subr.bf16.mxu0 (!%p140_p2), %v4810_v4  ;;  %4783 = vmatprep.subr.bf16.mxu1 (!%p140_p2), %v4810_v4  ;;  %v4833_v24 = vld [vmem:[%s6536_s1 + $0x100] sm:$0xff] (!%p140_p2)   ;;  %v4832_v27 = vld [vmem:[%s6536_s1 + $0x88] sm:$0xff] (!%p140_p2)   ;;  %v4841_v32 = vld [vmem:[%s6536_s1 + $0x90] sm:$0xff] (!%p140_p2)  }
   0xd   : > { %s6540_s16 = smov (!%p165_p3, %s3694_s16), 63  ;;  %v4851_v28 = vld [vmem:[%s6536_s1 + $0x148] sm:$0xff]   ;;  %v4842_v34 = vld [vmem:[%s6536_s1 + $0xd8] sm:$0xff]   ;;  %v4850_v40 = vld [vmem:[%s6536_s1 + $0xe0] sm:$0xff]  }
   0xe   : > { %s4797_s29 = smul.u32 52, %s6540_s16  ;;  %v4853_v33 = vld [vmem:[%s6536_s1 + $0x108] sm:$0xff]   ;;  %v4843_v37 = vld [vmem:[%s6536_s1 + $0x98] sm:$0xff]   ;;  %v4852_v41 = vld [vmem:[%s6536_s1 + $0xa0] sm:$0xff]  }
   0xf   : > { %4060 = vmatpush3.bf16.msra.mxu0 %v4811_v5  ;;  %4791 = vmatpush3.bf16.msra.mxu1 %v4811_v5  ;;  %v4854_v42 = vld [vmem:[%s6536_s1 + $0xe8] sm:$0xff]   ;;  %v4865_v43 = vld [vmem:[%s6536_s1 + $0x150] sm:$0xff]   ;;  %v4864_v52 = vld [vmem:[%s6536_s1 + $0xf8] sm:$0xff]  }
  0x10   : > { %4061 = vmatprep.subr.bf16.mxu0 %v4812_v6  ;;  %4784 = vmatprep.subr.bf16.mxu1 %v4812_v6  ;;  %s5405_s9 = scalar_lea.vmem %s6535_s0, %s4797_s29  ;;  %v4867_v46 = vld [vmem:[%s6536_s1 + $0x110] sm:$0xff]   ;;  %v4855_v47 = vld [vmem:[%s6536_s1 + $0xa8] sm:$0xff]   ;;  %v4882_v55 = vld [vmem:[%s6536_s1 + $0x158] sm:$0xff]  }
  0x11   : > { %v4824_v11 = vld [vmem:[%s5405_s9 + $0x4] ss:$52 sps:$4 sm:$0xff]   ;;  %v4822_v19 = vld [vmem:[%s5405_s9] ss:$52 sps:$4 sm:$0xff]   ;;  %v4838_v29 = vld [vmem:[%s5405_s9 + $0x68] ss:$52 sps:$4 sm:$0xff]  }
  0x12   : > { %v4827_v12 = vld [vmem:[%s5405_s9 + $0x4e4] ss:$52 sps:$4 sm:$0xff]   ;;  %2314 = vmatprep.mubr.bf16.mxu0 %v4824_v11  ;;  %v4825_v20 = vld [vmem:[%s5405_s9 + $0x4e0] ss:$52 sps:$4 sm:$0xff]   ;;  %v4839_v30 = vld [vmem:[%s5405_s9 + $0x548] ss:$52 sps:$4 sm:$0xff]  }
  0x13   : > { %4062 = vmatpush3.bf16.msra.mxu0 %v4813_v7  ;;  %4792 = vmatpush3.bf16.msra.mxu1 %v4813_v7  ;;  %v4834_v25 = vld [vmem:[%s5405_s9 + $0x6c] ss:$52 sps:$4 sm:$0xff]   ;;  %v4844_v35 = vld [vmem:[%s5405_s9 + $0xd4] ss:$52 sps:$4 sm:$0xff]   ;;  %v4848_v38 = vld [vmem:[%s5405_s9 + $0xd0] ss:$52 sps:$4 sm:$0xff]  }
  0x14   : > { %4063 = vmatprep.subr.bf16.mxu0 %v4814_v8  ;;  %4785 = vmatprep.subr.bf16.mxu1 %v4814_v8  ;;  %v4836_v26 = vld [vmem:[%s5405_s9 + $0x54c] ss:$52 sps:$4 sm:$0xff]   ;;  %v4846_v36 = vld [vmem:[%s5405_s9 + $0x5b4] ss:$52 sps:$4 sm:$0xff]   ;;  %v4849_v39 = vld [vmem:[%s5405_s9 + $0x5b0] ss:$52 sps:$4 sm:$0xff]  }
  0x15   : > { %2410 = vmatprep.mubr.bf16.mxu1 %v4827_v12  ;;  %v4856_v44 = vld [vmem:[%s5405_s9 + $0x13c] ss:$52 sps:$4 sm:$0xff]   ;;  %v4860_v49 = vld [vmem:[%s5405_s9 + $0x138] ss:$52 sps:$4 sm:$0xff]   ;;  %v4873_v59 = vld [vmem:[%s5405_s9 + $0x1a0] ss:$52 sps:$4 sm:$0xff]  }
  0x16   : > { %v4858_v45 = vld [vmem:[%s5405_s9 + $0x61c] ss:$52 sps:$4 sm:$0xff]   ;;  %v4861_v50 = vld [vmem:[%s5405_s9 + $0x618] ss:$52 sps:$4 sm:$0xff]   ;;  %v4874_v60 = vld [vmem:[%s6536_s1 + $0x1c0] sm:$0xff]  }
  0x17   : > { %4064 = vmatpush3.bf16.msra.mxu0 %v4815_v9  ;;  %4793 = vmatpush3.bf16.msra.mxu1 %v4815_v9  ;;  %v4862_v48 = vld [vmem:[%s6536_s1 + $0xf0] sm:$0xff]   ;;  %v4868_v53 = vld [vmem:[%s5405_s9 + $0x1a4] ss:$52 sps:$4 sm:$0xff]   ;;  %v4872_v54 = vld [vmem:[%s5405_s9 + $0xc] ss:$52 sps:$4 sm:$0xff]  }
  0x18   : > { %4065 = vmatprep.subr.bf16.mxu0 %v4816_v10  ;;  %4786 = vmatprep.subr.bf16.mxu1 %v4816_v10  ;;  %v4863_v51 = vld [vmem:[%s6536_s1 + $0xb0] sm:$0xff]   ;;  %v4883_v56 = vld [vmem:[%s6536_s1 + $0x118] sm:$0xff]   ;;  %v4875_v61 = vld [vmem:[%s6536_s1 + $0x180] sm:$0xff]  }
  0x19   : > { %v4866_v57 = vld [vmem:[%s6536_s1 + $0xb8] sm:$0xff]   ;;  %v4876_v62 = vld [vmem:[%s5405_s9 + $0x20c] ss:$52 sps:$4 sm:$0xff]   ;;  %v4878_v63 = vld [vmem:[%s5405_s9 + $0x74] ss:$52 sps:$4 sm:$0xff]  }
  0x1a   : > { %v4870_v58 = vld [vmem:[%s5405_s9 + $0x8] ss:$52 sps:$4 sm:$0xff]   ;;  %v4892_v0 = vld [vmem:[%s6536_s1 + $0x160] sm:$0xff]   ;;  %v4907_v9 = vld [vmem:[%s6536_s1 + $0x1d0] sm:$0xff]  }
  0x1b   : > { %4066 = vmatpush3.bf16.msra.mxu0 %v4817_v13  ;;  %4794 = vmatpush3.bf16.msra.mxu1 %v4817_v13  ;;  %v4890_v1 = vld [vmem:[%s6536_s1 + $0x1c8] sm:$0xff]   ;;  %v4893_v2 = vld [vmem:[%s6536_s1 + $0x120] sm:$0xff]   ;;  %v4886_v7 = vld [vmem:[%s5405_s9 + $0xdc] ss:$52 sps:$4 sm:$0xff]  }
  0x1c   : > { %4067 = vmatprep.subr.bf16.mxu0 %v4818_v14  ;;  %4787 = vmatprep.subr.bf16.mxu1 %v4818_v14  ;;  %v4891_v3 = vld [vmem:[%s6536_s1 + $0x188] sm:$0xff]   ;;  %v4881_v5 = vld [vmem:[%s5405_s9 + $0x70] ss:$52 sps:$4 sm:$0xff]  }
  0x1d   : > { %v4880_v4 = vld [vmem:[%s5405_s9 + $0x208] ss:$52 sps:$4 sm:$0xff]   ;;  %v4909_v11 = vld [vmem:[%s6536_s1 + $0x190] sm:$0xff]   ;;  %v4889_v13 = vld [vmem:[%s5405_s9 + $0xd8] ss:$52 sps:$4 sm:$0xff]  }
  0x1e   : > { %v4884_v6 = vld [vmem:[%s5405_s9 + $0x274] ss:$52 sps:$4 sm:$0xff]   ;;  %v4888_v12 = vld [vmem:[%s5405_s9 + $0x270] ss:$52 sps:$4 sm:$0xff]  }
  0x1f   : > { %4068 = vmatpush3.bf16.msra.mxu0 %v4819_v15  ;;  %4795 = vmatpush3.bf16.msra.mxu1 %v4819_v15  ;;  %v4906_v8 = vld [vmem:[%s6536_s1 + $0x168] sm:$0xff]   ;;  %v4894_v14 = vld [vmem:[%s5405_s9 + $0x2dc] ss:$52 sps:$4 sm:$0xff]  }
  0x20   : > { %4069 = vmatprep.subr.bf16.mxu0 %v4820_v16  ;;  %4788 = vmatprep.subr.bf16.mxu1 %v4820_v16  ;;  %v4908_v10 = vld [vmem:[%s6536_s1 + $0x128] sm:$0xff]   ;;  %v4916_v15 = vld [vmem:[%s6536_s1 + $0x170] sm:$0xff]  }
  0x21   : > { %v4917_v16 = vld [vmem:[%s6536_s1 + $0x130] sm:$0xff]  }
  0x23   : > { %4070 = vmatpush3.bf16.msra.mxu0 %v4821_v17  ;;  %4796 = vmatpush3.bf16.msra.mxu1 %v4821_v17  ;;  %v4896_v17 = vld [vmem:[%s5405_s9 + $0x144] ss:$52 sps:$4 sm:$0xff]  }
  0x24   : > { %4167 = vmatprep.subr.bf16.mxu1 %v4828_v18  ;;  %4279 = vmatprep.subr.bf16.mxu0 %v4831_v21  ;;  %v4924_v18 = vld [vmem:[%s6536_s1 + $0x1d8] sm:$0xff]   ;;  %v4899_v21 = vld [vmem:[%s5405_s9 + $0x140] ss:$52 sps:$4 sm:$0xff]  }
  0x26   : > { %2315 = vmatmul.mubr.bf16.vlgmr.msra.gmra.mrb[0].mxu0 %v4822_v19  ;;  %2411 = vmatmul.mubr.bf16.vlgmr.msra.gmra.mrb[0].mxu1 %v4825_v20  ;;  %v4925_v19 = vld [vmem:[%s6536_s1 + $0x198] sm:$0xff]  }
  0x27   : > { %4168 = vmatpush3.bf16.msra.mxu1 %v4829_v22  ;;  %4280 = vmatpush3.bf16.msra.mxu0 %v4833_v24  ;;  %v4898_v20 = vld [vmem:[%s5405_s9 + $0x2d8] ss:$52 sps:$4 sm:$0xff]  }
  0x28   : > { %4169 = vmatprep.subr.bf16.mxu1 %v4830_v23  ;;  %2322 = vmatprep.mubr.bf16.mxu0 %v4834_v25  ;;  %v4900_v22 = vld [vmem:[%s5405_s9 + $0x344] ss:$52 sps:$4 sm:$0xff]   ;;  %v4902_v23 = vld [vmem:[%s5405_s9 + $0x1ac] ss:$52 sps:$4 sm:$0xff]  }
  0x29   : > { %2418 = vmatprep.mubr.bf16.mxu1 %v4836_v26  ;;  %4281 = vmatprep.subr.bf16.mxu0 %v4851_v28  ;;  %v4932_v24 = vld [vmem:[%s6536_s1 + $0x178] sm:$0xff]   ;;  %v4940_v26 = vld [vmem:[%s6536_s1 + $0x1e0] sm:$0xff]  }
  0x2a   : > { %v4933_v25 = vld [vmem:[%s6536_s1 + $0x138] sm:$0xff]  }
  0x2b   : > { %4170 = vmatpush3.bf16.msra.mxu1 %v4832_v27  ;;  %4282 = vmatpush3.bf16.msra.mxu0 %v4853_v33  ;;  %v4904_v27 = vld [vmem:[%s5405_s9 + $0x340] ss:$52 sps:$4 sm:$0xff]   ;;  %v4905_v28 = vld [vmem:[%s5405_s9 + $0x1a8] ss:$52 sps:$4 sm:$0xff]  }
  0x2c   : > { %4171 = vmatprep.subr.bf16.mxu1 %v4840_v31  ;;  %4283 = vmatprep.subr.bf16.mxu0 %v4865_v43  ;;  %v4910_v31 = vld [vmem:[%s5405_s9 + $0x3ac] ss:$52 sps:$4 sm:$0xff]   ;;  %v4914_v33 = vld [vmem:[%s5405_s9 + $0x3a8] ss:$52 sps:$4 sm:$0xff]   ;;  %v4972_v43 = vld [vmem:[%s6536_s1 + $0x1f0] sm:$0xff]  }
  0x2e   : > { %2323 = vmatmul.mubr.bf16.gmra.mrb[4].mxu0 %v4838_v29  ;;  %2419 = vmatmul.mubr.bf16.gmra.mrb[4].mxu1 %v4839_v30  ;;  %v4941_v29 = vld [vmem:[%s6536_s1 + $0x1a0] sm:$0xff]  }
  0x2f   : > { %4172 = vmatpush3.bf16.msra.mxu1 %v4841_v32  ;;  %2330 = vmatprep.mubr.bf16.mxu0 %v4844_v35  ;;  %v4942_v30 = vld [vmem:[%s6536_s1 + $0x240] sm:$0xff]   ;;  %v4912_v32 = vld [vmem:[%s5405_s9 + $0x214] ss:$52 sps:$4 sm:$0xff]  }
  0x30   : > { %4173 = vmatprep.subr.bf16.mxu1 %v4842_v34  ;;  %2426 = vmatprep.mubr.bf16.mxu1 %v4846_v36  ;;  %v4915_v34 = vld [vmem:[%s5405_s9 + $0x210] ss:$52 sps:$4 sm:$0xff]   ;;  %v4956_v35 = vld [vmem:[%s6536_s1 + $0x1e8] sm:$0xff]  }
  0x31   : > { %4284 = vmatpush3.bf16.msra.mxu0 %v4867_v46  ;;  %v4957_v36 = vld [vmem:[%s6536_s1 + $0x1a8] sm:$0xff]   ;;  %v4931_v46 = vld [vmem:[%s5405_s9 + $0x2e0] ss:$52 sps:$4 sm:$0xff]  }
  0x32   : > { %4285 = vmatprep.subr.bf16.mxu0 %v4882_v55  ;;  %v4946_v55 = vld [vmem:[%s5405_s9 + $0x7c] ss:$52 sps:$4 sm:$0xff]  }
  0x33   : > { %4174 = vmatpush3.bf16.msra.mxu1 %v4843_v37  ;;  %v4918_v37 = vld [vmem:[%s5405_s9 + $0x414] ss:$52 sps:$4 sm:$0xff]  }
  0x34   : > { %4175 = vmatprep.subr.bf16.mxu1 %v4850_v40  ;;  %v4923_v40 = vld [vmem:[%s5405_s9 + $0x278] ss:$52 sps:$4 sm:$0xff]  }
  0x35   : > { %4286 = vmatpush3.bf16.msra.mxu0 %v4883_v56  ;;  %v4958_v56 = vld [vmem:[%s6536_s1 + $0x248] sm:$0xff]  }
  0x36   : > { %2331 = vmatmul.mubr.bf16.gmra.mrb[8].mxu0 %v4848_v38  ;;  %2427 = vmatmul.mubr.bf16.gmra.mrb[8].mxu1 %v4849_v39  ;;  %v4920_v38 = vld [vmem:[%s5405_s9 + $0x27c] ss:$52 sps:$4 sm:$0xff]  }
  0x37   : > { %4176 = vmatpush3.bf16.msra.mxu1 %v4852_v41  ;;  %2338 = vmatprep.mubr.bf16.mxu0 %v4856_v44  ;;  %v4922_v39 = vld [vmem:[%s5405_s9 + $0x410] ss:$52 sps:$4 sm:$0xff]  }
  0x38   : > { %4177 = vmatprep.subr.bf16.mxu1 %v4854_v42  ;;  %2434 = vmatprep.mubr.bf16.mxu1 %v4858_v45  ;;  %v4926_v41 = vld [vmem:[%s5405_s9 + $0x47c] ss:$52 sps:$4 sm:$0xff]   ;;  %v4928_v42 = vld [vmem:[%s5405_s9 + $0x2e4] ss:$52 sps:$4 sm:$0xff]  }
  0x39   : > { %4287 = vmatprep.subr.bf16.mxu0 %v4892_v0  ;;  %v4973_v44 = vld [vmem:[%s6536_s1 + $0x1b0] sm:$0xff]   ;;  %v4930_v45 = vld [vmem:[%s5405_s9 + $0x478] ss:$52 sps:$4 sm:$0xff]  }
  0x3a   : > { %4288 = vmatpush3.bf16.msra.mxu0 %v4893_v2  ;;  %v4975_v0 = vld [vmem:[%s6536_s1 + $0x210] sm:$0xff]   ;;  %v4954_v2 = vld [vmem:[%s5405_s9 + $0x418] ss:$52 sps:$4 sm:$0xff]  }
  0x3b   : > { %4178 = vmatpush3.bf16.msra.mxu1 %v4855_v47  ;;  %4289 = vmatprep.subr.bf16.mxu0 %v4906_v8  ;;  %v4934_v47 = vld [vmem:[%s5405_s9 + $0x34c] ss:$52 sps:$4 sm:$0xff]  }
  0x3c   : > { %4179 = vmatprep.subr.bf16.mxu1 %v4862_v48  ;;  %v4938_v48 = vld [vmem:[%s5405_s9 + $0x14] ss:$52 sps:$4 sm:$0xff]   ;;  %v5007_v8 = vld [vmem:[%s6536_s1 + $0x220] sm:$0xff]  }
  0x3e   : > { %2339 = vmatmul.mubr.bf16.gmra.mrb[12].mxu0 %v4860_v49  ;;  %2435 = vmatmul.mubr.bf16.gmra.mrb[12].mxu1 %v4861_v50  ;;  %v4988_v49 = vld [vmem:[%s6536_s1 + $0x1f8] sm:$0xff]  }
  0x3f   : > { %4180 = vmatpush3.bf16.msra.mxu1 %v4863_v51  ;;  %2346 = vmatprep.mubr.bf16.mxu0 %v4868_v53  ;;  %v4989_v50 = vld [vmem:[%s6536_s1 + $0x1b8] sm:$0xff]   ;;  %v4936_v51 = vld [vmem:[%s5405_s9 + $0x10] ss:$52 sps:$4 sm:$0xff]  }
  0x40   : > { %4181 = vmatprep.subr.bf16.mxu1 %v4864_v52  ;;  %2475 = vmatprep.mubr.bf16.mxu1 %v4872_v54  ;;  %v4939_v52 = vld [vmem:[%s5405_s9 + $0x348] ss:$52 sps:$4 sm:$0xff]   ;;  %v4943_v53 = vld [vmem:[%s6536_s1 + $0x200] sm:$0xff]  }
  0x41   : > { %4290 = vmatpush3.bf16.msra.mxu0 %v4908_v10  ;;  %v4944_v54 = vld [vmem:[%s5405_s9 + $0x3b4] ss:$52 sps:$4 sm:$0xff]  }
  0x42   : > { %4291 = vmatprep.subr.bf16.mxu0 %v4916_v15  ;;  %v4964_v10 = vld [vmem:[%s5405_s9 + $0x480] ss:$52 sps:$4 sm:$0xff]  }
  0x43   : > { %4182 = vmatpush3.bf16.msra.mxu1 %v4866_v57  ;;  %v5004_v57 = vld [vmem:[%s6536_s1 + $0x2c0] sm:$0xff]   ;;  %v4968_v15 = vld [vmem:[%s5405_s9 + $0x1b4] ss:$52 sps:$4 sm:$0xff]  }
  0x44   : > { %4391 = vmatprep.subr.bf16.mxu1 %v4874_v60  ;;  %v4948_v60 = vld [vmem:[%s5405_s9 + $0x3b0] ss:$52 sps:$4 sm:$0xff]  }
  0x45   : > { %4292 = vmatpush3.bf16.msra.mxu0 %v4917_v16  ;;  %v5039_v16 = vld [vmem:[%s6536_s1 + $0x230] sm:$0xff]  }
  0x46   : > { %2347 = vmatmul.mubr.bf16.gmra.mrb[16].mxu0 %v4873_v59  ;;  %2476 = vmatmul.mubr.bf16.vlgmr.msra.gmra.mrb[16].mxu1 %v4870_v58  ;;  %v4959_v58 = vld [vmem:[%s6536_s1 + $0x208] sm:$0xff]   ;;  %v4974_v59 = vld [vmem:[%s6536_s1 + $0x250] sm:$0xff]  }
  0x47   : > { %4392 = vmatpush3.bf16.msra.mxu1 %v4875_v61  ;;  %2354 = vmatprep.mubr.bf16.mxu0 %v4876_v62  ;;  %v4949_v61 = vld [vmem:[%s5405_s9 + $0x78] ss:$52 sps:$4 sm:$0xff]   ;;  %v4950_v62 = vld [vmem:[%s5405_s9 + $0x41c] ss:$52 sps:$4 sm:$0xff]  }
  0x48   : > { %2483 = vmatprep.mubr.bf16.mxu1 %v4878_v63  ;;  %4393 = vmatprep.subr.bf16.mxu1 %v4890_v1  ;;  %v4952_v63 = vld [vmem:[%s5405_s9 + $0xe4] ss:$52 sps:$4 sm:$0xff]  }
  0x49   : > { %4293 = vmatprep.subr.bf16.mxu0 %v4932_v24  ;;  %v4990_v1 = vld [vmem:[%s6536_s1 + $0x258] sm:$0xff]  }
  0x4a   : > { %4294 = vmatpush3.bf16.msra.mxu0 %v4933_v25  ;;  %v4981_v24 = vld [vmem:[%s5405_s9 + $0x218] ss:$52 sps:$4 sm:$0xff]   ;;  %v4982_v25 = vld [vmem:[%s5405_s9 + $0x5bc] ss:$52 sps:$4 sm:$0xff]  }
  0x4b   : > { %4394 = vmatpush3.bf16.msra.mxu1 %v4891_v3  ;;  %4503 = vmatprep.subr.bf16.mxu0 %v4942_v30  ;;  %v4991_v3 = vld [vmem:[%s6536_s1 + $0x218] sm:$0xff]  }
  0x4c   : > { %4395 = vmatprep.subr.bf16.mxu1 %v4907_v9  ;;  %v5022_v9 = vld [vmem:[%s6536_s1 + $0x268] sm:$0xff]   ;;  %v4992_v30 = vld [vmem:[%s5405_s9 + $0x624] ss:$52 sps:$4 sm:$0xff]  }
  0x4e   : > { %2355 = vmatmul.mubr.bf16.gmra.mrb[20].mxu0 %v4880_v4  ;;  %2484 = vmatmul.mubr.bf16.gmra.mrb[20].mxu1 %v4881_v5  ;;  %v5006_v4 = vld [vmem:[%s6536_s1 + $0x260] sm:$0xff]  }
  0x4f   : > { %2362 = vmatprep.mubr.bf16.mxu0 %v4884_v6  ;;  %2491 = vmatprep.mubr.bf16.mxu1 %v4886_v7  ;;  %v4955_v5 = vld [vmem:[%s5405_s9 + $0xe0] ss:$52 sps:$4 sm:$0xff]   ;;  %v4960_v6 = vld [vmem:[%s5405_s9 + $0x484] ss:$52 sps:$4 sm:$0xff]  }
  0x50   : > { %4396 = vmatpush3.bf16.msra.mxu1 %v4909_v11  ;;  %v4962_v7 = vld [vmem:[%s5405_s9 + $0x14c] ss:$52 sps:$4 sm:$0xff]   ;;  %v4965_v11 = vld [vmem:[%s5405_s9 + $0x148] ss:$52 sps:$4 sm:$0xff]  }
  0x51   : > { %4397 = vmatprep.subr.bf16.mxu1 %v4924_v18  ;;  %v4971_v18 = vld [vmem:[%s5405_s9 + $0x1b0] ss:$52 sps:$4 sm:$0xff]  }
  0x54   : > { %4398 = vmatpush3.bf16.msra.mxu1 %v4925_v19  ;;  %v4976_v19 = vld [vmem:[%s5405_s9 + $0x554] ss:$52 sps:$4 sm:$0xff]  }
  0x55   : > { %4399 = vmatprep.subr.bf16.mxu1 %v4940_v26  ;;  %v4984_v26 = vld [vmem:[%s5405_s9 + $0x284] ss:$52 sps:$4 sm:$0xff]  }
  0x56   : > { %2363 = vmatmul.mubr.bf16.gmra.mrb[24].mxu0 %v4888_v12  ;;  %2492 = vmatmul.mubr.bf16.gmra.mrb[24].mxu1 %v4889_v13  ;;  %v5023_v12 = vld [vmem:[%s6536_s1 + $0x228] sm:$0xff]   ;;  %v5038_v13 = vld [vmem:[%s6536_s1 + $0x270] sm:$0xff]  }
  0x57   : > { %2370 = vmatprep.mubr.bf16.mxu0 %v4894_v14  ;;  %2499 = vmatprep.mubr.bf16.mxu1 %v4896_v17  ;;  %v4966_v14 = vld [vmem:[%s5405_s9 + $0x4ec] ss:$52 sps:$4 sm:$0xff]   ;;  %v4970_v17 = vld [vmem:[%s5405_s9 + $0x4e8] ss:$52 sps:$4 sm:$0xff]  }
  0x58   : > { %4400 = vmatpush3.bf16.msra.mxu1 %v4941_v29  ;;  %v4987_v29 = vld [vmem:[%s5405_s9 + $0x280] ss:$52 sps:$4 sm:$0xff]  }
  0x59   : > { %4401 = vmatprep.subr.bf16.mxu1 %v4956_v35  ;;  %v5002_v35 = vld [vmem:[%s5405_s9 + $0x1c] ss:$52 sps:$4 sm:$0xff]  }
  0x5c   : > { %4402 = vmatpush3.bf16.msra.mxu1 %v4957_v36  ;;  %v5000_v36 = vld [vmem:[%s5405_s9 + $0x18] ss:$52 sps:$4 sm:$0xff]  }
  0x5d   : > { %4403 = vmatprep.subr.bf16.mxu1 %v4972_v43  ;;  %v5036_v43 = vld [vmem:[%s6536_s1 + $0x2d0] sm:$0xff]  }
  0x5e   : > { %2371 = vmatmul.mubr.bf16.gmra.mrb[28].mxu0 %v4898_v20  ;;  %2500 = vmatmul.mubr.bf16.gmra.mrb[28].mxu1 %v4899_v21  ;;  %v4978_v20 = vld [vmem:[%s5405_s9 + $0x21c] ss:$52 sps:$4 sm:$0xff]  }
  0x5f   : > { %2378 = vmatprep.mubr.bf16.mxu0 %v4900_v22  ;;  %2507 = vmatprep.mubr.bf16.mxu1 %v4902_v23  ;;  %v5054_v21 = vld [vmem:[%s6536_s1 + $0x278] sm:$0xff]   ;;  %v4980_v23 = vld [vmem:[%s5405_s9 + $0x550] ss:$52 sps:$4 sm:$0xff]  }
  0x60   : > { %4404 = vmatpush3.bf16.msra.mxu1 %v4973_v44  ;;  %v5055_v22 = vld [vmem:[%s6536_s1 + $0x238] sm:$0xff]  }
  0x61   : > { %4405 = vmatprep.subr.bf16.mxu1 %v4988_v49  ;;  %v5012_v44 = vld [vmem:[%s5405_s9 + $0x3b8] ss:$52 sps:$4 sm:$0xff]  }
  0x62   : > { %v5052_v49 = vld [vmem:[%s6536_s1 + $0x2d8] sm:$0xff]  }
  0x64   : > { %4406 = vmatpush3.bf16.msra.mxu1 %v4989_v50  ;;  %v5053_v50 = vld [vmem:[%s6536_s1 + $0x298] sm:$0xff]  }
  0x65   : > { %4615 = vmatprep.subr.bf16.mxu1 %v5004_v57  ;;  %v5083_v57 = vld [vmem:[%s6536_s1 + $0x2e8] sm:$0xff]  }
  0x66   : > { %2379 = vmatmul.mubr.bf16.gmra.mrb[32].mxu0 %v4904_v27  ;;  %2508 = vmatmul.mubr.bf16.gmra.mrb[32].mxu1 %v4905_v28  ;;  %v5700_v27 = vld [vmem:[%s6536_s1 + $0x300] sm:$0xff]   ;;  %v4986_v28 = vld [vmem:[%s5405_s9 + $0x5b8] ss:$52 sps:$4 sm:$0xff]  }
  0x67   : > { %2386 = vmatprep.mubr.bf16.mxu0 %v4910_v31  ;;  %2515 = vmatprep.mubr.bf16.mxu1 %v4912_v32  ;;  %v4994_v31 = vld [vmem:[%s5405_s9 + $0x2ec] ss:$52 sps:$4 sm:$0xff]  }
  0x68   : > { %v4996_v32 = vld [vmem:[%s5405_s9 + $0x620] ss:$52 sps:$4 sm:$0xff]  }
  0x6e   : > { %2387 = vmatmul.mubr.bf16.gmra.mrb[36].mxu0 %v4914_v33  ;;  %2516 = vmatmul.mubr.bf16.gmra.mrb[36].mxu1 %v4915_v34  ;;  %v4997_v33 = vld [vmem:[%s5405_s9 + $0x2e8] ss:$52 sps:$4 sm:$0xff]  }
  0x6f   : > { %2394 = vmatprep.mubr.bf16.mxu0 %v4918_v37  ;;  %2523 = vmatprep.mubr.bf16.mxu1 %v4920_v38  ;;  %v4998_v34 = vld [vmem:[%s5405_s9 + $0x354] ss:$52 sps:$4 sm:$0xff]   ;;  %v5003_v37 = vld [vmem:[%s5405_s9 + $0x350] ss:$52 sps:$4 sm:$0xff]  }
  0x70   : > { %v5005_v38 = vld [vmem:[%s6536_s1 + $0x280] sm:$0xff]  }
  0x76   : > { %2395 = vmatmul.mubr.bf16.gmra.mrb[40].mxu0 %v4922_v39  ;;  %2524 = vmatmul.mubr.bf16.gmra.mrb[40].mxu1 %v4923_v40  ;;  %v5008_v39 = vld [vmem:[%s5405_s9 + $0x3bc] ss:$52 sps:$4 sm:$0xff]   ;;  %v5010_v40 = vld [vmem:[%s5405_s9 + $0x84] ss:$52 sps:$4 sm:$0xff]  }
  0x77   : > { %2402 = vmatprep.mubr.bf16.mxu0 %v4926_v41  ;;  %2531 = vmatprep.mubr.bf16.mxu1 %v4928_v42  ;;  %v5020_v41 = vld [vmem:[%s6536_s1 + $0x2c8] sm:$0xff]  }
  0x78   : > { %v5021_v42 = vld [vmem:[%s6536_s1 + $0x288] sm:$0xff]  }
  0x7e   : > { %2403 = vmatmul.mubr.bf16.gmra.mrb[44].mxu0 %v4930_v45  ;;  %2532 = vmatmul.mubr.bf16.gmra.mrb[44].mxu1 %v4931_v46  ;;  %v5013_v45 = vld [vmem:[%s5405_s9 + $0x80] ss:$52 sps:$4 sm:$0xff]   ;;  %v5014_v46 = vld [vmem:[%s5405_s9 + $0x424] ss:$52 sps:$4 sm:$0xff]  }
  0x7f   : > { %2539 = vmatprep.mubr.bf16.mxu1 %v4934_v47  ;;  %2636 = vmatprep.mubr.bf16.mxu0 %v4938_v48  ;;  %v5016_v47 = vld [vmem:[%s5405_s9 + $0xec] ss:$52 sps:$4 sm:$0xff]   ;;  %v5037_v48 = vld [vmem:[%s6536_s1 + $0x290] sm:$0xff]  }
  0x86   : > { %2540 = vmatmul.mubr.bf16.gmra.mrb[48].mxu1 %v4939_v52  ;;  %2637 = vmatmul.mubr.bf16.vlgmr.msra.gmra.mrb[48].mxu0 %v4936_v51  ;;  %v5068_v51 = vld [vmem:[%s6536_s1 + $0x2e0] sm:$0xff]  }
  0x87   : > { %4504 = vmatpush3.bf16.msra.mxu0 %v4943_v53  ;;  %2547 = vmatprep.mubr.bf16.mxu1 %v4944_v54  ;;  %v5018_v52 = vld [vmem:[%s5405_s9 + $0x420] ss:$52 sps:$4 sm:$0xff]   ;;  %v5019_v53 = vld [vmem:[%s5405_s9 + $0xe8] ss:$52 sps:$4 sm:$0xff]  }
  0x88   : > { %2644 = vmatprep.mubr.bf16.mxu0 %v4946_v55  ;;  %4505 = vmatprep.subr.bf16.mxu0 %v4958_v56  ;;  %v5024_v54 = vld [vmem:[%s5405_s9 + $0x48c] ss:$52 sps:$4 sm:$0xff]   ;;  %v5026_v55 = vld [vmem:[%s5405_s9 + $0x154] ss:$52 sps:$4 sm:$0xff]  }
  0x89   : > { %v5069_v56 = vld [vmem:[%s6536_s1 + $0x2a0] sm:$0xff]  }
  0x8b   : > { %4506 = vmatpush3.bf16.msra.mxu0 %v4959_v58  ;;  %v5084_v58 = vld [vmem:[%s6536_s1 + $0x2a8] sm:$0xff]  }
  0x8c   : > { %4507 = vmatprep.subr.bf16.mxu0 %v4974_v59  ;;  %v5097_v59 = vld [vmem:[%s6536_s1 + $0x2f0] sm:$0xff]  }
  0x8e   : > { %2548 = vmatmul.mubr.bf16.gmra.mrb[52].mxu1 %v4948_v60  ;;  %2645 = vmatmul.mubr.bf16.gmra.mrb[52].mxu0 %v4949_v61  ;;  %v5028_v60 = vld [vmem:[%s5405_s9 + $0x488] ss:$52 sps:$4 sm:$0xff]   ;;  %v5029_v61 = vld [vmem:[%s5405_s9 + $0x150] ss:$52 sps:$4 sm:$0xff]  }
  0x8f   : > { %2555 = vmatprep.mubr.bf16.mxu1 %v4950_v62  ;;  %2652 = vmatprep.mubr.bf16.mxu0 %v4952_v63  ;;  %v5030_v62 = vld [vmem:[%s5405_s9 + $0x4f4] ss:$52 sps:$4 sm:$0xff]   ;;  %v5032_v63 = vld [vmem:[%s5405_s9 + $0x1bc] ss:$52 sps:$4 sm:$0xff]  }
  0x90   : > { %4508 = vmatpush3.bf16.msra.mxu0 %v4975_v0  ;;  %v5098_v0 = vld [vmem:[%s6536_s1 + $0x2b0] sm:$0xff]  }
  0x91   : > { %4509 = vmatprep.subr.bf16.mxu0 %v4990_v1  ;;  %v5111_v1 = vld [vmem:[%s6536_s1 + $0x2f8] sm:$0xff]  }
  0x94   : > { %4510 = vmatpush3.bf16.msra.mxu0 %v4991_v3  ;;  %v5034_v3 = vld [vmem:[%s5405_s9 + $0x4f0] ss:$52 sps:$4 sm:$0xff]  }
  0x95   : > { %4511 = vmatprep.subr.bf16.mxu0 %v5006_v4  ;;  %v5035_v4 = vld [vmem:[%s5405_s9 + $0x1b8] ss:$52 sps:$4 sm:$0xff]  }
  0x96   : > { %2556 = vmatmul.mubr.bf16.gmra.mrb[56].mxu1 %v4954_v2  ;;  %2653 = vmatmul.mubr.bf16.gmra.mrb[56].mxu0 %v4955_v5  ;;  %v5112_v2 = vld [vmem:[%s6536_s1 + $0x2b8] sm:$0xff]  }
  0x97   : > { %2563 = vmatprep.mubr.bf16.mxu1 %v4960_v6  ;;  %2660 = vmatprep.mubr.bf16.mxu0 %v4962_v7  ;;  %v5040_v5 = vld [vmem:[%s5405_s9 + $0x55c] ss:$52 sps:$4 sm:$0xff]   ;;  %v5042_v6 = vld [vmem:[%s5405_s9 + $0x224] ss:$52 sps:$4 sm:$0xff]  }
  0x98   : > { %4512 = vmatpush3.bf16.msra.mxu0 %v5007_v8  ;;  %v5044_v7 = vld [vmem:[%s5405_s9 + $0x558] ss:$52 sps:$4 sm:$0xff]   ;;  %v5045_v8 = vld [vmem:[%s5405_s9 + $0x220] ss:$52 sps:$4 sm:$0xff]  }
  0x99   : > { %4513 = vmatprep.subr.bf16.mxu0 %v5022_v9  ;;  %v5046_v9 = vld [vmem:[%s5405_s9 + $0x5c4] ss:$52 sps:$4 sm:$0xff]  }
  0x9c   : > { %4514 = vmatpush3.bf16.msra.mxu0 %v5023_v12  ;;  %v5051_v12 = vld [vmem:[%s5405_s9 + $0x288] ss:$52 sps:$4 sm:$0xff]  }
  0x9d   : > { %4515 = vmatprep.subr.bf16.mxu0 %v5038_v13  ;;  %v5056_v13 = vld [vmem:[%s5405_s9 + $0x62c] ss:$52 sps:$4 sm:$0xff]  }
  0x9e   : > { %2564 = vmatmul.mubr.bf16.gmra.mrb[60].mxu1 %v4964_v10  ;;  %2661 = vmatmul.mubr.bf16.gmra.mrb[60].mxu0 %v4965_v11  ;;  %v5048_v10 = vld [vmem:[%s5405_s9 + $0x28c] ss:$52 sps:$4 sm:$0xff]  }
  0x9f   : > { %2571 = vmatprep.mubr.bf16.mxu1 %v4966_v14  ;;  %2668 = vmatprep.mubr.bf16.mxu0 %v4968_v15  ;;  %v5050_v11 = vld [vmem:[%s5405_s9 + $0x5c0] ss:$52 sps:$4 sm:$0xff]  }
  0xa0   : > { %4516 = vmatpush3.bf16.msra.mxu0 %v5039_v16  ;;  %v5058_v14 = vld [vmem:[%s5405_s9 + $0x2f4] ss:$52 sps:$4 sm:$0xff]  }
  0xa1   : > { %4517 = vmatprep.subr.bf16.mxu0 %v5054_v21 }
  0xa4   : > { %4518 = vmatpush3.bf16.msra.mxu0 %v5055_v22 }
  0xa5   : > { %4745 = vmatprep.subr.bf16.mxu0 %v5700_v27 }
  0xa6   : > { %2572 = vmatmul.mubr.bf16.gmra.mrb[64].mxu1 %v4970_v17  ;;  %2669 = vmatmul.mubr.bf16.gmra.mrb[64].mxu0 %v4971_v18 }
  0xa7   : > { %2579 = vmatprep.mubr.bf16.mxu1 %v4976_v19  ;;  %2676 = vmatprep.mubr.bf16.mxu0 %v4978_v20  ;;  %v5060_v19 = vld [vmem:[%s5405_s9 + $0x628] ss:$52 sps:$4 sm:$0xff]   ;;  %v5061_v20 = vld [vmem:[%s5405_s9 + $0x2f0] ss:$52 sps:$4 sm:$0xff]  }
  0xae   : > { %2580 = vmatmul.mubr.bf16.gmra.mrb[68].mxu1 %v4980_v23  ;;  %2677 = vmatmul.mubr.bf16.gmra.mrb[68].mxu0 %v4981_v24 }
  0xaf   : > { %2587 = vmatprep.mubr.bf16.mxu1 %v4982_v25  ;;  %2684 = vmatprep.mubr.bf16.mxu0 %v4984_v26  ;;  %v5062_v25 = vld [vmem:[%s5405_s9 + $0x35c] ss:$52 sps:$4 sm:$0xff]   ;;  %v5066_v26 = vld [vmem:[%s5405_s9 + $0x24] ss:$52 sps:$4 sm:$0xff]  }
  0xb6   : > { %2588 = vmatmul.mubr.bf16.gmra.mrb[72].mxu1 %v4986_v28  ;;  %2685 = vmatmul.mubr.bf16.gmra.mrb[72].mxu0 %v4987_v29 }
  0xb7   : > { %2595 = vmatprep.mubr.bf16.mxu1 %v4992_v30  ;;  %2692 = vmatprep.mubr.bf16.mxu0 %v4994_v31 }
  0xbe   : > { %2596 = vmatmul.mubr.bf16.gmra.mrb[76].mxu1 %v4996_v32  ;;  %2693 = vmatmul.mubr.bf16.gmra.mrb[76].mxu0 %v4997_v33 }
  0xbf   : > { %2700 = vmatprep.mubr.bf16.mxu0 %v4998_v34  ;;  %2797 = vmatprep.mubr.bf16.mxu1 %v5002_v35 }
  0xc6   : > { %2701 = vmatmul.mubr.bf16.gmra.mrb[80].mxu0 %v5003_v37  ;;  %2798 = vmatmul.mubr.bf16.vlgmr.msra.gmra.mrb[80].mxu1 %v5000_v36  ;;  %v5064_v36 = vld [vmem:[%s5405_s9 + $0x20] ss:$52 sps:$4 sm:$0xff]   ;;  %v5067_v37 = vld [vmem:[%s5405_s9 + $0x358] ss:$52 sps:$4 sm:$0xff]  }
  0xc7   : > { %4616 = vmatpush3.bf16.msra.mxu1 %v5005_v38  ;;  %2708 = vmatprep.mubr.bf16.mxu0 %v5008_v39 }
  0xc8   : > { %2805 = vmatprep.mubr.bf16.mxu1 %v5010_v40  ;;  %4617 = vmatprep.subr.bf16.mxu1 %v5020_v41 }
  0xcb   : > { %4618 = vmatpush3.bf16.msra.mxu1 %v5021_v42  ;;  %v5071_v42 = vld [vmem:[%s5405_s9 + $0x3c4] ss:$52 sps:$4 sm:$0xff]  }
  0xcc   : > { %4619 = vmatprep.subr.bf16.mxu1 %v5036_v43 }
  0xce   : > { %2709 = vmatmul.mubr.bf16.gmra.mrb[84].mxu0 %v5012_v44  ;;  %2806 = vmatmul.mubr.bf16.gmra.mrb[84].mxu1 %v5013_v45  ;;  %v5073_v45 = vld [vmem:[%s5405_s9 + $0x8c] ss:$52 sps:$4 sm:$0xff]  }
  0xcf   : > { %2716 = vmatprep.mubr.bf16.mxu0 %v5014_v46  ;;  %2813 = vmatprep.mubr.bf16.mxu1 %v5016_v47  ;;  %v5125_v46 = vld [vmem:[%s6536_s1 + $0x308] sm:$0xff]  }
  0xd0   : > { %4620 = vmatpush3.bf16.msra.mxu1 %v5037_v48 }
  0xd1   : > { %4621 = vmatprep.subr.bf16.mxu1 %v5052_v49 }
  0xd4   : > { %4622 = vmatpush3.bf16.msra.mxu1 %v5053_v50 }
  0xd5   : > { %4623 = vmatprep.subr.bf16.mxu1 %v5068_v51 }
  0xd6   : > { %2717 = vmatmul.mubr.bf16.gmra.mrb[88].mxu0 %v5018_v52  ;;  %2814 = vmatmul.mubr.bf16.gmra.mrb[88].mxu1 %v5019_v53  ;;  %v5075_v53 = vld [vmem:[%s5405_s9 + $0x3c0] ss:$52 sps:$4 sm:$0xff]  }
  0xd7   : > { %2724 = vmatprep.mubr.bf16.mxu0 %v5024_v54  ;;  %2821 = vmatprep.mubr.bf16.mxu1 %v5026_v55  ;;  %v5076_v54 = vld [vmem:[%s5405_s9 + $0x88] ss:$52 sps:$4 sm:$0xff]  }
  0xd8   : > { %4624 = vmatpush3.bf16.msra.mxu1 %v5069_v56 }
  0xd9   : > { %4625 = vmatprep.subr.bf16.mxu1 %v5083_v57 }
  0xdc   : > { %4626 = vmatpush3.bf16.msra.mxu1 %v5084_v58 }
  0xdd   : > { %4627 = vmatprep.subr.bf16.mxu1 %v5097_v59  ;;  %v5077_v59 = vld [vmem:[%s5405_s9 + $0x42c] ss:$52 sps:$4 sm:$0xff]  }
  0xde   : > { %2725 = vmatmul.mubr.bf16.gmra.mrb[92].mxu0 %v5028_v60  ;;  %2822 = vmatmul.mubr.bf16.gmra.mrb[92].mxu1 %v5029_v61  ;;  %v5079_v60 = vld [vmem:[%s5405_s9 + $0xf4] ss:$52 sps:$4 sm:$0xff]  }
  0xdf   : > { %2732 = vmatprep.mubr.bf16.mxu0 %v5030_v62  ;;  %2829 = vmatprep.mubr.bf16.mxu1 %v5032_v63 }
  0xe0   : > { %4628 = vmatpush3.bf16.msra.mxu1 %v5098_v0 }
  0xe1   : > { %4629 = vmatprep.subr.bf16.mxu1 %v5111_v1 }
  0xe4   : > { %4630 = vmatpush3.bf16.msra.mxu1 %v5112_v2 }
  0xe6   : > { %2733 = vmatmul.mubr.bf16.gmra.mrb[96].mxu0 %v5034_v3  ;;  %2830 = vmatmul.mubr.bf16.gmra.mrb[96].mxu1 %v5035_v4  ;;  %v5081_v4 = vld [vmem:[%s5405_s9 + $0x428] ss:$52 sps:$4 sm:$0xff]  }
  0xe7   : > { %2740 = vmatprep.mubr.bf16.mxu0 %v5040_v5  ;;  %2837 = vmatprep.mubr.bf16.mxu1 %v5042_v6  ;;  %v5082_v5 = vld [vmem:[%s5405_s9 + $0xf0] ss:$52 sps:$4 sm:$0xff]  }
  0xee   : > { %2741 = vmatmul.mubr.bf16.gmra.mrb[100].mxu0 %v5044_v7  ;;  %2838 = vmatmul.mubr.bf16.gmra.mrb[100].mxu1 %v5045_v8 }
  0xef   : > { %2748 = vmatprep.mubr.bf16.mxu0 %v5046_v9  ;;  %2845 = vmatprep.mubr.bf16.mxu1 %v5048_v10  ;;  %v5085_v10 = vld [vmem:[%s5405_s9 + $0x494] ss:$52 sps:$4 sm:$0xff]  }
  0xf6   : > { %2749 = vmatmul.mubr.bf16.gmra.mrb[104].mxu0 %v5050_v11  ;;  %2846 = vmatmul.mubr.bf16.gmra.mrb[104].mxu1 %v5051_v12  ;;  %v5087_v11 = vld [vmem:[%s5405_s9 + $0x15c] ss:$52 sps:$4 sm:$0xff]  }
  0xf7   : > { %2756 = vmatprep.mubr.bf16.mxu0 %v5056_v13  ;;  %2853 = vmatprep.mubr.bf16.mxu1 %v5058_v14 }
  0xf9   : > { %v4143_v15 = vpop.f32.mrb[0].mxu1  ;;  %v4071_v16 = vpop.f32.mrb[0].mxu0 }
  0xfa   : > { %v4144_v17 = vpop.f32.mrb[1].mxu1  ;;  %v4072_v18 = vpop.f32.mrb[1].mxu0 }
  0xfb   : > { %v5786_v21 = vadd.f32 %v4144_v17, %v4143_v15  ;;  %v4146_v22 = vpop.f32.mrb[2].mxu1  ;;  %v5788_v23 = vadd.f32 %v4072_v18, %v4071_v16  ;;  %v4074_v24 = vpop.f32.mrb[2].mxu0  ;;  %v5839_v16 = vld [vmem:[%s6537_s2] ss:$0 sm:$0xff] }
  0xfc   : > { %v4147_v28 = vpop.f32.mrb[3].mxu1  ;;  %v4075_v29 = vpop.f32.mrb[3].mxu0 }
  0xfd   : > { %v5792_v30 = vadd.f32 %v4147_v28, %v4146_v22  ;;  %v5794_v31 = vadd.f32 %v4075_v29, %v4074_v24  ;;  %v5089_v22 = vld [vmem:[%s5405_s9 + $0x490] ss:$52 sps:$4 sm:$0xff]   ;;  %v5090_v24 = vld [vmem:[%s5405_s9 + $0x158] ss:$52 sps:$4 sm:$0xff]  }
  0xfe   : > { %2757 = vmatmul.mubr.bf16.gmra.mrb[108].mxu0 %v5060_v19  ;;  %2854 = vmatmul.mubr.bf16.gmra.mrb[108].mxu1 %v5061_v20 }
  0xff   : > { %2861 = vmatprep.mubr.bf16.mxu1 %v5062_v25  ;;  %2958 = vmatprep.mubr.bf16.mxu0 %v5066_v26  ;;  %v2317_v25 = vadd.f32 %v5788_v23, %v5839_v16 }
 0x101   : > { %v4149_v32 = vpop.f32.mrb[4].mxu1  ;;  %v4077_v33 = vpop.f32.mrb[4].mxu0 }
 0x102   : > { %v4150_v34 = vpop.f32.mrb[5].mxu1  ;;  %v4078_v35 = vpop.f32.mrb[5].mxu0 }
 0x103   : > { %v5798_v38 = vadd.f32 %v4150_v34, %v4149_v32  ;;  %v4152_v39 = vpop.f32.mrb[6].mxu1  ;;  %v5800_v40 = vadd.f32 %v4078_v35, %v4077_v33  ;;  %v4080_v41 = vpop.f32.mrb[6].mxu0  ;;  %v5091_v33 = vld [vmem:[%s5405_s9 + $0x4fc] ss:$52 sps:$4 sm:$0xff]   ;;  %v5093_v34 = vld [vmem:[%s5405_s9 + $0x1c4] ss:$52 sps:$4 sm:$0xff]  }
 0x104   : > { %v4153_v43 = vpop.f32.mrb[7].mxu1  ;;  %v4081_v44 = vpop.f32.mrb[7].mxu0 }
 0x105   : > { %v5807_v47 = vadd.f32 %v4153_v43, %v4152_v39  ;;  %v5809_v48 = vadd.f32 %v4081_v44, %v4080_v41 }
 0x106   : > { %2862 = vmatmul.mubr.bf16.gmra.mrb[112].mxu1 %v5067_v37  ;;  %2959 = vmatmul.mubr.bf16.vlgmr.msra.gmra.mrb[112].mxu0 %v5064_v36  ;;  %v2320_v37 = vadd.f32 %v5794_v31, %v5839_v16  ;;  %v2325_v31 = vadd.f32 %v5800_v40, %v5839_v16 }
 0x107   : > { %4746 = vmatpush3.bf16.msra.mxu0 %v5700_v27  ;;  %2869 = vmatprep.mubr.bf16.mxu1 %v5071_v42 }
 0x108   : > { %2966 = vmatprep.mubr.bf16.mxu0 %v5073_v45  ;;  %4747 = vmatprep.subr.bf16.mxu0 %v5125_v46 }
 0x109   : > { %v4155_v49 = vpop.f32.mrb[8].mxu1  ;;  %v4083_v50 = vpop.f32.mrb[8].mxu0 }
 0x10a   : > { %v4156_v51 = vpop.f32.mrb[9].mxu1  ;;  %v4084_v52 = vpop.f32.mrb[9].mxu0 }
 0x10b   : > { %v5814_v55 = vadd.f32 %v4156_v51, %v4155_v49  ;;  %v4158_v56 = vpop.f32.mrb[10].mxu1  ;;  %v5816_v57 = vadd.f32 %v4084_v52, %v4083_v50  ;;  %v4086_v58 = vpop.f32.mrb[10].mxu0  ;;  %4748 = vmatpush3.bf16.msra.mxu0 %v5125_v46  ;;  %v5095_v49 = vld [vmem:[%s5405_s9 + $0x4f8] ss:$52 sps:$4 sm:$0xff]   ;;  %v5096_v50 = vld [vmem:[%s5405_s9 + $0x1c0] ss:$52 sps:$4 sm:$0xff]  }
 0x10c   : > { %v4159_v27 = vpop.f32.mrb[11].mxu1  ;;  %v4087_v61 = vpop.f32.mrb[11].mxu0 }
 0x10d   : > { %v5820_v62 = vadd.f32 %v4159_v27, %v4158_v56  ;;  %v5822_v63 = vadd.f32 %v4087_v61, %v4086_v58  ;;  %v5099_v56 = vld [vmem:[%s5405_s9 + $0x564] ss:$52 sps:$4 sm:$0xff]   ;;  %v5101_v58 = vld [vmem:[%s5405_s9 + $0x22c] ss:$52 sps:$4 sm:$0xff]   ;;  %v2328_v27 = vadd.f32 %v5809_v48, %v5839_v16  ;;  %v2333_v48 = vadd.f32 %v5816_v57, %v5839_v16 }
 0x10e   : > { %2870 = vmatmul.mubr.bf16.gmra.mrb[116].mxu1 %v5075_v53  ;;  %2967 = vmatmul.mubr.bf16.gmra.mrb[116].mxu0 %v5076_v54 }
 0x10f   : > { %2877 = vmatprep.mubr.bf16.mxu1 %v5077_v59  ;;  %2974 = vmatprep.mubr.bf16.mxu0 %v5079_v60 }
 0x111   : > { %v4161_v0 = vpop.f32.mrb[12].mxu1  ;;  %v4089_v1 = vpop.f32.mrb[12].mxu0 }
 0x112   : > { %v4162_v2 = vpop.f32.mrb[13].mxu1  ;;  %v4090_v3 = vpop.f32.mrb[13].mxu0 }
 0x113   : > { %v5826_v6 = vadd.f32 %v4162_v2, %v4161_v0  ;;  %v4164_v7 = vpop.f32.mrb[14].mxu1  ;;  %v5828_v8 = vadd.f32 %v4090_v3, %v4089_v1  ;;  %v4092_v9 = vpop.f32.mrb[14].mxu0 }
 0x114   : > { %v4165_v12 = vpop.f32.mrb[15].mxu1  ;;  %v4093_v13 = vpop.f32.mrb[15].mxu0 }
 0x115   : > { %v5832_v14 = vadd.f32 %v4165_v12, %v4164_v7  ;;  %v5834_v15 = vadd.f32 %v4093_v13, %v4092_v9  ;;  %v5103_v7 = vld [vmem:[%s5405_s9 + $0x560] ss:$52 sps:$4 sm:$0xff]   ;;  %v5104_v9 = vld [vmem:[%s5405_s9 + $0x228] ss:$52 sps:$4 sm:$0xff]  }
 0x116   : > { %2878 = vmatmul.mubr.bf16.gmra.mrb[120].mxu1 %v5081_v4  ;;  %2975 = vmatmul.mubr.bf16.gmra.mrb[120].mxu0 %v5082_v5 }
 0x117   : > { %2885 = vmatprep.mubr.bf16.mxu1 %v5085_v10  ;;  %2982 = vmatprep.mubr.bf16.mxu0 %v5087_v11 }
 0x119   : > { %v4183_v17 = vpop.f32.mrb[16].mxu1  ;;  %v4095_v18 = vpop.f32.mrb[16].mxu0 }
 0x11a   : > { %v4184_v19 = vpop.f32.mrb[17].mxu1  ;;  %v4096_v20 = vpop.f32.mrb[17].mxu0 }
 0x11b   : > { %v4185_v26 = vadd.f32 %v4184_v19, %v4183_v17  ;;  %v4186_v28 = vpop.f32.mrb[18].mxu1  ;;  %v5845_v29 = vadd.f32 %v4096_v20, %v4095_v18  ;;  %v4098_v32 = vpop.f32.mrb[18].mxu0  ;;  %v5105_v17 = vld [vmem:[%s5405_s9 + $0x5cc] ss:$52 sps:$4 sm:$0xff]   ;;  %v5107_v18 = vld [vmem:[%s5405_s9 + $0x294] ss:$52 sps:$4 sm:$0xff]  }
 0x11c   : > { %v4187_v35 = vpop.f32.mrb[19].mxu1  ;;  %v4099_v36 = vpop.f32.mrb[19].mxu0 }
 0x11d   : > { %v5851_v39 = vadd.f32 %v4185_v26, %v2317_v25  ;;  %v4188_v41 = vadd.f32 %v4187_v35, %v4186_v28  ;;  %v5853_v42 = vadd.f32 %v4099_v36, %v4098_v32  ;;  %v5109_v35 = vld [vmem:[%s5405_s9 + $0x5c8] ss:$52 sps:$4 sm:$0xff]   ;;  %v5110_v36 = vld [vmem:[%s5405_s9 + $0x290] ss:$52 sps:$4 sm:$0xff]  }
 0x11e   : > { %2886 = vmatmul.mubr.bf16.gmra.mrb[124].mxu1 %v5089_v22  ;;  %2983 = vmatmul.mubr.bf16.gmra.mrb[124].mxu0 %v5090_v24  ;;  %v2336_v22 = vadd.f32 %v5822_v63, %v5839_v16  ;;  %v2341_v63 = vadd.f32 %v5828_v8, %v5839_v16 }
 0x11f   : > { %v5855_v23 = vadd.f32 %v4188_v41, %v2320_v37  ;;  %2893 = vmatprep.mubr.bf16.mxu1 %v5091_v33  ;;  %2990 = vmatprep.mubr.bf16.mxu0 %v5093_v34 }
 0x121   : > { %v4189_v43 = vpop.f32.mrb[20].mxu1  ;;  %v4101_v44 = vpop.f32.mrb[20].mxu0 }
 0x122   : > { %v4190_v45 = vpop.f32.mrb[21].mxu1  ;;  %v4102_v46 = vpop.f32.mrb[21].mxu0 }
 0x123   : > { %v4191_v51 = vadd.f32 %v4190_v45, %v4189_v43  ;;  %v4192_v52 = vpop.f32.mrb[22].mxu1  ;;  %v5861_v53 = vadd.f32 %v4102_v46, %v4101_v44  ;;  %v4104_v54 = vpop.f32.mrb[22].mxu0  ;;  %v5113_v45 = vld [vmem:[%s5405_s9 + $0x634] ss:$52 sps:$4 sm:$0xff]   ;;  %v5115_v46 = vld [vmem:[%s5405_s9 + $0x2fc] ss:$52 sps:$4 sm:$0xff]  }
 0x124   : > { %v4193_v59 = vpop.f32.mrb[23].mxu1  ;;  %v4105_v60 = vpop.f32.mrb[23].mxu0 }
 0x125   : > { %v5867_v61 = vadd.f32 %v4191_v51, %v2325_v31  ;;  %v4194_v0 = vadd.f32 %v4193_v59, %v4192_v52  ;;  %v5869_v1 = vadd.f32 %v4105_v60, %v4104_v54  ;;  %v2344_v31 = vadd.f32 %v5834_v15, %v5839_v16 }
 0x126   : > { %2894 = vmatmul.mubr.bf16.gmra.mrb[128].mxu1 %v5095_v49  ;;  %2991 = vmatmul.mubr.bf16.gmra.mrb[128].mxu0 %v5096_v50  ;;  %v2349_v15 = vadd.f32 %v5845_v29, %v5839_v16 }
 0x127   : > { %v5871_v40 = vadd.f32 %v4194_v0, %v2328_v27  ;;  %2901 = vmatprep.mubr.bf16.mxu1 %v5099_v56  ;;  %2998 = vmatprep.mubr.bf16.mxu0 %v5101_v58  ;;  %v5117_v27 = vld [vmem:[%s5405_s9 + $0x630] ss:$52 sps:$4 sm:$0xff]   ;;  %v5118_v0 = vld [vmem:[%s5405_s9 + $0x2f8] ss:$52 sps:$4 sm:$0xff]  }
 0x129   : > { %v4195_v2 = vpop.f32.mrb[24].mxu1  ;;  %v4107_v3 = vpop.f32.mrb[24].mxu0 }
 0x12a   : > { %v4196_v4 = vpop.f32.mrb[25].mxu1  ;;  %v4108_v5 = vpop.f32.mrb[25].mxu0 }
 0x12b   : > { %v4197_v10 = vadd.f32 %v4196_v4, %v4195_v2  ;;  %v4198_v11 = vpop.f32.mrb[26].mxu1  ;;  %v5877_v12 = vadd.f32 %v4108_v5, %v4107_v3  ;;  %v4110_v13 = vpop.f32.mrb[26].mxu0 }
 0x12c   : > { %v4199_v19 = vpop.f32.mrb[27].mxu1  ;;  %v4111_v20 = vpop.f32.mrb[27].mxu0 }
 0x12d   : > { %v5883_v24 = vadd.f32 %v4197_v10, %v2333_v48  ;;  %v4200_v25 = vadd.f32 %v4199_v19, %v4198_v11  ;;  %v5885_v26 = vadd.f32 %v4111_v20, %v4110_v13  ;;  %v2352_v11 = vadd.f32 %v5853_v42, %v5839_v16 }
 0x12e   : > { %2902 = vmatmul.mubr.bf16.gmra.mrb[132].mxu1 %v5103_v7  ;;  %2999 = vmatmul.mubr.bf16.gmra.mrb[132].mxu0 %v5104_v9  ;;  %v5119_v7 = vld [vmem:[%s5405_s9 + $0x364] ss:$52 sps:$4 sm:$0xff]   ;;  %v5123_v9 = vld [vmem:[%s5405_s9 + $0x2c] ss:$52 sps:$4 sm:$0xff]   ;;  %v2357_v42 = vadd.f32 %v5861_v53, %v5839_v16 }
 0x12f   : > { %v5887_v57 = vadd.f32 %v4200_v25, %v2336_v22  ;;  %2909 = vmatprep.mubr.bf16.mxu1 %v5105_v17  ;;  %3006 = vmatprep.mubr.bf16.mxu0 %v5107_v18 }
 0x131   : > { %v4201_v28 = vpop.f32.mrb[28].mxu1  ;;  %v4113_v32 = vpop.f32.mrb[28].mxu0 }
 0x132   : > { %v4202_v33 = vpop.f32.mrb[29].mxu1  ;;  %v4114_v34 = vpop.f32.mrb[29].mxu0 }
 0x133   : > { %v4203_v37 = vadd.f32 %v4202_v33, %v4201_v28  ;;  %v4204_v41 = vpop.f32.mrb[30].mxu1  ;;  %v5893_v43 = vadd.f32 %v4114_v34, %v4113_v32  ;;  %v4116_v44 = vpop.f32.mrb[30].mxu0  ;;  %v5121_v28 = vld [vmem:[%s5405_s9 + $0x28] ss:$52 sps:$4 sm:$0xff]   ;;  %v5124_v32 = vld [vmem:[%s5405_s9 + $0x360] ss:$52 sps:$4 sm:$0xff]  }
 0x134   : > { %v4205_v49 = vpop.f32.mrb[31].mxu1  ;;  %v4117_v50 = vpop.f32.mrb[31].mxu0 }
 0x135   : > { %v5899_v51 = vadd.f32 %v4203_v37, %v2341_v63  ;;  %v4206_v52 = vadd.f32 %v4205_v49, %v4204_v41  ;;  %v5901_v54 = vadd.f32 %v4117_v50, %v4116_v44  ;;  %v5126_v63 = vld [vmem:[%s5405_s9 + $0x3cc] ss:$52 sps:$4 sm:$0xff]   ;;  %v5128_v37 = vld [vmem:[%s5405_s9 + $0x94] ss:$52 sps:$4 sm:$0xff]  }
 0x136   : > { %2910 = vmatmul.mubr.bf16.gmra.mrb[136].mxu1 %v5109_v35  ;;  %3007 = vmatmul.mubr.bf16.gmra.mrb[136].mxu0 %v5110_v36 }
 0x137   : > { %v5903_v8 = vadd.f32 %v4206_v52, %v2344_v31  ;;  %2917 = vmatprep.mubr.bf16.mxu1 %v5113_v45  ;;  %3014 = vmatprep.mubr.bf16.mxu0 %v5115_v46  ;;  %v2360_v45 = vadd.f32 %v5869_v1, %v5839_v16  ;;  %v2365_v1 = vadd.f32 %v5877_v12, %v5839_v16 }
 0x139   : > { %v4207_v56 = vpop.f32.mrb[32].mxu1  ;;  %v4119_v58 = vpop.f32.mrb[32].mxu0 }
 0x13a   : > { %v4208_v59 = vpop.f32.mrb[33].mxu1  ;;  %v4120_v60 = vpop.f32.mrb[33].mxu0 }
 0x13b   : > { %v4209_v2 = vadd.f32 %v4208_v59, %v4207_v56  ;;  %v4210_v3 = vpop.f32.mrb[34].mxu1  ;;  %v5909_v4 = vadd.f32 %v4120_v60, %v4119_v58  ;;  %v4122_v5 = vpop.f32.mrb[34].mxu0  ;;  %v5130_v59 = vld [vmem:[%s5405_s9 + $0x3c8] ss:$52 sps:$4 sm:$0xff]   ;;  %v5131_v60 = vld [vmem:[%s5405_s9 + $0x90] ss:$52 sps:$4 sm:$0xff]  }
 0x13c   : > { %v4211_v48 = vpop.f32.mrb[35].mxu1  ;;  %v4123_v10 = vpop.f32.mrb[35].mxu0 }
 0x13d   : > { %v5915_v13 = vadd.f32 %v4209_v2, %v2349_v15  ;;  %v4212_v17 = vadd.f32 %v4211_v48, %v4210_v3  ;;  %v5917_v18 = vadd.f32 %v4123_v10, %v4122_v5  ;;  %v5132_v3 = vld [vmem:[%s5405_s9 + $0x434] ss:$52 sps:$4 sm:$0xff]   ;;  %v5134_v5 = vld [vmem:[%s5405_s9 + $0xfc] ss:$52 sps:$4 sm:$0xff]   ;;  %v2368_v48 = vadd.f32 %v5885_v26, %v5839_v16 }
 0x13e   : > { %2918 = vmatmul.mubr.bf16.gmra.mrb[140].mxu1 %v5117_v27  ;;  %3015 = vmatmul.mubr.bf16.gmra.mrb[140].mxu0 %v5118_v0  ;;  %v2373_v26 = vadd.f32 %v5893_v43, %v5839_v16 }
 0x13f   : > { %v5919_v29 = vadd.f32 %v4212_v17, %v2352_v11  ;;  %3022 = vmatprep.mubr.bf16.mxu0 %v5119_v7  ;;  %3119 = vmatprep.mubr.bf16.mxu1 %v5123_v9 }
 0x141   : > { %v4213_v19 = vpop.f32.mrb[36].mxu1  ;;  %v4125_v20 = vpop.f32.mrb[36].mxu0 }
 0x142   : > { %v4214_v22 = vpop.f32.mrb[37].mxu1  ;;  %v4126_v25 = vpop.f32.mrb[37].mxu0 }
 0x143   : > { %v4215_v33 = vadd.f32 %v4214_v22, %v4213_v19  ;;  %v4216_v34 = vpop.f32.mrb[38].mxu1  ;;  %v5925_v35 = vadd.f32 %v4126_v25, %v4125_v20  ;;  %v4128_v36 = vpop.f32.mrb[38].mxu0 }
 0x144   : > { %v4217_v41 = vpop.f32.mrb[39].mxu1  ;;  %v4129_v44 = vpop.f32.mrb[39].mxu0 }
 0x145   : > { %v5931_v46 = vadd.f32 %v4215_v33, %v2357_v42  ;;  %v4218_v49 = vadd.f32 %v4217_v41, %v4216_v34  ;;  %v5933_v50 = vadd.f32 %v4129_v44, %v4128_v36 }
 0x146   : > { %3023 = vmatmul.mubr.bf16.gmra.mrb[144].mxu0 %v5124_v32  ;;  %3120 = vmatmul.mubr.bf16.vlgmr.msra.gmra.mrb[144].mxu1 %v5121_v28  ;;  %v5136_v28 = vld [vmem:[%s5405_s9 + $0x430] ss:$52 sps:$4 sm:$0xff]   ;;  %v5137_v32 = vld [vmem:[%s5405_s9 + $0xf8] ss:$52 sps:$4 sm:$0xff]  }
 0x147   : > { %v5935_v53 = vadd.f32 %v4218_v49, %v2360_v45  ;;  %3030 = vmatprep.mubr.bf16.mxu0 %v5126_v63  ;;  %3127 = vmatprep.mubr.bf16.mxu1 %v5128_v37  ;;  %v5138_v63 = vld [vmem:[%s5405_s9 + $0x49c] ss:$52 sps:$4 sm:$0xff]   ;;  %v5140_v37 = vld [vmem:[%s5405_s9 + $0x164] ss:$52 sps:$4 sm:$0xff]   ;;  %v2376_v45 = vadd.f32 %v5901_v54, %v5839_v16  ;;  %v2381_v54 = vadd.f32 %v5909_v4, %v5839_v16 }
 0x149   : > { %v4219_v31 = vpop.f32.mrb[40].mxu1  ;;  %v4131_v52 = vpop.f32.mrb[40].mxu0 }
 0x14a   : > { %v4220_v56 = vpop.f32.mrb[41].mxu1  ;;  %v4132_v58 = vpop.f32.mrb[41].mxu0 }
 0x14b   : > { %v4221_v27 = vadd.f32 %v4220_v56, %v4219_v31  ;;  %v4222_v0 = vpop.f32.mrb[42].mxu1  ;;  %v5941_v15 = vadd.f32 %v4132_v58, %v4131_v52  ;;  %v4134_v2 = vpop.f32.mrb[42].mxu0 }
 0x14c   : > { %v4223_v7 = vpop.f32.mrb[43].mxu1  ;;  %v4135_v9 = vpop.f32.mrb[43].mxu0 }
 0x14d   : > { %v5947_v10 = vadd.f32 %v4221_v27, %v2365_v1  ;;  %v4224_v11 = vadd.f32 %v4223_v7, %v4222_v0  ;;  %v5949_v17 = vadd.f32 %v4135_v9, %v4134_v2  ;;  %v5142_v1 = vld [vmem:[%s5405_s9 + $0x498] ss:$52 sps:$4 sm:$0xff]   ;;  %v5143_v27 = vld [vmem:[%s5405_s9 + $0x160] ss:$52 sps:$4 sm:$0xff]  }
 0x14e   : > { %3031 = vmatmul.mubr.bf16.gmra.mrb[148].mxu0 %v5130_v59  ;;  %3128 = vmatmul.mubr.bf16.gmra.mrb[148].mxu1 %v5131_v60  ;;  %v5144_v7 = vld [vmem:[%s5405_s9 + $0x504] ss:$52 sps:$4 sm:$0xff]   ;;  %v5146_v9 = vld [vmem:[%s5405_s9 + $0x1cc] ss:$52 sps:$4 sm:$0xff]  }
 0x14f   : > { %v5951_v12 = vadd.f32 %v4224_v11, %v2368_v48  ;;  %3038 = vmatprep.mubr.bf16.mxu0 %v5132_v3  ;;  %3135 = vmatprep.mubr.bf16.mxu1 %v5134_v5  ;;  %v2384_v48 = vadd.f32 %v5917_v18, %v5839_v16 }
 0x151   : > { %v4225_v19 = vpop.f32.mrb[44].mxu1  ;;  %v4137_v20 = vpop.f32.mrb[44].mxu0 }
 0x152   : > { %v4226_v22 = vpop.f32.mrb[45].mxu1  ;;  %v4138_v25 = vpop.f32.mrb[45].mxu0 }
 0x153   : > { %v4227_v42 = vadd.f32 %v4226_v22, %v4225_v19  ;;  %v4228_v33 = vpop.f32.mrb[46].mxu1  ;;  %v5957_v34 = vadd.f32 %v4138_v25, %v4137_v20  ;;  %v4140_v36 = vpop.f32.mrb[46].mxu0 }
 0x154   : > { %v4229_v41 = vpop.f32.mrb[47].mxu1  ;;  %v4141_v44 = vpop.f32.mrb[47].mxu0 }
 0x155   : > { %v5963_v49 = vadd.f32 %v4227_v42, %v2373_v26  ;;  %v4230_v31 = vadd.f32 %v4229_v41, %v4228_v33  ;;  %v5965_v52 = vadd.f32 %v4141_v44, %v4140_v36  ;;  %v5148_v36 = vld [vmem:[%s5405_s9 + $0x500] ss:$52 sps:$4 sm:$0xff]  }
 0x156   : > { %3039 = vmatmul.mubr.bf16.gmra.mrb[152].mxu0 %v5136_v28  ;;  %3136 = vmatmul.mubr.bf16.gmra.mrb[152].mxu1 %v5137_v32 }
 0x157   : > { %v5967_v43 = vadd.f32 %v4230_v31, %v2376_v45  ;;  %3046 = vmatprep.mubr.bf16.mxu0 %v5138_v63  ;;  %3143 = vmatprep.mubr.bf16.mxu1 %v5140_v37  ;;  %v2389_v63 = vadd.f32 %v5925_v35, %v5839_v16  ;;  %v5150_v31 = vld [vmem:[%s5405_s9 + $0x56c] ss:$52 sps:$4 sm:$0xff]  }
 0x159   : > { %v4231_v56 = vpop.f32.mrb[48].mxu1  ;;  %v4295_v58 = vpop.f32.mrb[48].mxu0 }
 0x15a   : > { %v4232_v59 = vpop.f32.mrb[49].mxu1  ;;  %v4296_v60 = vpop.f32.mrb[49].mxu0 }
 0x15b   : > { %v4233_v0 = vadd.f32 %v4232_v59, %v4231_v56  ;;  %v4297_v2 = vadd.f32 %v4296_v60, %v4295_v58  ;;  %v4234_v3 = vpop.f32.mrb[50].mxu1  ;;  %v4298_v5 = vpop.f32.mrb[50].mxu0  ;;  %v5152_v56 = vld [vmem:[%s5405_s9 + $0x234] ss:$52 sps:$4 sm:$0xff]  }
 0x15c   : > { %v4235_v11 = vpop.f32.mrb[51].mxu1  ;;  %v4299_v19 = vpop.f32.mrb[51].mxu0 }
 0x15d   : > { %v5977_v20 = vadd.f32 %v4233_v0, %v2381_v54  ;;  %v5980_v22 = vadd.f32 %v4297_v2, %v5851_v39  ;;  %v4236_v25 = vadd.f32 %v4235_v11, %v4234_v3  ;;  %v4300_v4 = vadd.f32 %v4299_v19, %v4298_v5  ;;  %v5149_v39 = vld [vmem:[%s5405_s9 + $0x1c8] ss:$52 sps:$4 sm:$0xff]  }
 0x15e   : > { %3047 = vmatmul.mubr.bf16.gmra.mrb[156].mxu0 %v5142_v1  ;;  %3144 = vmatmul.mubr.bf16.gmra.mrb[156].mxu1 %v5143_v27 }
 0x15f   : > { %v5982_v28 = vadd.f32 %v4236_v25, %v2384_v48  ;;  %v5985_v32 = vadd.f32 %v4300_v4, %v5855_v23  ;;  %3054 = vmatprep.mubr.bf16.mxu0 %v5144_v7  ;;  %3151 = vmatprep.mubr.bf16.mxu1 %v5146_v9  ;;  %v2392_v23 = vadd.f32 %v5933_v50, %v5839_v16  ;;  %v5154_v7 = vld [vmem:[%s5405_s9 + $0x568] ss:$52 sps:$4 sm:$0xff]  }
 0x160   : > { %v2397_v9 = vadd.f32 %v5941_v15, %v5839_v16  ;;  %v5156_v4 = vld [vmem:[%s5405_s9 + $0x5d4] ss:$52 sps:$4 sm:$0xff]  }
 0x161   : > { %v4237_v18 = vpop.f32.mrb[52].mxu1  ;;  %v4301_v26 = vpop.f32.mrb[52].mxu0 }
 0x162   : > { %v4238_v42 = vpop.f32.mrb[53].mxu1  ;;  %v4302_v33 = vpop.f32.mrb[53].mxu0 }
 0x163   : > { %v4239_v37 = vadd.f32 %v4238_v42, %v4237_v18  ;;  %v4303_v41 = vadd.f32 %v4302_v33, %v4301_v26  ;;  %v4240_v44 = vpop.f32.mrb[54].mxu1  ;;  %v4304_v45 = vpop.f32.mrb[54].mxu0  ;;  %v5158_v18 = vld [vmem:[%s5405_s9 + $0x29c] ss:$52 sps:$4 sm:$0xff]  }
 0x164   : > { %v4241_v58 = vpop.f32.mrb[55].mxu1  ;;  %v4305_v59 = vpop.f32.mrb[55].mxu0 }
 0x165   : > { %v5995_v60 = vadd.f32 %v4239_v37, %v2389_v63  ;;  %v5998_v1 = vadd.f32 %v4303_v41, %v5867_v61  ;;  %v4242_v27 = vadd.f32 %v4241_v58, %v4240_v44  ;;  %v4306_v35 = vadd.f32 %v4305_v59, %v4304_v45  ;;  %v5155_v61 = vld [vmem:[%s5405_s9 + $0x230] ss:$52 sps:$4 sm:$0xff]  }
 0x166   : > { %3055 = vmatmul.mubr.bf16.gmra.mrb[160].mxu0 %v5148_v36  ;;  %3152 = vmatmul.mubr.bf16.gmra.mrb[160].mxu1 %v5149_v39 }
 0x167   : > { %v6000_v54 = vadd.f32 %v4242_v27, %v2392_v23  ;;  %v6003_v0 = vadd.f32 %v4306_v35, %v5871_v40  ;;  %3062 = vmatprep.mubr.bf16.mxu0 %v5150_v31  ;;  %3159 = vmatprep.mubr.bf16.mxu1 %v5152_v56  ;;  %v2400_v40 = vadd.f32 %v5949_v17, %v5839_v16  ;;  %v5160_v31 = vld [vmem:[%s5405_s9 + $0x5d0] ss:$52 sps:$4 sm:$0xff]  }
 0x168   : > { %v2405_v56 = vadd.f32 %v5957_v34, %v5839_v16  ;;  %v5162_v35 = vld [vmem:[%s5405_s9 + $0x63c] ss:$52 sps:$4 sm:$0xff]  }
 0x169   : > { %v4243_v50 = vpop.f32.mrb[56].mxu1  ;;  %v4307_v2 = vpop.f32.mrb[56].mxu0 }
 0x16a   : > { %v4244_v3 = vpop.f32.mrb[57].mxu1  ;;  %v4308_v5 = vpop.f32.mrb[57].mxu0 }
 0x16b   : > { %v4245_v48 = vadd.f32 %v4244_v3, %v4243_v50  ;;  %v4309_v11 = vadd.f32 %v4308_v5, %v4307_v2  ;;  %v4246_v19 = vpop.f32.mrb[58].mxu1  ;;  %v4310_v25 = vpop.f32.mrb[58].mxu0  ;;  %v5164_v50 = vld [vmem:[%s5405_s9 + $0x304] ss:$52 sps:$4 sm:$0xff]  }
 0x16c   : > { %v4247_v26 = vpop.f32.mrb[59].mxu1  ;;  %v4311_v42 = vpop.f32.mrb[59].mxu0 }
 0x16d   : > { %v6013_v33 = vadd.f32 %v4245_v48, %v2397_v9  ;;  %v6016_v36 = vadd.f32 %v4309_v11, %v5883_v24  ;;  %v4248_v39 = vadd.f32 %v4247_v26, %v4246_v19  ;;  %v4312_v15 = vadd.f32 %v4311_v42, %v4310_v25  ;;  %v5161_v24 = vld [vmem:[%s5405_s9 + $0x298] ss:$52 sps:$4 sm:$0xff]  }
 0x16e   : > { %3063 = vmatmul.mubr.bf16.gmra.mrb[164].mxu0 %v5154_v7  ;;  %3160 = vmatmul.mubr.bf16.gmra.mrb[164].mxu1 %v5155_v61 }
 0x16f   : > { %v6018_v63 = vadd.f32 %v4248_v39, %v2400_v40  ;;  %v6021_v37 = vadd.f32 %v4312_v15, %v5887_v57  ;;  %3070 = vmatprep.mubr.bf16.mxu0 %v5156_v4  ;;  %3167 = vmatprep.mubr.bf16.mxu1 %v5158_v18  ;;  %v2408_v57 = vadd.f32 %v5965_v52, %v5839_v16  ;;  %v5166_v4 = vld [vmem:[%s5405_s9 + $0x638] ss:$52 sps:$4 sm:$0xff]  }
 0x170   : > { %v2413_v18 = vadd.f32 %v5786_v21, %v5839_v16  ;;  %v5168_v15 = vld [vmem:[%s5405_s9 + $0x36c] ss:$52 sps:$4 sm:$0xff]  }
 0x171   : > { %v4249_v17 = vpop.f32.mrb[60].mxu1  ;;  %v4313_v41 = vpop.f32.mrb[60].mxu0 }
 0x172   : > { %v4250_v44 = vpop.f32.mrb[61].mxu1  ;;  %v4314_v45 = vpop.f32.mrb[61].mxu0 }
 0x173   : > { %v4251_v23 = vadd.f32 %v4250_v44, %v4249_v17  ;;  %v4315_v58 = vadd.f32 %v4314_v45, %v4313_v41  ;;  %v4252_v59 = vpop.f32.mrb[62].mxu1  ;;  %v4316_v27 = vpop.f32.mrb[62].mxu0  ;;  %v5170_v17 = vld [vmem:[%s5405_s9 + $0x30] ss:$52 sps:$4 sm:$0xff]  }
 0x174   : > { %v4253_v2 = vpop.f32.mrb[63].mxu1  ;;  %v4317_v3 = vpop.f32.mrb[63].mxu0 }
 0x175   : > { %v6031_v5 = vadd.f32 %v4251_v23, %v2405_v56  ;;  %v6034_v7 = vadd.f32 %v4315_v58, %v5899_v51  ;;  %v4254_v61 = vadd.f32 %v4253_v2, %v4252_v59  ;;  %v4318_v34 = vadd.f32 %v4317_v3, %v4316_v27  ;;  %v5167_v51 = vld [vmem:[%s5405_s9 + $0x300] ss:$52 sps:$4 sm:$0xff]  }
 0x176   : > { %3071 = vmatmul.mubr.bf16.gmra.mrb[168].mxu0 %v5160_v31  ;;  %3168 = vmatmul.mubr.bf16.gmra.mrb[168].mxu1 %v5161_v24 }
 0x177   : > { %v6036_v9 = vadd.f32 %v4254_v61, %v2408_v57  ;;  %v6039_v48 = vadd.f32 %v4318_v34, %v5903_v8  ;;  %3078 = vmatprep.mubr.bf16.mxu0 %v5162_v35  ;;  %3175 = vmatprep.mubr.bf16.mxu1 %v5164_v50  ;;  %v2416_v8 = vadd.f32 %v5792_v30, %v5839_v16  ;;  %v5172_v35 = vld [vmem:[%s5405_s9 + $0x98] ss:$52 sps:$4 sm:$0xff]   ;;  %v5173_v34 = vld [vmem:[%s5405_s9 + $0x3d4] ss:$52 sps:$4 sm:$0xff]  }
 0x178   : > { %v2421_v50 = vadd.f32 %v5798_v38, %v5839_v16 }
 0x179   : > { %v4255_v52 = vpop.f32.mrb[64].mxu1  ;;  %v4319_v11 = vpop.f32.mrb[64].mxu0 }
 0x17a   : > { %v4256_v19 = vpop.f32.mrb[65].mxu1  ;;  %v4320_v25 = vpop.f32.mrb[65].mxu0 }
 0x17b   : > { %v4257_v40 = vadd.f32 %v4256_v19, %v4255_v52  ;;  %v4321_v26 = vadd.f32 %v4320_v25, %v4319_v11  ;;  %v4258_v42 = vpop.f32.mrb[66].mxu1  ;;  %v4322_v39 = vpop.f32.mrb[66].mxu0  ;;  %v5175_v52 = vld [vmem:[%s5405_s9 + $0x100] ss:$52 sps:$4 sm:$0xff]  }
 0x17c   : > { %v4259_v41 = vpop.f32.mrb[67].mxu1  ;;  %v4323_v44 = vpop.f32.mrb[67].mxu0 }
 0x17d   : > { %v6049_v45 = vadd.f32 %v4257_v40, %v2413_v18  ;;  %v6052_v31 = vadd.f32 %v4321_v26, %v5915_v13  ;;  %v4260_v21 = vadd.f32 %v4259_v41, %v4258_v42  ;;  %v4324_v24 = vadd.f32 %v4323_v44, %v4322_v39  ;;  %v5171_v13 = vld [vmem:[%s5405_s9 + $0x368] ss:$52 sps:$4 sm:$0xff]   ;;  %v5176_v39 = vld [vmem:[%s5405_s9 + $0x3d0] ss:$52 sps:$4 sm:$0xff]  }
 0x17e   : > { %3079 = vmatmul.mubr.bf16.gmra.mrb[172].mxu0 %v5166_v4  ;;  %3176 = vmatmul.mubr.bf16.gmra.mrb[172].mxu1 %v5167_v51 }
 0x17f   : > { %v6054_v56 = vadd.f32 %v4260_v21, %v2416_v8  ;;  %v6057_v30 = vadd.f32 %v4324_v24, %v5919_v29  ;;  %3183 = vmatprep.mubr.bf16.mxu1 %v5168_v15  ;;  %4749 = vmatprep.mubr.msk.bf16.mxu0 %vm2233_vm0, %v5170_v17  ;;  %v2424_v29 = vadd.f32 %v5807_v47, %v5839_v16  ;;  %v5177_v15 = vld [vmem:[%s5405_s9 + $0x168] ss:$52 sps:$4 sm:$0xff]  }
 0x180   : > { %v2429_v17 = vadd.f32 %v5814_v55, %v5839_v16  ;;  %v5178_v24 = vld [vmem:[%s5405_s9 + $0x43c] ss:$52 sps:$4 sm:$0xff]  }
 0x181   : > { %v4261_v23 = vpop.f32.mrb[68].mxu1  ;;  %v4325_v58 = vpop.f32.mrb[68].mxu0 }
 0x182   : > { %v4262_v59 = vpop.f32.mrb[69].mxu1  ;;  %v4326_v27 = vpop.f32.mrb[69].mxu0 }
 0x183   : > { %v4263_v57 = vadd.f32 %v4262_v59, %v4261_v23  ;;  %v4327_v2 = vadd.f32 %v4326_v27, %v4325_v58  ;;  %v4264_v3 = vpop.f32.mrb[70].mxu1  ;;  %v4328_v61 = vpop.f32.mrb[70].mxu0  ;;  %v5180_v23 = vld [vmem:[%s5405_s9 + $0x1d0] ss:$52 sps:$4 sm:$0xff]  }
 0x184   : > { %v4265_v11 = vpop.f32.mrb[71].mxu1  ;;  %v4329_v19 = vpop.f32.mrb[71].mxu0 }
 0x185   : > { %v6068_v25 = vadd.f32 %v4263_v57, %v2421_v50  ;;  %v6071_v4 = vadd.f32 %v4327_v2, %v5931_v46  ;;  %v4266_v51 = vadd.f32 %v4265_v11, %v4264_v3  ;;  %v4330_v38 = vadd.f32 %v4329_v19, %v4328_v61  ;;  %v5181_v61 = vld [vmem:[%s5405_s9 + $0x438] ss:$52 sps:$4 sm:$0xff]  }
 0x186   : > { %3184 = vmatmul.mubr.bf16.gmra.mrb[176].mxu1 %v5171_v13  ;;  %4750 = vmatmul.mubr.msk.bf16.vlgmr.msra.gmra.mrb[176].mxu0 %vm2233_vm0, %v5172_v35 }
 0x187   : > { %v6074_v18 = vadd.f32 %v4266_v51, %v2424_v29  ;;  %v6077_v47 = vadd.f32 %v4330_v38, %v5935_v53  ;;  %3191 = vmatprep.mubr.bf16.mxu1 %v5173_v34  ;;  %4753 = vmatprep.mubr.msk.bf16.mxu0 %vm2233_vm0, %v5175_v52  ;;  %v2432_v53 = vadd.f32 %v5820_v62, %v5839_v16  ;;  %v5182_v34 = vld [vmem:[%s5405_s9 + $0x238] ss:$52 sps:$4 sm:$0xff]  }
 0x188   : > { %v2437_v52 = vadd.f32 %v5826_v6, %v5839_v16  ;;  %v5183_v38 = vld [vmem:[%s5405_s9 + $0x4a4] ss:$52 sps:$4 sm:$0xff]  }
 0x189   : > { %v4267_v40 = vpop.f32.mrb[72].mxu1  ;;  %v4331_v26 = vpop.f32.mrb[72].mxu0 }
 0x18a   : > { %v4268_v42 = vpop.f32.mrb[73].mxu1  ;;  %v4332_v46 = vpop.f32.mrb[73].mxu0 }
 0x18b   : > { %v4269_v8 = vadd.f32 %v4268_v42, %v4267_v40  ;;  %v4333_v41 = vadd.f32 %v4332_v46, %v4331_v26  ;;  %v4270_v44 = vpop.f32.mrb[74].mxu1  ;;  %v4334_v21 = vpop.f32.mrb[74].mxu0  ;;  %v5185_v40 = vld [vmem:[%s5405_s9 + $0x2a0] ss:$52 sps:$4 sm:$0xff]  }
 0x18c   : > { %v4271_v58 = vpop.f32.mrb[75].mxu1  ;;  %v4335_v59 = vpop.f32.mrb[75].mxu0 }
 0x18d   : > { %v6088_v27 = vadd.f32 %v4269_v8, %v2429_v17  ;;  %v6091_v13 = vadd.f32 %v4333_v41, %v5947_v10  ;;  %v4272_v35 = vadd.f32 %v4271_v58, %v4270_v44  ;;  %v4336_v55 = vadd.f32 %v4335_v59, %v4334_v21  ;;  %v5186_v44 = vld [vmem:[%s5405_s9 + $0x4a0] ss:$52 sps:$4 sm:$0xff]   ;;  %v5187_v21 = vld [vmem:[%s5405_s9 + $0x308] ss:$52 sps:$4 sm:$0xff]  }
 0x18e   : > { %3192 = vmatmul.mubr.bf16.gmra.mrb[180].mxu1 %v5176_v39  ;;  %4754 = vmatmul.mubr.msk.bf16.gmra.mrb[180].mxu0 %vm2233_vm0, %v5177_v15  ;;  %v5188_v59 = vld [vmem:[%s5405_s9 + $0x50c] ss:$52 sps:$4 sm:$0xff]  }
 0x18f   : > { %v6094_v50 = vadd.f32 %v4272_v35, %v2432_v53  ;;  %v6097_v62 = vadd.f32 %v4336_v55, %v5951_v12  ;;  %3199 = vmatprep.mubr.bf16.mxu1 %v5178_v24  ;;  %4757 = vmatprep.mubr.msk.bf16.mxu0 %vm2233_vm0, %v5180_v23  ;;  %v2440_v12 = vadd.f32 %v5832_v14, %v5839_v16  ;;  %v5190_v35 = vld [vmem:[%s5405_s9 + $0x370] ss:$52 sps:$4 sm:$0xff]  }
 0x191   : > { %v4273_v57 = vpop.f32.mrb[76].mxu1  ;;  %v4337_v2 = vpop.f32.mrb[76].mxu0 }
 0x192   : > { %v4274_v3 = vpop.f32.mrb[77].mxu1  ;;  %v4338_v10 = vpop.f32.mrb[77].mxu0 }
 0x193   : > { %v4275_v29 = vadd.f32 %v4274_v3, %v4273_v57  ;;  %v4339_v11 = vadd.f32 %v4338_v10, %v4337_v2  ;;  %v4276_v19 = vpop.f32.mrb[78].mxu1  ;;  %v4340_v51 = vpop.f32.mrb[78].mxu0 }
 0x194   : > { %v4277_v26 = vpop.f32.mrb[79].mxu1  ;;  %v4341_v42 = vpop.f32.mrb[79].mxu0 }
 0x195   : > { %v6108_v46 = vadd.f32 %v4275_v29, %v2437_v52  ;;  %v6111_v39 = vadd.f32 %v4339_v11, %v5963_v49  ;;  %v4278_v15 = vadd.f32 %v4277_v26, %v4276_v19  ;;  %v4342_v6 = vadd.f32 %v4341_v42, %v4340_v51  ;;  %v5191_v11 = vld [vmem:[%s5405_s9 + $0x508] ss:$52 sps:$4 sm:$0xff]   ;;  %v5192_v19 = vld [vmem:[%s5405_s9 + $0x3d8] ss:$52 sps:$4 sm:$0xff]   ;;  %v5195_v42 = vld [vmem:[%s5405_s9 + $0x440] ss:$52 sps:$4 sm:$0xff]  }
 0x196   : > { %3200 = vmatmul.mubr.bf16.gmra.mrb[184].mxu1 %v5181_v61  ;;  %4758 = vmatmul.mubr.msk.bf16.gmra.mrb[184].mxu0 %vm2233_vm0, %v5182_v34  ;;  %v5193_v26 = vld [vmem:[%s5405_s9 + $0x574] ss:$52 sps:$4 sm:$0xff]  }
 0x197   : > { %v6114_v17 = vadd.f32 %v4278_v15, %v2440_v12  ;;  %v6117_v14 = vadd.f32 %v4342_v6, %v5967_v43  ;;  %3207 = vmatprep.mubr.bf16.mxu1 %v5183_v38  ;;  %4761 = vmatprep.mubr.msk.bf16.mxu0 %vm2233_vm0, %v5185_v40 }
 0x199   : > { %v4343_v16 = vpop.f32.mrb[80].mxu0  ;;  %v4407_v8 = vpop.f32.mrb[80].mxu1 }
 0x19a   : > { %v4344_v41 = vpop.f32.mrb[81].mxu0  ;;  %v4408_v49 = vpop.f32.mrb[81].mxu1 }
 0x19b   : > { %v4345_v24 = vadd.f32 %v4344_v41, %v4343_v16  ;;  %v4409_v23 = vadd.f32 %v4408_v49, %v4407_v8  ;;  %v4346_v53 = vpop.f32.mrb[82].mxu0  ;;  %v4410_v58 = vpop.f32.mrb[82].mxu1 }
 0x19c   : > { %v4347_v55 = vpop.f32.mrb[83].mxu0  ;;  %v4411_v57 = vpop.f32.mrb[83].mxu1 }
 0x19d   : > { %v6125_v43 = vadd.f32 %v4345_v24, %v5977_v20  ;;  %v6128_v2 = vadd.f32 %v4409_v23, %v5980_v22  ;;  %v4348_v3 = vadd.f32 %v4347_v55, %v4346_v53  ;;  %v4412_v10 = vadd.f32 %v4411_v57, %v4410_v58  ;;  %v5196_v24 = vld [vmem:[%s5405_s9 + $0x570] ss:$52 sps:$4 sm:$0xff]   ;;  %v5197_v23 = vld [vmem:[%s5405_s9 + $0x4a8] ss:$52 sps:$4 sm:$0xff]  }
 0x19e   : > { %3208 = vmatmul.mubr.bf16.gmra.mrb[188].mxu1 %v5186_v44  ;;  %4762 = vmatmul.mubr.msk.bf16.gmra.mrb[188].mxu0 %vm2233_vm0, %v5187_v21  ;;  %v5198_v55 = vld [vmem:[%s5405_s9 + $0x5dc] ss:$52 sps:$4 sm:$0xff]  }
 0x19f   : > { %v6132_v61 = vadd.f32 %v4348_v3, %v5982_v28  ;;  %v6135_v34 = vadd.f32 %v4412_v10, %v5985_v32  ;;  %3215 = vmatprep.mubr.bf16.mxu1 %v5188_v59  ;;  %4765 = vmatprep.mubr.msk.bf16.mxu0 %vm2233_vm0, %v5190_v35  ;;  %v5200_v57 = vld [vmem:[%s5405_s9 + $0x510] ss:$52 sps:$4 sm:$0xff]  }
 0x1a1   : > { %v4349_v20 = vpop.f32.mrb[84].mxu0  ;;  %v4413_v52 = vpop.f32.mrb[84].mxu1 }
 0x1a2   : > { %v4350_v22 = vpop.f32.mrb[85].mxu0  ;;  %v4414_v29 = vpop.f32.mrb[85].mxu1 }
 0x1a3   : > { %v4351_v51 = vadd.f32 %v4350_v22, %v4349_v20  ;;  %v4415_v38 = vadd.f32 %v4414_v29, %v4413_v52  ;;  %v4352_v40 = vpop.f32.mrb[86].mxu0  ;;  %v4416_v12 = vpop.f32.mrb[86].mxu1 }
 0x1a4   : > { %v4353_v28 = vpop.f32.mrb[87].mxu0  ;;  %v4417_v15 = vpop.f32.mrb[87].mxu1 }
 0x1a5   : > { %v6143_v32 = vadd.f32 %v4351_v51, %v5995_v60  ;;  %v6146_v6 = vadd.f32 %v4415_v38, %v5998_v1  ;;  %v4354_v16 = vadd.f32 %v4353_v28, %v4352_v40  ;;  %v4418_v8 = vadd.f32 %v4417_v15, %v4416_v12  ;;  %v5201_v51 = vld [vmem:[%s5405_s9 + $0x5d8] ss:$52 sps:$4 sm:$0xff]   ;;  %v5205_v15 = vld [vmem:[%s5405_s9 + $0x5e0] ss:$52 sps:$4 sm:$0xff]  }
 0x1a6   : > { %3216 = vmatmul.mubr.bf16.gmra.mrb[192].mxu1 %v5191_v11  ;;  %4766 = vmatmul.mubr.msk.bf16.gmra.mrb[192].mxu0 %vm2233_vm0, %v5192_v19  ;;  %v5202_v38 = vld [vmem:[%s5405_s9 + $0x578] ss:$52 sps:$4 sm:$0xff]  }
 0x1a7   : > { %v6150_v41 = vadd.f32 %v4354_v16, %v6000_v54  ;;  %v6153_v49 = vadd.f32 %v4418_v8, %v6003_v0  ;;  %3223 = vmatprep.mubr.bf16.mxu1 %v5193_v26  ;;  %4769 = vmatprep.mubr.msk.bf16.mxu0 %vm2233_vm0, %v5195_v42  ;;  %v5203_v28 = vld [vmem:[%s5405_s9 + $0x644] ss:$52 sps:$4 sm:$0xff]  }
 0x1a9   : > { %v4355_v60 = vpop.f32.mrb[88].mxu0  ;;  %v4419_v44 = vpop.f32.mrb[88].mxu1 }
 0x1aa   : > { %v4356_v1 = vpop.f32.mrb[89].mxu0  ;;  %v4420_v21 = vpop.f32.mrb[89].mxu1 }
 0x1ab   : > { %v4357_v53 = vadd.f32 %v4356_v1, %v4355_v60  ;;  %v4421_v58 = vadd.f32 %v4420_v21, %v4419_v44  ;;  %v4358_v59 = vpop.f32.mrb[90].mxu0  ;;  %v4422_v35 = vpop.f32.mrb[90].mxu1 }
 0x1ac   : > { %v4359_v54 = vpop.f32.mrb[91].mxu0  ;;  %v4423_v3 = vpop.f32.mrb[91].mxu1 }
 0x1ad   : > { %v6161_v0 = vadd.f32 %v4357_v53, %v6013_v33  ;;  %v6164_v10 = vadd.f32 %v4421_v58, %v6016_v36  ;;  %v4360_v20 = vadd.f32 %v4359_v54, %v4358_v59  ;;  %v4424_v52 = vadd.f32 %v4423_v3, %v4422_v35  ;;  %v5207_v58 = vld [vmem:[%s5405_s9 + $0x648] ss:$52 sps:$4 sm:$0xff]  }
 0x1ae   : > { %3224 = vmatmul.mubr.bf16.gmra.mrb[196].mxu1 %v5196_v24  ;;  %4770 = vmatmul.mubr.msk.bf16.gmra.mrb[196].mxu0 %vm2233_vm0, %v5197_v23 }
 0x1af   : > { %v6168_v22 = vadd.f32 %v4360_v20, %v6018_v63  ;;  %v6171_v29 = vadd.f32 %v4424_v52, %v6021_v37  ;;  %3231 = vmatprep.mubr.bf16.mxu1 %v5198_v55  ;;  %4773 = vmatprep.mubr.msk.bf16.mxu0 %vm2233_vm0, %v5200_v57 }
 0x1b1   : > { %v4361_v33 = vpop.f32.mrb[92].mxu0  ;;  %v4425_v11 = vpop.f32.mrb[92].mxu1 }
 0x1b2   : > { %v4362_v36 = vpop.f32.mrb[93].mxu0  ;;  %v4426_v19 = vpop.f32.mrb[93].mxu1 }
 0x1b3   : > { %v4363_v40 = vadd.f32 %v4362_v36, %v4361_v33  ;;  %v4427_v12 = vadd.f32 %v4426_v19, %v4425_v11  ;;  %v4364_v26 = vpop.f32.mrb[94].mxu0  ;;  %v4428_v42 = vpop.f32.mrb[94].mxu1 }
 0x1b4   : > { %v4365_v63 = vpop.f32.mrb[95].mxu0  ;;  %v4429_v16 = vpop.f32.mrb[95].mxu1 }
 0x1b5   : > { %v6179_v37 = vadd.f32 %v4363_v40, %v6031_v5  ;;  %v6182_v8 = vadd.f32 %v4427_v12, %v6034_v7  ;;  %v4366_v60 = vadd.f32 %v4365_v63, %v4364_v26  ;;  %v4430_v44 = vadd.f32 %v4429_v16, %v4428_v42  ;;  %v5206_v7 = vld [vmem:[%s5405_s9 + $0x640] ss:$52 sps:$4 sm:$0xff]   ;;  %s3697_s9 = sshll.u32 %s6540_s16, 3 }
 0x1b6   : > { %3232 = vmatmul.mubr.bf16.gmra.mrb[200].mxu1 %v5201_v51  ;;  %4774 = vmatmul.mubr.msk.bf16.gmra.mrb[200].mxu0 %vm2233_vm0, %v5202_v38  ;;  %s6470_s26 = scalar_lea.vmem %s6538_s3, %s3697_s9 }
 0x1b7   : > { %v6186_v1 = vadd.f32 %v4366_v60, %v6036_v9  ;;  %v6189_v21 = vadd.f32 %v4430_v44, %v6039_v48  ;;  %3239 = vmatprep.mubr.bf16.mxu1 %v5203_v28  ;;  %4777 = vmatprep.mubr.msk.bf16.mxu0 %vm2233_vm0, %v5205_v15 }
 0x1b9   : > { %v4367_v24 = vpop.f32.mrb[96].mxu0  ;;  %v4431_v5 = vpop.f32.mrb[96].mxu1 }
 0x1ba   : > { %v4368_v23 = vpop.f32.mrb[97].mxu0  ;;  %v4432_v53 = vpop.f32.mrb[97].mxu1 }
 0x1bb   : > { %v4369_v59 = vadd.f32 %v4368_v23, %v4367_v24  ;;  %v4433_v35 = vadd.f32 %v4432_v53, %v4431_v5  ;;  %v4370_v55 = vpop.f32.mrb[98].mxu0  ;;  %v4434_v57 = vpop.f32.mrb[98].mxu1 }
 0x1bc   : > { %v4371_v54 = vpop.f32.mrb[99].mxu0  ;;  %v4435_v3 = vpop.f32.mrb[99].mxu1 }
 0x1bd   : > { %v6195_v9 = vadd.f32 %v4369_v59, %v6049_v45  ;;  %v6198_v48 = vadd.f32 %v4433_v35, %v6052_v31  ;;  %v4372_v20 = vadd.f32 %v4371_v54, %v4370_v55  ;;  %v4436_v52 = vadd.f32 %v4435_v3, %v4434_v57 }
 0x1be   : > { %3240 = vmatmul.mubr.bf16.gmra.mrb[204].mxu1 %v5206_v7  ;;  %4778 = vmatmul.mubr.msk.bf16.gmra.mrb[204].mxu0 %vm2233_vm0, %v5207_v58 }
 0x1bf   : > { %v6202_v33 = vadd.f32 %v4372_v20, %v6054_v56  ;;  %v6205_v11 = vadd.f32 %v4436_v52, %v6057_v30 }
 0x1c1   : > { %v4373_v36 = vpop.f32.mrb[100].mxu0  ;;  %v4437_v19 = vpop.f32.mrb[100].mxu1 }
 0x1c2   : > { %v4374_v51 = vpop.f32.mrb[101].mxu0  ;;  %v4438_v38 = vpop.f32.mrb[101].mxu1 }
 0x1c3   : > { %v4375_v45 = vadd.f32 %v4374_v51, %v4373_v36  ;;  %v4439_v40 = vadd.f32 %v4438_v38, %v4437_v19  ;;  %v4376_v12 = vpop.f32.mrb[102].mxu0  ;;  %v4440_v31 = vpop.f32.mrb[102].mxu1 }
 0x1c4   : > { %v4377_v26 = vpop.f32.mrb[103].mxu0  ;;  %v4441_v42 = vpop.f32.mrb[103].mxu1 }
 0x1c5   : > { %v6208_v28 = vadd.f32 %v4375_v45, %v6068_v25  ;;  %v6211_v15 = vadd.f32 %v4439_v40, %v6071_v4  ;;  %v4378_v56 = vadd.f32 %v4377_v26, %v4376_v12  ;;  %v4442_v63 = vadd.f32 %v4441_v42, %v4440_v31 }
 0x1c7   : > { %v6214_v30 = vadd.f32 %v4378_v56, %v6074_v18  ;;  %v6217_v16 = vadd.f32 %v4442_v63, %v6077_v47 }
 0x1c9   : > { %v4379_v60 = vpop.f32.mrb[104].mxu0  ;;  %v4443_v44 = vpop.f32.mrb[104].mxu1 }
 0x1ca   : > { %v4380_v24 = vpop.f32.mrb[105].mxu0  ;;  %v4444_v5 = vpop.f32.mrb[105].mxu1 }
 0x1cb   : > { %v4381_v23 = vadd.f32 %v4380_v24, %v4379_v60  ;;  %v4445_v53 = vadd.f32 %v4444_v5, %v4443_v44  ;;  %v4382_v7 = vpop.f32.mrb[106].mxu0  ;;  %v4446_v25 = vpop.f32.mrb[106].mxu1 }
 0x1cc   : > { %v4383_v58 = vpop.f32.mrb[107].mxu0  ;;  %v4447_v59 = vpop.f32.mrb[107].mxu1 }
 0x1cd   : > { %v6220_v4 = vadd.f32 %v4381_v23, %v6088_v27  ;;  %v6223_v35 = vadd.f32 %v4445_v53, %v6091_v13  ;;  %v4384_v18 = vadd.f32 %v4383_v58, %v4382_v7  ;;  %v4448_v55 = vadd.f32 %v4447_v59, %v4446_v25 }
 0x1cf   : > { %v6226_v47 = vadd.f32 %v4384_v18, %v6094_v50  ;;  %v6229_v57 = vadd.f32 %v4448_v55, %v6097_v62 }
 0x1d1   : > { %v4385_v54 = vpop.f32.mrb[108].mxu0  ;;  %v4449_v3 = vpop.f32.mrb[108].mxu1 }
 0x1d2   : > { %v4386_v20 = vpop.f32.mrb[109].mxu0  ;;  %v4450_v52 = vpop.f32.mrb[109].mxu1 }
 0x1d3   : > { %v4387_v36 = vadd.f32 %v4386_v20, %v4385_v54  ;;  %v4451_v19 = vadd.f32 %v4450_v52, %v4449_v3  ;;  %v4388_v51 = vpop.f32.mrb[110].mxu0  ;;  %v4452_v27 = vpop.f32.mrb[110].mxu1 }
 0x1d4   : > { %v4389_v38 = vpop.f32.mrb[111].mxu0  ;;  %v4453_v45 = vpop.f32.mrb[111].mxu1 }
 0x1d5   : > { %v6232_v13 = vadd.f32 %v4387_v36, %v6108_v46  ;;  %v6235_v40 = vadd.f32 %v4451_v19, %v6111_v39  ;;  %v4390_v50 = vadd.f32 %v4389_v38, %v4388_v51  ;;  %v4454_v12 = vadd.f32 %v4453_v45, %v4452_v27 }
 0x1d7   : > { %v6238_v62 = vadd.f32 %v4390_v50, %v6114_v17  ;;  %v6241_v31 = vadd.f32 %v4454_v12, %v6117_v14 }
 0x1d9   : > { %v4455_v26 = vpop.f32.mrb[112].mxu1  ;;  %v4519_v42 = vpop.f32.mrb[112].mxu0 }
 0x1da   : > { %v4456_v56 = vpop.f32.mrb[113].mxu1  ;;  %v4520_v63 = vpop.f32.mrb[113].mxu0 }
 0x1db   : > { %v4457_v60 = vadd.f32 %v4456_v56, %v4455_v26  ;;  %v4521_v44 = vadd.f32 %v4520_v63, %v4519_v42  ;;  %v4458_v24 = vpop.f32.mrb[114].mxu1  ;;  %v4522_v46 = vpop.f32.mrb[114].mxu0 }
 0x1dc   : > { %v4459_v5 = vpop.f32.mrb[115].mxu1  ;;  %v4523_v23 = vpop.f32.mrb[115].mxu0 }
 0x1dd   : > { %v6244_v39 = vadd.f32 %v4457_v60, %v6125_v43  ;;  %v6247_v53 = vadd.f32 %v4521_v44, %v6128_v2  ;;  %v4460_v17 = vadd.f32 %v4459_v5, %v4458_v24  ;;  %v4524_v7 = vadd.f32 %v4523_v23, %v4522_v46 }
 0x1df   : > { %v6250_v14 = vadd.f32 %v4460_v17, %v6132_v61  ;;  %v6253_v25 = vadd.f32 %v4524_v7, %v6135_v34 }
 0x1e1   : > { %v4461_v58 = vpop.f32.mrb[116].mxu1  ;;  %v4525_v59 = vpop.f32.mrb[116].mxu0 }
 0x1e2   : > { %v4462_v18 = vpop.f32.mrb[117].mxu1  ;;  %v4526_v55 = vpop.f32.mrb[117].mxu0 }
 0x1e3   : > { %v4463_v54 = vadd.f32 %v4462_v18, %v4461_v58  ;;  %v4527_v3 = vadd.f32 %v4526_v55, %v4525_v59  ;;  %v4464_v20 = vpop.f32.mrb[118].mxu1  ;;  %v4528_v43 = vpop.f32.mrb[118].mxu0 }
 0x1e4   : > { %v4465_v52 = vpop.f32.mrb[119].mxu1  ;;  %v4529_v36 = vpop.f32.mrb[119].mxu0 }
 0x1e5   : > { %v6256_v2 = vadd.f32 %v4463_v54, %v6143_v32  ;;  %v6259_v19 = vadd.f32 %v4527_v3, %v6146_v6  ;;  %v4466_v61 = vadd.f32 %v4465_v52, %v4464_v20  ;;  %v4530_v51 = vadd.f32 %v4529_v36, %v4528_v43 }
 0x1e7   : > { %v6262_v34 = vadd.f32 %v4466_v61, %v6150_v41  ;;  %v6265_v27 = vadd.f32 %v4530_v51, %v6153_v49 }
 0x1e9   : > { %v4467_v38 = vpop.f32.mrb[120].mxu1  ;;  %v4531_v45 = vpop.f32.mrb[120].mxu0 }
 0x1ea   : > { %v4468_v50 = vpop.f32.mrb[121].mxu1  ;;  %v4532_v12 = vpop.f32.mrb[121].mxu0 }
 0x1eb   : > { %v4469_v26 = vadd.f32 %v4468_v50, %v4467_v38  ;;  %v4533_v42 = vadd.f32 %v4532_v12, %v4531_v45  ;;  %v4470_v56 = vpop.f32.mrb[122].mxu1  ;;  %v4534_v32 = vpop.f32.mrb[122].mxu0 }
 0x1ec   : > { %v4471_v63 = vpop.f32.mrb[123].mxu1  ;;  %v4535_v60 = vpop.f32.mrb[123].mxu0 }
 0x1ed   : > { %v6268_v6 = vadd.f32 %v4469_v26, %v6161_v0  ;;  %v6271_v44 = vadd.f32 %v4533_v42, %v6164_v10  ;;  %v4472_v41 = vadd.f32 %v4471_v63, %v4470_v56  ;;  %v4536_v24 = vadd.f32 %v4535_v60, %v4534_v32 }
 0x1ef   : > { %v6274_v49 = vadd.f32 %v4472_v41, %v6168_v22  ;;  %v6277_v46 = vadd.f32 %v4536_v24, %v6171_v29 }
 0x1f1   : > { %v4473_v5 = vpop.f32.mrb[124].mxu1  ;;  %v4537_v23 = vpop.f32.mrb[124].mxu0 }
 0x1f2   : > { %v4474_v17 = vpop.f32.mrb[125].mxu1  ;;  %v4538_v7 = vpop.f32.mrb[125].mxu0 }
 0x1f3   : > { %v4475_v58 = vadd.f32 %v4474_v17, %v4473_v5  ;;  %v4539_v59 = vadd.f32 %v4538_v7, %v4537_v23  ;;  %v4476_v18 = vpop.f32.mrb[126].mxu1  ;;  %v4540_v0 = vpop.f32.mrb[126].mxu0 }
 0x1f4   : > { %v4477_v55 = vpop.f32.mrb[127].mxu1  ;;  %v4541_v54 = vpop.f32.mrb[127].mxu0 }
 0x1f5   : > { %v6280_v10 = vadd.f32 %v4475_v58, %v6179_v37  ;;  %v6283_v3 = vadd.f32 %v4539_v59, %v6182_v8  ;;  %v4478_v22 = vadd.f32 %v4477_v55, %v4476_v18  ;;  %v4542_v20 = vadd.f32 %v4541_v54, %v4540_v0 }
 0x1f7   : > { %v6286_v29 = vadd.f32 %v4478_v22, %v6186_v1  ;;  %v6289_v43 = vadd.f32 %v4542_v20, %v6189_v21 }
 0x1f9   : > { %v4479_v52 = vpop.f32.mrb[128].mxu1  ;;  %v4543_v36 = vpop.f32.mrb[128].mxu0 }
 0x1fa   : > { %v4480_v61 = vpop.f32.mrb[129].mxu1  ;;  %v4544_v51 = vpop.f32.mrb[129].mxu0 }
 0x1fb   : > { %v4481_v38 = vadd.f32 %v4480_v61, %v4479_v52  ;;  %v4545_v45 = vadd.f32 %v4544_v51, %v4543_v36  ;;  %v4482_v50 = vpop.f32.mrb[130].mxu1  ;;  %v4546_v37 = vpop.f32.mrb[130].mxu0 }
 0x1fc   : > { %v4483_v12 = vpop.f32.mrb[131].mxu1  ;;  %v4547_v26 = vpop.f32.mrb[131].mxu0 }
 0x1fd   : > { %v6292_v8 = vadd.f32 %v4481_v38, %v6195_v9  ;;  %v6295_v42 = vadd.f32 %v4545_v45, %v6198_v48  ;;  %v4484_v1 = vadd.f32 %v4483_v12, %v4482_v50  ;;  %v4548_v56 = vadd.f32 %v4547_v26, %v4546_v37 }
 0x1ff   : > { %v6298_v21 = vadd.f32 %v4484_v1, %v6202_v33  ;;  %v6301_v32 = vadd.f32 %v4548_v56, %v6205_v11 }
 0x201   : > { %v4485_v63 = vpop.f32.mrb[132].mxu1  ;;  %v4549_v60 = vpop.f32.mrb[132].mxu0 }
 0x202   : > { %v4486_v41 = vpop.f32.mrb[133].mxu1  ;;  %v4550_v24 = vpop.f32.mrb[133].mxu0 }
 0x203   : > { %v4487_v5 = vadd.f32 %v4486_v41, %v4485_v63  ;;  %v4551_v23 = vadd.f32 %v4550_v24, %v4549_v60  ;;  %v4488_v17 = vpop.f32.mrb[134].mxu1  ;;  %v4552_v9 = vpop.f32.mrb[134].mxu0 }
 0x204   : > { %v4489_v7 = vpop.f32.mrb[135].mxu1  ;;  %v4553_v58 = vpop.f32.mrb[135].mxu0 }
 0x205   : > { %v6304_v48 = vadd.f32 %v4487_v5, %v6208_v28  ;;  %v6307_v59 = vadd.f32 %v4551_v23, %v6211_v15  ;;  %v4490_v33 = vadd.f32 %v4489_v7, %v4488_v17  ;;  %v4554_v18 = vadd.f32 %v4553_v58, %v4552_v9 }
 0x207   : > { %v6310_v11 = vadd.f32 %v4490_v33, %v6214_v30  ;;  %v6313_v0 = vadd.f32 %v4554_v18, %v6217_v16 }
 0x209   : > { %v4491_v55 = vpop.f32.mrb[136].mxu1  ;;  %v4555_v54 = vpop.f32.mrb[136].mxu0 }
 0x20a   : > { %v4492_v22 = vpop.f32.mrb[137].mxu1  ;;  %v4556_v20 = vpop.f32.mrb[137].mxu0 }
 0x20b   : > { %v4493_v52 = vadd.f32 %v4492_v22, %v4491_v55  ;;  %v4557_v36 = vadd.f32 %v4556_v20, %v4555_v54  ;;  %v4494_v61 = vpop.f32.mrb[138].mxu1  ;;  %v4558_v28 = vpop.f32.mrb[138].mxu0 }
 0x20c   : > { %v4495_v51 = vpop.f32.mrb[139].mxu1  ;;  %v4559_v38 = vpop.f32.mrb[139].mxu0 }
 0x20d   : > { %v6316_v15 = vadd.f32 %v4493_v52, %v6220_v4  ;;  %v6319_v45 = vadd.f32 %v4557_v36, %v6223_v35  ;;  %v4496_v30 = vadd.f32 %v4495_v51, %v4494_v61  ;;  %v4560_v50 = vadd.f32 %v4559_v38, %v4558_v28 }
 0x20f   : > { %v6322_v16 = vadd.f32 %v4496_v30, %v6226_v47  ;;  %v6325_v37 = vadd.f32 %v4560_v50, %v6229_v57 }
 0x211   : > { %v4497_v12 = vpop.f32.mrb[140].mxu1  ;;  %v4561_v26 = vpop.f32.mrb[140].mxu0 }
 0x212   : > { %v4498_v1 = vpop.f32.mrb[141].mxu1  ;;  %v4562_v56 = vpop.f32.mrb[141].mxu0 }
 0x213   : > { %v4499_v63 = vadd.f32 %v4498_v1, %v4497_v12  ;;  %v4563_v60 = vadd.f32 %v4562_v56, %v4561_v26  ;;  %v4500_v41 = vpop.f32.mrb[142].mxu1  ;;  %v4564_v4 = vpop.f32.mrb[142].mxu0 }
 0x214   : > { %v4501_v24 = vpop.f32.mrb[143].mxu1  ;;  %v4565_v5 = vpop.f32.mrb[143].mxu0 }
 0x215   : > { %v6328_v35 = vadd.f32 %v4499_v63, %v6232_v13  ;;  %v6331_v23 = vadd.f32 %v4563_v60, %v6235_v40  ;;  %v4502_v47 = vadd.f32 %v4501_v24, %v4500_v41  ;;  %v4566_v17 = vadd.f32 %v4565_v5, %v4564_v4 }
 0x217   : > { %v6334_v57 = vadd.f32 %v4502_v47, %v6238_v62  ;;  %v6337_v9 = vadd.f32 %v4566_v17, %v6241_v31 }
 0x219   : > { %v4567_v7 = vpop.f32.mrb[144].mxu0  ;;  %v4631_v58 = vpop.f32.mrb[144].mxu1 }
 0x21a   : > { %v4568_v33 = vpop.f32.mrb[145].mxu0  ;;  %v4632_v18 = vpop.f32.mrb[145].mxu1 }
 0x21b   : > { %v4569_v55 = vadd.f32 %v4568_v33, %v4567_v7  ;;  %v4633_v54 = vadd.f32 %v4632_v18, %v4631_v58  ;;  %v4570_v22 = vpop.f32.mrb[146].mxu0  ;;  %v4634_v13 = vpop.f32.mrb[146].mxu1 }
 0x21c   : > { %v4571_v20 = vpop.f32.mrb[147].mxu0  ;;  %v4635_v52 = vpop.f32.mrb[147].mxu1 }
 0x21d   : > { %v6340_v40 = vadd.f32 %v4569_v55, %v6244_v39  ;;  %v4572_v36 = vadd.f32 %v4571_v20, %v4570_v22  ;;  %v4636_v61 = vadd.f32 %v4635_v52, %v4634_v13  ;;  %v6343_v62 = vadd.f32 %v4633_v54, %v6247_v53 }
 0x21f   : > { %v6346_v31 = vadd.f32 %v4572_v36, %v6250_v14  ;;  %v6349_v28 = vadd.f32 %v4636_v61, %v6253_v25 }
 0x221   : > { %v4573_v51 = vpop.f32.mrb[148].mxu0  ;;  %v4637_v38 = vpop.f32.mrb[148].mxu1 }
 0x222   : > { %v4574_v30 = vpop.f32.mrb[149].mxu0  ;;  %v4638_v50 = vpop.f32.mrb[149].mxu1 }
 0x223   : > { %v4575_v12 = vadd.f32 %v4574_v30, %v4573_v51  ;;  %v4639_v26 = vadd.f32 %v4638_v50, %v4637_v38  ;;  %v4576_v1 = vpop.f32.mrb[150].mxu0  ;;  %v4640_v39 = vpop.f32.mrb[150].mxu1 }
 0x224   : > { %v4577_v56 = vpop.f32.mrb[151].mxu0  ;;  %v4641_v63 = vpop.f32.mrb[151].mxu1 }
 0x225   : > { %v6352_v60 = vadd.f32 %v4575_v12, %v6256_v2  ;;  %v4578_v53 = vadd.f32 %v4577_v56, %v4576_v1  ;;  %v4642_v41 = vadd.f32 %v4641_v63, %v4640_v39  ;;  %v6355_v14 = vadd.f32 %v4639_v26, %v6259_v19 }
 0x227   : > { %v6358_v25 = vadd.f32 %v4578_v53, %v6262_v34  ;;  %v6361_v4 = vadd.f32 %v4642_v41, %v6265_v27 }
 0x229   : > { %v4579_v24 = vpop.f32.mrb[152].mxu0  ;;  %v4643_v5 = vpop.f32.mrb[152].mxu1 }
 0x22a   : > { %v4580_v47 = vpop.f32.mrb[153].mxu0  ;;  %v4644_v17 = vpop.f32.mrb[153].mxu1 }
 0x22b   : > { %v4581_v7 = vadd.f32 %v4580_v47, %v4579_v24  ;;  %v4645_v58 = vadd.f32 %v4644_v17, %v4643_v5  ;;  %v4582_v33 = vpop.f32.mrb[154].mxu0  ;;  %v4646_v2 = vpop.f32.mrb[154].mxu1 }
 0x22c   : > { %v4583_v18 = vpop.f32.mrb[155].mxu0  ;;  %v4647_v55 = vpop.f32.mrb[155].mxu1 }
 0x22d   : > { %v6364_v54 = vadd.f32 %v4581_v7, %v6268_v6  ;;  %v4584_v19 = vadd.f32 %v4583_v18, %v4582_v33  ;;  %v4648_v22 = vadd.f32 %v4647_v55, %v4646_v2  ;;  %v6367_v34 = vadd.f32 %v4645_v58, %v6271_v44 }
 0x22f   : > { %v6370_v27 = vadd.f32 %v4584_v19, %v6274_v49  ;;  %v6373_v13 = vadd.f32 %v4648_v22, %v6277_v46 }
 0x231   : > { %v4585_v20 = vpop.f32.mrb[156].mxu0  ;;  %v4649_v52 = vpop.f32.mrb[156].mxu1 }
 0x232   : > { %v4586_v36 = vpop.f32.mrb[157].mxu0  ;;  %v4650_v61 = vpop.f32.mrb[157].mxu1 }
 0x233   : > { %v4587_v51 = vadd.f32 %v4586_v36, %v4585_v20  ;;  %v4651_v38 = vadd.f32 %v4650_v61, %v4649_v52  ;;  %v4588_v30 = vpop.f32.mrb[158].mxu0  ;;  %v4652_v6 = vpop.f32.mrb[158].mxu1 }
 0x234   : > { %v4589_v50 = vpop.f32.mrb[159].mxu0  ;;  %v4653_v12 = vpop.f32.mrb[159].mxu1 }
 0x235   : > { %v6376_v26 = vadd.f32 %v4587_v51, %v6280_v10  ;;  %v4590_v44 = vadd.f32 %v4589_v50, %v4588_v30  ;;  %v4654_v1 = vadd.f32 %v4653_v12, %v4652_v6  ;;  %v6379_v49 = vadd.f32 %v4651_v38, %v6283_v3 }
 0x237   : > { %v6382_v46 = vadd.f32 %v4590_v44, %v6286_v29  ;;  %v6385_v39 = vadd.f32 %v4654_v1, %v6289_v43 }
 0x239   : > { %v4591_v56 = vpop.f32.mrb[160].mxu0  ;;  %v4655_v63 = vpop.f32.mrb[160].mxu1 }
 0x23a   : > { %v4592_v53 = vpop.f32.mrb[161].mxu0  ;;  %v4656_v41 = vpop.f32.mrb[161].mxu1 }
 0x23b   : > { %v4593_v24 = vadd.f32 %v4592_v53, %v4591_v56  ;;  %v4657_v5 = vadd.f32 %v4656_v41, %v4655_v63  ;;  %v4594_v47 = vpop.f32.mrb[162].mxu0  ;;  %v4658_v10 = vpop.f32.mrb[162].mxu1 }
 0x23c   : > { %v4595_v17 = vpop.f32.mrb[163].mxu0  ;;  %v4659_v7 = vpop.f32.mrb[163].mxu1 }
 0x23d   : > { %v6388_v58 = vadd.f32 %v4593_v24, %v6292_v8  ;;  %v4596_v3 = vadd.f32 %v4595_v17, %v4594_v47  ;;  %v4660_v33 = vadd.f32 %v4659_v7, %v4658_v10  ;;  %v6391_v29 = vadd.f32 %v4657_v5, %v6295_v42 }
 0x23f   : > { %v6394_v43 = vadd.f32 %v4596_v3, %v6298_v21  ;;  %v6397_v2 = vadd.f32 %v4660_v33, %v6301_v32 }
 0x241   : > { %v4597_v18 = vpop.f32.mrb[164].mxu0  ;;  %v4661_v55 = vpop.f32.mrb[164].mxu1 }
 0x242   : > { %v4598_v19 = vpop.f32.mrb[165].mxu0  ;;  %v4662_v22 = vpop.f32.mrb[165].mxu1 }
 0x243   : > { %v4599_v20 = vadd.f32 %v4598_v19, %v4597_v18  ;;  %v4663_v52 = vadd.f32 %v4662_v22, %v4661_v55  ;;  %v4600_v36 = vpop.f32.mrb[166].mxu0  ;;  %v4664_v8 = vpop.f32.mrb[166].mxu1 }
 0x244   : > { %v4601_v61 = vpop.f32.mrb[167].mxu0  ;;  %v4665_v51 = vpop.f32.mrb[167].mxu1 }
 0x245   : > { %v6400_v38 = vadd.f32 %v4599_v20, %v6304_v48  ;;  %v4602_v42 = vadd.f32 %v4601_v61, %v4600_v36  ;;  %v4666_v30 = vadd.f32 %v4665_v51, %v4664_v8  ;;  %v6403_v21 = vadd.f32 %v4663_v52, %v6307_v59 }
 0x247   : > { %v6406_v32 = vadd.f32 %v4602_v42, %v6310_v11  ;;  %v6409_v6 = vadd.f32 %v4666_v30, %v6313_v0 }
 0x249   : > { %v4603_v50 = vpop.f32.mrb[168].mxu0  ;;  %v4667_v12 = vpop.f32.mrb[168].mxu1 }
 0x24a   : > { %v4604_v44 = vpop.f32.mrb[169].mxu0  ;;  %v4668_v1 = vpop.f32.mrb[169].mxu1 }
 0x24b   : > { %v4605_v56 = vadd.f32 %v4604_v44, %v4603_v50  ;;  %v4669_v63 = vadd.f32 %v4668_v1, %v4667_v12  ;;  %v4606_v53 = vpop.f32.mrb[170].mxu0  ;;  %v4670_v48 = vpop.f32.mrb[170].mxu1 }
 0x24c   : > { %v4607_v41 = vpop.f32.mrb[171].mxu0  ;;  %v4671_v24 = vpop.f32.mrb[171].mxu1 }
 0x24d   : > { %v6412_v5 = vadd.f32 %v4605_v56, %v6316_v15  ;;  %v4608_v59 = vadd.f32 %v4607_v41, %v4606_v53  ;;  %v4672_v47 = vadd.f32 %v4671_v24, %v4670_v48  ;;  %v6415_v11 = vadd.f32 %v4669_v63, %v6319_v45 }
 0x24f   : > { %v6418_v0 = vadd.f32 %v4608_v59, %v6322_v16  ;;  %v6421_v10 = vadd.f32 %v4672_v47, %v6325_v37 }
 0x251   : > { %v4609_v17 = vpop.f32.mrb[172].mxu0  ;;  %v4673_v7 = vpop.f32.mrb[172].mxu1 }
 0x252   : > { %v4610_v3 = vpop.f32.mrb[173].mxu0  ;;  %v4674_v33 = vpop.f32.mrb[173].mxu1 }
 0x253   : > { %v4611_v18 = vadd.f32 %v4610_v3, %v4609_v17  ;;  %v4675_v55 = vadd.f32 %v4674_v33, %v4673_v7  ;;  %v4612_v19 = vpop.f32.mrb[174].mxu0  ;;  %v4676_v15 = vpop.f32.mrb[174].mxu1 }
 0x254   : > { %v4613_v22 = vpop.f32.mrb[175].mxu0  ;;  %v4677_v20 = vpop.f32.mrb[175].mxu1 }
 0x255   : > { %v6424_v52 = vadd.f32 %v4611_v18, %v6328_v35  ;;  %v4614_v45 = vadd.f32 %v4613_v22, %v4612_v19  ;;  %v4678_v36 = vadd.f32 %v4677_v20, %v4676_v15  ;;  %v6427_v16 = vadd.f32 %v4675_v55, %v6331_v23 }
 0x257   : > { %v6430_v37 = vadd.f32 %v4614_v45, %v6334_v57  ;;  %v6433_v8 = vadd.f32 %v4678_v36, %v6337_v9 }
 0x259   : > { %v4679_v61 = vpop.f32.mrb[176].mxu1  ;;  %v4751_v51 = vpop.f32.mrb[176].mxu0 }
 0x25a   : > { %v3291_v42 = vadd.f32 %v4751_v51, %v6355_v14  ;;  %v4680_v30 = vpop.f32.mrb[177].mxu1  ;;  %v3282_v50 = vpop.f32.mrb[177].mxu0 }
 0x25b   : > { %v4681_v12 = vadd.f32 %v4680_v30, %v4679_v61  ;;  %v3283_v35 = vadd.f32 %v3282_v50, %v6343_v62  ;;  %v4682_v44 = vpop.f32.mrb[178].mxu1  ;;  %v4752_v1 = vpop.f32.mrb[178].mxu0 }
 0x25c   : > { %v4023_v56 = vmul.f32 -1.442695, %v3291_v42  ;;  %v3294_v23 = vadd.f32 %v4752_v1, %v6361_v4  ;;  %v4683_v63 = vpop.f32.mrb[179].mxu1  ;;  %v3285_v57 = vpop.f32.mrb[179].mxu0 }
 0x25d   : > { %v4021_v53 = vmul.f32 -1.442695, %v3283_v35  ;;  %v4684_v48 = vadd.f32 %v4683_v63, %v4682_v44  ;;  %v3286_v9 = vadd.f32 %v3285_v57, %v6349_v28  ;;  %v6440_v41 = vadd.f32 %v4681_v12, %v6340_v40 }
 0x25e   : > { %5208 = vpow2.f32 %v4023_v56  ;;  %v4024_v14 = vmul.f32 -1.442695, %v3294_v23 }
 0x25f   : > { %5210 = vpow2.f32 %v4021_v53  ;;  %v4022_v24 = vmul.f32 -1.442695, %v3286_v9  ;;  %v6443_v62 = vadd.f32 %v4684_v48, %v6346_v31 }
 0x260   : > { %5212 = vpow2.f32 %v4024_v14 }
 0x261   : > { %5214 = vpow2.f32 %v4022_v24  ;;  %v4685_v59 = vpop.f32.mrb[180].mxu1  ;;  %v4755_v4 = vpop.f32.mrb[180].mxu0 }
 0x262   : > { %v3307_v47 = vadd.f32 %v4755_v4, %v6379_v49  ;;  %v4686_v17 = vpop.f32.mrb[181].mxu1  ;;  %v3298_v7 = vpop.f32.mrb[181].mxu0 }
 0x263   : > { %v4687_v3 = vadd.f32 %v4686_v17, %v4685_v59  ;;  %v3299_v28 = vadd.f32 %v3298_v7, %v6367_v34  ;;  %v4688_v40 = vpop.f32.mrb[182].mxu1  ;;  %v4756_v33 = vpop.f32.mrb[182].mxu0 }
 0x264   : > { %v4027_v18 = vmul.f32 -1.442695, %v3307_v47  ;;  %v3310_v55 = vadd.f32 %v4756_v33, %v6385_v39  ;;  %v4689_v19 = vpop.f32.mrb[183].mxu1  ;;  %v3301_v15 = vpop.f32.mrb[183].mxu0 }
 0x265   : > { %v4025_v31 = vmul.f32 -1.442695, %v3299_v28  ;;  %v4690_v22 = vadd.f32 %v4689_v19, %v4688_v40  ;;  %v3302_v20 = vadd.f32 %v3301_v15, %v6373_v13  ;;  %v6450_v45 = vadd.f32 %v4687_v3, %v6352_v60 }
 0x266   : > { %5216 = vpow2.f32 %v4027_v18  ;;  %v4028_v49 = vmul.f32 -1.442695, %v3310_v55 }
 0x267   : > { %5218 = vpow2.f32 %v4025_v31  ;;  %v4026_v36 = vmul.f32 -1.442695, %v3302_v20  ;;  %v6453_v34 = vadd.f32 %v4690_v22, %v6358_v25 }
 0x268   : > { %v5209_v61 = vpop.eup %5208  ;;  %5220 = vpow2.f32 %v4028_v49 }
 0x269   : > { %v5211_v51 = vpop.eup %5210  ;;  %v3507_v39 = vadd.f32 1.0, %v5209_v61  ;;  %5222 = vpow2.f32 %v4026_v36  ;;  %v4691_v42 = vpop.f32.mrb[184].mxu1 }
 0x26a   : > { %v4759_v30 = vpop.f32.mrb[184].mxu0  ;;  %v5213_v50 = vpop.eup %5212  ;;  %v3505_v12 = vadd.f32 1.0, %v5211_v51 }
 0x26b   : > { %v3323_v13 = vadd.f32 %v4759_v30, %v6403_v21  ;;  %v4692_v60 = vpop.f32.mrb[185].mxu1  ;;  %v3314_v35 = vpop.f32.mrb[185].mxu0  ;;  %5224 = vrcp.f32 %v3507_v39  ;;  %v3508_v1 = vadd.f32 1.0, %v5213_v50 }
 0x26c   : > { %v5215_v44 = vpop.eup %5214  ;;  %v4693_v56 = vadd.f32 %v4692_v60, %v4691_v42  ;;  %v3315_v25 = vadd.f32 %v3314_v35, %v6391_v29  ;;  %v4694_v23 = vpop.f32.mrb[186].mxu1  ;;  %5226 = vrcp.f32 %v3505_v12 }
 0x26d   : > { %v4760_v63 = vpop.f32.mrb[186].mxu0  ;;  %v3506_v57 = vadd.f32 1.0, %v5215_v44  ;;  %v4031_v53 = vmul.f32 -1.442695, %v3323_v13  ;;  %v4695_v9 = vpop.f32.mrb[187].mxu1  ;;  %5228 = vrcp.f32 %v3508_v1 }
 0x26e   : > { %v3326_v48 = vadd.f32 %v4760_v63, %v6409_v6  ;;  %v3317_v14 = vpop.f32.mrb[187].mxu0  ;;  %v4029_v21 = vmul.f32 -1.442695, %v3315_v25  ;;  %v4696_v24 = vadd.f32 %v4695_v9, %v4694_v23  ;;  %v6460_v47 = vadd.f32 %v4693_v56, %v6364_v54 }
 0x26f   : > { %v3318_v59 = vadd.f32 %v3317_v14, %v6397_v2  ;;  %5230 = vrcp.f32 %v3506_v57 }
 0x270   : > { %v4032_v4 = vmul.f32 -1.442695, %v3326_v48  ;;  %5232 = vpow2.f32 %v4031_v53  ;;  %v6463_v17 = vadd.f32 %v4696_v24, %v6370_v27  ;;  %v5217_v7 = vpop.eup %5216 }
 0x271   : > { %v4030_v29 = vmul.f32 -1.442695, %v3318_v59  ;;  %5234 = vpow2.f32 %v4029_v21  ;;  %v5219_v6 = vpop.eup %5218  ;;  %v3511_v3 = vadd.f32 1.0, %v5217_v7  ;;  %v4697_v28 = vpop.f32.mrb[188].mxu1 }
 0x272   : > { %5236 = vpow2.f32 %v4032_v4  ;;  %v4763_v40 = vpop.f32.mrb[188].mxu0  ;;  %v5221_v33 = vpop.eup %5220  ;;  %v3509_v2 = vadd.f32 1.0, %v5219_v6 }
 0x273   : > { %5238 = vpow2.f32 %v4030_v29  ;;  %v3339_v18 = vadd.f32 %v4763_v40, %v6427_v16  ;;  %v4698_v54 = vpop.f32.mrb[189].mxu1  ;;  %v3330_v55 = vpop.f32.mrb[189].mxu0  ;;  %v3512_v27 = vadd.f32 1.0, %v5221_v33 }
 0x274   : > { %v5223_v19 = vpop.eup %5222  ;;  %5240 = vrcp.f32 %v3511_v3  ;;  %v4699_v15 = vadd.f32 %v4698_v54, %v4697_v28  ;;  %v3331_v31 = vadd.f32 %v3330_v55, %v6415_v11  ;;  %v4700_v22 = vpop.f32.mrb[190].mxu1 }
 0x275   : > { %v4764_v20 = vpop.f32.mrb[190].mxu0  ;;  %5242 = vrcp.f32 %v3509_v2  ;;  %v3510_v49 = vadd.f32 1.0, %v5223_v19  ;;  %v4035_v16 = vmul.f32 -1.442695, %v3339_v18  ;;  %v4701_v61 = vpop.f32.mrb[191].mxu1 }
 0x276   : > { %v3342_v36 = vadd.f32 %v4764_v20, %v6433_v8  ;;  %v3333_v51 = vpop.f32.mrb[191].mxu0  ;;  %v5225_v39 = vpop.eup %5224  ;;  %5244 = vrcp.f32 %v3512_v27  ;;  %v4033_v42 = vmul.f32 -1.442695, %v3331_v31  ;;  %v4702_v30 = vadd.f32 %v4701_v61, %v4700_v22 }
 0x277   : > { %v3334_v50 = vadd.f32 %v3333_v51, %v6421_v10  ;;  %v5227_v12 = vpop.eup %5226  ;;  %3603 = vst [vmem:[%s6470_s26 + $0x10] sm:$0xff] %v5225_v39  ;;  %5246 = vrcp.f32 %v3510_v49  ;;  %v3210_v13 = vadd.f32 %v4699_v15, %v6376_v26 }
 0x278   : > { %v4036_v11 = vmul.f32 -1.442695, %v3342_v36  ;;  %v5229_v60 = vpop.eup %5228  ;;  %3601 = vst [vmem:[%s6470_s26] sm:$0xff] %v5227_v12  ;;  %5248 = vpow2.f32 %v4035_v16  ;;  %v6479_v35 = vadd.f32 %v4702_v30, %v6382_v46 }
 0x279   : > { %v4034_v8 = vmul.f32 -1.442695, %v3334_v50  ;;  %v5231_v44 = vpop.eup %5230  ;;  %3604 = vst [vmem:[%s6470_s26 + $0x18] sm:$0xff] %v5229_v60  ;;  %5250 = vpow2.f32 %v4033_v42  ;;  %v4703_v10 = vpop.f32.mrb[192].mxu1 }
 0x27a   : > { %v5233_v1 = vpop.eup %5232  ;;  %3602 = vst [vmem:[%s6470_s26 + $0x8] sm:$0xff] %v5231_v44  ;;  %5252 = vpow2.f32 %v4036_v11  ;;  %v4767_v56 = vpop.f32.mrb[192].mxu0 }
 0x27b   : > { %v5235_v25 = vpop.eup %5234  ;;  %v3515_v23 = vadd.f32 1.0, %v5233_v1  ;;  %5254 = vpow2.f32 %v4034_v8  ;;  %v3355_v26 = vadd.f32 %v4767_v56, %v6450_v45  ;;  %v4704_v63 = vpop.f32.mrb[193].mxu1 }
 0x27c   : > { %v3346_v57 = vpop.f32.mrb[193].mxu0  ;;  %v5237_v53 = vpop.eup %5236  ;;  %v3513_v48 = vadd.f32 1.0, %v5235_v25  ;;  %v4705_v9 = vadd.f32 %v4704_v63, %v4703_v10 }
 0x27d   : > { %v3347_v46 = vadd.f32 %v3346_v57, %v6440_v41  ;;  %v4706_v14 = vpop.f32.mrb[194].mxu1  ;;  %v4768_v21 = vpop.f32.mrb[194].mxu0  ;;  %5256 = vrcp.f32 %v3515_v23  ;;  %v3516_v59 = vadd.f32 1.0, %v5237_v53  ;;  %v4039_v4 = vmul.f32 -1.442695, %v3355_v26 }
 0x27e   : > { %v5239_v24 = vpop.eup %5238  ;;  %v3358_v29 = vadd.f32 %v4768_v21, %v6453_v34  ;;  %v4707_v7 = vpop.f32.mrb[195].mxu1  ;;  %5258 = vrcp.f32 %v3513_v48  ;;  %v6489_v18 = vadd.f32 %v4705_v9, %v6388_v58 }
 0x27f   : > { %v3349_v6 = vpop.f32.mrb[195].mxu0  ;;  %v5241_v45 = vpop.eup %5240  ;;  %v3514_v3 = vadd.f32 1.0, %v5239_v24  ;;  %v4037_v28 = vmul.f32 -1.442695, %v3347_v46  ;;  %v4708_v40 = vadd.f32 %v4707_v7, %v4706_v14  ;;  %5260 = vrcp.f32 %v3516_v59 }
 0x280   : > { %v5243_v41 = vpop.eup %5242  ;;  %3607 = vst [vmem:[%s6470_s26 + $0x30] sm:$0xff] %v5241_v45  ;;  %v4040_v33 = vmul.f32 -1.442695, %v3358_v29  ;;  %v3350_v2 = vadd.f32 %v3349_v6, %v6443_v62 }
 0x281   : > { %v5245_v54 = vpop.eup %5244  ;;  %3605 = vst [vmem:[%s6470_s26 + $0x20] sm:$0xff] %v5243_v41  ;;  %5262 = vrcp.f32 %v3514_v3  ;;  %v6493_v34 = vadd.f32 %v4708_v40, %v6394_v43  ;;  %v4709_v15 = vpop.f32.mrb[196].mxu1 }
 0x282   : > { %v5247_v55 = vpop.eup %5246  ;;  %3608 = vst [vmem:[%s6470_s26 + $0x38] sm:$0xff] %v5245_v54  ;;  %5264 = vpow2.f32 %v4039_v4  ;;  %v4038_v19 = vmul.f32 -1.442695, %v3350_v2  ;;  %v4771_v31 = vpop.f32.mrb[196].mxu0 }
 0x283   : > { %v5249_v27 = vpop.eup %5248  ;;  %3606 = vst [vmem:[%s6470_s26 + $0x28] sm:$0xff] %v5247_v55  ;;  %5266 = vpow2.f32 %v4037_v28  ;;  %v3371_v58 = vadd.f32 %v4771_v31, %v3210_v13  ;;  %v4710_v20 = vpop.f32.mrb[197].mxu1 }
 0x284   : > { %v5251_v22 = vpop.eup %5250  ;;  %v3519_v62 = vadd.f32 1.0, %v5249_v27  ;;  %5268 = vpow2.f32 %v4040_v33  ;;  %v3362_v49 = vpop.f32.mrb[197].mxu0  ;;  %v4711_v43 = vadd.f32 %v4710_v20, %v4709_v15 }
 0x285   : > { %v5253_v16 = vpop.eup %5252  ;;  %v3517_v36 = vadd.f32 1.0, %v5251_v22  ;;  %5270 = vpow2.f32 %v4038_v19  ;;  %v3363_v61 = vadd.f32 %v3362_v49, %v6460_v47  ;;  %v4712_v51 = vpop.f32.mrb[198].mxu1  ;;  %v4043_v50 = vmul.f32 -1.442695, %v3371_v58 }
 0x286   : > { %v4772_v39 = vpop.f32.mrb[198].mxu0  ;;  %v5255_v42 = vpop.eup %5254  ;;  %5272 = vrcp.f32 %v3519_v62  ;;  %v3520_v30 = vadd.f32 1.0, %v5253_v16  ;;  %v3226_v56 = vadd.f32 %v4711_v43, %v6400_v38 }
 0x287   : > { %v3374_v12 = vadd.f32 %v4772_v39, %v6479_v35  ;;  %v4713_v11 = vpop.f32.mrb[199].mxu1  ;;  %v3365_v13 = vpop.f32.mrb[199].mxu0  ;;  %5274 = vrcp.f32 %v3517_v36  ;;  %v3518_v60 = vadd.f32 1.0, %v5255_v42  ;;  %v4041_v8 = vmul.f32 -1.442695, %v3363_v61 }
 0x288   : > { %v4714_v44 = vadd.f32 %v4713_v11, %v4712_v51  ;;  %v5257_v1 = vpop.eup %5256  ;;  %5276 = vrcp.f32 %v3520_v30  ;;  %v3366_v10 = vadd.f32 %v3365_v13, %v6463_v17 }
 0x289   : > { %v4044_v47 = vmul.f32 -1.442695, %v3374_v12  ;;  %v5259_v25 = vpop.eup %5258  ;;  %3611 = vst [vmem:[%s6470_s26 + $0x50] sm:$0xff] %v5257_v1  ;;  %5278 = vrcp.f32 %v3518_v60  ;;  %v4715_v57 = vpop.f32.mrb[200].mxu1 }
 0x28a   : > { %v3229_v35 = vadd.f32 %v4714_v44, %v6406_v32  ;;  %v5261_v23 = vpop.eup %5260  ;;  %3609 = vst [vmem:[%s6470_s26 + $0x40] sm:$0xff] %v5259_v25  ;;  %5280 = vpow2.f32 %v4043_v50  ;;  %v4042_v26 = vmul.f32 -1.442695, %v3366_v10  ;;  %v4775_v53 = vpop.f32.mrb[200].mxu0 }
 0x28b   : > { %v5263_v63 = vpop.eup %5262  ;;  %3612 = vst [vmem:[%s6470_s26 + $0x58] sm:$0xff] %v5261_v23  ;;  %5282 = vpow2.f32 %v4041_v8  ;;  %v3387_v17 = vadd.f32 %v4775_v53, %v3226_v56  ;;  %v4716_v9 = vpop.f32.mrb[201].mxu1 }
 0x28c   : > { %v5265_v48 = vpop.eup %5264  ;;  %3610 = vst [vmem:[%s6470_s26 + $0x48] sm:$0xff] %v5263_v63  ;;  %5284 = vpow2.f32 %v4044_v47  ;;  %v3378_v38 = vpop.f32.mrb[201].mxu0  ;;  %v4717_v21 = vadd.f32 %v4716_v9, %v4715_v57 }
 0x28d   : > { %v5267_v46 = vpop.eup %5266  ;;  %v3523_v14 = vadd.f32 1.0, %v5265_v48  ;;  %5286 = vpow2.f32 %v4042_v26  ;;  %v3379_v32 = vadd.f32 %v3378_v38, %v6489_v18  ;;  %v4718_v24 = vpop.f32.mrb[202].mxu1  ;;  %v4047_v40 = vmul.f32 -1.442695, %v3387_v17 }
 0x28e   : > { %v4776_v59 = vpop.f32.mrb[202].mxu0  ;;  %v5269_v4 = vpop.eup %5268  ;;  %v3521_v29 = vadd.f32 1.0, %v5267_v46  ;;  %v3234_v27 = vadd.f32 %v4717_v21, %v6412_v5 }
 0x28f   : > { %v3390_v7 = vadd.f32 %v4776_v59, %v3229_v35  ;;  %v4719_v6 = vpop.f32.mrb[203].mxu1  ;;  %v3381_v45 = vpop.f32.mrb[203].mxu0  ;;  %5288 = vrcp.f32 %v3523_v14  ;;  %v3524_v28 = vadd.f32 1.0, %v5269_v4  ;;  %v4045_v54 = vmul.f32 -1.442695, %v3379_v32 }
 0x290   : > { %v5271_v3 = vpop.eup %5270  ;;  %v4720_v41 = vadd.f32 %v4719_v6, %v4718_v24  ;;  %5290 = vrcp.f32 %v3521_v29  ;;  %v3382_v18 = vadd.f32 %v3381_v45, %v6493_v34 }
 0x291   : > { %v5273_v33 = vpop.eup %5272  ;;  %v3522_v2 = vadd.f32 1.0, %v5271_v3  ;;  %5292 = vrcp.f32 %v3524_v28  ;;  %v4048_v19 = vmul.f32 -1.442695, %v3390_v7  ;;  %v4721_v58 = vpop.f32.mrb[204].mxu1 }
 0x292   : > { %v5275_v55 = vpop.eup %5274  ;;  %3615 = vst [vmem:[%s6470_s26 + $0x70] sm:$0xff] %v5273_v33  ;;  %v3237_v15 = vadd.f32 %v4720_v41, %v6418_v0  ;;  %v4046_v22 = vmul.f32 -1.442695, %v3382_v18  ;;  %v4779_v20 = vpop.f32.mrb[204].mxu0 }
 0x293   : > { %v5277_v31 = vpop.eup %5276  ;;  %3613 = vst [vmem:[%s6470_s26 + $0x60] sm:$0xff] %v5275_v55  ;;  %5294 = vrcp.f32 %v3522_v2  ;;  %v4722_v34 = vpop.f32.mrb[205].mxu1 }
 0x294   : > { %v5279_v62 = vpop.eup %5278  ;;  %3616 = vst [vmem:[%s6470_s26 + $0x78] sm:$0xff] %v5277_v31  ;;  %5296 = vpow2.f32 %v4047_v40  ;;  %v3394_v16 = vpop.f32.mrb[205].mxu0  ;;  %v4723_v5 = vadd.f32 %v4722_v34, %v4721_v58 }
 0x295   : > { %v5281_v49 = vpop.eup %5280  ;;  %3614 = vst [vmem:[%s6470_s26 + $0x68] sm:$0xff] %v5279_v62  ;;  %5298 = vpow2.f32 %v4045_v54  ;;  %v3395_v61 = vadd.f32 %v3394_v16, %v3234_v27  ;;  %v4724_v0 = vpop.f32.mrb[206].mxu1 }
 0x296   : > { %v5283_v36 = vpop.eup %5282  ;;  %v3527_v43 = vadd.f32 1.0, %v5281_v49  ;;  %5300 = vpow2.f32 %v4048_v19  ;;  %v4780_v51 = vpop.f32.mrb[206].mxu0  ;;  %v3242_v13 = vadd.f32 %v4723_v5, %v6424_v52 }
 0x297   : > { %v5285_v39 = vpop.eup %5284  ;;  %v3525_v42 = vadd.f32 1.0, %v5283_v36  ;;  %5302 = vpow2.f32 %v4046_v22  ;;  %v4725_v30 = vpop.f32.mrb[207].mxu1  ;;  %v4049_v60 = vmul.f32 -1.442695, %v3395_v61 }
 0x298   : > { %v3397_v50 = vpop.f32.mrb[207].mxu0  ;;  %v5287_v12 = vpop.eup %5286  ;;  %5304 = vrcp.f32 %v3527_v43  ;;  %v3528_v11 = vadd.f32 1.0, %v5285_v39  ;;  %v4726_v44 = vadd.f32 %v4725_v30, %v4724_v0  ;;  %v3403_v10 = vadd.f32 %v4779_v20, %v3242_v13 }
 0x299   : > { %5306 = vrcp.f32 %v3525_v42  ;;  %v3526_v8 = vadd.f32 1.0, %v5287_v12  ;;  %v3398_v1 = vadd.f32 %v3397_v50, %v3237_v15  ;;  %v5289_v47 = vpop.eup %5288 }
 0x29a   : > { %5308 = vrcp.f32 %v3528_v11  ;;  %v5291_v56 = vpop.eup %5290  ;;  %3619 = vst [vmem:[%s6470_s26 + $0x90] sm:$0xff] %v5289_v47  ;;  %v3245_v25 = vadd.f32 %v4726_v44, %v6430_v37  ;;  %v4051_v26 = vmul.f32 -1.442695, %v3403_v10 }
 0x29b   : > { %5310 = vrcp.f32 %v3526_v8  ;;  %v4050_v35 = vmul.f32 -1.442695, %v3398_v1  ;;  %v5293_v23 = vpop.eup %5292  ;;  %3617 = vst [vmem:[%s6470_s26 + $0x80] sm:$0xff] %v5291_v56 }
 0x29c   : > { %5312 = vpow2.f32 %v4049_v60  ;;  %3620 = vst [vmem:[%s6470_s26 + $0x98] sm:$0xff] %v5293_v23  ;;  %v3406_v63 = vadd.f32 %v4780_v51, %v3245_v25 }
 0x29d   : > { %v5295_v52 = vpop.eup %5294  ;;  %5314 = vpow2.f32 %v4050_v35 }
 0x29e   : > { %v5297_v57 = vpop.eup %5296  ;;  %3618 = vst [vmem:[%s6470_s26 + $0x88] sm:$0xff] %v5295_v52  ;;  %5316 = vpow2.f32 %v4051_v26  ;;  %v4052_v46 = vmul.f32 -1.442695, %v3406_v63 }
 0x29f   : > { %v5299_v53 = vpop.eup %5298  ;;  %v3531_v48 = vadd.f32 1.0, %v5297_v57 }
 0x2a0   : > { %v5301_v17 = vpop.eup %5300  ;;  %v3529_v9 = vadd.f32 1.0, %v5299_v53 }
 0x2a1   : > { %v5303_v37 = vpop.eup %5302  ;;  %5318 = vrcp.f32 %v3531_v48  ;;  %v3532_v38 = vadd.f32 1.0, %v5301_v17 }
 0x2a2   : > { %v5305_v14 = vpop.eup %5304  ;;  %5320 = vrcp.f32 %v3529_v9  ;;  %v3530_v21 = vadd.f32 1.0, %v5303_v37 }
 0x2a3   : > { %v5307_v32 = vpop.eup %5306  ;;  %3623 = vst [vmem:[%s6470_s26 + $0xb0] sm:$0xff] %v5305_v14  ;;  %5322 = vrcp.f32 %v3532_v38 }
 0x2a4   : > { %v5309_v24 = vpop.eup %5308  ;;  %3621 = vst [vmem:[%s6470_s26 + $0xa0] sm:$0xff] %v5307_v32  ;;  %5324 = vrcp.f32 %v3530_v21 }
 0x2a5   : > { %v5311_v59 = vpop.eup %5310  ;;  %3624 = vst [vmem:[%s6470_s26 + $0xb8] sm:$0xff] %v5309_v24  ;;  %5326 = vpow2.f32 %v4052_v46 }
 0x2a6   : > { %v5313_v4 = vpop.eup %5312  ;;  %3622 = vst [vmem:[%s6470_s26 + $0xa8] sm:$0xff] %v5311_v59 }
 0x2a7   : > { %v5315_v29 = vpop.eup %5314  ;;  %v3533_v7 = vadd.f32 1.0, %v5313_v4 }
 0x2a8   : > { %v5317_v6 = vpop.eup %5316  ;;  %v3534_v45 = vadd.f32 1.0, %v5315_v29 }
 0x2a9   : > { %v3535_v3 = vadd.f32 1.0, %v5317_v6  ;;  %5328 = vrcp.f32 %v3533_v7 }
 0x2aa   : > { %5330 = vrcp.f32 %v3534_v45 }
 0x2ab   : > { %v5319_v28 = vpop.eup %5318  ;;  %5332 = vrcp.f32 %v3535_v3 }
 0x2ac   : > { %v5321_v40 = vpop.eup %5320  ;;  %3627 = vst [vmem:[%s6470_s26 + $0xd0] sm:$0xff] %v5319_v28 }
 0x2ad   : > { %v5323_v41 = vpop.eup %5322  ;;  %3625 = vst [vmem:[%s6470_s26 + $0xc0] sm:$0xff] %v5321_v40 }
 0x2ae   : > { %v5325_v33 = vpop.eup %5324  ;;  %3628 = vst [vmem:[%s6470_s26 + $0xd8] sm:$0xff] %v5323_v41 }
 0x2af   : > { %v5327_v2 = vpop.eup %5326  ;;  %3626 = vst [vmem:[%s6470_s26 + $0xc8] sm:$0xff] %v5325_v33 }
 0x2b0   : > { %v3536_v54 = vadd.f32 1.0, %v5327_v2 }
 0x2b2   : > { %5334 = vrcp.f32 %v3536_v54 }
 0x2b3   : > { %v5329_v18 = vpop.eup %5328 }
 0x2b4   : > { %v5331_v55 = vpop.eup %5330  ;;  %3629 = vst [vmem:[%s6470_s26 + $0xe0] sm:$0xff] %v5329_v18 }
 0x2b5   : > { %v5333_v19 = vpop.eup %5332  ;;  %3630 = vst [vmem:[%s6470_s26 + $0xe8] sm:$0xff] %v5331_v55 }
 0x2b6   : > { %3631 = vst [vmem:[%s6470_s26 + $0xf0] sm:$0xff] %v5333_v19 }
 0x2bc   : > { %v5335_v27 = vpop.eup %5334 }
 0x2bd   : > { %3632 = vst [vmem:[%s6470_s26 + $0xf8] sm:$0xff] %v5335_v27 }
 0x2be PF: > { %s13_s12 = sadd.s32 1, %s5342_s12  }
 0x2bf   : > { %p10_p4 = scmp.ge.s32.totalorder %s13_s12, 4  }
 0x2c1   :  { %12 = sbr.rel (!%p10_p4) target bundleno = 1 (0x1), region = 62 }

</bundles_post_ra>
